<compile_context>
chip_gen: v6e
topology: v6e:2x2x1
jax: 0.10.0
libtpu: 0.0.40
codegen_flags: <defaults>
</compile_context>

<pallas_src>
import functools
import math

import jax
import jax.numpy as jnp
from jax.experimental import pallas as pl
from jax.experimental.pallas import tpu as pltpu


_VMEM_LIMIT = 32 * 1024 * 1024  # safe on v5e/v6e (128 MiB) and v7x (64 MiB physical)


# ----------------------------------------------------------------------------
# Pallas kernels
# ----------------------------------------------------------------------------
def _conv3x3_relu_kernel(x_ref, w_ref, b_ref, o_ref, *, H, W, R):
    """Fused 3x3 SAME conv + bias + ReLU for one image, row-block batched.

    x_ref: (H+2, W+2, Cin)  zero-padded image (bf16), resident in VMEM
    w_ref: (9, Cin, Cout)   taps in (dy, dx) order (bf16), resident in VMEM
    b_ref: (1, Cout)        bias (f32)
    o_ref: (H, W, Cout)     output (bf16)

    Each row-block of R output rows is computed with 9 accumulating MXU dots of
    shape (R*W, Cin) x (Cin, Cout) — M = R*W instead of the per-row M = W.
    """
    cin = x_ref.shape[-1]
    cout = o_ref.shape[-1]
    bias = b_ref[...]                                  # (1, Cout) f32, loaded once

    def do_block(r0):
        acc = None
        for dy in range(3):                            # static: 9 MXU dots / block
            for dx in range(3):
                lhs = x_ref[pl.ds(r0 + dy, R), pl.ds(dx, W), :]        # (R, W, Cin)
                d = jnp.dot(lhs.reshape(R * W, cin), w_ref[dy * 3 + dx],
                            preferred_element_type=jnp.float32)
                acc = d if acc is None else acc + d
        out = jnp.maximum(acc + bias, 0.0).astype(o_ref.dtype)
        o_ref[pl.ds(r0, R)] = out.reshape(R, W, cout)

    nblocks = H // R
    if nblocks == 1:
        do_block(0)
    else:
        def body(rb, carry):
            do_block(pl.multiple_of(rb * R, R))
            return carry
        jax.lax.fori_loop(0, nblocks, body, 0)


def _maxpool2x2_kernel(even_ref, odd_ref, o_ref, *, c):
    """2x2/stride-2 max pool.

    even_ref / odd_ref: (Ho, Wo, 2*C) — even / odd input rows with the width
    pair folded into the lane dim (free HBM reshape, strided BlockSpec reads).
    o_ref: (Ho, Wo, C)
    """
    # TODO(synk): for C=64 (pool1) the lane-split slice + 64-lane store is masked;
    # lane-dense repacking was judged minor at this size and is not done here.
    m = jnp.maximum(even_ref[...], odd_ref[...])
    o_ref[...] = jnp.maximum(m[:, :, :c], m[:, :, c:])


def _matmul_bias_kernel(a_ref, b_ref, bias_ref, o_ref, acc_ref, *, k_steps, relu):
    """Tiled matmul, f32 accumulator, fused bias (+ optional ReLU) on last K step."""
    @pl.when(pl.program_id(2) == 0)
    def _():
        acc_ref[...] = jnp.zeros_like(acc_ref)

    acc_ref[...] += jnp.dot(a_ref[...], b_ref[...],
                            preferred_element_type=jnp.float32)

    @pl.when(pl.program_id(2) == k_steps - 1)
    def _():
        r = acc_ref[...] + bias_ref[...]
        if relu:
            r = jnp.maximum(r, 0.0)
        o_ref[...] = r.astype(o_ref.dtype)


def _deconv_1x1_kernel(s_ref, w_ref, o_ref):
    """ConvTranspose2d(64x64, stride 32) applied to a 1x1 map == outer product.

    Single grid step: the whole (7, Cout*64*64) weight is resident; 7 VPU
    broadcast MACs (no MXU — K=7 would leave it ~0.1% utilized).
    s_ref: (N, 7) f32    w_ref: (7, NOUT) bf16    o_ref: (N, NOUT) f32
    """
    s = s_ref[...].astype(jnp.float32)                       # (N, 7)
    acc = jnp.zeros(o_ref.shape, jnp.float32)
    for ci in range(s_ref.shape[1]):                         # 7, static
        w_row = w_ref[pl.ds(ci, 1), :].astype(jnp.float32)   # (1, NOUT)
        acc = acc + s[:, ci:ci + 1] * w_row                  # (N,1)*(1,NOUT) bcast
    o_ref[...] = acc


# ----------------------------------------------------------------------------
# Kernel wrappers
# ----------------------------------------------------------------------------
def _rows_per_block(h, w, target=512):
    """Rows per conv row-block so that M = rows*w ~ target and rows divides h."""
    r = max(1, min(h, target // w))
    while h % r:
        r -= 1
    return r


def conv3x3_relu(x, w9, b):
    """x: (N,H,W,Cin) bf16, w9: (9,Cin,Cout) bf16, b: (1,Cout) f32 -> bf16 NHWC."""
    n, h, wd, cin = x.shape
    cout = w9.shape[-1]
    # TODO(synk): SAME-padding halo still materialized via jnp.pad in HBM; folding it
    # into the kernel would save ~1 read+write of the activation per layer.
    xp = jnp.pad(x, ((0, 0), (1, 1), (1, 1), (0, 0)))
    hp, wp = h + 2, wd + 2
    r = _rows_per_block(h, wd)
    kernel = functools.partial(_conv3x3_relu_kernel, H=h, W=wd, R=r)
    return pl.pallas_call(
        kernel,
        out_shape=jax.ShapeDtypeStruct((n, h, wd, cout), jnp.bfloat16),
        grid_spec=pltpu.PrefetchScalarGridSpec(
            num_scalar_prefetch=0,
            grid=(n,),
            in_specs=[
                pl.BlockSpec((None, hp, wp, cin), lambda i: (i, 0, 0, 0)),
                pl.BlockSpec((9, cin, cout), lambda i: (0, 0, 0)),   # weight resident
                pl.BlockSpec((1, cout), lambda i: (0, 0)),
            ],
            out_specs=pl.BlockSpec((None, h, wd, cout), lambda i: (i, 0, 0, 0)),
        ),
        compiler_params=pltpu.CompilerParams(
            dimension_semantics=("parallel",),
            vmem_limit_bytes=_VMEM_LIMIT),
    )(xp, w9, b)


def maxpool2x2(x):
    """x: (N,H,W,C) NHWC bf16 -> (N,H//2,W//2,C), single pass, no HBM copies."""
    n, h, w, c = x.shape
    ho, wo = h // 2, w // 2
    # Free (row-major identity) reshape: (N,H,W,C) -> (N*Ho, 2, Wo, 2*C).
    x2 = x.reshape(n * ho, 2, wo, 2 * c)
    kernel = functools.partial(_maxpool2x2_kernel, c=c)
    out = pl.pallas_call(
        kernel,
        out_shape=jax.ShapeDtypeStruct((n * ho, wo, c), x.dtype),
        grid_spec=pltpu.PrefetchScalarGridSpec(
            num_scalar_prefetch=0,
            grid=(n,),
            in_specs=[
                pl.BlockSpec((ho, None, wo, 2 * c), lambda i: (i, 0, 0, 0)),  # even rows
                pl.BlockSpec((ho, None, wo, 2 * c), lambda i: (i, 1, 0, 0)),  # odd rows
            ],
            out_specs=pl.BlockSpec((ho, wo, c), lambda i: (i, 0, 0)),
        ),
        compiler_params=pltpu.CompilerParams(
            dimension_semantics=("parallel",),
            vmem_limit_bytes=_VMEM_LIMIT),
    )(x2, x2)
    return out.reshape(n, ho, wo, c)


def _pick_tile(dim, prefs=(2048, 1024, 512, 256, 128)):
    """Largest preferred tile dividing dim (dims here are padded to 128-multiples)."""
    for p in prefs:
        if dim % p == 0:
            return p
    return dim


def matmul_bias(a, b, bias, *, relu, out_dtype=jnp.bfloat16):
    """a: (M,K) bf16, b: (K,N) bf16, bias: (1,N) f32 -> (M,N) out_dtype.

    M is tiny (batch) here, so the kernel is pure weight streaming: big 2048x2048
    weight tiles keep the grid at a handful of steps (fc1: 2, fc2: 4, score: 2).
    """
    m, k = a.shape
    k2, n = b.shape
    assert k == k2 and bias.shape == (1, n)

    # Lane-align N and K (score layer has N=7 -> pad to 128 for unmasked stores).
    n_pad = (-n) % 128
    if n_pad:
        b = jnp.pad(b, ((0, 0), (0, n_pad)))
        bias = jnp.pad(bias, ((0, 0), (0, n_pad)))
    k_pad = (-k) % 128
    if k_pad:
        a = jnp.pad(a, ((0, 0), (0, k_pad)))
        b = jnp.pad(b, ((0, k_pad), (0, 0)))
    kp, np_ = k + k_pad, n + n_pad

    tm = m if m <= 512 else _pick_tile(m, (512, 256, 128, 8))
    tn = _pick_tile(np_)    # 2048 for the 4096-wide layers -> j-axis has >=2 parallel steps
    tk = _pick_tile(kp)
    k_steps = kp // tk

    kernel = functools.partial(_matmul_bias_kernel, k_steps=k_steps, relu=relu)
    out = pl.pallas_call(
        kernel,
        out_shape=jax.ShapeDtypeStruct((m, np_), out_dtype),
        grid_spec=pltpu.PrefetchScalarGridSpec(
            num_scalar_prefetch=0,
            grid=(m // tm, np_ // tn, k_steps),
            in_specs=[
                pl.BlockSpec((tm, tk), lambda i, j, kk: (i, kk)),
                pl.BlockSpec((tk, tn), lambda i, j, kk: (kk, j)),
                pl.BlockSpec((1, tn), lambda i, j, kk: (0, j)),
            ],
            out_specs=pl.BlockSpec((tm, tn), lambda i, j, kk: (i, j)),
            scratch_shapes=[pltpu.VMEM((tm, tn), jnp.float32)],
        ),
        compiler_params=pltpu.CompilerParams(
            dimension_semantics=("parallel", "parallel", "arbitrary"),
            vmem_limit_bytes=_VMEM_LIMIT),
    )(a, b, bias)
    return out[:, :n] if n_pad else out


def deconv_upsample_1x1(scores, w_up):
    """scores: (N,7) f32, w_up: (7, 7*64*64) bf16 -> (N, 7*64*64) f32.

    Total data < 1 MB: run as a single grid step with the whole weight resident.
    """
    nb, cin = scores.shape
    _, nout = w_up.shape
    return pl.pallas_call(
        _deconv_1x1_kernel,
        out_shape=jax.ShapeDtypeStruct((nb, nout), jnp.float32),
        grid_spec=pltpu.PrefetchScalarGridSpec(
            num_scalar_prefetch=0,
            grid=(1,),
            in_specs=[
                pl.BlockSpec((nb, cin), lambda i: (0, 0)),
                pl.BlockSpec((cin, nout), lambda i: (0, 0)),
            ],
            out_specs=pl.BlockSpec((nb, nout), lambda i: (0, 0)),
        ),
        compiler_params=pltpu.CompilerParams(vmem_limit_bytes=_VMEM_LIMIT),
    )(scores, w_up)


# ----------------------------------------------------------------------------
# Parameter construction (deterministic, synthetic, bf16 weights)
# ----------------------------------------------------------------------------
_VGG16_CFG = [64, 64, "M", 128, 128, "M", 256, 256, 256, "M",
              512, 512, 512, "M", 512, 512, 512, "M"]


def init_params(key):
    params = {"features": []}
    cin = 3
    for v in _VGG16_CFG:
        if v == "M":
            params["features"].append("M")
            continue
        key, kw = jax.random.split(key)
        fan_in = 9 * cin
        w = (jax.random.normal(kw, (3, 3, cin, v), jnp.float32)
             * math.sqrt(2.0 / fan_in)).reshape(9, cin, v).astype(jnp.bfloat16)
        b = jnp.zeros((1, v), jnp.float32)
        params["features"].append((w, b))
        cin = v

    key, k1, k2, k3, k4 = jax.random.split(key, 5)
    # Conv2d(512, 4096, 2x2): flattened im2col ordering (dy, dx, cin).
    params["fc1_w"] = (jax.random.normal(k1, (2 * 2 * 512, 4096), jnp.float32)
                       * math.sqrt(2.0 / (2 * 2 * 512))).astype(jnp.bfloat16)
    params["fc1_b"] = jnp.zeros((1, 4096), jnp.float32)
    params["fc2_w"] = (jax.random.normal(k2, (4096, 4096), jnp.float32)
                       * math.sqrt(2.0 / 4096)).astype(jnp.bfloat16)
    params["fc2_b"] = jnp.zeros((1, 4096), jnp.float32)
    params["score_w"] = (jax.random.normal(k3, (4096, 7), jnp.float32)
                         * math.sqrt(2.0 / 4096)).astype(jnp.bfloat16)
    params["score_b"] = jnp.zeros((1, 7), jnp.float32)
    # ConvTranspose2d(7, 7, 64, 64, stride=32, bias=False):
    # PyTorch weight (cin=7, cout=7, 64, 64) flattened to (cin, cout*64*64).
    params["up_w"] = (jax.random.normal(k4, (7, 7 * 64 * 64), jnp.float32)
                      * 0.01).astype(jnp.bfloat16)
    return params


# ----------------------------------------------------------------------------
# Forward pass
# ----------------------------------------------------------------------------
def vgg16_fcn32s_forward(x_nchw, params):
    x = jnp.transpose(x_nchw, (0, 2, 3, 1)).astype(jnp.bfloat16)   # NCHW -> NHWC bf16

    # ---- vgg16.features: 13x (conv3x3 + ReLU), 5x maxpool2x2 ----
    for layer in params["features"]:
        if layer == "M":
            x = maxpool2x2(x)
        else:
            w, b = layer
            x = conv3x3_relu(x, w, b)

    # ---- conv1 head ----
    n, h, wd, c = x.shape
    assert h == 2 and wd == 2 and c == 512, \
        "head expects a 2x2x512 feature map (use 64x64 inputs)"
    # Conv2d(512, 4096, kernel 2x2, VALID) on a 2x2 map == one matmul over (dy,dx,c).
    # TODO(synk): fc1->fc2->score could be fused into one pallas_call (activations
    # stay resident); kept as three calls with large weight tiles for simplicity.
    x = matmul_bias(x.reshape(n, 4 * c), params["fc1_w"], params["fc1_b"],
                    relu=True, out_dtype=jnp.bfloat16)
    # TODO(synk): Dropout2d implemented as identity (inference mode); training-mode
    # stochastic channel dropout is not reproduced here.
    x = matmul_bias(x, params["fc2_w"], params["fc2_b"],
                    relu=True, out_dtype=jnp.bfloat16)
    scores = matmul_bias(x, params["score_w"], params["score_b"],
                         relu=False, out_dtype=jnp.float32)        # (N, 7)

    # ---- conv2: ConvTranspose2d(7, 7, 64x64, stride=32, bias=False) ----
    # On a 1x1 feature map there is no overlap-add, so the deconv is exactly
    # out[n, co, y, x] = sum_ci scores[n, ci] * W[ci, co, y, x].
    # TODO(synk): general overlap-add upsampling for feature maps larger than 1x1.
    out = deconv_upsample_1x1(scores, params["up_w"])
    return out.reshape(n, 7, 64, 64)      # already NCHW: (N, 7, 64, 64)


# ----------------------------------------------------------------------------
if __name__ == "__main__":
    key = jax.random.PRNGKey(0)
    key, kx = jax.random.split(key)

    # Smallest input for which the FCN-32s head is well-defined:
    # 64x64 -> (5 pools) 2x2 -> (2x2 VALID conv) 1x1 -> (deconv, stride 32) 64x64.
    x = jax.random.normal(kx, (2, 3, 64, 64), jnp.float32)   # NCHW, like PyTorch

    params = init_params(key)
    y = vgg16_fcn32s_forward(x, params)
    y = jax.block_until_ready(y)

    assert y.shape == (2, 7, 64, 64), y.shape
    assert bool(jnp.all(jnp.isfinite(y)))
    print("KERNEL_OK")
</pallas_src>

<mosaic_0001>
module attributes {stable_mosaic.version = 11 : i64} {
  func.func @_conv3x3_relu_kernel(%arg0: i32, %arg1: memref<1x66x66x3xbf16, #tpu.memory_space<vmem>>, %arg2: memref<9x3x64xbf16, #tpu.memory_space<vmem>>, %arg3: memref<1x64xf32, #tpu.memory_space<vmem>>, %arg4: memref<1x64x64x64xbf16, #tpu.memory_space<vmem>>) attributes {dimension_semantics = [#tpu.dimension_semantics<parallel>], iteration_bounds = array<i64: 2>, scalar_prefetch = 0 : i64, scratch_operands = 0 : i64, tpu.core_type = #tpu.core_type<tc>, window_params = [{transform_indices = @transform_0, window_bounds = array<i64: 1, 66, 66, 3>}, {pipeline_mode = #tpu.pipeline_mode<synchronous>, transform_indices = @transform_1, window_bounds = array<i64: 9, 3, 64>}, {pipeline_mode = #tpu.pipeline_mode<synchronous>, transform_indices = @transform_2, window_bounds = array<i64: 1, 64>}, {transform_indices = @transform_3, window_bounds = array<i64: 1, 64, 64, 64>}]} {
    %c0 = arith.constant 0 : index
    %c0_0 = arith.constant 0 : index
    %0 = vector.load %arg3[%c0, %c0_0] : memref<1x64xf32, #tpu.memory_space<vmem>>, vector<1x64xf32>
    %c0_i32 = arith.constant 0 : i32
    %c8_i32 = arith.constant 8 : i32
    %1 = arith.addi %c0_i32, %c8_i32 : i32
    %c1_i32 = arith.constant 1 : i32
    scf.for %arg5 = %c0_i32 to %1 step %c1_i32  : i32 {
      %c8_i32_2 = arith.constant 8 : i32
      %2 = arith.muli %arg5, %c8_i32_2 : i32
      %3 = tpu.assume_multiple %2, 8 : i32
      %c0_i32_3 = arith.constant 0 : i32
      %4 = arith.addi %3, %c0_i32_3 : i32
      %c0_4 = arith.constant 0 : index
      %5 = arith.index_cast %4 : i32 to index
      %c0_5 = arith.constant 0 : index
      %c0_6 = arith.constant 0 : index
      %6 = vector.load %arg1[%c0_4, %5, %c0_5, %c0_6] : memref<1x66x66x3xbf16, #tpu.memory_space<vmem>>, vector<1x8x64x3xbf16>
      %7 = vector.shape_cast %6 : vector<1x8x64x3xbf16> to vector<8x64x3xbf16>
      %8 = vector.shape_cast %7 : vector<8x64x3xbf16> to vector<512x3xbf16>
      %c0_7 = arith.constant 0 : index
      %c0_8 = arith.constant 0 : index
      %c0_9 = arith.constant 0 : index
      %9 = vector.load %arg2[%c0_7, %c0_8, %c0_9] : memref<9x3x64xbf16, #tpu.memory_space<vmem>>, vector<1x3x64xbf16>
      %10 = vector.shape_cast %9 : vector<1x3x64xbf16> to vector<3x64xbf16>
      %cst = arith.constant dense<0.000000e+00> : vector<512x64xf32>
      %11 = tpu.matmul %8, %10, %cst {dimension_numbers = #tpu.dot_dimension_numbers<[1], [0], [0], [1], [0, 0, 1, 1], [], []>} : vector<512x3xbf16>, vector<3x64xbf16>, vector<512x64xf32> -> vector<512x64xf32>
      %c0_i32_10 = arith.constant 0 : i32
      %12 = arith.addi %3, %c0_i32_10 : i32
      %c0_11 = arith.constant 0 : index
      %13 = arith.index_cast %12 : i32 to index
      %c1 = arith.constant 1 : index
      %c0_12 = arith.constant 0 : index
      %14 = vector.load %arg1[%c0_11, %13, %c1, %c0_12] : memref<1x66x66x3xbf16, #tpu.memory_space<vmem>>, vector<1x8x64x3xbf16>
      %15 = vector.shape_cast %14 : vector<1x8x64x3xbf16> to vector<8x64x3xbf16>
      %16 = vector.shape_cast %15 : vector<8x64x3xbf16> to vector<512x3xbf16>
      %c1_13 = arith.constant 1 : index
      %c0_14 = arith.constant 0 : index
      %c0_15 = arith.constant 0 : index
      %17 = vector.load %arg2[%c1_13, %c0_14, %c0_15] : memref<9x3x64xbf16, #tpu.memory_space<vmem>>, vector<1x3x64xbf16>
      %18 = vector.shape_cast %17 : vector<1x3x64xbf16> to vector<3x64xbf16>
      %cst_16 = arith.constant dense<0.000000e+00> : vector<512x64xf32>
      %19 = tpu.matmul %16, %18, %cst_16 {dimension_numbers = #tpu.dot_dimension_numbers<[1], [0], [0], [1], [0, 0, 1, 1], [], []>} : vector<512x3xbf16>, vector<3x64xbf16>, vector<512x64xf32> -> vector<512x64xf32>
      %20 = arith.addf %11, %19 : vector<512x64xf32>
      %c0_i32_17 = arith.constant 0 : i32
      %21 = arith.addi %3, %c0_i32_17 : i32
      %c0_18 = arith.constant 0 : index
      %22 = arith.index_cast %21 : i32 to index
      %c2 = arith.constant 2 : index
      %c0_19 = arith.constant 0 : index
      %23 = vector.load %arg1[%c0_18, %22, %c2, %c0_19] : memref<1x66x66x3xbf16, #tpu.memory_space<vmem>>, vector<1x8x64x3xbf16>
      %24 = vector.shape_cast %23 : vector<1x8x64x3xbf16> to vector<8x64x3xbf16>
      %25 = vector.shape_cast %24 : vector<8x64x3xbf16> to vector<512x3xbf16>
      %c2_20 = arith.constant 2 : index
      %c0_21 = arith.constant 0 : index
      %c0_22 = arith.constant 0 : index
      %26 = vector.load %arg2[%c2_20, %c0_21, %c0_22] : memref<9x3x64xbf16, #tpu.memory_space<vmem>>, vector<1x3x64xbf16>
      %27 = vector.shape_cast %26 : vector<1x3x64xbf16> to vector<3x64xbf16>
      %cst_23 = arith.constant dense<0.000000e+00> : vector<512x64xf32>
      %28 = tpu.matmul %25, %27, %cst_23 {dimension_numbers = #tpu.dot_dimension_numbers<[1], [0], [0], [1], [0, 0, 1, 1], [], []>} : vector<512x3xbf16>, vector<3x64xbf16>, vector<512x64xf32> -> vector<512x64xf32>
      %29 = arith.addf %20, %28 : vector<512x64xf32>
      %c1_i32_24 = arith.constant 1 : i32
      %30 = arith.addi %3, %c1_i32_24 : i32
      %c0_25 = arith.constant 0 : index
      %31 = arith.index_cast %30 : i32 to index
      %c0_26 = arith.constant 0 : index
      %c0_27 = arith.constant 0 : index
      %32 = vector.load %arg1[%c0_25, %31, %c0_26, %c0_27] : memref<1x66x66x3xbf16, #tpu.memory_space<vmem>>, vector<1x8x64x3xbf16>
      %33 = vector.shape_cast %32 : vector<1x8x64x3xbf16> to vector<8x64x3xbf16>
      %34 = vector.shape_cast %33 : vector<8x64x3xbf16> to vector<512x3xbf16>
      %c3 = arith.constant 3 : index
      %c0_28 = arith.constant 0 : index
      %c0_29 = arith.constant 0 : index
      %35 = vector.load %arg2[%c3, %c0_28, %c0_29] : memref<9x3x64xbf16, #tpu.memory_space<vmem>>, vector<1x3x64xbf16>
      %36 = vector.shape_cast %35 : vector<1x3x64xbf16> to vector<3x64xbf16>
      %cst_30 = arith.constant dense<0.000000e+00> : vector<512x64xf32>
      %37 = tpu.matmul %34, %36, %cst_30 {dimension_numbers = #tpu.dot_dimension_numbers<[1], [0], [0], [1], [0, 0, 1, 1], [], []>} : vector<512x3xbf16>, vector<3x64xbf16>, vector<512x64xf32> -> vector<512x64xf32>
      %38 = arith.addf %29, %37 : vector<512x64xf32>
      %c1_i32_31 = arith.constant 1 : i32
      %39 = arith.addi %3, %c1_i32_31 : i32
      %c0_32 = arith.constant 0 : index
      %40 = arith.index_cast %39 : i32 to index
      %c1_33 = arith.constant 1 : index
      %c0_34 = arith.constant 0 : index
      %41 = vector.load %arg1[%c0_32, %40, %c1_33, %c0_34] : memref<1x66x66x3xbf16, #tpu.memory_space<vmem>>, vector<1x8x64x3xbf16>
      %42 = vector.shape_cast %41 : vector<1x8x64x3xbf16> to vector<8x64x3xbf16>
      %43 = vector.shape_cast %42 : vector<8x64x3xbf16> to vector<512x3xbf16>
      %c4 = arith.constant 4 : index
      %c0_35 = arith.constant 0 : index
      %c0_36 = arith.constant 0 : index
      %44 = vector.load %arg2[%c4, %c0_35, %c0_36] : memref<9x3x64xbf16, #tpu.memory_space<vmem>>, vector<1x3x64xbf16>
      %45 = vector.shape_cast %44 : vector<1x3x64xbf16> to vector<3x64xbf16>
      %cst_37 = arith.constant dense<0.000000e+00> : vector<512x64xf32>
      %46 = tpu.matmul %43, %45, %cst_37 {dimension_numbers = #tpu.dot_dimension_numbers<[1], [0], [0], [1], [0, 0, 1, 1], [], []>} : vector<512x3xbf16>, vector<3x64xbf16>, vector<512x64xf32> -> vector<512x64xf32>
      %47 = arith.addf %38, %46 : vector<512x64xf32>
      %c1_i32_38 = arith.constant 1 : i32
      %48 = arith.addi %3, %c1_i32_38 : i32
      %c0_39 = arith.constant 0 : index
      %49 = arith.index_cast %48 : i32 to index
      %c2_40 = arith.constant 2 : index
      %c0_41 = arith.constant 0 : index
      %50 = vector.load %arg1[%c0_39, %49, %c2_40, %c0_41] : memref<1x66x66x3xbf16, #tpu.memory_space<vmem>>, vector<1x8x64x3xbf16>
      %51 = vector.shape_cast %50 : vector<1x8x64x3xbf16> to vector<8x64x3xbf16>
      %52 = vector.shape_cast %51 : vector<8x64x3xbf16> to vector<512x3xbf16>
      %c5 = arith.constant 5 : index
      %c0_42 = arith.constant 0 : index
      %c0_43 = arith.constant 0 : index
      %53 = vector.load %arg2[%c5, %c0_42, %c0_43] : memref<9x3x64xbf16, #tpu.memory_space<vmem>>, vector<1x3x64xbf16>
      %54 = vector.shape_cast %53 : vector<1x3x64xbf16> to vector<3x64xbf16>
      %cst_44 = arith.constant dense<0.000000e+00> : vector<512x64xf32>
      %55 = tpu.matmul %52, %54, %cst_44 {dimension_numbers = #tpu.dot_dimension_numbers<[1], [0], [0], [1], [0, 0, 1, 1], [], []>} : vector<512x3xbf16>, vector<3x64xbf16>, vector<512x64xf32> -> vector<512x64xf32>
      %56 = arith.addf %47, %55 : vector<512x64xf32>
      %c2_i32 = arith.constant 2 : i32
      %57 = arith.addi %3, %c2_i32 : i32
      %c0_45 = arith.constant 0 : index
      %58 = arith.index_cast %57 : i32 to index
      %c0_46 = arith.constant 0 : index
      %c0_47 = arith.constant 0 : index
      %59 = vector.load %arg1[%c0_45, %58, %c0_46, %c0_47] : memref<1x66x66x3xbf16, #tpu.memory_space<vmem>>, vector<1x8x64x3xbf16>
      %60 = vector.shape_cast %59 : vector<1x8x64x3xbf16> to vector<8x64x3xbf16>
      %61 = vector.shape_cast %60 : vector<8x64x3xbf16> to vector<512x3xbf16>
      %c6 = arith.constant 6 : index
      %c0_48 = arith.constant 0 : index
      %c0_49 = arith.constant 0 : index
      %62 = vector.load %arg2[%c6, %c0_48, %c0_49] : memref<9x3x64xbf16, #tpu.memory_space<vmem>>, vector<1x3x64xbf16>
      %63 = vector.shape_cast %62 : vector<1x3x64xbf16> to vector<3x64xbf16>
      %cst_50 = arith.constant dense<0.000000e+00> : vector<512x64xf32>
      %64 = tpu.matmul %61, %63, %cst_50 {dimension_numbers = #tpu.dot_dimension_numbers<[1], [0], [0], [1], [0, 0, 1, 1], [], []>} : vector<512x3xbf16>, vector<3x64xbf16>, vector<512x64xf32> -> vector<512x64xf32>
      %65 = arith.addf %56, %64 : vector<512x64xf32>
      %c2_i32_51 = arith.constant 2 : i32
      %66 = arith.addi %3, %c2_i32_51 : i32
      %c0_52 = arith.constant 0 : index
      %67 = arith.index_cast %66 : i32 to index
      %c1_53 = arith.constant 1 : index
      %c0_54 = arith.constant 0 : index
      %68 = vector.load %arg1[%c0_52, %67, %c1_53, %c0_54] : memref<1x66x66x3xbf16, #tpu.memory_space<vmem>>, vector<1x8x64x3xbf16>
      %69 = vector.shape_cast %68 : vector<1x8x64x3xbf16> to vector<8x64x3xbf16>
      %70 = vector.shape_cast %69 : vector<8x64x3xbf16> to vector<512x3xbf16>
      %c7 = arith.constant 7 : index
      %c0_55 = arith.constant 0 : index
      %c0_56 = arith.constant 0 : index
      %71 = vector.load %arg2[%c7, %c0_55, %c0_56] : memref<9x3x64xbf16, #tpu.memory_space<vmem>>, vector<1x3x64xbf16>
      %72 = vector.shape_cast %71 : vector<1x3x64xbf16> to vector<3x64xbf16>
      %cst_57 = arith.constant dense<0.000000e+00> : vector<512x64xf32>
      %73 = tpu.matmul %70, %72, %cst_57 {dimension_numbers = #tpu.dot_dimension_numbers<[1], [0], [0], [1], [0, 0, 1, 1], [], []>} : vector<512x3xbf16>, vector<3x64xbf16>, vector<512x64xf32> -> vector<512x64xf32>
      %74 = arith.addf %65, %73 : vector<512x64xf32>
      %c2_i32_58 = arith.constant 2 : i32
      %75 = arith.addi %3, %c2_i32_58 : i32
      %c0_59 = arith.constant 0 : index
      %76 = arith.index_cast %75 : i32 to index
      %c2_60 = arith.constant 2 : index
      %c0_61 = arith.constant 0 : index
      %77 = vector.load %arg1[%c0_59, %76, %c2_60, %c0_61] : memref<1x66x66x3xbf16, #tpu.memory_space<vmem>>, vector<1x8x64x3xbf16>
      %78 = vector.shape_cast %77 : vector<1x8x64x3xbf16> to vector<8x64x3xbf16>
      %79 = vector.shape_cast %78 : vector<8x64x3xbf16> to vector<512x3xbf16>
      %c8 = arith.constant 8 : index
      %c0_62 = arith.constant 0 : index
      %c0_63 = arith.constant 0 : index
      %80 = vector.load %arg2[%c8, %c0_62, %c0_63] : memref<9x3x64xbf16, #tpu.memory_space<vmem>>, vector<1x3x64xbf16>
      %81 = vector.shape_cast %80 : vector<1x3x64xbf16> to vector<3x64xbf16>
      %cst_64 = arith.constant dense<0.000000e+00> : vector<512x64xf32>
      %82 = tpu.matmul %79, %81, %cst_64 {dimension_numbers = #tpu.dot_dimension_numbers<[1], [0], [0], [1], [0, 0, 1, 1], [], []>} : vector<512x3xbf16>, vector<3x64xbf16>, vector<512x64xf32> -> vector<512x64xf32>
      %83 = arith.addf %74, %82 : vector<512x64xf32>
      %84 = vector.broadcast %0 : vector<1x64xf32> to vector<512x64xf32>
      %85 = arith.addf %83, %84 : vector<512x64xf32>
      %cst_65 = arith.constant 0.000000e+00 : f32
      %86 = vector.broadcast %cst_65 : f32 to vector<512x64xf32>
      %87 = arith.maximumf %85, %86 : vector<512x64xf32>
      %88 = arith.truncf %87 : vector<512x64xf32> to vector<512x64xbf16>
      %89 = vector.shape_cast %88 : vector<512x64xbf16> to vector<8x64x64xbf16>
      %c0_66 = arith.constant 0 : index
      %90 = arith.index_cast %3 : i32 to index
      %c0_67 = arith.constant 0 : index
      %c0_68 = arith.constant 0 : index
      %91 = vector.load %arg4[%c0_66, %90, %c0_67, %c0_68] : memref<1x64x64x64xbf16, #tpu.memory_space<vmem>>, vector<1x8x64x64xbf16>
      %92 = vector.shape_cast %91 : vector<1x8x64x64xbf16> to vector<8x64x64xbf16>
      %93 = vector.shape_cast %89 : vector<8x64x64xbf16> to vector<1x8x64x64xbf16>
      tpu.vector_store %arg4[%c0_66, %90, %c0_67, %c0_68], %93 {strides = array<i32>} : memref<1x64x64x64xbf16, #tpu.memory_space<vmem>>, vector<1x8x64x64xbf16>,
    }
    %c8_i32_1 = arith.constant 8 : i32
    return
  }
  func.func @transform_0(%arg0: i32) -> (i32, i32, i32, i32) {
    %c0_i32 = arith.constant 0 : i32
    %c0_i32_0 = arith.constant 0 : i32
    %c0_i32_1 = arith.constant 0 : i32
    %c0_i32_2 = arith.constant 0 : i32
    return %arg0, %c0_i32, %c0_i32_0, %c0_i32_1 : i32, i32, i32, i32
  }
  func.func @transform_1(%arg0: i32) -> (i32, i32, i32) {
    %c0_i32 = arith.constant 0 : i32
    %c0_i32_0 = arith.constant 0 : i32
    %c0_i32_1 = arith.constant 0 : i32
    %c0_i32_2 = arith.constant 0 : i32
    return %c0_i32, %c0_i32_0, %c0_i32_1 : i32, i32, i32
  }
  func.func @transform_2(%arg0: i32) -> (i32, i32) {
    %c0_i32 = arith.constant 0 : i32
    %c0_i32_0 = arith.constant 0 : i32
    %c0_i32_1 = arith.constant 0 : i32
    return %c0_i32, %c0_i32_0 : i32, i32
  }
  func.func @transform_3(%arg0: i32) -> (i32, i32, i32, i32) {
    %c0_i32 = arith.constant 0 : i32
    %c0_i32_0 = arith.constant 0 : i32
    %c0_i32_1 = arith.constant 0 : i32
    %c0_i32_2 = arith.constant 0 : i32
    return %arg0, %c0_i32, %c0_i32_0, %c0_i32_1 : i32, i32, i32, i32
  }
}

</mosaic_0001>

<bundles_post_ra>
// kernel: tpu_custom_call.1
= control target key start
LH: loop header
LB: loop body
LE: loop exit
PB: predicated region body
PF: predicated region fallthrough
CT: control target
= control target key end

     0   :  { %8 = vsyncpa [#allocation3], 0  ;;  %s16141_s0 = inlined_call_operand.vmem [shape: bf16[2,66,66,3], index: 0, kind: input, shape index: {}]   ;;  %s16142_s1 = inlined_call_operand.vmem [shape: bf16[9,3,64], index: 1, kind: input, shape index: {}]   ;;  %s16143_s2 = inlined_call_operand.vmem [shape: f32[1,64], index: 2, kind: input, shape index: {}]   ;;  %s16144_s3 = inlined_call_operand.hbm [shape: bf16[2,64,64,64], index: 3, kind: output, shape index: {}]  }
   0x1   :  { %10 = vsyncpa [#allocation3 + $0x1], 0  ;;  %s11193_s12 = smov 0   ;;  %s11195_s13 = smov 0  }
   0x2   :  { %s11197_s14 = smov 0   ;;  %s11199_s15 = smov 0  }
   0x3 LB: > { %s11214_s16 = sadd.s32 4294967295, %s11163_s15   ;;  %s8908_s17 = sadd.s32 4294967294, %s11163_s15   ;;  %s11163_s15 = sphi %s11199_s15, %s16995_s15   ;;  %s11159_s14 = sphi %s11197_s14, %s16994_s14   ;;  %s11155_s13 = sphi %s11195_s13, %s16993_s13   ;;  %s11151_s12 = sphi %s11193_s12, %s16992_s12  }
   0x4   : > { %s11218_s18 = sadd.s32 1, %s11163_s15   ;;  %s91_s19 = sadd.s32 1, %s11159_s14 }
   0x5   : > { %s88_s20 = ssub.s32 %s11163_s15, %s11218_s18  ;;  %p101_p0 = scmp.ne.s32.totalorder %s11159_s14, %s11155_s13 }
   0x6   : > { %p89_p1 = scmp.eq.s32.totalorder %s88_s20, 0  ;;  %p102_p2 = scmp.eq.s32.totalorder %s11214_s16, 1 }
   0x7   : > { %p107_p3 = scmp.ne.s32.totalorder %s11155_s13, %s11151_s12  ;;  %p108_p4 = scmp.eq.s32.totalorder %s8908_s17, 1 }
   0x8   : > { %s11229_s21 = scalar_select %p89_p1, %s11159_s14, %s91_s19  }
   0x9   : > { %p11231_p5 = por %p102_p2, %p101_p0  ;;  %p11235_p6 = por %p108_p4, %p107_p3 }
   0xa   : > { %p8911_p7 = scmp.ge.s32.totalorder %s11163_s15, 1  ;;  %p140_p8 = scmp.lt.s32.totalorder %s11163_s15, 3 }
   0xc   : > { %p141_p9 = pnand %p8911_p7, %p140_p8 }
   0xe   : > { %144 = sbr.rel (%p141_p9) target bundleno = 901 (0x385), region = 32 }
  0x13   : > { %s161_s24 = sand.u32 1, %s11155_s13   ;;  %p164_p10 = scmp.lt.s32.totalorder %s11214_s16, 1  ;;  %v11246_v0 = vld [vmem:[%s16143_s2] ss:$0 sm:$0xff] }
  0x14   : > { %16249 = vst [vmem:[#allocation5_spill] sm:$0xff] %v11246_v0  ;;  %s11250_s27 = sshll.u32 %s161_s24, 11  ;;  %s11259_s7 = smov 0  }
  0x15   : > { %s165_s28 = scalar_select %p164_p10, %s11214_s16, 1 }
  0x16   : > { %s163_s6 = scalar_lea.vmem [#allocation2], %s11250_s27 }
  0x17   : > { %s10850_s29 = smul.u32 2376, %s165_s28 }
  0x19   : > { %s11256_s5 = scalar_lea.vmem %s16141_s0, %s10850_s29 }
  0x1a LB: >> { %v8917_v1 = vld [vmem:[%s16142_s1 + $0x2] sm:$0x3]  ;;  %vm1124_vm0 = vcmask 1040384   ;;  %vm1125_vm1 = vcmask 1041408   ;;  %v11169_v2 = vmov 65535   ;;  %s9889_s10 = smul.u32 288, %s11167_s7  ;;  %s11167_s7 = sphi %s11259_s7, %s176_s7  }
  0x1b   : >> { %v1126_v3 = vsel %vm1124_vm0, 4294967295, %v11169_v2  ;;  %v245_v5 = vld [vmem:[%s16142_s1] sm:$0x3]  ;;  %v9054_v6 = vld [vmem:[%s16142_s1 + $0x4] sm:$0x3]  ;;  %vm1027_vm4 = vcmask 23552  }
  0x1c   : >> { %v11267_v4 = vsel %vm1125_vm1, %v1126_v3, 0  ;;  %s11284_s25 = scalar_lea.vmem %s11256_s5, %s9889_s10  ;;  %vm254_vm2 = vsmask.f32 3328  ;;  %vm255_vm3 = vsmask.f32 7440  ;;  %v16251_v35 = vmov 0 }
  0x1d   : >> { %16250 = vst [vmem:[#allocation6_spill] sm:$0xff] %v11267_v4  ;;  %v1129_v7 = vand.u32 %v8917_v1, %v11267_v4  ;;  %v11278_v8 = vand.u32 %v11267_v4, %v245_v5  ;;  %v11281_v9 = vand.u32 %v9054_v6, %v11267_v4  ;;  %v181_v10 = vld [vmem:[%s11284_s25] sm:$0xf]  ;;  %v182_v11 = vld [vmem:[%s11284_s25 + $0x4] sm:$0xf]  ;;  %vm11297_vm5 = vmor %vm254_vm2, %vm255_vm3  ;;  %vm1992_vm6 = vcmask 1042432  }
  0x1e   : >> { %v183_v12 = vld [vmem:[%s11284_s25 + $0x8] sm:$0xf]  ;;  %v258_v13 = vshrl.u32 %v181_v10, 16  ;;  %v261_v14 = vshll.u32 %v181_v10, 16  ;;  %v267_v15 = vshll.u32 %v182_v11, 16  ;;  %v271_v16 = vshrl.u32 %v182_v11, 16 }
  0x1f   : >> { %10848 = vmatprep.subr.bf16.mxu1 %v1129_v7  ;;  %10254 = vmatprep.subr.bf16.mxu0 %v1129_v7  ;;  %v277_v17 = vshll.u32 %v183_v12, 16  ;;  %v281_v18 = vshrl.u32 %v183_v12, 16  ;;  %v213_v19 = vld [vmem:[%s11284_s25 + $0x90] sm:$0xf]  ;;  %v214_v20 = vld [vmem:[%s11284_s25 + $0x94] sm:$0xf] }
  0x20   : >> { %10849 = vmatpush3.bf16.msra.mxu1 %v1129_v7  ;;  %10255 = vmatpush3.bf16.msra.mxu0 %v1129_v7  ;;  %v260_v21 = vrot.slane %v258_v13, 4  ;;  %v263_v22 = vrot.slane %v261_v14, 5  ;;  %v269_v23 = vrot.slane %v267_v15, 5  ;;  %v273_v24 = vrot.slane %v271_v16, 4  ;;  %v215_v25 = vld [vmem:[%s11284_s25 + $0x98] sm:$0xf] }
  0x21   : >> { %10320 = vmatprep.subr.bf16.mxu1 %v11278_v8  ;;  %10386 = vmatprep.subr.bf16.mxu0 %v11281_v9  ;;  %v279_v26 = vrot.slane %v277_v17, 5  ;;  %v283_v27 = vrot.slane %v281_v18, 4  ;;  %v594_v28 = vshrl.u32 %v213_v19, 16  ;;  %v597_v29 = vshll.u32 %v213_v19, 16  ;;  %v184_v34 = vld [vmem:[%s11284_s25 + $0xc] sm:$0xf] }
  0x22   : >> { %v264_v30 = vor.u32 %v263_v22, %v260_v21  ;;  %v274_v31 = vor.u32 %v273_v24, %v269_v23  ;;  %v603_v32 = vshll.u32 %v214_v20, 16  ;;  %v607_v33 = vshrl.u32 %v214_v20, 16  ;;  %v185_v48 = vld [vmem:[%s11284_s25 + $0x10] sm:$0xf]  ;;  %v216_v53 = vld [vmem:[%s11284_s25 + $0x9c] sm:$0xf] }
  0x23   : >> { %v16252_v35 = vsel %vm11297_vm5, 4294967295, %v16251_v35  ;;  %v284_v36 = vor.u32 %v283_v27, %v279_v26  ;;  %v596_v37 = vrot.slane %v594_v28, 4  ;;  %v599_v38 = vrot.slane %v597_v29, 5  ;;  %v217_v1 = vld [vmem:[%s11284_s25 + $0xa0] sm:$0xf] }
  0x24   : >> { %16253 = vst [vmem:[#allocation7_spill] sm:$0xff] %v16252_v35  ;;  %v613_v39 = vshll.u32 %v215_v25, 16  ;;  %v265_v40 = vrot.slane %v264_v30, 4  ;;  %v275_v41 = vrot.slane %v274_v31, 4  ;;  %v605_v42 = vrot.slane %v603_v32, 5 }
  0x25   : >> { %v609_v43 = vrot.slane %v607_v33, 4  ;;  %v285_v44 = vrot.slane %v284_v36, 4  ;;  %v600_v45 = vor.u32 %v599_v38, %v596_v37  ;;  %v617_v47 = vshrl.u32 %v215_v25, 16  ;;  %v186_v3 = vld [vmem:[%s11284_s25 + $0x14] sm:$0xf] }
  0x26   : >> { %v615_v46 = vrot.slane %v613_v39, 5  ;;  %v270_v49 = vsel %vm11297_vm5, %v265_v40, %v269_v23  ;;  %v280_v50 = vsel %vm11297_vm5, %v275_v41, %v279_v26  ;;  %v287_v52 = vshll.u32 %v184_v34, 16  ;;  %v187_v11 = vld [vmem:[%s11284_s25 + $0x18] sm:$0xf]  ;;  %v218_v24 = vld [vmem:[%s11284_s25 + $0xa4] sm:$0xf] }
  0x27   : >> { %v610_v51 = vor.u32 %v609_v43, %v605_v42  ;;  %v8918_v54 = vcombine.low %v270_v49, %v280_v50  ;;  %v601_v55 = vrot.slane %v600_v45, 4  ;;  %v619_v56 = vrot.slane %v617_v47, 4  ;;  %v219_v29 = vld [vmem:[%s11284_s25 + $0xa8] sm:$0xf]  ;;  %v188_v43 = vld [vmem:[%s11284_s25 + $0x1c] sm:$0xf] }
  0x28   : >> { %v291_v57 = vshrl.u32 %v184_v34, 16  ;;  %v289_v59 = vrot.slane %v287_v52, 5  ;;  %v297_v60 = vshll.u32 %v185_v48, 16  ;;  %v623_v2 = vshll.u32 %v216_v53, 16  ;;  %v246_v52 = vld [vmem:[%s11284_s25 + $0x20] sm:$0x1] }
  0x29   : >> { %v611_v58 = vrot.slane %v610_v51, 4  ;;  %10256 = vmatprep.mubr.msk.bf16.mxu0 %vm1027_vm4, %v8918_v54  ;;  %v606_v61 = vsel %vm11297_vm5, %v601_v55, %v605_v42  ;;  %v620_v62 = vor.u32 %v619_v56, %v615_v46  ;;  %v627_v10 = vshrl.u32 %v216_v53, 16  ;;  %v11927_v35 = vld [vmem:[%s11284_s25 + $0xbc] sm:$0xf] }
  0x2a   : >> { %v293_v63 = vrot.slane %v291_v57, 4  ;;  %v290_v6 = vsel %vm11297_vm5, %v285_v44, %v289_v59  ;;  %v299_v7 = vrot.slane %v297_v60, 5  ;;  %v625_v15 = vrot.slane %v623_v2, 5  ;;  %v250_v2 = vld [vmem:[%s11284_s25 + $0xb0] sm:$0x1]  ;;  %16267 = vst [vmem:[#allocation19_spill] sm:$0xff] %v11927_v35 }
  0x2b   : >> { %v616_v5 = vsel %vm11297_vm5, %v611_v58, %v615_v46  ;;  %v621_v12 = vrot.slane %v620_v62, 4  ;;  %v629_v16 = vrot.slane %v627_v10, 4  ;;  %v633_v17 = vshll.u32 %v217_v1, 16 }
  0x2c   : >> { %v8934_v13 = vcombine.low %v606_v61, %v616_v5  ;;  %v294_v14 = vor.u32 %v293_v63, %v289_v59  ;;  %v301_v18 = vshrl.u32 %v185_v48, 16  ;;  %v307_v19 = vshll.u32 %v186_v3, 16 }
  0x2d   : >> { %v626_v21 = vsel %vm11297_vm5, %v621_v12, %v625_v15  ;;  %v311_v22 = vshrl.u32 %v186_v3, 16  ;;  %v317_v23 = vshll.u32 %v187_v11, 16  ;;  %v630_v25 = vor.u32 %v629_v16, %v625_v15 }
  0x2e   : >> { %10288 = vmatprep.mubr.msk.bf16.mxu1 %vm1027_vm4, %v8934_v13  ;;  %v295_v20 = vrot.slane %v294_v14, 4  ;;  %v635_v26 = vrot.slane %v633_v17, 5  ;;  %v303_v27 = vrot.slane %v301_v18, 4  ;;  %v309_v28 = vrot.slane %v307_v19, 5  ;;  %v190_v18 = vld [vmem:[%s11284_s25 + $0x28] sm:$0xf] }
  0x2f   : >> { %v313_v31 = vrot.slane %v311_v22, 4  ;;  %v319_v32 = vrot.slane %v317_v23, 5  ;;  %v637_v33 = vshrl.u32 %v217_v1, 16  ;;  %v631_v36 = vrot.slane %v630_v25, 4  ;;  %v191_v23 = vld [vmem:[%s11284_s25 + $0x2c] sm:$0xf] }
  0x30   : >> { %v300_v30 = vsel %vm11297_vm5, %v295_v20, %v299_v7  ;;  %v304_v37 = vor.u32 %v303_v27, %v299_v7  ;;  %v643_v38 = vshll.u32 %v218_v24, 16  ;;  %v647_v41 = vshrl.u32 %v218_v24, 16 }
  0x31   : >> { %v8919_v34 = vcombine.low %v290_v6, %v300_v30  ;;  %v314_v39 = vor.u32 %v313_v31, %v309_v28  ;;  %v639_v40 = vrot.slane %v637_v33, 4  ;;  %v653_v42 = vshll.u32 %v219_v29, 16 }
  0x32   : >> { %v636_v44 = vsel %vm11297_vm5, %v631_v36, %v635_v26  ;;  %v305_v45 = vrot.slane %v304_v37, 4  ;;  %v645_v46 = vrot.slane %v643_v38, 5  ;;  %v321_v47 = vshrl.u32 %v187_v11, 16  ;;  %v222_v38 = vld [vmem:[%s11284_s25 + $0xb8] sm:$0xf] }
  0x33   : >> { %10257 = vmatmul.mubr.msk.bf16.vlgmr.msra.gmra.mxu0 %vm1027_vm4, %v8919_v34  ;;  %v8935_v48 = vcombine.low %v626_v21, %v636_v44  ;;  %v315_v49 = vrot.slane %v314_v39, 4  ;;  %v640_v50 = vor.u32 %v639_v40, %v635_v26  ;;  %v649_v51 = vrot.slane %v647_v41, 4 }
  0x34   : >> { %10387 = vmatpush3.bf16.msra.mxu0 %v11281_v9  ;;  %v310_v53 = vsel %vm11297_vm5, %v305_v45, %v309_v28  ;;  %v655_v54 = vrot.slane %v653_v42, 5  ;;  %v323_v55 = vrot.slane %v321_v47, 4  ;;  %v327_v56 = vshll.u32 %v188_v43, 16  ;;  %v220_v9 = vld [vmem:[%s11284_s25 + $0xac] sm:$0xf] }
  0x35   : >> { %10289 = vmatmul.mubr.msk.bf16.vlgmr.msra.gmra.mxu1 %vm1027_vm4, %v8935_v48  ;;  %v320_v57 = vsel %vm11297_vm5, %v315_v49, %v319_v32  ;;  %v641_v58 = vrot.slane %v640_v50, 4  ;;  %v650_v59 = vor.u32 %v649_v51, %v645_v46  ;;  %v331_v60 = vshrl.u32 %v188_v43, 16 }
  0x36   : >> { %10321 = vmatpush3.bf16.msra.mxu1 %v11278_v8  ;;  %v8920_v61 = vcombine.low %v310_v53, %v320_v57  ;;  %v324_v62 = vor.u32 %v323_v55, %v319_v32  ;;  %v329_v63 = vrot.slane %v327_v56, 5  ;;  %v337_v1 = vshll.u32 %v246_v52, 16  ;;  %v189_v8 = vld [vmem:[%s11284_s25 + $0x24] sm:$0xf]  ;;  %v221_v32 = vld [vmem:[%s11284_s25 + $0xb4] sm:$0xf] }
  0x37   : >> { %v646_v3 = vsel %vm11297_vm5, %v641_v58, %v645_v46  ;;  %v651_v5 = vrot.slane %v650_v59, 4  ;;  %v333_v6 = vrot.slane %v331_v60, 4  ;;  %v657_v7 = vshrl.u32 %v219_v29, 16  ;;  %v223_v46 = vld [vmem:[%s11284_s25 + $0xbc] sm:$0xf] }
  0x38   : >> { %10260 = vmatprep.mubr.msk.bf16.mxu0 %vm1027_vm4, %v8920_v61  ;;  %v325_v10 = vrot.slane %v324_v62, 4  ;;  %v339_v11 = vrot.slane %v337_v1, 5  ;;  %v663_v12 = vshll.u32 %v220_v9, 16  ;;  %v667_v13 = vshrl.u32 %v220_v9, 16  ;;  %v192_v52 = vld [vmem:[%s11284_s25 + $0x30] sm:$0xf] }
  0x39   : >> { %v656_v14 = vsel %vm11297_vm5, %v651_v5, %v655_v54  ;;  %v334_v15 = vor.u32 %v333_v6, %v329_v63  ;;  %v659_v16 = vrot.slane %v657_v7, 4  ;;  %v673_v17 = vshll.u32 %v250_v2, 16  ;;  %v193_v62 = vld [vmem:[%s11284_s25 + $0x34] sm:$0xf]  ;;  %v224_v7 = vld [vmem:[%s11284_s25 + $0xc0] sm:$0xf] }
  0x3a   : >> { %v8936_v19 = vcombine.low %v646_v3, %v656_v14  ;;  %v330_v20 = vsel %vm11297_vm5, %v325_v10, %v329_v63  ;;  %v665_v21 = vrot.slane %v663_v12, 5  ;;  %v669_v22 = vrot.slane %v667_v13, 4 }
  0x3b   : >> { %v335_v24 = vrot.slane %v334_v15, 4  ;;  %v660_v25 = vor.u32 %v659_v16, %v655_v54  ;;  %v675_v26 = vrot.slane %v673_v17, 5  ;;  %v342_v27 = vshrl.u32 %v189_v8, 16 }
  0x3c   : >> { %10292 = vmatprep.mubr.msk.bf16.mxu1 %vm1027_vm4, %v8936_v19  ;;  %v670_v28 = vor.u32 %v669_v22, %v665_v21  ;;  %v345_v29 = vshll.u32 %v189_v8, 16  ;;  %v351_v30 = vshll.u32 %v190_v18, 16  ;;  %v355_v31 = vshrl.u32 %v190_v18, 16  ;;  %v225_v19 = vld [vmem:[%s11284_s25 + $0xc4] sm:$0xf] }
  0x3d   : >> { %v340_v33 = vsel %vm11297_vm5, %v335_v24, %v339_v11  ;;  %v661_v34 = vrot.slane %v660_v25, 4  ;;  %v344_v36 = vrot.slane %v342_v27, 4  ;;  %v361_v37 = vshll.u32 %v191_v23, 16 }
  0x3e   : >> { %v8921_v39 = vcombine.low %v330_v20, %v340_v33  ;;  %v671_v40 = vrot.slane %v670_v28, 4  ;;  %v347_v41 = vrot.slane %v345_v29, 5  ;;  %v353_v42 = vrot.slane %v351_v30, 5 }
  0x3f   : >> { %v666_v43 = vsel %vm11297_vm5, %v661_v34, %v665_v21  ;;  %v357_v44 = vrot.slane %v355_v31, 4  ;;  %v363_v45 = vrot.slane %v361_v37, 5  ;;  %v678_v47 = vshrl.u32 %v221_v32, 16 }
  0x40   : >> { %10261 = vmatmul.mubr.msk.bf16.gmra.mxu0 %vm1027_vm4, %v8921_v39  ;;  %v676_v48 = vsel %vm11297_vm5, %v671_v40, %v675_v26  ;;  %v348_v49 = vor.u32 %v347_v41, %v344_v36  ;;  %v681_v50 = vshll.u32 %v221_v32, 16  ;;  %v687_v51 = vshll.u32 %v222_v38, 16  ;;  %v194_v26 = vld [vmem:[%s11284_s25 + $0x38] sm:$0xf] }
  0x41   : >> { %v8937_v53 = vcombine.low %v666_v43, %v676_v48  ;;  %v358_v54 = vor.u32 %v357_v44, %v353_v42  ;;  %v680_v55 = vrot.slane %v678_v47, 4  ;;  %v691_v56 = vshrl.u32 %v222_v38, 16  ;;  %v195_v38 = vld [vmem:[%s11284_s25 + $0x3c] sm:$0xf] }
  0x42   : >> { %v349_v57 = vrot.slane %v348_v49, 4  ;;  %v683_v58 = vrot.slane %v681_v50, 5  ;;  %v689_v59 = vrot.slane %v687_v51, 5  ;;  %v697_v60 = vshll.u32 %v223_v46, 16 }
  0x43   : >> { %10293 = vmatmul.mubr.msk.bf16.gmra.mxu1 %vm1027_vm4, %v8937_v53  ;;  %v359_v9 = vrot.slane %v358_v54, 4  ;;  %v693_v61 = vrot.slane %v691_v56, 4  ;;  %v365_v63 = vshrl.u32 %v191_v23, 16  ;;  %v371_v1 = vshll.u32 %v192_v52, 16  ;;  %v227_v56 = vld [vmem:[%s11284_s25 + $0xcc] sm:$0xf] }
  0x44   : >> { %v354_v2 = vsel %vm11297_vm5, %v349_v57, %v353_v42  ;;  %v684_v3 = vor.u32 %v683_v58, %v680_v55  ;;  %v699_v5 = vrot.slane %v697_v60, 5  ;;  %v375_v6 = vshrl.u32 %v192_v52, 16 }
  0x45   : >> { %v364_v10 = vsel %vm11297_vm5, %v359_v9, %v363_v45  ;;  %v694_v11 = vor.u32 %v693_v61, %v689_v59  ;;  %v367_v12 = vrot.slane %v365_v63, 4  ;;  %v373_v13 = vrot.slane %v371_v1, 5 }
  0x46   : >> { %v8922_v8 = vcombine.low %v354_v2, %v364_v10  ;;  %v685_v14 = vrot.slane %v684_v3, 4  ;;  %v377_v15 = vrot.slane %v375_v6, 4  ;;  %v381_v16 = vshll.u32 %v193_v62, 16  ;;  %v247_v10 = vld [vmem:[%s11284_s25 + $0x44] sm:$0x1] }
  0x47   : >> { %v695_v17 = vrot.slane %v694_v11, 4  ;;  %v368_v18 = vor.u32 %v367_v12, %v363_v45  ;;  %v701_v20 = vshrl.u32 %v223_v46, 16  ;;  %v707_v21 = vshll.u32 %v224_v7, 16  ;;  %v226_v45 = vld [vmem:[%s11284_s25 + $0xc8] sm:$0xf] }
  0x48   : >> { %10264 = vmatprep.mubr.msk.bf16.mxu0 %vm1027_vm4, %v8922_v8  ;;  %v690_v22 = vsel %vm11297_vm5, %v685_v14, %v689_v59  ;;  %v378_v23 = vor.u32 %v377_v15, %v373_v13  ;;  %v383_v24 = vrot.slane %v381_v16, 5  ;;  %v711_v25 = vshrl.u32 %v224_v7, 16  ;;  %v228_v15 = vld [vmem:[%s11284_s25 + $0xd0] sm:$0xf] }
  0x49   : >> { %v700_v27 = vsel %vm11297_vm5, %v695_v17, %v699_v5  ;;  %v369_v28 = vrot.slane %v368_v18, 4  ;;  %v703_v29 = vrot.slane %v701_v20, 4  ;;  %v709_v30 = vrot.slane %v707_v21, 5  ;;  %v251_v20 = vld [vmem:[%s11284_s25 + $0xd4] sm:$0x1] }
  0x4a   : >> { %v8938_v31 = vcombine.low %v690_v22, %v700_v27  ;;  %v379_v32 = vrot.slane %v378_v23, 4  ;;  %v713_v33 = vrot.slane %v711_v25, 4  ;;  %v717_v34 = vshll.u32 %v225_v19, 16  ;;  %v197_v25 = vld [vmem:[%s11284_s25 + $0x48] sm:$0xf] }
  0x4b   : >> { %v374_v36 = vsel %vm11297_vm5, %v369_v28, %v373_v13  ;;  %v704_v37 = vor.u32 %v703_v29, %v699_v5  ;;  %v385_v39 = vshrl.u32 %v193_v62, 16  ;;  %v391_v40 = vshll.u32 %v194_v26, 16  ;;  %v196_v62 = vld [vmem:[%s11284_s25 + $0x40] sm:$0xf] }
  0x4c   : >> { %10296 = vmatprep.mubr.msk.bf16.mxu1 %vm1027_vm4, %v8938_v31  ;;  %v384_v41 = vsel %vm11297_vm5, %v379_v32, %v383_v24  ;;  %v714_v42 = vor.u32 %v713_v33, %v709_v30  ;;  %v719_v43 = vrot.slane %v717_v34, 5  ;;  %v395_v44 = vshrl.u32 %v194_v26, 16 }
  0x4d   : >> { %v8923_v46 = vcombine.low %v374_v36, %v384_v41  ;;  %v705_v47 = vrot.slane %v704_v37, 4  ;;  %v387_v48 = vrot.slane %v385_v39, 4  ;;  %v393_v49 = vrot.slane %v391_v40, 5  ;;  %v11406_v40 = vld [vmem:[%s11284_s25 + $0x50] sm:$0xf] }
  0x4e   : >> { %v715_v50 = vrot.slane %v714_v42, 4  ;;  %v397_v51 = vrot.slane %v395_v44, 4  ;;  %v401_v52 = vshll.u32 %v195_v38, 16  ;;  %v721_v53 = vshrl.u32 %v225_v19, 16 }
  0x4f   : >> { %10265 = vmatmul.mubr.msk.bf16.gmra.mxu0 %vm1027_vm4, %v8923_v46  ;;  %v710_v54 = vsel %vm11297_vm5, %v705_v47, %v709_v30  ;;  %v388_v55 = vor.u32 %v387_v48, %v383_v24  ;;  %v727_v57 = vshll.u32 %v226_v45, 16  ;;  %v731_v58 = vshrl.u32 %v226_v45, 16  ;;  %v11400_v30 = vld [vmem:[%s11284_s25 + $0x4c] sm:$0xf]  ;;  %v229_v45 = vld [vmem:[%s11284_s25 + $0xd8] sm:$0xf] }
  0x50   : >> { %v720_v59 = vsel %vm11297_vm5, %v715_v50, %v719_v43  ;;  %v398_v60 = vor.u32 %v397_v51, %v393_v49  ;;  %v403_v9 = vrot.slane %v401_v52, 5  ;;  %v723_v61 = vrot.slane %v721_v53, 4  ;;  %v230_v50 = vld [vmem:[%s11284_s25 + $0xdc] sm:$0xf] }
  0x51   : >> { %v8939_v63 = vcombine.low %v710_v54, %v720_v59  ;;  %v389_v1 = vrot.slane %v388_v55, 4  ;;  %v729_v2 = vrot.slane %v727_v57, 5  ;;  %v733_v3 = vrot.slane %v731_v58, 4  ;;  %v231_v59 = vld [vmem:[%s11284_s25 + $0xe0] sm:$0xf] }
  0x52   : >> { %v399_v5 = vrot.slane %v398_v60, 4  ;;  %v724_v6 = vor.u32 %v723_v61, %v719_v43  ;;  %v737_v7 = vshll.u32 %v227_v56, 16  ;;  %v405_v11 = vshrl.u32 %v195_v38, 16 }
  0x53   : >> { %10297 = vmatmul.mubr.msk.bf16.gmra.mxu1 %vm1027_vm4, %v8939_v63  ;;  %v394_v12 = vsel %vm11297_vm5, %v389_v1, %v393_v49  ;;  %v734_v13 = vor.u32 %v733_v3, %v729_v2  ;;  %v411_v8 = vshll.u32 %v196_v62, 16  ;;  %v415_v14 = vshrl.u32 %v196_v62, 16  ;;  %v11420_v63 = vld [vmem:[%s11284_s25 + $0x54] sm:$0xf] }
  0x54   : >> { %v404_v16 = vsel %vm11297_vm5, %v399_v5, %v403_v9  ;;  %v725_v17 = vrot.slane %v724_v6, 4  ;;  %v739_v18 = vrot.slane %v737_v7, 5  ;;  %v407_v19 = vrot.slane %v405_v11, 4 }
  0x55   : >> { %v8924_v21 = vcombine.low %v394_v12, %v404_v16  ;;  %v735_v22 = vrot.slane %v734_v13, 4  ;;  %v413_v23 = vrot.slane %v411_v8, 5  ;;  %v417_v24 = vrot.slane %v415_v14, 4 }
  0x56   : >> { %v730_v26 = vsel %vm11297_vm5, %v725_v17, %v729_v2  ;;  %v408_v27 = vor.u32 %v407_v19, %v403_v9  ;;  %v421_v28 = vshll.u32 %v247_v10, 16  ;;  %v741_v29 = vshrl.u32 %v227_v56, 16  ;;  %v11428_v19 = vld [vmem:[%s11284_s25 + $0x58] sm:$0xf] }
  0x57   : >> { %10268 = vmatprep.mubr.msk.bf16.mxu0 %vm1027_vm4, %v8924_v21  ;;  %v740_v31 = vsel %vm11297_vm5, %v735_v22, %v739_v18  ;;  %v418_v32 = vor.u32 %v417_v24, %v413_v23  ;;  %v747_v33 = vshll.u32 %v228_v15, 16  ;;  %v751_v34 = vshrl.u32 %v228_v15, 16  ;;  %v232_v24 = vld [vmem:[%s11284_s25 + $0xe4] sm:$0xf] }
  0x58   : >> { %v8940_v36 = vcombine.low %v730_v26, %v740_v31  ;;  %v409_v37 = vrot.slane %v408_v27, 4  ;;  %v423_v38 = vrot.slane %v421_v28, 5  ;;  %v743_v39 = vrot.slane %v741_v29, 4  ;;  %v233_v29 = vld [vmem:[%s11284_s25 + $0xe8] sm:$0xf] }
  0x59   : >> { %v419_v41 = vrot.slane %v418_v32, 4  ;;  %v749_v42 = vrot.slane %v747_v33, 5  ;;  %v753_v43 = vrot.slane %v751_v34, 4  ;;  %v757_v44 = vshll.u32 %v251_v20, 16 }
  0x5a   : >> { %10300 = vmatprep.mubr.msk.bf16.mxu1 %vm1027_vm4, %v8940_v36  ;;  %v414_v46 = vsel %vm11297_vm5, %v409_v37, %v413_v23  ;;  %v744_v47 = vor.u32 %v743_v39, %v739_v18  ;;  %v426_v48 = vshrl.u32 %v197_v25, 16  ;;  %v429_v49 = vshll.u32 %v197_v25, 16 }
  0x5b   : >> { %v424_v51 = vsel %vm11297_vm5, %v419_v41, %v423_v38  ;;  %v754_v52 = vor.u32 %v753_v43, %v749_v42  ;;  %v759_v53 = vrot.slane %v757_v44, 5  ;;  %v435_v54 = vshll.u32 %v11400_v30, 16 }
  0x5c   : >> { %v8925_v55 = vcombine.low %v414_v46, %v424_v51  ;;  %v745_v56 = vrot.slane %v744_v47, 4  ;;  %v428_v57 = vrot.slane %v426_v48, 4  ;;  %v431_v58 = vrot.slane %v429_v49, 5 }
  0x5d   : >> { %v755_v60 = vrot.slane %v754_v52, 4  ;;  %v437_v9 = vrot.slane %v435_v54, 5  ;;  %v439_v61 = vshrl.u32 %v11400_v30, 16  ;;  %v445_v62 = vshll.u32 %v11406_v40, 16 }
  0x5e   : >> { %10269 = vmatmul.mubr.msk.bf16.gmra.mxu0 %vm1027_vm4, %v8925_v55  ;;  %v750_v1 = vsel %vm11297_vm5, %v745_v56, %v749_v42  ;;  %v432_v2 = vor.u32 %v431_v58, %v428_v57  ;;  %v762_v3 = vshrl.u32 %v229_v45, 16  ;;  %v765_v5 = vshll.u32 %v229_v45, 16  ;;  %v11444_v45 = vld [vmem:[%s11284_s25 + $0x5c] sm:$0xf] }
  0x5f   : >> { %v760_v6 = vsel %vm11297_vm5, %v755_v60, %v759_v53  ;;  %v441_v7 = vrot.slane %v439_v61, 4  ;;  %v447_v10 = vrot.slane %v445_v62, 5  ;;  %v771_v11 = vshll.u32 %v230_v50, 16 }
  0x60   : >> { %v8941_v12 = vcombine.low %v750_v1, %v760_v6  ;;  %v433_v13 = vrot.slane %v432_v2, 4  ;;  %v764_v8 = vrot.slane %v762_v3, 4  ;;  %v767_v14 = vrot.slane %v765_v5, 5  ;;  %v235_v1 = vld [vmem:[%s11284_s25 + $0xf0] sm:$0xf] }
  0x61   : >> { %v442_v15 = vor.u32 %v441_v7, %v437_v9  ;;  %v773_v16 = vrot.slane %v771_v11, 5  ;;  %v775_v17 = vshrl.u32 %v230_v50, 16  ;;  %v781_v18 = vshll.u32 %v231_v59, 16  ;;  %v11447_v50 = vld [vmem:[%s11284_s25 + $0x60] sm:$0xf] }
  0x62   : >> { %10301 = vmatmul.mubr.msk.bf16.gmra.mxu1 %vm1027_vm4, %v8941_v12  ;;  %v438_v20 = vsel %vm11297_vm5, %v433_v13, %v437_v9  ;;  %v768_v21 = vor.u32 %v767_v14, %v764_v8  ;;  %v449_v22 = vshrl.u32 %v11406_v40, 16  ;;  %v455_v23 = vshll.u32 %v11420_v63, 16 }
  0x63   : >> { %v443_v25 = vrot.slane %v442_v15, 4  ;;  %v777_v26 = vrot.slane %v775_v17, 4  ;;  %v783_v27 = vrot.slane %v781_v18, 5  ;;  %v459_v28 = vshrl.u32 %v11420_v63, 16 }
  0x64   : >> { %v769_v31 = vrot.slane %v768_v21, 4  ;;  %v451_v32 = vrot.slane %v449_v22, 4  ;;  %v457_v33 = vrot.slane %v455_v23, 5  ;;  %v465_v34 = vshll.u32 %v11428_v19, 16  ;;  %v11470_v22 = vld [vmem:[%s11284_s25 + $0x68] sm:$0x1] }
  0x65   : >> { %v448_v36 = vsel %vm11297_vm5, %v443_v25, %v447_v10  ;;  %v778_v37 = vor.u32 %v777_v26, %v773_v16  ;;  %v461_v38 = vrot.slane %v459_v28, 4  ;;  %v785_v39 = vshrl.u32 %v231_v59, 16  ;;  %v234_v59 = vld [vmem:[%s11284_s25 + $0xec] sm:$0xf] }
  0x66   : >> { %v8926_v41 = vcombine.low %v438_v20, %v448_v36  ;;  %v774_v42 = vsel %vm11297_vm5, %v769_v31, %v773_v16  ;;  %v452_v43 = vor.u32 %v451_v32, %v447_v10  ;;  %v467_v44 = vrot.slane %v465_v34, 5  ;;  %v11466_v16 = vld [vmem:[%s11284_s25 + $0x64] sm:$0xf] }
  0x67   : >> { %v779_v46 = vrot.slane %v778_v37, 4  ;;  %v462_v47 = vor.u32 %v461_v38, %v457_v33  ;;  %v787_v48 = vrot.slane %v785_v39, 4  ;;  %v791_v49 = vshll.u32 %v232_v24, 16  ;;  %v236_v37 = vld [vmem:[%s11284_s25 + $0xf4] sm:$0xf] }
  0x68   : >> { %10272 = vmatprep.mubr.msk.bf16.mxu0 %vm1027_vm4, %v8926_v41  ;;  %v453_v51 = vrot.slane %v452_v43, 4  ;;  %v795_v52 = vshrl.u32 %v232_v24, 16  ;;  %v801_v53 = vshll.u32 %v233_v29, 16  ;;  %v469_v54 = vshrl.u32 %v11428_v19, 16  ;;  %v252_v43 = vld [vmem:[%s11284_s25 + $0xf8] sm:$0x1] }
  0x69   : >> { %v784_v55 = vsel %vm11297_vm5, %v779_v46, %v783_v27  ;;  %v463_v56 = vrot.slane %v462_v47, 4  ;;  %v788_v57 = vor.u32 %v787_v48, %v783_v27  ;;  %v793_v58 = vrot.slane %v791_v49, 5 }
  0x6a   : >> { %v8942_v60 = vcombine.low %v774_v42, %v784_v55  ;;  %v458_v9 = vsel %vm11297_vm5, %v453_v51, %v457_v33  ;;  %v797_v61 = vrot.slane %v795_v52, 4  ;;  %v803_v62 = vrot.slane %v801_v53, 5 }
  0x6b   : >> { %v468_v2 = vsel %vm11297_vm5, %v463_v56, %v467_v44  ;;  %v789_v3 = vrot.slane %v788_v57, 4  ;;  %v471_v5 = vrot.slane %v469_v54, 4  ;;  %v475_v6 = vshll.u32 %v11444_v45, 16  ;;  %v11486_v54 = vld [vmem:[%s11284_s25 + $0x6c] sm:$0xf] }
  0x6c   : >> { %10304 = vmatprep.mubr.msk.bf16.mxu1 %vm1027_vm4, %v8942_v60  ;;  %v8927_v7 = vcombine.low %v458_v9, %v468_v2  ;;  %v798_v10 = vor.u32 %v797_v61, %v793_v58  ;;  %v479_v11 = vshrl.u32 %v11444_v45, 16  ;;  %v485_v12 = vshll.u32 %v11447_v50, 16  ;;  %v11494_v2 = vld [vmem:[%s11284_s25 + $0x74] sm:$0xf] }
  0x6d   : >> { %v794_v13 = vsel %vm11297_vm5, %v789_v3, %v793_v58  ;;  %v472_v8 = vor.u32 %v471_v5, %v467_v44  ;;  %v477_v14 = vrot.slane %v475_v6, 5  ;;  %v805_v15 = vshrl.u32 %v233_v29, 16 }
  0x6e   : >> { %10273 = vmatmul.mubr.msk.bf16.gmra.mxu0 %vm1027_vm4, %v8927_v7  ;;  %v799_v17 = vrot.slane %v798_v10, 4  ;;  %v481_v18 = vrot.slane %v479_v11, 4  ;;  %v487_v20 = vrot.slane %v485_v12, 5  ;;  %v811_v21 = vshll.u32 %v234_v59, 16 }
  0x6f   : >> { %v473_v23 = vrot.slane %v472_v8, 4  ;;  %v807_v24 = vrot.slane %v805_v15, 4  ;;  %v815_v25 = vshrl.u32 %v234_v59, 16  ;;  %v821_v26 = vshll.u32 %v235_v1, 16  ;;  %v11491_v59 = vld [vmem:[%s11284_s25 + $0x70] sm:$0xf] }
  0x70   : >> { %v804_v27 = vsel %vm11297_vm5, %v799_v17, %v803_v62  ;;  %v482_v28 = vor.u32 %v481_v18, %v477_v14  ;;  %v813_v29 = vrot.slane %v811_v21, 5  ;;  %v489_v31 = vshrl.u32 %v11447_v50, 16  ;;  %v11504_v18 = vld [vmem:[%s11284_s25 + $0x100] sm:$0xf] }
  0x71   : >> { %v8943_v32 = vcombine.low %v794_v13, %v804_v27  ;;  %v478_v33 = vsel %vm11297_vm5, %v473_v23, %v477_v14  ;;  %v808_v34 = vor.u32 %v807_v24, %v803_v62  ;;  %v817_v36 = vrot.slane %v815_v25, 4  ;;  %v237_v13 = vld [vmem:[%s11284_s25 + $0xfc] sm:$0xf]  ;;  %v11511_v25 = vld [vmem:[%s11284_s25 + $0x104] sm:$0xf] }
  0x72   : >> { %v483_v38 = vrot.slane %v482_v28, 4  ;;  %v823_v39 = vrot.slane %v821_v26, 5  ;;  %v491_v41 = vrot.slane %v489_v31, 4  ;;  %v495_v42 = vshll.u32 %v11466_v16, 16 }
  0x73   : >> { %10305 = vmatmul.mubr.msk.bf16.gmra.mxu1 %vm1027_vm4, %v8943_v32  ;;  %v809_v44 = vrot.slane %v808_v34, 4  ;;  %v818_v46 = vor.u32 %v817_v36, %v813_v29  ;;  %v499_v47 = vshrl.u32 %v11466_v16, 16  ;;  %v505_v48 = vshll.u32 %v11470_v22, 16 }
  0x74   : >> { %v488_v49 = vsel %vm11297_vm5, %v483_v38, %v487_v20  ;;  %v492_v51 = vor.u32 %v491_v41, %v487_v20  ;;  %v497_v52 = vrot.slane %v495_v42, 5  ;;  %v825_v53 = vshrl.u32 %v235_v1, 16  ;;  %v11519_v41 = vld [vmem:[%s11284_s25 + $0x78] sm:$0xf] }
  0x75   : >> { %v8928_v55 = vcombine.low %v478_v33, %v488_v49  ;;  %v814_v56 = vsel %vm11297_vm5, %v809_v44, %v813_v29  ;;  %v819_v57 = vrot.slane %v818_v46, 4  ;;  %v501_v58 = vrot.slane %v499_v47, 4  ;;  %v11525_v47 = vld [vmem:[%s11284_s25 + $0x7c] sm:$0xf] }
  0x76   : >> { %v493_v60 = vrot.slane %v492_v51, 4  ;;  %v507_v9 = vrot.slane %v505_v48, 5  ;;  %v827_v61 = vrot.slane %v825_v53, 4  ;;  %v831_v62 = vshll.u32 %v236_v37, 16 }
  0x77   : >> { %10276 = vmatprep.mubr.msk.bf16.mxu0 %vm1027_vm4, %v8928_v55  ;;  %v824_v1 = vsel %vm11297_vm5, %v819_v57, %v823_v39  ;;  %v502_v3 = vor.u32 %v501_v58, %v497_v52  ;;  %v835_v5 = vshrl.u32 %v236_v37, 16  ;;  %v841_v6 = vshll.u32 %v252_v43, 16 }
  0x78   : >> { %v8944_v7 = vcombine.low %v814_v56, %v824_v1  ;;  %v498_v10 = vsel %vm11297_vm5, %v493_v60, %v497_v52  ;;  %v828_v11 = vor.u32 %v827_v61, %v823_v39  ;;  %v833_v12 = vrot.slane %v831_v62, 5  ;;  %v11532_v62 = vld [vmem:[%s11284_s25 + $0x108] sm:$0xf] }
  0x79   : >> { %v503_v8 = vrot.slane %v502_v3, 4  ;;  %v837_v14 = vrot.slane %v835_v5, 4  ;;  %v843_v15 = vrot.slane %v841_v6, 5  ;;  %v510_v17 = vshrl.u32 %v11486_v54, 16  ;;  %16254 = vst [vmem:[#allocation8_spill] sm:$0xff] %v11532_v62 }
  0x7a   : >> { %10308 = vmatprep.mubr.msk.bf16.mxu1 %vm1027_vm4, %v8944_v7  ;;  %v829_v20 = vrot.slane %v828_v11, 4  ;;  %v513_v21 = vshll.u32 %v11486_v54, 16  ;;  %v519_v23 = vshll.u32 %v11491_v59, 16  ;;  %v523_v24 = vshrl.u32 %v11491_v59, 16  ;;  %v11540_v7 = vld [vmem:[%s11284_s25 + $0x10c] sm:$0xf] }
  0x7b   : >> { %v508_v26 = vsel %vm11297_vm5, %v503_v8, %v507_v9  ;;  %v838_v27 = vor.u32 %v837_v14, %v833_v12  ;;  %v512_v28 = vrot.slane %v510_v17, 4  ;;  %v529_v29 = vshll.u32 %v11494_v2, 16  ;;  %16255 = vst [vmem:[#allocation9_spill] sm:$0xff] %v11540_v7 }
  0x7c   : >> { %v8929_v31 = vcombine.low %v498_v10, %v508_v26  ;;  %v834_v32 = vsel %vm11297_vm5, %v829_v20, %v833_v12  ;;  %v515_v33 = vrot.slane %v513_v21, 5  ;;  %v521_v34 = vrot.slane %v519_v23, 5  ;;  %v11547_v26 = vld [vmem:[%s11284_s25 + $0x80] sm:$0xf] }
  0x7d   : >> { %v839_v36 = vrot.slane %v838_v27, 4  ;;  %v525_v37 = vrot.slane %v523_v24, 4  ;;  %v531_v38 = vrot.slane %v529_v29, 5  ;;  %v846_v39 = vshrl.u32 %v237_v13, 16 }
  0x7e   : >> { %10277 = vmatmul.mubr.msk.bf16.gmra.mxu0 %vm1027_vm4, %v8929_v31  ;;  %v516_v42 = vor.u32 %v515_v33, %v512_v28  ;;  %v849_v43 = vshll.u32 %v237_v13, 16  ;;  %v855_v44 = vshll.u32 %v11504_v18, 16  ;;  %v859_v46 = vshrl.u32 %v11504_v18, 16 }
  0x7f   : >> { %v844_v48 = vsel %vm11297_vm5, %v839_v36, %v843_v15  ;;  %v526_v49 = vor.u32 %v525_v37, %v521_v34  ;;  %v848_v51 = vrot.slane %v846_v39, 4  ;;  %v865_v52 = vshll.u32 %v11511_v25, 16 }
  0x80   : >> { %v8945_v53 = vcombine.low %v834_v32, %v844_v48  ;;  %v517_v55 = vrot.slane %v516_v42, 4  ;;  %v851_v56 = vrot.slane %v849_v43, 5  ;;  %v857_v57 = vrot.slane %v855_v44, 5  ;;  %v11555_v32 = vld [vmem:[%s11284_s25 + $0x84] sm:$0xf] }
  0x81   : >> { %v527_v58 = vrot.slane %v526_v49, 4  ;;  %v861_v60 = vrot.slane %v859_v46, 4  ;;  %v867_v9 = vrot.slane %v865_v52, 5  ;;  %v533_v61 = vshrl.u32 %v11494_v2, 16  ;;  %v11561_v44 = vld [vmem:[%s11284_s25 + $0x110] sm:$0xf] }
  0x82   : >> { %10309 = vmatmul.mubr.msk.bf16.gmra.mxu1 %vm1027_vm4, %v8945_v53  ;;  %v522_v1 = vsel %vm11297_vm5, %v517_v55, %v521_v34  ;;  %v852_v3 = vor.u32 %v851_v56, %v848_v51  ;;  %v539_v5 = vshll.u32 %v11519_v41, 16  ;;  %v543_v6 = vshrl.u32 %v11519_v41, 16  ;;  %16256 = vst [vmem:[#allocation10_spill] sm:$0xff] %v11561_v44 }
  0x83   : >> { %v532_v10 = vsel %vm11297_vm5, %v527_v58, %v531_v38  ;;  %v862_v11 = vor.u32 %v861_v60, %v857_v57  ;;  %v535_v12 = vrot.slane %v533_v61, 4  ;;  %v549_v13 = vshll.u32 %v11525_v47, 16 }
  0x84   : >> { %v8930_v8 = vcombine.low %v522_v1, %v532_v10  ;;  %v853_v14 = vrot.slane %v852_v3, 4  ;;  %v541_v15 = vrot.slane %v539_v5, 5  ;;  %v545_v17 = vrot.slane %v543_v6, 4  ;;  %v11577_v10 = vld [vmem:[%s11284_s25 + $0x88] sm:$0xf] }
  0x85   : >> { %v863_v20 = vrot.slane %v862_v11, 4  ;;  %v536_v21 = vor.u32 %v535_v12, %v531_v38  ;;  %v551_v23 = vrot.slane %v549_v13, 5  ;;  %v869_v24 = vshrl.u32 %v11511_v25, 16 }
  0x86   : >> { %10280 = vmatprep.mubr.msk.bf16.mxu0 %vm1027_vm4, %v8930_v8  ;;  %v858_v27 = vsel %vm11297_vm5, %v853_v14, %v857_v57  ;;  %v546_v28 = vor.u32 %v545_v17, %v541_v15  ;;  %v875_v29 = vshll.u32 %v11532_v62, 16  ;;  %v879_v31 = vshrl.u32 %v11532_v62, 16  ;;  %v11572_v57 = vld [vmem:[%s11284_s25 + $0x114] sm:$0xf] }
  0x87   : >> { %v868_v33 = vsel %vm11297_vm5, %v863_v20, %v867_v9  ;;  %v537_v34 = vrot.slane %v536_v21, 4  ;;  %v871_v36 = vrot.slane %v869_v24, 4  ;;  %v885_v37 = vshll.u32 %v11540_v7, 16  ;;  %16257 = vst [vmem:[#allocation11_spill] sm:$0xff] %v11572_v57  ;;  %v11587_v21 = vld [vmem:[%s11284_s25 + $0x8c] sm:$0x1] }
  0x88   : >> { %v8946_v38 = vcombine.low %v858_v27, %v868_v33  ;;  %v547_v39 = vrot.slane %v546_v28, 4  ;;  %v877_v42 = vrot.slane %v875_v29, 5  ;;  %v881_v43 = vrot.slane %v879_v31, 4 }
  0x89   : >> { %v542_v46 = vsel %vm11297_vm5, %v537_v34, %v541_v15  ;;  %v872_v48 = vor.u32 %v871_v36, %v867_v9  ;;  %v887_v49 = vrot.slane %v885_v37, 5  ;;  %v553_v51 = vshrl.u32 %v11525_v47, 16  ;;  %v11592_v36 = vld [vmem:[%s11284_s25 + $0x118] sm:$0xf] }
  0x8a   : >> { %10312 = vmatprep.mubr.msk.bf16.mxu1 %vm1027_vm4, %v8946_v38  ;;  %v552_v52 = vsel %vm11297_vm5, %v547_v39, %v551_v23  ;;  %v882_v53 = vor.u32 %v881_v43, %v877_v42  ;;  %v559_v55 = vshll.u32 %v11547_v26, 16  ;;  %v563_v56 = vshrl.u32 %v11547_v26, 16  ;;  %v11600_v43 = vld [vmem:[%s11284_s25 + $0x11c] sm:$0x1] }
  0x8b   : >> { %v8931_v58 = vcombine.low %v542_v46, %v552_v52  ;;  %v873_v60 = vrot.slane %v872_v48, 4  ;;  %v555_v61 = vrot.slane %v553_v51, 4  ;;  %v569_v9 = vshll.u32 %v11555_v32, 16 }
  0x8c   : >> { %v883_v1 = vrot.slane %v882_v53, 4  ;;  %v561_v3 = vrot.slane %v559_v55, 5  ;;  %v565_v5 = vrot.slane %v563_v56, 4  ;;  %v889_v6 = vshrl.u32 %v11540_v7, 16 }
  0x8d   : >> { %10281 = vmatmul.mubr.msk.bf16.gmra.mxu0 %vm1027_vm4, %v8931_v58  ;;  %v878_v11 = vsel %vm11297_vm5, %v873_v60, %v877_v42  ;;  %v556_v12 = vor.u32 %v555_v61, %v551_v23  ;;  %v571_v13 = vrot.slane %v569_v9, 5  ;;  %v895_v8 = vshll.u32 %v11561_v44, 16 }
  0x8e   : >> { %v888_v14 = vsel %vm11297_vm5, %v883_v1, %v887_v49  ;;  %v566_v15 = vor.u32 %v565_v5, %v561_v3  ;;  %v891_v17 = vrot.slane %v889_v6, 4  ;;  %v899_v20 = vshrl.u32 %v11561_v44, 16 }
  0x8f   : >> { %v8947_v24 = vcombine.low %v878_v11, %v888_v14  ;;  %v557_v27 = vrot.slane %v556_v12, 4  ;;  %v897_v28 = vrot.slane %v895_v8, 5  ;;  %v905_v29 = vshll.u32 %v11572_v57, 16  ;;  %v1968_v11 = vld [vmem:[%s11284_s25] sm:$0xe] }
  0x90   : >> { %v567_v23 = vrot.slane %v566_v15, 4  ;;  %v892_v31 = vor.u32 %v891_v17, %v887_v49  ;;  %v901_v33 = vrot.slane %v899_v20, 4  ;;  %v573_v34 = vshrl.u32 %v11555_v32, 16 }
  0x91   : >> { %10313 = vmatmul.mubr.msk.bf16.gmra.mxu1 %vm1027_vm4, %v8947_v24  ;;  %v562_v37 = vsel %vm11297_vm5, %v557_v27, %v561_v3  ;;  %v907_v38 = vrot.slane %v905_v29, 5  ;;  %v579_v39 = vshll.u32 %v11577_v10, 16  ;;  %v583_v42 = vshrl.u32 %v11577_v10, 16  ;;  %v11622_v29 = vld [vmem:[%s11284_s25 + $0x10] sm:$0xf] }
  0x92   : >> { %v572_v46 = vsel %vm11297_vm5, %v567_v23, %v571_v13  ;;  %v893_v48 = vrot.slane %v892_v31, 4  ;;  %v902_v49 = vor.u32 %v901_v33, %v897_v28  ;;  %v575_v51 = vrot.slane %v573_v34, 4 }
  0x93   : >> { %v8932_v52 = vcombine.low %v562_v37, %v572_v46  ;;  %v581_v53 = vrot.slane %v579_v39, 5  ;;  %v585_v55 = vrot.slane %v583_v42, 4  ;;  %v589_v56 = vshll.u32 %v11587_v21, 16 }
  0x94   : >> { %v898_v58 = vsel %vm11297_vm5, %v893_v48, %v897_v28  ;;  %v903_v60 = vrot.slane %v902_v49, 4  ;;  %v576_v61 = vor.u32 %v575_v51, %v571_v13  ;;  %v909_v9 = vshrl.u32 %v11572_v57, 16  ;;  %v9185_v13 = vld [vmem:[%s16142_s1 + $0x6] sm:$0x3]  ;;  %v9322_v28 = vld [vmem:[%s16142_s1 + $0x8] sm:$0x3] }
  0x95   : >> { %10284 = vmatprep.mubr.msk.bf16.mxu0 %vm1027_vm4, %v8932_v52  ;;  %v586_v1 = vor.u32 %v585_v55, %v581_v53  ;;  %v591_v3 = vrot.slane %v589_v56, 5  ;;  %v915_v5 = vshll.u32 %v11592_v36, 16  ;;  %v919_v6 = vshrl.u32 %v11592_v36, 16  ;;  %v10998_v51 = vld [vmem:[%s11284_s25 + $0x4] sm:$0xf] }
  0x96   : >> { %v908_v12 = vsel %vm11297_vm5, %v903_v60, %v907_v38  ;;  %v577_v8 = vrot.slane %v576_v61, 4  ;;  %v911_v14 = vrot.slane %v909_v9, 4  ;;  %v925_v15 = vshll.u32 %v11600_v43, 16 }
  0x97   : >> { %v8948_v17 = vcombine.low %v898_v58, %v908_v12  ;;  %v587_v20 = vrot.slane %v586_v1, 4  ;;  %v917_v24 = vrot.slane %v915_v5, 5  ;;  %v921_v27 = vrot.slane %v919_v6, 4  ;;  %v11643_v58 = vld [vmem:[%s11284_s25 + $0xc] sm:$0xf] }
  0x98   : >> { %v2006_v23 = vrot.slane %v11622_v29, 5  ;;  %v582_v31 = vsel %vm11297_vm5, %v577_v8, %v581_v53  ;;  %v912_v33 = vor.u32 %v911_v14, %v907_v38  ;;  %v927_v34 = vrot.slane %v925_v15, 5  ;;  %v11636_v53 = vld [vmem:[%s11284_s25 + $0x8] sm:$0xf]  ;;  %v11001_v6 = vld [vmem:[%s11284_s25] sm:$0xf] }
  0x99   : >> { %10316 = vmatprep.mubr.msk.bf16.mxu1 %vm1027_vm4, %v8948_v17  ;;  %v592_v37 = vsel %vm11297_vm5, %v587_v20, %v591_v3  ;;  %v922_v39 = vor.u32 %v921_v27, %v917_v24  ;;  %vm1993_vm7 = vcmask 1046532   ;;  %v9046_v49 = vrot.slane %v1968_v11, 9  ;;  %v1969_v14 = vld [vmem:[%s11284_s25 + $0x24] sm:$0xe]  ;;  %v11002_v20 = vld [vmem:[%s11284_s25 + $0x14] sm:$0xf] }
  0x9a   : >> { %v8933_v42 = vcombine.low %v582_v31, %v592_v37  ;;  %v913_v46 = vrot.slane %v912_v33, 4  ;;  %vm11630_vm8 = vmor %vm1992_vm6, %vm1993_vm7  ;;  %v1997_v38 = vrot.slane %v10998_v51, 5  ;;  %v2000_v55 = vrot.slane %v11636_v53, 5  ;;  %v11665_v33 = vld [vmem:[%s11284_s25 + $0x18] sm:$0xf] }
  0x9b   : >> { %v923_v52 = vrot.slane %v922_v39, 4  ;;  %v11640_v56 = vand.u32 %v9185_v13, %v11267_v4  ;;  %v2003_v60 = vrot.slane %v11643_v58, 5  ;;  %v4366_v3 = vand.u32 %v9322_v28, %v11267_v4 }
  0x9c   : >> { %10285 = vmatmul.mubr.msk.bf16.gmra.mxu0 %vm1027_vm4, %v8933_v42  ;;  %v918_v61 = vsel %vm11297_vm5, %v913_v46, %v917_v24  ;;  %v1998_v9 = vsel %vm11630_vm8, %v9046_v49, %v1997_v38  ;;  %v1999_v1 = vrot.slane %v1997_v38, 4  ;;  %v8982_v11 = vcombine.low %v11001_v6, %v10998_v51  ;;  %v11005_v51 = vld [vmem:[%s11284_s25 + $0x20] sm:$0x1] }
  0x9d   : >> { %v928_v5 = vsel %vm11297_vm5, %v923_v52, %v927_v34  ;;  %v2002_v12 = vrot.slane %v2000_v55, 4  ;;  %10452 = vmatprep.subr.bf16.mxu1 %v11640_v56  ;;  %v2005_v8 = vrot.slane %v2003_v60, 4  ;;  %10518 = vmatprep.subr.bf16.mxu0 %v4366_v3  ;;  %v2008_v17 = vrot.slane %v2006_v23, 4 }
  0x9e   : >> { %v8949_v15 = vcombine.low %v918_v61, %v928_v5  ;;  %v2001_v13 = vsel %vm11630_vm8, %v1999_v1, %v2000_v55  ;;  %v2009_v24 = vrot.slane %v11002_v20, 5  ;;  %v2012_v34 = vrot.slane %v11665_v33, 5 }
  0x9f   : >> { %v9055_v27 = vcombine.low %v1998_v9, %v2001_v13  ;;  %v2004_v28 = vsel %vm11630_vm8, %v2002_v12, %v2003_v60  ;;  %v2007_v31 = vsel %vm11630_vm8, %v2005_v8, %v2006_v23  ;;  %v11674_v23 = vld [vmem:[%s11284_s25 + $0x1c] sm:$0xf]  ;;  %v2018_v38 = vrot.slane %v11005_v51, 5  ;;  %v11681_v60 = vld [vmem:[%s11284_s25 + $0x28] sm:$0xf] }
  0xa0   : >> { %10317 = vmatmul.mubr.msk.bf16.gmra.mxu1 %vm1027_vm4, %v8949_v15  ;;  %v9056_v37 = vcombine.low %v2004_v28, %v2007_v31  ;;  %v2010_v39 = vsel %vm11630_vm8, %v2008_v17, %v2009_v24  ;;  %v2011_v42 = vrot.slane %v2009_v24, 4  ;;  %v2014_v46 = vrot.slane %v2012_v34, 4  ;;  %v11685_v9 = vld [vmem:[%s11284_s25 + $0x2c] sm:$0xf]  ;;  %v11692_v8 = vld [vmem:[%s11284_s25 + $0x30] sm:$0xf] }
  0xa1   : >> { %10322 = vmatprep.mubr.msk.bf16.mxu1 %vm1027_vm4, %v8982_v11  ;;  %10388 = vmatprep.mubr.msk.bf16.mxu0 %vm1027_vm4, %v9055_v27  ;;  %v2015_v49 = vrot.slane %v11674_v23, 5  ;;  %v9047_v55 = vrot.slane %v1969_v14, 9  ;;  %v2022_v61 = vrot.slane %v11681_v60, 5  ;;  %v2025_v1 = vrot.slane %v11685_v9, 5  ;;  %v11714_v31 = vld [vmem:[%s11284_s25 + $0x3c] sm:$0xf] }
  0xa2   : >> { %v2013_v52 = vsel %vm11630_vm8, %v2011_v42, %v2012_v34  ;;  %v8983_v11 = vcombine.low %v11636_v53, %v11643_v58  ;;  %v2028_v14 = vrot.slane %v11692_v8, 5  ;;  %v8984_v15 = vcombine.low %v11622_v29, %v11002_v20  ;;  %v11702_v58 = vld [vmem:[%s11284_s25 + $0x38] sm:$0xf]  ;;  %v11710_v29 = vld [vmem:[%s11284_s25 + $0x34] sm:$0xf] }
  0xa3   : >> { %v9057_v5 = vcombine.low %v2010_v39, %v2013_v52  ;;  %v2017_v6 = vrot.slane %v2015_v49, 4  ;;  %v2024_v12 = vrot.slane %v2022_v61, 4  ;;  %v2016_v13 = vsel %vm11630_vm8, %v2014_v46, %v2015_v49  ;;  %v11719_v46 = vld [vmem:[%s11284_s25 + $0x40] sm:$0xf]  ;;  %v11013_v52 = vld [vmem:[%s11284_s25 + $0x44] sm:$0x1] }
  0xa4   : >> { %10389 = vmatmul.mubr.msk.bf16.vlgmr.msra.gmra.mxu0 %vm1027_vm4, %v9056_v37  ;;  %v2034_v17 = vrot.slane %v11702_v58, 5  ;;  %v2023_v24 = vsel %vm11630_vm8, %v9047_v55, %v2022_v61  ;;  %v2031_v20 = vrot.slane %v11710_v29, 5  ;;  %v2027_v27 = vrot.slane %v2025_v1, 4 }
  0xa5   : >> { %10519 = vmatpush3.bf16.msra.mxu0 %v4366_v3  ;;  %10392 = vmatprep.mubr.msk.bf16.mxu0 %vm1027_vm4, %v9057_v5  ;;  %v2019_v53 = vsel %vm11630_vm8, %v2017_v6, %v2018_v38  ;;  %v2026_v3 = vsel %vm11630_vm8, %v2024_v12, %v2025_v1  ;;  %v2030_v28 = vrot.slane %v2028_v14, 4  ;;  %v2037_v34 = vrot.slane %v11714_v31, 5 }
  0xa6   : >> { %v9058_v37 = vcombine.low %v2016_v13, %v2019_v53  ;;  %v2033_v39 = vrot.slane %v2031_v20, 4  ;;  %v2036_v42 = vrot.slane %v2034_v17, 4  ;;  %v2040_v49 = vrot.slane %v11719_v46, 5  ;;  %v11014_v13 = vld [vmem:[%s11284_s25 + $0x24] sm:$0xf] }
  0xa7   : >> { %v9059_v51 = vcombine.low %v2023_v24, %v2026_v3  ;;  %v2039_v38 = vrot.slane %v2037_v34, 4  ;;  %v2043_v55 = vrot.slane %v11013_v52, 5  ;;  %v8985_v1 = vcombine.low %v11665_v33, %v11674_v23  ;;  %v1971_v24 = vld [vmem:[%s11284_s25 + $0x6c] sm:$0xe] }
  0xa8   : >> { %10323 = vmatmul.mubr.msk.bf16.vlgmr.msra.gmra.mxu1 %vm1027_vm4, %v8983_v11  ;;  %v2042_v61 = vrot.slane %v2040_v49, 4  ;;  %v2029_v5 = vsel %vm11630_vm8, %v2027_v27, %v2028_v14  ;;  %v2032_v6 = vsel %vm11630_vm8, %v2030_v28, %v2031_v20  ;;  %v1970_v11 = vld [vmem:[%s11284_s25 + $0x48] sm:$0xe]  ;;  %v2035_v12 = vsel %vm11630_vm8, %v2033_v39, %v2034_v17 }
  0xa9   : >> { %10453 = vmatpush3.bf16.msra.mxu1 %v11640_v56  ;;  %10326 = vmatprep.mubr.msk.bf16.mxu1 %vm1027_vm4, %v8984_v15  ;;  %v2047_v56 = vrot.slane %v11400_v30, 5  ;;  %v2038_v15 = vsel %vm11630_vm8, %v2036_v42, %v2037_v34  ;;  %v2050_v33 = vrot.slane %v11406_v40, 5  ;;  %v2053_v23 = vrot.slane %v11420_v63, 5 }
  0xaa   : >> { %v8986_v14 = vcombine.low %v11014_v13, %v11681_v60  ;;  %v8987_v30 = vcombine.low %v11685_v9, %v11692_v8  ;;  %v11747_v53 = vsel %vm11630_vm8, %v2039_v38, %v2040_v49  ;;  %v11751_v17 = vsel %vm11630_vm8, %v2042_v61, %v2043_v55 }
  0xab   : >> { %v8988_v40 = vcombine.low %v11710_v29, %v11702_v58  ;;  %v9048_v3 = vrot.slane %v1970_v11, 9  ;;  %v2056_v60 = vrot.slane %v11428_v19, 5  ;;  %v2062_v20 = vrot.slane %v11447_v50, 5 }
  0xac   : >> { %10393 = vmatmul.mubr.msk.bf16.gmra.mxu0 %vm1027_vm4, %v9058_v37  ;;  %v9060_v27 = vcombine.low %v2029_v5, %v2032_v6  ;;  %v9061_v28 = vcombine.low %v2035_v12, %v2038_v15  ;;  %v2049_v9 = vrot.slane %v2047_v56, 4  ;;  %v2065_v8 = vrot.slane %v11466_v16, 5  ;;  %v1973_v6 = vld [vmem:[%s11284_s25 + $0xb4] sm:$0xe] }
  0xad   : >> { %10396 = vmatprep.mubr.msk.bf16.mxu0 %vm1027_vm4, %v9059_v51  ;;  %v9062_v34 = vcombine.low %v11747_v53, %v11751_v17  ;;  %v2052_v37 = vrot.slane %v2050_v33, 4  ;;  %v2055_v39 = vrot.slane %v2053_v23, 4  ;;  %v2058_v58 = vrot.slane %v2056_v60, 4 }
  0xae   : >> { %v2059_v29 = vrot.slane %v11444_v45, 5  ;;  %v2064_v42 = vrot.slane %v2062_v20, 4  ;;  %v2067_v49 = vrot.slane %v2065_v8, 4  ;;  %v2068_v51 = vrot.slane %v11470_v22, 5 }
  0xaf   : >> { %v2048_v38 = vsel %vm11630_vm8, %v9048_v3, %v2047_v56  ;;  %v9049_v55 = vrot.slane %v1971_v24, 9  ;;  %v2072_v61 = vrot.slane %v11491_v59, 5  ;;  %v2075_v22 = vrot.slane %v11494_v2, 5 }
  0xb0   : >> { %10327 = vmatmul.mubr.msk.bf16.gmra.mxu1 %vm1027_vm4, %v8985_v1  ;;  %v2051_v1 = vsel %vm11630_vm8, %v2049_v9, %v2050_v33  ;;  %v11780_v45 = vsel %vm11630_vm8, %v2064_v42, %v2065_v8  ;;  %v11784_v5 = vsel %vm11630_vm8, %v2067_v49, %v2068_v51  ;;  %v2078_v33 = vrot.slane %v11519_v41, 5 }
  0xb1   : >> { %10330 = vmatprep.mubr.msk.bf16.mxu1 %vm1027_vm4, %v8986_v14  ;;  %v11792_v11 = vsel %vm11630_vm8, %v9049_v55, %v2072_v61  ;;  %v2074_v56 = vrot.slane %v2072_v61, 4  ;;  %v2077_v15 = vrot.slane %v2075_v22, 4  ;;  %v2081_v13 = vrot.slane %v11525_v47, 5 }
  0xb2   : >> { %v2084_v17 = vrot.slane %v11547_v26, 5  ;;  %v2087_v24 = vrot.slane %v11555_v32, 5  ;;  %v2080_v9 = vrot.slane %v2078_v33, 4  ;;  %v2090_v51 = vrot.slane %v11577_v10, 5 }
  0xb3   : >> { %v11803_v53 = vsel %vm11630_vm8, %v2074_v56, %v2075_v22  ;;  %v2083_v8 = vrot.slane %v2081_v13, 4  ;;  %v2093_v55 = vrot.slane %v11587_v21, 5  ;;  %v9063_v61 = vcombine.low %v2048_v38, %v2051_v1 }
  0xb4   : >> { %10397 = vmatmul.mubr.msk.bf16.gmra.mxu0 %vm1027_vm4, %v9060_v27  ;;  %v2086_v42 = vrot.slane %v2084_v17, 4  ;;  %v2089_v49 = vrot.slane %v2087_v24, 4  ;;  %v2061_v22 = vrot.slane %v2059_v29, 4  ;;  %v11821_v56 = vsel %vm11630_vm8, %v2080_v9, %v2081_v13 }
  0xb5   : >> { %10400 = vmatprep.mubr.msk.bf16.mxu0 %vm1027_vm4, %v9061_v28  ;;  %v11813_v28 = vsel %vm11630_vm8, %v2077_v15, %v2078_v33  ;;  %v11825_v15 = vsel %vm11630_vm8, %v2083_v8, %v2084_v17  ;;  %v8989_v1 = vcombine.low %v11714_v31, %v11719_v46  ;;  %v11015_v17 = vld [vmem:[%s11284_s25 + $0x48] sm:$0xf]  ;;  %v2054_v8 = vsel %vm11630_vm8, %v2052_v37, %v2053_v23  ;;  %v11867_v23 = vld [vmem:[%s11284_s25 + $0x94] sm:$0xf]  ;;  %v11897_v46 = vld [vmem:[%s11284_s25 + $0xa0] sm:$0xf] }
  0xb6   : >> { %v11831_v33 = vsel %vm11630_vm8, %v2086_v42, %v2087_v24  ;;  %v11835_v21 = vsel %vm11630_vm8, %v2089_v49, %v2090_v51  ;;  %v11016_v24 = vld [vmem:[%s11284_s25 + $0x4c] sm:$0xf]  ;;  %v2057_v31 = vsel %vm11630_vm8, %v2055_v39, %v2056_v60  ;;  %v2063_v63 = vsel %vm11630_vm8, %v2061_v22, %v2062_v20  ;;  %v1972_v42 = vld [vmem:[%s11284_s25 + $0x90] sm:$0xe]  ;;  %v11871_v60 = vld [vmem:[%s11284_s25 + $0x98] sm:$0xf] }
  0xb7   : >> { %v8990_v9 = vcombine.low %v11015_v17, %v11016_v24  ;;  %v2097_v19 = vrot.slane %v11867_v23, 5  ;;  %16260 = vst [vmem:[#allocation12_spill] sm:$0xff] %v11871_v60  ;;  %v2100_v37 = vrot.slane %v11871_v60, 5  ;;  %v11875_v39 = vld [vmem:[%s11284_s25 + $0x9c] sm:$0xf]  ;;  %v9064_v20 = vcombine.low %v2054_v8, %v2057_v31  ;;  %16265 = vst [vmem:[#allocation17_spill] sm:$0xff] %v11897_v46 }
  0xb8   : >> { %10331 = vmatmul.mubr.msk.bf16.gmra.mxu1 %vm1027_vm4, %v8987_v30  ;;  %16261 = vst [vmem:[#allocation13_spill] sm:$0xff] %v11875_v39  ;;  %v2103_v50 = vrot.slane %v11875_v39, 5  ;;  %v11025_v24 = vld [vmem:[%s11284_s25 + $0x58] sm:$0xf]  ;;  %v11026_v8 = vld [vmem:[%s11284_s25 + $0x5c] sm:$0xf] }
  0xb9   : >> { %10334 = vmatprep.mubr.msk.bf16.mxu1 %vm1027_vm4, %v8988_v40  ;;  %v2092_v40 = vrot.slane %v2090_v51, 4  ;;  %v11885_v51 = vld [vmem:[%s11284_s25 + $0xa8] sm:$0xf]  ;;  %v8992_v31 = vcombine.low %v11025_v24, %v11026_v8  ;;  %v9050_v3 = vrot.slane %v1972_v42, 9  ;;  %v2099_v14 = vrot.slane %v2097_v19, 4 }
  0xba   : >> { %16263 = vst [vmem:[#allocation15_spill] sm:$0xff] %v11885_v51  ;;  %v2102_v12 = vrot.slane %v2100_v37, 4  ;;  %v2105_v38 = vrot.slane %v2103_v50, 4  ;;  %v11931_v39 = vld [vmem:[%s11284_s25 + $0xc0] sm:$0xf]  ;;  %vm8750_vm9 = vcmask 519168  }
  0xbb   : >> { %v11844_v13 = vsel %vm11630_vm8, %v2092_v40, %v2093_v55  ;;  %v2112_v55 = vrot.slane %v11885_v51, 5  ;;  %v11023_v40 = vld [vmem:[%s11284_s25 + $0x50] sm:$0xf]  ;;  %v11922_v42 = vsel %vm11630_vm8, %v9050_v3, %v2097_v19  ;;  %16268 = vst [vmem:[#allocation20_spill] sm:$0xff] %v11931_v39  ;;  %v11936_v60 = vsel %vm11630_vm8, %v2099_v14, %v2100_v37  ;;  %v11958_v37 = vld [vmem:[%s11284_s25 + $0xc8] sm:$0xf] }
  0xbc   : >> { %10401 = vmatmul.mubr.msk.bf16.gmra.mxu0 %vm1027_vm4, %v9062_v34  ;;  %v2060_v34 = vsel %vm11630_vm8, %v2058_v58, %v2059_v29  ;;  %v11880_v58 = vld [vmem:[%s11284_s25 + $0xa4] sm:$0xf]  ;;  %v11940_v3 = vsel %vm11630_vm8, %v2102_v12, %v2103_v50  ;;  %v9051_v12 = vrot.slane %v1973_v6, 9  ;;  %16269 = vst [vmem:[#allocation21_spill] sm:$0xff] %v11958_v37  ;;  %v16274_v51 = vcombine.low %v11780_v45, %v11784_v5  ;;  %v12032_v5 = vld [vmem:[%s11284_s25 + $0xdc] sm:$0xf] }
  0xbd   : >> { %10404 = vmatprep.mubr.msk.bf16.mxu0 %vm1027_vm4, %v9063_v61  ;;  %16262 = vst [vmem:[#allocation14_spill] sm:$0xff] %v11880_v58  ;;  %v2109_v29 = vrot.slane %v11880_v58, 5  ;;  %v9065_v49 = vcombine.low %v2060_v34, %v2063_v63  ;;  %v11889_v61 = vld [vmem:[%s11284_s25 + $0xac] sm:$0xf]  ;;  %v11901_v34 = vld [vmem:[%s11284_s25 + $0x60] sm:$0xf] }
  0xbe   : >> { %16264 = vst [vmem:[#allocation16_spill] sm:$0xff] %v11889_v61  ;;  %v2115_v22 = vrot.slane %v11889_v61, 5  ;;  %v2114_v30 = vrot.slane %v2112_v55, 4  ;;  %v11030_v63 = vld [vmem:[%s11284_s25 + $0xb0] sm:$0x1]  ;;  %16280 = vst [vmem:[#allocation30_spill] sm:$0xff] %v12032_v5 }
  0xbf   : >> { %v2111_v8 = vrot.slane %v2109_v29, 4  ;;  %v2118_v27 = vrot.slane %v11030_v63, 5  ;;  %v2128_v63 = vrot.slane %v11931_v39, 5  ;;  %v11988_v61 = vld [vmem:[%s11284_s25 + $0xd0] sm:$0xf] }
  0xc0   : >> { %10335 = vmatmul.mubr.msk.bf16.gmra.mxu1 %vm1027_vm4, %v8989_v1  ;;  %v11024_v1 = vld [vmem:[%s11284_s25 + $0x54] sm:$0xf]  ;;  %v2117_v52 = vrot.slane %v2115_v22, 4  ;;  %v11964_v50 = vsel %vm11630_vm8, %v2114_v30, %v2115_v22  ;;  %16273 = vst [vmem:[#allocation25_spill] sm:$0xff] %v11988_v61 }
  0xc1   : >> { %10338 = vmatprep.mubr.msk.bf16.mxu1 %vm1027_vm4, %v8990_v9  ;;  %v8991_v17 = vcombine.low %v11023_v40, %v11024_v1  ;;  %v2106_v9 = vrot.slane %v11897_v46, 5  ;;  %v11907_v40 = vld [vmem:[%s11284_s25 + $0x90] sm:$0xf]  ;;  %v11955_v14 = vsel %vm11630_vm8, %v2111_v8, %v2112_v55  ;;  %v11971_v55 = vld [vmem:[%s11284_s25 + $0xc4] sm:$0xf]  ;;  %v2130_v8 = vrot.slane %v2128_v63, 4 }
  0xc2   : >> { %16270 = vst [vmem:[#allocation22_spill] sm:$0xff] %v11971_v55  ;;  %v2131_v6 = vrot.slane %v11971_v55, 5  ;;  %v11977_v1 = vld [vmem:[%s11284_s25 + $0xcc] sm:$0xf]  ;;  %v11983_v22 = vld [vmem:[%s11284_s25 + $0xb4] sm:$0xf] }
  0xc3   : >> { %v2108_v24 = vrot.slane %v2106_v9, 4  ;;  %v11944_v19 = vsel %vm11630_vm8, %v2105_v38, %v2106_v9  ;;  %v2134_v38 = vrot.slane %v11958_v37, 5  ;;  %16271 = vst [vmem:[#allocation23_spill] sm:$0xff] %v11977_v1  ;;  %16272 = vst [vmem:[#allocation24_spill] sm:$0xff] %v11983_v22  ;;  %v2140_v9 = vrot.slane %v11988_v61, 5 }
  0xc4   : >> { %10405 = vmatmul.mubr.msk.bf16.gmra.mxu0 %vm1027_vm4, %v9064_v20  ;;  %v11917_v20 = vld [vmem:[%s11284_s25 + $0xb8] sm:$0xf]  ;;  %v16275_v22 = vcombine.low %v11792_v11, %v11803_v53  ;;  %v12023_v53 = vsel %vm11630_vm8, %v2130_v8, %v2131_v6  ;;  %v16281_v8 = vcombine.low %v11901_v34, %v11466_v16  ;;  %v12052_v46 = vld [vmem:[%s11284_s25 + $0xec] sm:$0xf]  ;;  %v12056_v61 = vld [vmem:[%s11284_s25 + $0xf0] sm:$0xf]  ;;  %v16284_v34 = vcombine.low %v11486_v54, %v11491_v59 }
  0xc5   : >> { %10408 = vmatprep.mubr.msk.bf16.mxu0 %vm1027_vm4, %v9065_v49  ;;  %16266 = vst [vmem:[#allocation18_spill] sm:$0xff] %v11917_v20  ;;  %v2122_v0 = vrot.slane %v11917_v20, 5  ;;  %v2125_v49 = vrot.slane %v11927_v35, 5  ;;  %v11951_v58 = vsel %vm11630_vm8, %v2108_v24, %v2109_v29  ;;  %v11968_v29 = vsel %vm11630_vm8, %v2117_v52, %v2118_v27  ;;  %16278 = vst [vmem:[#allocation28_spill] sm:$0xff] %v12023_v53  ;;  %v12071_v37 = vld [vmem:[%s11284_s25 + $0xf4] sm:$0xf] }
  0xc6   : >> { %v2133_v27 = vrot.slane %v2131_v6, 4  ;;  %v2136_v20 = vrot.slane %v2134_v38, 4  ;;  %v2159_v30 = vrot.slane %v12052_v46, 5  ;;  %16283 = vst [vmem:[#allocation32_spill] sm:$0xff] %v12056_v61  ;;  %v2162_v16 = vrot.slane %v12056_v61, 5  ;;  %16286 = vst [vmem:[#allocation34_spill] sm:$0xff] %v12071_v37 }
  0xc7   : >> { %v2127_v24 = vrot.slane %v2125_v49, 4  ;;  %v12001_v52 = vsel %vm11630_vm8, %v9051_v12, %v2122_v0  ;;  %v11039_v12 = vld [vmem:[%s11284_s25 + $0xd4] sm:$0x1]  ;;  %v2165_v55 = vrot.slane %v12071_v37, 5  ;;  %v12081_v59 = vld [vmem:[%s11284_s25 + $0xe8] sm:$0xf] }
  0xc8   : >> { %10339 = vmatmul.mubr.msk.bf16.gmra.mxu1 %vm1027_vm4, %v8991_v17  ;;  %v2124_v17 = vrot.slane %v2122_v0, 4  ;;  %v2142_v0 = vrot.slane %v2140_v9, 4  ;;  %v2161_v53 = vrot.slane %v2159_v30, 4  ;;  %v16315_v37 = vld [vmem:[#allocation15_spill] sm:$0xff]  ;;  %v16316_v61 = vld [vmem:[#allocation16_spill] sm:$0xff] }
  0xc9   : >> { %10342 = vmatprep.mubr.msk.bf16.mxu1 %vm1027_vm4, %v8992_v31  ;;  %v2137_v31 = vrot.slane %v11977_v1, 5  ;;  %v12019_v11 = vsel %vm11630_vm8, %v2127_v24, %v2128_v63  ;;  %v2147_v63 = vrot.slane %v12032_v5, 5  ;;  %v12036_v24 = vld [vmem:[%s11284_s25 + $0xe0] sm:$0xf] }
  0xca   : >> { %v12009_v45 = vsel %vm11630_vm8, %v2124_v17, %v2125_v49  ;;  %16277 = vst [vmem:[#allocation27_spill] sm:$0xff] %v12019_v11  ;;  %v2143_v17 = vrot.slane %v11039_v12, 5  ;;  %v2150_v6 = vrot.slane %v12036_v24, 5  ;;  %v2164_v11 = vrot.slane %v2162_v16, 4 }
  0xcb   : >> { %16276 = vst [vmem:[#allocation26_spill] sm:$0xff] %v12009_v45  ;;  %v2139_v49 = vrot.slane %v2137_v31, 4  ;;  %v2149_v39 = vrot.slane %v2147_v63, 4 }
  0xcc   : >> { %10409 = vmatmul.mubr.msk.bf16.gmra.mxu0 %vm1027_vm4, %v16274_v51  ;;  %v12029_v51 = vsel %vm11630_vm8, %v2133_v27, %v2134_v38  ;;  %v12045_v38 = vsel %vm11630_vm8, %v2136_v20, %v2137_v31  ;;  %v12048_v27 = vld [vmem:[%s11284_s25 + $0xe4] sm:$0xf]  ;;  %v12066_v31 = vld [vmem:[%s11284_s25 + $0xd8] sm:$0xf]  ;;  %v1975_v20 = vld [vmem:[%s11284_s25 + $0xfc] sm:$0xe]  ;;  %v12090_v5 = vsel %vm11630_vm8, %v2142_v0, %v2143_v17 }
  0xcd   : >> { %10412 = vmatprep.mubr.msk.bf16.mxu0 %vm1027_vm4, %v16275_v22  ;;  %v1974_v22 = vld [vmem:[%s11284_s25 + $0xd8] sm:$0xe]  ;;  %16279 = vst [vmem:[#allocation29_spill] sm:$0xff] %v12029_v51  ;;  %16282 = vst [vmem:[#allocation31_spill] sm:$0xff] %v12045_v38  ;;  %v2153_v12 = vrot.slane %v12048_v27, 5  ;;  %v12078_v54 = vsel %vm11630_vm8, %v2139_v49, %v2140_v9  ;;  %v16287_v9 = vcombine.low %v11813_v28, %v11821_v56  ;;  %v9053_v17 = vrot.slane %v1975_v20, 9 }
  0xce   : >> { %16285 = vst [vmem:[#allocation33_spill] sm:$0xff] %v12066_v31  ;;  %v9052_v1 = vrot.slane %v1974_v22, 9  ;;  %v2152_v31 = vrot.slane %v2150_v6, 4  ;;  %v2167_v22 = vrot.slane %v2165_v55, 4  ;;  %v11048_v38 = vld [vmem:[%s11284_s25 + $0xf8] sm:$0x1]  ;;  %v16289_v20 = vcombine.low %v11494_v2, %v11519_v41 }
  0xcf   : >> { %v2155_v49 = vrot.slane %v2153_v12, 4  ;;  %v2168_v0 = vrot.slane %v11048_v38, 5  ;;  %v2175_v51 = vrot.slane %v11511_v25, 5  ;;  %v2178_v38 = vrot.slane %v11532_v62, 5  ;;  %v9253_v56 = vld [vmem:[%s11284_s25 + $0x30] sm:$0xf] }
  0xd0   : >> { %10343 = vmatmul.mubr.msk.bf16.gmra.mxu1 %vm1027_vm4, %v16281_v8  ;;  %v2172_v8 = vrot.slane %v11504_v18, 5  ;;  %v16288_v18 = vcombine.low %v11825_v15, %v11831_v33  ;;  %v12110_v15 = vsel %vm11630_vm8, %v9052_v1, %v2147_v63  ;;  %v12114_v33 = vsel %vm11630_vm8, %v2149_v39, %v2150_v6  ;;  %v9251_v63 = vld [vmem:[%s11284_s25 + $0x28] sm:$0xf]  ;;  %v9256_v28 = vld [vmem:[%s11284_s25 + $0x3c] sm:$0xf] }
  0xd1   : >> { %10346 = vmatprep.mubr.msk.bf16.mxu1 %vm1027_vm4, %v16284_v34  ;;  %v2156_v34 = vrot.slane %v12081_v59, 5  ;;  %v12118_v25 = vsel %vm11630_vm8, %v2152_v31, %v2153_v12  ;;  %v12135_v1 = vsel %vm11630_vm8, %v2161_v53, %v2162_v16  ;;  %v16290_v2 = vcombine.low %v11525_v47, %v11547_v26  ;;  %v12170_v31 = vld [vmem:[%s11284_s25 + $0xfc] sm:$0xf] }
  0xd2   : >> { %v2174_v45 = vrot.slane %v2172_v8, 4  ;;  %v12145_v41 = vsel %vm11630_vm8, %v2164_v11, %v2165_v55  ;;  %v2177_v53 = vrot.slane %v2175_v51, 4  ;;  %v2181_v26 = vrot.slane %v11540_v7, 5  ;;  %v9403_v11 = vld [vmem:[%s16142_s1 + $0xa] sm:$0x3]  ;;  %16292 = vst [vmem:[#allocation36_spill] sm:$0xff] %v12170_v31 }
  0xd3   : >> { %v2158_v35 = vrot.slane %v2156_v34, 4  ;;  %v2184_v6 = vrot.slane %v11561_v44, 5  ;;  %v2187_v55 = vrot.slane %v11572_v57, 5  ;;  %v3513_v12 = vshrl.u32 %v9251_v63, 16  ;;  %v9259_v57 = vld [vmem:[%s11284_s25 + $0x48] sm:$0xf] }
  0xd4   : >> { %10413 = vmatmul.mubr.msk.bf16.gmra.mxu0 %vm1027_vm4, %v16287_v9  ;;  %v12157_v47 = vsel %vm11630_vm8, %v2174_v45, %v2175_v51  ;;  %v12173_v45 = vld [vmem:[%s11284_s25 + $0x100] sm:$0xf]  ;;  %v9534_v51 = vld [vmem:[%s16142_s1 + $0xc] sm:$0x3]  ;;  %v12207_v9 = vand.u32 %v9403_v11, %v11267_v4  ;;  %v16302_v11 = vcombine.low %v11907_v40, %v11867_v23  ;;  %v3559_v40 = vshll.u32 %v9256_v28, 16 }
  0xd5   : >> { %10416 = vmatprep.mubr.msk.bf16.mxu0 %vm1027_vm4, %v16288_v18  ;;  %v12127_v18 = vsel %vm11630_vm8, %v2155_v49, %v2156_v34  ;;  %v12131_v39 = vsel %vm11630_vm8, %v2158_v35, %v2159_v30  ;;  %v12149_v35 = vsel %vm11630_vm8, %v2167_v22, %v2168_v0  ;;  %v12153_v30 = vsel %vm11630_vm8, %v9053_v17, %v2172_v8  ;;  %v9250_v34 = vld [vmem:[%s11284_s25 + $0x24] sm:$0xf]  ;;  %v9252_v0 = vld [vmem:[%s11284_s25 + $0x2c] sm:$0xf] }
  0xd6   : >> { %16291 = vst [vmem:[#allocation35_spill] sm:$0xff] %v12157_v47  ;;  %16293 = vst [vmem:[#allocation37_spill] sm:$0xff] %v12173_v45  ;;  %v2180_v8 = vrot.slane %v2178_v38, 4  ;;  %v16294_v22 = vcombine.low %v11835_v21, %v11844_v13  ;;  %v12187_v17 = vld [vmem:[%s11284_s25 + $0x104] sm:$0xf]  ;;  %v16296_v21 = vcombine.low %v11922_v42, %v11936_v60  ;;  %v12211_v60 = vsel %vm11630_vm8, %v2177_v53, %v2178_v38 }
  0xd7   : >> { %16295 = vst [vmem:[#allocation38_spill] sm:$0xff] %v12187_v17  ;;  %16297 = vst [vmem:[#allocation39_spill] sm:$0xff] %v12207_v9  ;;  %v2186_v42 = vrot.slane %v2184_v6, 4  ;;  %v3500_v13 = vshrl.u32 %v9250_v34, 16  ;;  %10584 = vmatprep.subr.bf16.mxu1 %v12207_v9  ;;  %v12224_v38 = vand.u32 %v9534_v51, %v11267_v4  ;;  %v9255_v53 = vld [vmem:[%s11284_s25 + $0x38] sm:$0xf]  ;;  %v16301_v49 = vcombine.low %v11555_v32, %v11577_v10 }
  0xd8   : >> { %10347 = vmatmul.mubr.msk.bf16.gmra.mxu1 %vm1027_vm4, %v16289_v20  ;;  %16298 = vst [vmem:[#allocation40_spill] sm:$0xff] %v12211_v60  ;;  %v3519_v51 = vshll.u32 %v9252_v0, 16  ;;  %v3523_v20 = vshrl.u32 %v9252_v0, 16  ;;  %v9254_v4 = vld [vmem:[%s11284_s25 + $0x34] sm:$0xf]  ;;  %v3529_v32 = vshll.u32 %v9253_v56, 16  ;;  %v16317_v47 = vcombine.low %v16315_v37, %v16316_v61 }
  0xd9   : >> { %10350 = vmatprep.mubr.msk.bf16.mxu1 %vm1027_vm4, %v16290_v2  ;;  %v2183_v2 = vrot.slane %v2181_v26, 4  ;;  %16300 = vst [vmem:[#allocation42_spill] sm:$0xff] %v12224_v38  ;;  %v3533_v10 = vshrl.u32 %v9253_v56, 16  ;;  %10650 = vmatprep.subr.bf16.mxu0 %v12224_v38  ;;  %v3553_v23 = vshrl.u32 %v9255_v53, 16  ;;  %v3563_v0 = vshrl.u32 %v9256_v28, 16 }
  0xda   : >> { %v16303_v56 = vcombine.low %v11940_v3, %v11944_v19  ;;  %v12261_v28 = vrot.slane %v3529_v32, 5  ;;  %v16305_v19 = vrot.slane %v11592_v36, 5  ;;  %v16307_v32 = vld [vmem:[#allocation13_spill] sm:$0xff]  ;;  %v9262_v17 = vld [vmem:[%s11284_s25 + $0x54] sm:$0xf] }
  0xdb   : >> { %v12233_v16 = vsel %vm11630_vm8, %v2183_v2, %v2184_v6  ;;  %v3549_v2 = vshll.u32 %v9255_v53, 16  ;;  %v3515_v6 = vrot.slane %v3513_v12, 4  ;;  %v3525_v53 = vrot.slane %v3523_v20, 4  ;;  %v16306_v20 = vld [vmem:[#allocation12_spill] sm:$0xff] }
  0xdc   : >> { %10417 = vmatmul.mubr.msk.bf16.gmra.mxu0 %vm1027_vm4, %v16294_v22  ;;  %v12218_v22 = vsel %vm11630_vm8, %v2180_v8, %v2181_v26  ;;  %v3503_v26 = vshll.u32 %v9250_v34, 16  ;;  %v3509_v8 = vshll.u32 %v9251_v63, 16  ;;  %v12246_v63 = vsel %vm11630_vm8, %v2186_v42, %v2187_v55  ;;  %v9263_v37 = vld [vmem:[%s11284_s25 + $0x58] sm:$0xf] }
  0xdd   : >> { %10420 = vmatprep.mubr.msk.bf16.mxu0 %vm1027_vm4, %v16296_v21  ;;  %v12213_v21 = vrot.slane %v2187_v55, 4  ;;  %16299 = vst [vmem:[#allocation41_spill] sm:$0xff] %v12218_v22  ;;  %v3502_v34 = vrot.slane %v3500_v13, 4  ;;  %v3539_v55 = vshll.u32 %v9254_v4, 16  ;;  %v16304_v13 = vcombine.low %v11951_v58, %v11955_v14 }
  0xde   : >> { %v3505_v9 = vrot.slane %v3503_v26, 5  ;;  %v12253_v38 = vrot.slane %v3509_v8, 5  ;;  %v12259_v42 = vrot.slane %v3519_v51, 5  ;;  %v3535_v3 = vrot.slane %v3533_v10, 4 }
  0xdf   : >> { %v2192_v26 = vrot.slane %v16305_v19, 4  ;;  %v3555_v58 = vrot.slane %v3553_v23, 4  ;;  %v12268_v14 = vrot.slane %v3559_v40, 5  ;;  %v3565_v51 = vrot.slane %v3563_v0, 4  ;;  %v16309_v23 = vld [vmem:[#allocation17_spill] sm:$0xff]  ;;  %v16310_v40 = vld [vmem:[#allocation14_spill] sm:$0xff] }
  0xe0   : >> { %10351 = vmatmul.mubr.msk.bf16.gmra.mxu1 %vm1027_vm4, %v16301_v49  ;;  %v3543_v49 = vshrl.u32 %v9254_v4, 16  ;;  %v12266_v4 = vrot.slane %v3549_v2, 5  ;;  %v16308_v44 = vcombine.low %v16306_v20, %v16307_v32  ;;  %v3506_v10 = vor.u32 %v3505_v9, %v3502_v34  ;;  %v9261_v32 = vld [vmem:[%s11284_s25 + $0x50] sm:$0xf] }
  0xe1   : >> { %10354 = vmatprep.mubr.msk.bf16.mxu1 %vm1027_vm4, %v16302_v11  ;;  %v9257_v11 = vld [vmem:[%s11284_s25 + $0x40] sm:$0xf]  ;;  %v12276_v19 = vrot.slane %v3539_v55, 5  ;;  %v16311_v7 = vcombine.low %v16309_v23, %v16310_v40  ;;  %v3526_v0 = vor.u32 %v3525_v53, %v12259_v42  ;;  %v3536_v20 = vor.u32 %v3535_v3, %v12261_v28 }
  0xe2   : >> { %v3545_v8 = vrot.slane %v3543_v49, 4  ;;  %v3573_v12 = vshrl.u32 %v9257_v11, 16  ;;  %v3516_v49 = vor.u32 %v3515_v6, %v12253_v38  ;;  %v3584_v9 = vshrl.u32 %v9259_v57, 16 }
  0xe3   : >> { %v3587_v34 = vshll.u32 %v9259_v57, 16  ;;  %v3566_v22 = vor.u32 %v3565_v51, %v12268_v14  ;;  %v16312_v53 = vcombine.low %v11964_v50, %v11968_v29  ;;  %v3603_v57 = vshll.u32 %v9261_v32, 16 }
  0xe4   : >> { %10421 = vmatmul.mubr.msk.bf16.gmra.mxu0 %vm1027_vm4, %v16303_v56  ;;  %v3569_v56 = vshll.u32 %v9257_v11, 16  ;;  %v12279_v11 = vld [vmem:[%s11284_s25 + $0x44] sm:$0x1]  ;;  %v3546_v6 = vor.u32 %v3545_v8, %v12276_v19  ;;  %v3586_v3 = vrot.slane %v3584_v9, 4  ;;  %v3607_v51 = vshrl.u32 %v9261_v32, 16 }
  0xe5   : >> { %10424 = vmatprep.mubr.msk.bf16.mxu0 %vm1027_vm4, %v16304_v13  ;;  %v9260_v13 = vld [vmem:[%s11284_s25 + $0x4c] sm:$0xf]  ;;  %v3617_v60 = vshrl.u32 %v9262_v17, 16  ;;  %v3507_v45 = vrot.slane %v3506_v10, 4  ;;  %v3517_v31 = vrot.slane %v3516_v49, 4  ;;  %v3527_v50 = vrot.slane %v3526_v0, 4 }
  0xe6   : >> { %v12281_v2 = vrot.slane %v3569_v56, 5  ;;  %v3593_v55 = vshll.u32 %v9260_v13, 16  ;;  %v3597_v62 = vshrl.u32 %v9260_v13, 16  ;;  %v3556_v56 = vor.u32 %v3555_v58, %v12266_v4  ;;  %v16313_v13 = vld [vmem:[#allocation26_spill] sm:$0xff]  ;;  %v16318_v10 = vld [vmem:[#allocation24_spill] sm:$0xff] }
  0xe7   : >> { %v16314_v40 = vcombine.low %v12001_v52, %v16313_v13  ;;  %v3537_v29 = vrot.slane %v3536_v20, 4  ;;  %v12310_v32 = vrot.slane %v3603_v57, 5  ;;  %v16319_v13 = vld [vmem:[#allocation18_spill] sm:$0xff]  ;;  %v16321_v0 = vrot.slane %v11592_v36, 5 }
  0xe8   : >> { %10355 = vmatmul.mubr.msk.bf16.gmra.mxu1 %vm1027_vm4, %v16308_v44  ;;  %v3575_v44 = vrot.slane %v3573_v12, 4  ;;  %v3589_v12 = vrot.slane %v3587_v34, 5  ;;  %v12300_v8 = vrot.slane %v3593_v55, 5  ;;  %v3599_v58 = vrot.slane %v3597_v62, 4 }
  0xe9   : >> { %10358 = vmatprep.mubr.msk.bf16.mxu1 %vm1027_vm4, %v16311_v7  ;;  %v3579_v7 = vshll.u32 %v12279_v11, 16  ;;  %v3557_v9 = vrot.slane %v3556_v56, 4  ;;  %v3567_v34 = vrot.slane %v3566_v22, 4  ;;  %v16320_v49 = vcombine.low %v16318_v10, %v16319_v13 }
  0xea   : >> { %v3576_v23 = vor.u32 %v3575_v44, %v12281_v2  ;;  %v3613_v44 = vshll.u32 %v9262_v17, 16  ;;  %v3590_v62 = vor.u32 %v3589_v12, %v3586_v3  ;;  %v3609_v17 = vrot.slane %v3607_v51, 4  ;;  %v16328_v51 = vld [vmem:[#allocation31_spill] sm:$0xff] }
  0xeb   : >> { %v3581_v55 = vrot.slane %v3579_v7, 5  ;;  %v12321_v22 = vsel %vm11630_vm8, %v12213_v21, %v16321_v0  ;;  %v3600_v61 = vor.u32 %v3599_v58, %v12300_v8  ;;  %v3619_v20 = vrot.slane %v3617_v60, 4 }
  0xec   : >> { %10425 = vmatmul.mubr.msk.bf16.gmra.mxu0 %vm1027_vm4, %v16312_v53  ;;  %v3547_v53 = vrot.slane %v3546_v6, 4  ;;  %v3577_v52 = vrot.slane %v3576_v23, 4  ;;  %v16322_v6 = vrot.slane %v11600_v43, 5  ;;  %v3512_v7 = vsel %vm11297_vm5, %v3507_v45, %v12253_v38  ;;  %v9264_v43 = vld [vmem:[%s11284_s25 + $0x5c] sm:$0xf] }
  0xed   : >> { %10428 = vmatprep.mubr.msk.bf16.mxu0 %vm1027_vm4, %v16314_v40  ;;  %v3522_v21 = vsel %vm11297_vm5, %v3517_v31, %v12259_v42  ;;  %v3532_v60 = vsel %vm11297_vm5, %v3527_v50, %v12261_v28  ;;  %v3562_v31 = vsel %vm11297_vm5, %v3557_v9, %v12268_v14  ;;  %v3572_v38 = vsel %vm11297_vm5, %v3567_v34, %v12281_v2  ;;  %v16324_v42 = vld [vmem:[#allocation27_spill] sm:$0xff]  ;;  %v16325_v28 = vld [vmem:[#allocation28_spill] sm:$0xff]  ;;  %v16327_v14 = vld [vmem:[#allocation29_spill] sm:$0xff] }
  0xee   : >> { %v12331_v56 = vsel %vm11630_vm8, %v2192_v26, %v16322_v6  ;;  %v3542_v26 = vsel %vm11297_vm5, %v3537_v29, %v12276_v19  ;;  %v3552_v45 = vsel %vm11297_vm5, %v3547_v53, %v12266_v4  ;;  %v16326_v12 = vcombine.low %v16324_v42, %v16325_v28  ;;  %v9265_v53 = vld [vmem:[%s11284_s25 + $0x60] sm:$0xf]  ;;  %v16332_v6 = vld [vmem:[#allocation19_spill] sm:$0xff]  ;;  %v16333_v42 = vld [vmem:[#allocation20_spill] sm:$0xff] }
  0xef   : >> { %v3582_v19 = vsel %vm11297_vm5, %v3577_v52, %v3581_v55  ;;  %v12365_v40 = vrot.slane %v3590_v62, 4  ;;  %v3610_v4 = vor.u32 %v3609_v17, %v12310_v32  ;;  %v3623_v58 = vshll.u32 %v9263_v37, 16  ;;  %v16350_v55 = vld [vmem:[#allocation30_spill] sm:$0xff] }
  0xf0   : >> { %10359 = vmatmul.mubr.msk.bf16.gmra.mxu1 %vm1027_vm4, %v16317_v47  ;;  %v12325_v47 = vrot.slane %v3613_v44, 5  ;;  %v16329_v44 = vcombine.low %v16327_v14, %v16328_v51  ;;  %v12374_v50 = vrot.slane %v3600_v61, 4  ;;  %v3627_v9 = vshrl.u32 %v9263_v37, 16  ;;  %v9266_v37 = vld [vmem:[%s11284_s25 + $0x64] sm:$0xf] }
  0xf1   : >> { %10362 = vmatprep.mubr.msk.bf16.mxu1 %vm1027_vm4, %v16320_v49  ;;  %v3633_v34 = vshll.u32 %v9264_v43, 16  ;;  %v12382_v62 = vcombine.low %v3512_v7, %v3522_v21  ;;  %v3637_v17 = vshrl.u32 %v9264_v43, 16  ;;  %v12384_v10 = vcombine.low %v3532_v60, %v3542_v26 }
  0xf2   : >> { %v3620_v29 = vor.u32 %v3619_v20, %v12325_v47  ;;  %v12388_v49 = vcombine.low %v3552_v45, %v3562_v31  ;;  %v12390_v0 = vcombine.low %v3572_v38, %v3582_v19  ;;  %v9268_v20 = vld [vmem:[%s11284_s25 + $0x6c] sm:$0xf]  ;;  %v16334_v28 = vcombine.low %v16332_v6, %v16333_v42  ;;  %v9269_v45 = vld [vmem:[%s11284_s25 + $0x70] sm:$0xf]  ;;  %v16337_v38 = vld [vmem:[#allocation21_spill] sm:$0xff] }
  0xf3   : >> { %v12339_v3 = vpop.f32.mrf.mxu0  ;;  %v3596_v21 = vsel %vm11297_vm5, %v12365_v40, %v12300_v8  ;;  %v3611_v60 = vrot.slane %v3610_v4, 4  ;;  %v3625_v43 = vrot.slane %v3623_v58, 5  ;;  %v3643_v26 = vshll.u32 %v9265_v53, 16  ;;  %v16336_v31 = vld [vmem:[#allocation22_spill] sm:$0xff]  ;;  %v9270_v6 = vld [vmem:[%s11284_s25 + $0x74] sm:$0xf] }
  0xf4   : >> { %10429 = vmatmul.mubr.msk.bf16.gmra.mxu0 %vm1027_vm4, %v16326_v12  ;;  %v16338_v12 = vcombine.low %v16336_v31, %v16337_v38  ;;  %v3606_v19 = vsel %vm11297_vm5, %v12374_v50, %v12310_v32  ;;  %v3621_v14 = vrot.slane %v3620_v29, 4  ;;  %v3629_v51 = vrot.slane %v3627_v9, 4  ;;  %v9271_v42 = vld [vmem:[%s11284_s25 + $0x78] sm:$0xf] }
  0xf5   : >> { %v12361_v57 = vpop.f32.mrf.mxu0  ;;  %10432 = vmatprep.mubr.msk.bf16.mxu0 %vm1027_vm4, %v16329_v44  ;;  %v12372_v2 = vpop.f32.mrf.mxu1  ;;  %v12414_v44 = vrot.slane %v3633_v34, 5  ;;  %v3639_v8 = vrot.slane %v3637_v17, 4  ;;  %v3647_v40 = vshrl.u32 %v9265_v53, 16  ;;  %v3653_v4 = vshll.u32 %v9266_v37, 16 }
  0xf6   : >> { %16330 = vst [vmem:[#allocation12_spill] sm:$0xff] %v12372_v2  ;;  %v3657_v58 = vshrl.u32 %v9266_v37, 16  ;;  %v3668_v31 = vshrl.u32 %v9268_v20, 16  ;;  %v3671_v38 = vshll.u32 %v9268_v20, 16  ;;  %v3681_v61 = vshrl.u32 %v9269_v45, 16 }
  0xf7   : >> { %v12386_v13 = vpop.f32.mrf.mxu1  ;;  %v12399_v7 = vpop.f32.mrf.mxu0  ;;  %v16340_v32 = vcombine.low %v12078_v54, %v12090_v5  ;;  %v3616_v29 = vsel %vm11297_vm5, %v3611_v60, %v12325_v47  ;;  %v12429_v53 = vrot.slane %v3643_v26, 5  ;;  %v3687_v9 = vshll.u32 %v9270_v6, 16  ;;  %v9277_v2 = vld [vmem:[%s11284_s25 + $0x90] sm:$0xf] }
  0xf8   : >> { %16331 = vst [vmem:[#allocation13_spill] sm:$0xff] %v12386_v13  ;;  %10363 = vmatmul.mubr.msk.bf16.gmra.mxu1 %vm1027_vm4, %v16334_v28  ;;  %16335 = vst [vmem:[#allocation17_spill] sm:$0xff] %v12399_v7  ;;  %v3691_v34 = vshrl.u32 %v9270_v6, 16  ;;  %v16342_v17 = vcombine.low %v12110_v15, %v12114_v33  ;;  %v3626_v5 = vsel %vm11297_vm5, %v3621_v14, %v3625_v43  ;;  %v3697_v37 = vshll.u32 %v9271_v42, 16  ;;  %v16345_v14 = vld [vmem:[#allocation23_spill] sm:$0xff] }
  0xf9   : >> { %10366 = vmatprep.mubr.msk.bf16.mxu1 %vm1027_vm4, %v16338_v12  ;;  %v12418_v28 = vpop.f32.mrf.mxu1  ;;  %v3677_v12 = vshll.u32 %v9269_v45, 16  ;;  %v12424_v50 = vpop.f32.mrf.mxu0  ;;  %v3630_v54 = vor.u32 %v3629_v51, %v3625_v43  ;;  %v3701_v20 = vshrl.u32 %v9271_v42, 16  ;;  %v3640_v45 = vor.u32 %v3639_v8, %v12414_v44  ;;  %v16346_v51 = vld [vmem:[#allocation25_spill] sm:$0xff] }
  0xfa   : >> { %16339 = vst [vmem:[#allocation14_spill] sm:$0xff] %v12418_v28  ;;  %16341 = vst [vmem:[#allocation26_spill] sm:$0xff] %v12424_v50  ;;  %v3649_v47 = vrot.slane %v3647_v40, 4  ;;  %v12441_v60 = vrot.slane %v3653_v4, 5  ;;  %v3659_v26 = vrot.slane %v3657_v58, 4  ;;  %v3670_v15 = vrot.slane %v3668_v31, 4 }
  0xfb   : >> { %v12443_v6 = vpop.f32.mrf.mxu1  ;;  %v3673_v33 = vrot.slane %v3671_v38, 5  ;;  %v3683_v43 = vrot.slane %v3681_v61, 4  ;;  %v16347_v42 = vcombine.low %v16345_v14, %v16346_v51  ;;  %v12453_v40 = vrot.slane %v3687_v9, 5  ;;  %v9272_v58 = vld [vmem:[%s11284_s25 + $0x7c] sm:$0xf]  ;;  %v16349_v38 = vld [vmem:[#allocation33_spill] sm:$0xff] }
  0xfc   : >> { %10433 = vmatmul.mubr.msk.bf16.gmra.mxu0 %vm1027_vm4, %v16340_v32  ;;  %v12439_v32 = vld [vmem:[%s11284_s25 + $0x68] sm:$0x1]  ;;  %16344 = vst [vmem:[#allocation16_spill] sm:$0xff] %v12443_v6  ;;  %v3693_v4 = vrot.slane %v3691_v34, 4  ;;  %v12456_v52 = vrot.slane %v3697_v37, 5  ;;  %v3703_v31 = vrot.slane %v3701_v20, 4  ;;  %v12462_v61 = vcombine.low %v3596_v21, %v3606_v19 }
  0xfd   : >> { %10436 = vmatprep.mubr.msk.bf16.mxu0 %vm1027_vm4, %v16342_v17  ;;  %16343 = vst [vmem:[#allocation15_spill] sm:$0xff] %v12439_v32  ;;  %v12445_v17 = vrot.slane %v3677_v12, 5  ;;  %v16351_v12 = vcombine.low %v16349_v38, %v16350_v55  ;;  %v12464_v14 = vcombine.low %v3616_v29, %v3626_v5  ;;  %v12466_v51 = vrot.slane %v3630_v54, 4  ;;  %v9274_v6 = vld [vmem:[%s11284_s25 + $0x84] sm:$0xf] }
  0xfe   : >> { %v3663_v9 = vshll.u32 %v12439_v32, 16  ;;  %v12471_v34 = vrot.slane %v3640_v45, 4  ;;  %v3650_v37 = vor.u32 %v3649_v47, %v12429_v53  ;;  %v3711_v28 = vshrl.u32 %v9272_v58, 16  ;;  %v9275_v55 = vld [vmem:[%s11284_s25 + $0x88] sm:$0xf] }
  0xff   : >> { %v3660_v19 = vor.u32 %v3659_v26, %v12441_v60  ;;  %v3674_v29 = vor.u32 %v3673_v33, %v3670_v15  ;;  %v3684_v5 = vor.u32 %v3683_v43, %v12445_v17  ;;  %v3707_v54 = vshll.u32 %v9272_v58, 16 }
 0x100   : >> { %10367 = vmatmul.mubr.msk.bf16.gmra.mxu1 %vm1027_vm4, %v16347_v42  ;;  %v12451_v8 = vpop.f32.mrf.mxu0  ;;  %v9273_v42 = vld [vmem:[%s11284_s25 + $0x80] sm:$0xf]  ;;  %v16354_v45 = vcombine.low %v12118_v25, %v12127_v18  ;;  %v3694_v47 = vor.u32 %v3693_v4, %v12453_v40  ;;  %v3636_v26 = vsel %vm11297_vm5, %v12466_v51, %v12414_v44  ;;  %v3727_v25 = vshll.u32 %v9274_v6, 16 }
 0x101   : >> { %16348 = vst [vmem:[#allocation24_spill] sm:$0xff] %v12451_v8  ;;  %10370 = vmatprep.mubr.msk.bf16.mxu1 %vm1027_vm4, %v16351_v12  ;;  %v3704_v12 = vor.u32 %v3703_v31, %v12456_v52  ;;  %v3717_v20 = vshll.u32 %v9273_v42, 16  ;;  %v3721_v13 = vshrl.u32 %v9273_v42, 16  ;;  %v3731_v18 = vshrl.u32 %v9274_v6, 16 }
 0x102   : >> { %v12478_v21 = vpop.f32.mrf.mxu0  ;;  %v3737_v15 = vshll.u32 %v9275_v55, 16  ;;  %v3651_v33 = vrot.slane %v3650_v37, 4  ;;  %v3665_v43 = vrot.slane %v3663_v9, 5  ;;  %v3713_v4 = vrot.slane %v3711_v28, 4  ;;  %v9278_v37 = vld [vmem:[%s11284_s25 + $0x94] sm:$0xf] }
 0x103   : >> { %v12476_v38 = vpop.f32.mrf.mxu1  ;;  %16353 = vst [vmem:[#allocation27_spill] sm:$0xff] %v12478_v21  ;;  %v3741_v58 = vshrl.u32 %v9275_v55, 16  ;;  %v16358_v44 = vcombine.low %v12036_v24, %v12048_v27  ;;  %v3695_v6 = vrot.slane %v3694_v47, 4  ;;  %v3705_v51 = vrot.slane %v3704_v12, 4  ;;  %v9291_v21 = vld [vmem:[%s11284_s25 + $0xc8] sm:$0xf] }
 0x104   : >> { %16352 = vst [vmem:[#allocation18_spill] sm:$0xff] %v12476_v38  ;;  %10437 = vmatmul.mubr.msk.bf16.gmra.mxu0 %vm1027_vm4, %v16354_v45  ;;  %v16355_v38 = vcombine.low %v12131_v39, %v12135_v1  ;;  %v12498_v42 = vpop.f32.mrf.mxu0  ;;  %v3661_v39 = vrot.slane %v3660_v19, 4  ;;  %v3675_v1 = vrot.slane %v3674_v29, 4  ;;  %v3709_v45 = vrot.slane %v3707_v54, 5 }
 0x105   : >> { %v12496_v31 = vpop.f32.mrf.mxu1  ;;  %16357 = vst [vmem:[#allocation29_spill] sm:$0xff] %v12498_v42  ;;  %v12505_v9 = vrot.slane %v3717_v20, 5  ;;  %v3723_v28 = vrot.slane %v3721_v13, 4  ;;  %v16359_v55 = vcombine.low %v12081_v59, %v12052_v46  ;;  %v12512_v19 = vrot.slane %v3727_v25, 5  ;;  %v9276_v13 = vld [vmem:[%s11284_s25 + $0x8c] sm:$0x1] }
 0x106   : >> { %10440 = vmatprep.mubr.msk.bf16.mxu0 %vm1027_vm4, %v16355_v38  ;;  %16356 = vst [vmem:[#allocation28_spill] sm:$0xff] %v12496_v31  ;;  %v3685_v38 = vrot.slane %v3684_v5, 4  ;;  %v3733_v29 = vrot.slane %v3731_v18, 4  ;;  %v12514_v5 = vrot.slane %v3737_v15, 5  ;;  %v3743_v24 = vrot.slane %v3741_v58, 4  ;;  %v12523_v46 = vpop.f32.mrf.mxu0 }
 0x107   : >> { %v3646_v27 = vsel %vm11297_vm5, %v12471_v34, %v12429_v53  ;;  %v3714_v20 = vor.u32 %v3713_v4, %v3709_v45  ;;  %v3752_v54 = vshrl.u32 %v9277_v2, 16  ;;  %v3755_v47 = vshll.u32 %v9277_v2, 16  ;;  %v12521_v12 = vpop.f32.mrf.mxu1  ;;  %16361 = vst [vmem:[#allocation19_spill] sm:$0xff] %v12523_v46  ;;  %v9279_v18 = vld [vmem:[%s11284_s25 + $0x98] sm:$0xf] }
 0x108   : >> { %10371 = vmatmul.mubr.msk.bf16.gmra.mxu1 %vm1027_vm4, %v16358_v44  ;;  %16360 = vst [vmem:[#allocation31_spill] sm:$0xff] %v12521_v12  ;;  %v3656_v59 = vsel %vm11297_vm5, %v3651_v33, %v12441_v60  ;;  %v3666_v25 = vsel %vm11297_vm5, %v3661_v39, %v3665_v43  ;;  %v3761_v15 = vshll.u32 %v9278_v37, 16  ;;  %v3765_v58 = vshrl.u32 %v9278_v37, 16  ;;  %v16363_v43 = vld [vmem:[#allocation35_spill] sm:$0xff]  ;;  %v9280_v44 = vld [vmem:[%s11284_s25 + $0x9c] sm:$0xf] }
 0x109   : >> { %10374 = vmatprep.mubr.msk.bf16.mxu1 %vm1027_vm4, %v16359_v55  ;;  %v16362_v53 = vcombine.low %v12145_v41, %v12149_v35  ;;  %v3680_v2 = vsel %vm11297_vm5, %v3675_v1, %v12445_v17  ;;  %v3690_v60 = vsel %vm11297_vm5, %v3685_v38, %v12453_v40  ;;  %v3700_v34 = vsel %vm11297_vm5, %v3695_v6, %v12456_v52  ;;  %v12556_v6 = vpop.f32.mrf.mxu1  ;;  %v16367_v55 = vld [vmem:[#allocation32_spill] sm:$0xff] }
 0x10a   : >> { %v3724_v33 = vor.u32 %v3723_v28, %v12505_v9  ;;  %v16364_v4 = vcombine.low %v12153_v30, %v16363_v43  ;;  %v3710_v41 = vsel %vm11297_vm5, %v3705_v51, %v3709_v45  ;;  %v3734_v35 = vor.u32 %v3733_v29, %v12512_v19  ;;  %16365 = vst [vmem:[#allocation20_spill] sm:$0xff] %v12556_v6  ;;  %v16368_v29 = vld [vmem:[#allocation34_spill] sm:$0xff]  ;;  %v16382_v12 = vld [vmem:[#allocation8_spill] sm:$0xff] }
 0x10b   : >> { %v3744_v17 = vor.u32 %v3743_v24, %v12514_v5  ;;  %v3747_v39 = vshll.u32 %v9276_v13, 16  ;;  %v12553_v40 = vrot.slane %v3714_v20, 4  ;;  %v3754_v1 = vrot.slane %v3752_v54, 4  ;;  %v16381_v6 = vld [vmem:[#allocation38_spill] sm:$0xff] }
 0x10c   : >> { %10441 = vmatmul.mubr.msk.bf16.gmra.mxu0 %vm1027_vm4, %v16362_v53  ;;  %v3757_v52 = vrot.slane %v3755_v47, 5  ;;  %v3771_v38 = vshll.u32 %v9279_v18, 16  ;;  %v12560_v28 = vcombine.low %v3636_v26, %v3646_v27  ;;  %v12562_v45 = vrot.slane %v3761_v15, 5  ;;  %v9281_v26 = vld [vmem:[%s11284_s25 + $0xa0] sm:$0xf]  ;;  %v16370_v53 = vld [vmem:[#allocation36_spill] sm:$0xff] }
 0x10d   : >> { %10444 = vmatprep.mubr.msk.bf16.mxu0 %vm1027_vm4, %v16364_v4  ;;  %v3767_v51 = vrot.slane %v3765_v58, 4  ;;  %v3775_v37 = vshrl.u32 %v9279_v18, 16  ;;  %v16369_v24 = vcombine.low %v16367_v55, %v16368_v29  ;;  %v12568_v20 = vcombine.low %v3656_v59, %v3666_v25  ;;  %v9282_v27 = vld [vmem:[%s11284_s25 + $0xa4] sm:$0xf] }
 0x10e   : >> { %v12570_v13 = vcombine.low %v3680_v2, %v3690_v60  ;;  %v12572_v54 = vcombine.low %v3700_v34, %v3710_v41  ;;  %v12574_v47 = vrot.slane %v3724_v33, 4  ;;  %v16371_v15 = vld [vmem:[#allocation37_spill] sm:$0xff]  ;;  %v12582_v18 = vrot.slane %v3734_v35, 4  ;;  %v9283_v2 = vld [vmem:[%s11284_s25 + $0xa8] sm:$0xf] }
 0x10f   : >> { %v12558_v30 = vpop.f32.mrf.mxu0  ;;  %v16372_v43 = vcombine.low %v16370_v53, %v16371_v15  ;;  %v12584_v58 = vrot.slane %v3744_v17, 4  ;;  %v12586_v59 = vrot.slane %v3747_v39, 5  ;;  %v3781_v25 = vshll.u32 %v9280_v44, 16  ;;  %v16375_v53 = vld [vmem:[#allocation40_spill] sm:$0xff]  ;;  %v16376_v15 = vld [vmem:[#allocation41_spill] sm:$0xff] }
 0x110   : >> { %16366 = vst [vmem:[#allocation22_spill] sm:$0xff] %v12558_v30  ;;  %10375 = vmatmul.mubr.msk.bf16.gmra.mxu1 %vm1027_vm4, %v16369_v24  ;;  %v3758_v33 = vor.u32 %v3757_v52, %v3754_v1  ;;  %v12595_v4 = vrot.slane %v3771_v38, 5  ;;  %v3785_v41 = vshrl.u32 %v9280_v44, 16  ;;  %v3768_v35 = vor.u32 %v3767_v51, %v12562_v45  ;;  %v9284_v24 = vld [vmem:[%s11284_s25 + $0xac] sm:$0xf] }
 0x111   : >> { %10378 = vmatprep.mubr.msk.bf16.mxu1 %vm1027_vm4, %v16372_v43  ;;  %v12589_v60 = vpop.f32.mrf.mxu0  ;;  %v3777_v17 = vrot.slane %v3775_v37, 4  ;;  %v3791_v39 = vshll.u32 %v9281_v26, 16  ;;  %v3795_v29 = vshrl.u32 %v9281_v26, 16  ;;  %v16377_v43 = vcombine.low %v16375_v53, %v16376_v15 }
 0x112   : >> { %16373 = vst [vmem:[#allocation21_spill] sm:$0xff] %v12589_v60  ;;  %v3801_v34 = vshll.u32 %v9282_v27, 16  ;;  %v3805_v1 = vshrl.u32 %v9282_v27, 16  ;;  %v3811_v52 = vshll.u32 %v9283_v2, 16  ;;  %v3815_v38 = vshrl.u32 %v9283_v2, 16  ;;  %v16385_v60 = vld [vmem:[#allocation10_spill] sm:$0xff] }
 0x113   : >> { %v12597_v55 = vpop.f32.mrf.mxu1  ;;  %v16378_v44 = vcombine.low %v12233_v16, %v12246_v63  ;;  %v12621_v27 = vrot.slane %v3781_v25, 5  ;;  %v9286_v16 = vld [vmem:[%s11284_s25 + $0xb4] sm:$0xf]  ;;  %v12624_v63 = vpop.f32.mrf.mxu0  ;;  %v12626_v2 = vrot.slane %v3758_v33, 4  ;;  %v3787_v53 = vrot.slane %v3785_v41, 4 }
 0x114   : >> { %16374 = vst [vmem:[#allocation23_spill] sm:$0xff] %v12597_v55  ;;  %10445 = vmatmul.mubr.msk.bf16.gmra.mxu0 %vm1027_vm4, %v16377_v43  ;;  %16379 = vst [vmem:[#allocation25_spill] sm:$0xff] %v12624_v63  ;;  %v3821_v15 = vshll.u32 %v9284_v24, 16  ;;  %v3825_v43 = vshrl.u32 %v9284_v24, 16  ;;  %v12631_v37 = vrot.slane %v3768_v35, 4  ;;  %v3778_v55 = vor.u32 %v3777_v17, %v12595_v4  ;;  %v16384_v35 = vld [vmem:[#allocation9_spill] sm:$0xff] }
 0x115   : >> { %10448 = vmatprep.mubr.msk.bf16.mxu0 %vm1027_vm4, %v16378_v44  ;;  %v9287_v44 = vld [vmem:[%s11284_s25 + $0xb8] sm:$0xf]  ;;  %v12629_v51 = vpop.f32.mrf.mxu1  ;;  %v12634_v26 = vrot.slane %v3791_v39, 5  ;;  %v3797_v25 = vrot.slane %v3795_v29, 4  ;;  %v16383_v31 = vcombine.low %v16381_v6, %v16382_v12  ;;  %v12640_v33 = vrot.slane %v3801_v34, 5  ;;  %v10933_v34 = vld [vmem:[%s11284_s25 + $0x24] sm:$0xff]  }
 0x116   : >> { %16380 = vst [vmem:[#allocation33_spill] sm:$0xff] %v12629_v51  ;;  %v3807_v41 = vrot.slane %v3805_v1, 4  ;;  %v12642_v24 = vrot.slane %v3811_v52, 5  ;;  %v3817_v63 = vrot.slane %v3815_v38, 4  ;;  %v9288_v51 = vld [vmem:[%s11284_s25 + $0xbc] sm:$0xf]  ;;  %v16386_v30 = vcombine.low %v16384_v35, %v16385_v60 }
 0x117   : >> { %v3836_v17 = vshrl.u32 %v9286_v16, 16  ;;  %v3839_v39 = vshll.u32 %v9286_v16, 16  ;;  %v3845_v29 = vshll.u32 %v9287_v44, 16  ;;  %v3849_v12 = vshrl.u32 %v9287_v44, 16  ;;  %v9289_v6 = vld [vmem:[%s11284_s25 + $0xc0] sm:$0xf]  ;;  %v12659_v38 = vpop.f32.mrf.mxu1 }
 0x118   : >> { %10379 = vmatmul.mubr.msk.bf16.gmra.mxu1 %vm1027_vm4, %v16383_v31  ;;  %v12650_v31 = vpop.f32.mrf.mxu0  ;;  %v3788_v1 = vor.u32 %v3787_v53, %v12621_v27  ;;  %v12657_v52 = vrot.slane %v3821_v15, 5  ;;  %v3827_v60 = vrot.slane %v3825_v43, 4  ;;  %16388 = vst [vmem:[#allocation35_spill] sm:$0xff] %v12659_v38  ;;  %v3798_v16 = vor.u32 %v3797_v25, %v12634_v26  ;;  %v9285_v44 = vld [vmem:[%s11284_s25 + $0xb0] sm:$0x1] }
 0x119   : >> { %10382 = vmatprep.mubr.msk.bf16.mxu1 %vm1027_vm4, %v16386_v30  ;;  %16387 = vst [vmem:[#allocation30_spill] sm:$0xff] %v12650_v31  ;;  %v12661_v30 = vrot.slane %v3778_v55, 4  ;;  %v3855_v35 = vshll.u32 %v9288_v51, 16  ;;  %v3859_v31 = vshrl.u32 %v9288_v51, 16  ;;  %v16389_v46 = vcombine.low %v12321_v22, %v12331_v56  ;;  %v12683_v50 = vpop.f32.mrf.mxu1 }
 0x11a   : >> { %v3808_v53 = vor.u32 %v3807_v41, %v12640_v33  ;;  %v3818_v15 = vor.u32 %v3817_v63, %v12642_v24  ;;  %v3865_v43 = vshll.u32 %v9289_v6, 16  ;;  %v3869_v55 = vshrl.u32 %v9289_v6, 16  ;;  %v9290_v63 = vld [vmem:[%s11284_s25 + $0xc4] sm:$0xf]  ;;  %16391 = vst [vmem:[#allocation34_spill] sm:$0xff] %v12683_v50 }
 0x11b   : >> { %v3838_v25 = vrot.slane %v3836_v17, 4  ;;  %v3841_v38 = vrot.slane %v3839_v39, 5  ;;  %v12674_v42 = vrot.slane %v3845_v29, 5  ;;  %v3851_v51 = vrot.slane %v3849_v12, 4  ;;  %v16392_v39 = vld [vmem:[#allocation11_spill] sm:$0xff] }
 0x11c   : >> { %10449 = vmatmul.mubr.msk.bf16.gmra.mxu0 %vm1027_vm4, %v16389_v46  ;;  %v3828_v56 = vor.u32 %v3827_v60, %v12657_v52  ;;  %v3831_v46 = vshll.u32 %v9285_v44, 16  ;;  %v12680_v8 = vrot.slane %v3855_v35, 5  ;;  %v3861_v41 = vrot.slane %v3859_v31, 4 }
 0x11d   : >> { %10520 = vmatprep.mubr.msk.bf16.mxu0 %vm1027_vm4, %v12382_v62  ;;  %v3789_v6 = vrot.slane %v3788_v1, 4  ;;  %v12685_v32 = vrot.slane %v3865_v43, 5  ;;  %v3871_v62 = vrot.slane %v3869_v55, 4  ;;  %v3879_v17 = vshrl.u32 %v9290_v63, 16 }
 0x11e   : >> { %v12677_v22 = vpop.f32.mrf.mxu0  ;;  %v16393_v29 = vcombine.low %v16392_v39, %v11592_v36  ;;  %v3799_v12 = vrot.slane %v3798_v16, 4  ;;  %v3885_v60 = vshll.u32 %v9291_v21, 16  ;;  %v3889_v44 = vshrl.u32 %v9291_v21, 16 }
 0x11f   : >> { %16390 = vst [vmem:[#allocation32_spill] sm:$0xff] %v12677_v22  ;;  %v3809_v22 = vrot.slane %v3808_v53, 4  ;;  %v3819_v31 = vrot.slane %v3818_v15, 4  ;;  %v3842_v35 = vor.u32 %v3841_v38, %v3838_v25  ;;  %v3852_v1 = vor.u32 %v3851_v51, %v12674_v42  ;;  %v9292_v25 = vld [vmem:[%s11284_s25 + $0xcc] sm:$0xf] }
 0x120   : >> { %10383 = vmatmul.mubr.msk.bf16.gmra.mxu1 %vm1027_vm4, %v16393_v29  ;;  %v3875_v43 = vshll.u32 %v9290_v63, 16  ;;  %v12693_v55 = vpop.f32.mrf.mxu0  ;;  %v3774_v36 = vsel %vm11297_vm5, %v12631_v37, %v12595_v4  ;;  %v3829_v16 = vrot.slane %v3828_v56, 4  ;;  %v3833_v53 = vrot.slane %v3831_v46, 5  ;;  %v10934_v37 = vld [vmem:[%s11284_s25 + $0x2c] sm:$0xff]   ;;  %v10935_v46 = vld [vmem:[%s11284_s25 + $0x34] sm:$0xff]  }
 0x121   : >> { %10454 = vmatprep.mubr.msk.bf16.mxu1 %vm1027_vm4, %v10933_v34  ;;  %16394 = vst [vmem:[#allocation36_spill] sm:$0xff] %v12693_v55  ;;  %v3862_v21 = vor.u32 %v3861_v41, %v12680_v8  ;;  %v3784_v34 = vsel %vm11297_vm5, %v12661_v30, %v12621_v27  ;;  %v3794_v38 = vsel %vm11297_vm5, %v3789_v6, %v12634_v26  ;;  %v3881_v4 = vrot.slane %v3879_v17, 4  ;;  %v16396_v56 = vld [vmem:[#allocation42_spill] sm:$0xff]  ;;  %v9293_v17 = vld [vmem:[%s11284_s25 + $0xd0] sm:$0xf] }
 0x122   : >> { %v12700_v39 = vpop.f32.mrf.mxu1  ;;  %v3872_v15 = vor.u32 %v3871_v62, %v12685_v32  ;;  %v3804_v51 = vsel %vm11297_vm5, %v3799_v12, %v12640_v33  ;;  %v3814_v27 = vsel %vm11297_vm5, %v3809_v22, %v12642_v24  ;;  %v12720_v30 = vrot.slane %v3885_v60, 5  ;;  %v12735_v24 = vpop.f32.mrf.mxu0 }
 0x123   : >> { %16395 = vst [vmem:[#allocation37_spill] sm:$0xff] %v12700_v39  ;;  %v3891_v26 = vrot.slane %v3889_v44, 4  ;;  %v12729_v41 = vrot.slane %v3842_v35, 4  ;;  %v12731_v33 = vrot.slane %v3852_v1, 4  ;;  %v12733_v63 = vrot.slane %v3875_v43, 5  ;;  %16397 = vst [vmem:[#allocation40_spill] sm:$0xff] %v12735_v24 }
 0x124   : >> { %10521 = vmatmul.mubr.msk.bf16.vlgmr.msra.gmra.mxu0 %vm1027_vm4, %v12384_v10  ;;  %v3824_v10 = vsel %vm11297_vm5, %v3819_v31, %v12657_v52  ;;  %v3834_v22 = vsel %vm11297_vm5, %v3829_v16, %v3833_v53  ;;  %v12739_v6 = vrot.slane %v3862_v21, 4  ;;  %v3895_v62 = vshll.u32 %v9292_v25, 16  ;;  %v12742_v29 = vpop.f32.mrf.mxu1  ;;  %v16404_v1 = vld [vmem:[#allocation39_spill] sm:$0xff]  ;;  %v9296_v16 = vld [vmem:[%s11284_s25 + $0xdc] sm:$0xf] }
 0x125   : >> { %10651 = vmatpush3.bf16.msra.mxu0 %v16396_v56  ;;  %10524 = vmatprep.mubr.msk.bf16.mxu0 %vm1027_vm4, %v12388_v49  ;;  %v3899_v49 = vshrl.u32 %v9292_v25, 16  ;;  %16398 = vst [vmem:[#allocation41_spill] sm:$0xff] %v12742_v29  ;;  %v16399_v52 = vsel %vm11297_vm5, %v12574_v47, %v12512_v19  ;;  %v16400_v12 = vsel %vm11297_vm5, %v12553_v40, %v12505_v9  ;;  %v12768_v19 = vrot.slane %v3872_v15, 4  ;;  %v9297_v53 = vld [vmem:[%s11284_s25 + $0xe0] sm:$0xf] }
 0x126   : >> { %v12754_v60 = vcombine.low %v16400_v12, %v16399_v52  ;;  %v16401_v44 = vsel %vm11297_vm5, %v12584_v58, %v12586_v59  ;;  %v16402_v31 = vsel %vm11297_vm5, %v12582_v18, %v12514_v5  ;;  %v3882_v9 = vor.u32 %v3881_v4, %v12733_v63  ;;  %v9295_v59 = vld [vmem:[%s11284_s25 + $0xd8] sm:$0xf]  ;;  %v10936_v21 = vld [vmem:[%s11284_s25 + $0x3c] sm:$0xff]   ;;  %v9300_v12 = vld [vmem:[%s11284_s25 + $0xec] sm:$0xf] }
 0x127   : >> { %v12766_v35 = vcombine.low %v16402_v31, %v16401_v44  ;;  %v16403_v40 = vsel %vm11297_vm5, %v12626_v2, %v12562_v45  ;;  %v12779_v58 = vcombine.low %v3784_v34, %v3794_v38  ;;  %v12781_v5 = vcombine.low %v3804_v51, %v3814_v27  ;;  %v12800_v34 = vpop.f32.mrf.mxu0  ;;  %v10937_v51 = vld [vmem:[%s11284_s25 + $0x48] sm:$0xff]   ;;  %v12810_v27 = vpop.f32.mrf.mxu1 }
 0x128   : >> { %10455 = vmatmul.mubr.msk.bf16.vlgmr.msra.gmra.mxu1 %vm1027_vm4, %v10934_v37  ;;  %v12777_v47 = vcombine.low %v16403_v40, %v3774_v36  ;;  %v3892_v18 = vor.u32 %v3891_v26, %v12720_v30  ;;  %v12787_v43 = vcombine.low %v3824_v10, %v3834_v22  ;;  %v3905_v36 = vshll.u32 %v9293_v17, 16  ;;  %16405 = vst [vmem:[#allocation38_spill] sm:$0xff] %v12800_v34  ;;  %v9298_v37 = vld [vmem:[%s11284_s25 + $0xe4] sm:$0xf] }
 0x129   : >> { %10585 = vmatpush3.bf16.msra.mxu1 %v16404_v1  ;;  %10458 = vmatprep.mubr.msk.bf16.mxu1 %vm1027_vm4, %v10935_v46  ;;  %v12806_v15 = vrot.slane %v3895_v62, 5  ;;  %v3901_v25 = vrot.slane %v3899_v49, 4  ;;  %v3909_v4 = vshrl.u32 %v9293_v17, 16  ;;  %16406 = vst [vmem:[#allocation8_spill] sm:$0xff] %v12810_v27  ;;  %v12816_v56 = vrot.slane %v3882_v9, 4 }
 0x12a   : >> { %v9294_v46 = vld [vmem:[%s11284_s25 + $0xd4] sm:$0x1]  ;;  %v3920_v10 = vshrl.u32 %v9295_v59, 16  ;;  %v3923_v22 = vshll.u32 %v9295_v59, 16  ;;  %v12821_v62 = vrot.slane %v3892_v18, 4  ;;  %v3929_v49 = vshll.u32 %v9296_v16, 16 }
 0x12b   : >> { %v3933_v17 = vshrl.u32 %v9296_v16, 16  ;;  %v3939_v52 = vshll.u32 %v9297_v53, 16  ;;  %v12826_v44 = vrot.slane %v3905_v36, 5  ;;  %v3943_v31 = vshrl.u32 %v9297_v53, 16  ;;  %v9299_v9 = vld [vmem:[%s11284_s25 + $0xe8] sm:$0xf]  ;;  %v12832_v16 = vpop.f32.mrf.mxu1 }
 0x12c   : >> { %10525 = vmatmul.mubr.msk.bf16.gmra.mxu0 %vm1027_vm4, %v12390_v0  ;;  %v3949_v40 = vshll.u32 %v9298_v37, 16  ;;  %v3953_v1 = vshrl.u32 %v9298_v37, 16  ;;  %v3902_v0 = vor.u32 %v3901_v25, %v12806_v15  ;;  %v3911_v18 = vrot.slane %v3909_v4, 4  ;;  %16408 = vst [vmem:[#allocation10_spill] sm:$0xff] %v12832_v16  ;;  %v9301_v27 = vld [vmem:[%s11284_s25 + $0xf0] sm:$0xf] }
 0x12d   : >> { %10528 = vmatprep.mubr.msk.bf16.mxu0 %vm1027_vm4, %v12462_v61  ;;  %v3915_v38 = vshll.u32 %v9294_v46, 16  ;;  %v3963_v26 = vshrl.u32 %v9299_v9, 16  ;;  %v3922_v45 = vrot.slane %v3920_v10, 4  ;;  %v3925_v2 = vrot.slane %v3923_v22, 5  ;;  %v9302_v22 = vld [vmem:[%s11284_s25 + $0xf4] sm:$0xf] }
 0x12e   : >> { %v12829_v59 = vpop.f32.mrf.mxu0  ;;  %v3969_v61 = vshll.u32 %v9300_v12, 16  ;;  %v3973_v36 = vshrl.u32 %v9300_v12, 16  ;;  %v12836_v53 = vrot.slane %v3929_v49, 5  ;;  %v3935_v37 = vrot.slane %v3933_v17, 4 }
 0x12f   : >> { %16407 = vst [vmem:[#allocation9_spill] sm:$0xff] %v12829_v59  ;;  %v12838_v29 = vrot.slane %v3939_v52, 5  ;;  %v3959_v39 = vshll.u32 %v9299_v9, 16  ;;  %v3945_v25 = vrot.slane %v3943_v31, 4  ;;  %v12841_v4 = vrot.slane %v3949_v40, 5  ;;  %v10938_v40 = vld [vmem:[%s11284_s25 + $0x50] sm:$0xff]  }
 0x130   : >> { %10459 = vmatmul.mubr.msk.bf16.gmra.mxu1 %vm1027_vm4, %v10936_v21  ;;  %v3955_v46 = vrot.slane %v3953_v1, 4  ;;  %v3965_v10 = vrot.slane %v3963_v26, 4  ;;  %v12844_v16 = vpop.f32.mrf.mxu0  ;;  %v12846_v12 = vrot.slane %v3969_v61, 5  ;;  %v3975_v21 = vrot.slane %v3973_v36, 4  ;;  %v9303_v59 = vld [vmem:[%s11284_s25 + $0xf8] sm:$0x1] }
 0x131   : >> { %10462 = vmatprep.mubr.msk.bf16.mxu1 %vm1027_vm4, %v10937_v51  ;;  %16409 = vst [vmem:[#allocation11_spill] sm:$0xff] %v12844_v16  ;;  %v3979_v49 = vshll.u32 %v9301_v27, 16  ;;  %v3983_v17 = vshrl.u32 %v9301_v27, 16  ;;  %v3912_v31 = vor.u32 %v3911_v18, %v12826_v44  ;;  %v12859_v9 = vrot.slane %v3915_v38, 5  ;;  %v9304_v51 = vld [vmem:[%s11284_s25 + $0xfc] sm:$0xf] }
 0x132   : >> { %v12864_v27 = vrot.slane %v3902_v0, 4  ;;  %v3926_v1 = vor.u32 %v3925_v2, %v3922_v45  ;;  %v12866_v61 = vrot.slane %v3959_v39, 5  ;;  %v3989_v36 = vshll.u32 %v9302_v22, 16  ;;  %v12878_v39 = vpop.f32.mrf.mxu0 }
 0x133   : >> { %v12848_v52 = vpop.f32.mrf.mxu1  ;;  %v3936_v18 = vor.u32 %v3935_v37, %v12836_v53  ;;  %v3946_v38 = vor.u32 %v3945_v25, %v12838_v29  ;;  %v3956_v26 = vor.u32 %v3955_v46, %v12841_v4  ;;  %v3993_v50 = vshrl.u32 %v9302_v22, 16  ;;  %16412 = vst [vmem:[#allocation43_spill] sm:$0xff] %v12878_v39  ;;  %v12893_v39 = vld [vmem:[%s11284_s25 + $0x104] sm:$0xf] }
 0x134   : >> { %16410 = vst [vmem:[#allocation42_spill] sm:$0xff] %v12848_v52  ;;  %10529 = vmatmul.mubr.msk.bf16.gmra.mxu0 %vm1027_vm4, %v12464_v14  ;;  %v10939_v52 = vld [vmem:[%s11284_s25 + $0x58] sm:$0xff]   ;;  %v9305_v14 = vld [vmem:[%s11284_s25 + $0x100] sm:$0xf]  ;;  %v3966_v45 = vor.u32 %v3965_v10, %v12866_v61  ;;  %v3976_v2 = vor.u32 %v3975_v21, %v12846_v12  ;;  %v12882_v16 = vrot.slane %v3979_v49, 5  ;;  %v12885_v37 = vrot.slane %v3989_v36, 5 }
 0x135   : >> { %10532 = vmatprep.mubr.msk.bf16.mxu0 %vm1027_vm4, %v12560_v28  ;;  %v12876_v0 = vpop.f32.mrf.mxu1  ;;  %v3985_v28 = vrot.slane %v3983_v17, 4  ;;  %v3995_v25 = vrot.slane %v3993_v50, 4  ;;  %v4004_v34 = vshrl.u32 %v9304_v51, 16  ;;  %v4007_v46 = vshll.u32 %v9304_v51, 16 }
 0x136   : >> { %16411 = vst [vmem:[#allocation39_spill] sm:$0xff] %v12876_v0  ;;  %v3908_v22 = vsel %vm11297_vm5, %v12864_v27, %v12826_v44  ;;  %v3913_v0 = vrot.slane %v3912_v31, 4  ;;  %v3927_v10 = vrot.slane %v3926_v1, 4  ;;  %v4013_v21 = vshll.u32 %v9305_v14, 16 }
 0x137   : >> { %v3937_v49 = vrot.slane %v3936_v18, 4  ;;  %v3947_v17 = vrot.slane %v3946_v38, 4  ;;  %v3957_v50 = vrot.slane %v3956_v26, 4  ;;  %v4017_v36 = vshrl.u32 %v9305_v14, 16  ;;  %v12896_v51 = vpop.f32.mrf.mxu1  ;;  %v10940_v18 = vld [vmem:[%s11284_s25 + $0x60] sm:$0xff]  }
 0x138   : >> { %10463 = vmatmul.mubr.msk.bf16.gmra.mxu1 %vm1027_vm4, %v10938_v40  ;;  %16413 = vst [vmem:[#allocation44_spill] sm:$0xff] %v12896_v51  ;;  %v12898_v40 = vpop.f32.mrf.mxu0  ;;  %v3967_v24 = vrot.slane %v3966_v45, 4  ;;  %v3977_v44 = vrot.slane %v3976_v2, 4  ;;  %v3986_v31 = vor.u32 %v3985_v28, %v12882_v16  ;;  %v3999_v27 = vshll.u32 %v9303_v59, 16  ;;  %v12913_v59 = vld [vmem:[%s11284_s25 + $0x108] sm:$0xf] }
 0x139   : >> { %10466 = vmatprep.mubr.msk.bf16.mxu1 %vm1027_vm4, %v10939_v52  ;;  %v3996_v1 = vor.u32 %v3995_v25, %v12885_v37  ;;  %v4006_v55 = vrot.slane %v4004_v34, 4  ;;  %v4009_v7 = vrot.slane %v4007_v46, 5  ;;  %v4023_v52 = vshll.u32 %v12893_v39, 16  ;;  %v10941_v34 = vld [vmem:[%s11284_s25 + $0x6c] sm:$0xff]   ;;  %v12930_v28 = vpop.f32.mrf.mxu1 }
 0x13a   : >> { %v3918_v26 = vsel %vm11297_vm5, %v3913_v0, %v12859_v9  ;;  %v12909_v38 = vrot.slane %v4013_v21, 5  ;;  %v4019_v14 = vrot.slane %v4017_v36, 4  ;;  %v4027_v45 = vshrl.u32 %v12893_v39, 16  ;;  %16414 = vst [vmem:[#allocation45_spill] sm:$0xff] %v12930_v28  ;;  %v12949_v21 = vld [vmem:[%s11284_s25 + $0x10c] sm:$0xf] }
 0x13b   : >> { %v3942_v9 = vsel %vm11297_vm5, %v3937_v49, %v12838_v29  ;;  %v3952_v0 = vsel %vm11297_vm5, %v3947_v17, %v12841_v4  ;;  %v3962_v2 = vsel %vm11297_vm5, %v3957_v50, %v12866_v61  ;;  %v3982_v29 = vsel %vm11297_vm5, %v3977_v44, %v12882_v16  ;;  %v13117_v51 = vld [vmem:[%s11284_s25 + $0x130] sm:$0xf] }
 0x13c   : >> { %10533 = vmatmul.mubr.msk.bf16.gmra.mxu0 %vm1027_vm4, %v12568_v20  ;;  %v3932_v20 = vsel %vm11297_vm5, %v3927_v10, %v12836_v53  ;;  %v12940_v53 = vrot.slane %v3986_v31, 4  ;;  %v12942_v46 = vrot.slane %v3999_v27, 5  ;;  %v12944_v4 = vrot.slane %v3996_v1, 4 }
 0x13d   : >> { %10536 = vmatprep.mubr.msk.bf16.mxu0 %vm1027_vm4, %v12570_v13  ;;  %v3972_v13 = vsel %vm11297_vm5, %v3967_v24, %v12846_v12  ;;  %v4010_v10 = vor.u32 %v4009_v7, %v4006_v55  ;;  %v12946_v61 = vrot.slane %v4023_v52, 5  ;;  %v4033_v49 = vshll.u32 %v12913_v59, 16 }
 0x13e   : >> { %v12932_v25 = vpop.f32.mrf.mxu0  ;;  %v4020_v24 = vor.u32 %v4019_v14, %v12909_v38  ;;  %v4029_v16 = vrot.slane %v4027_v45, 4  ;;  %v4037_v12 = vshrl.u32 %v12913_v59, 16  ;;  %v4047_v17 = vshrl.u32 %v12949_v21, 16  ;;  %v10942_v14 = vld [vmem:[%s11284_s25 + $0x74] sm:$0xff]  }
 0x13f   : >> { %v16415_v55 = vsel %vm11297_vm5, %v12731_v33, %v12680_v8  ;;  %v16416_v50 = vsel %vm11297_vm5, %v12729_v41, %v12674_v42  ;;  %v16417_v44 = vsel %vm11297_vm5, %v12768_v19, %v12733_v63  ;;  %v16418_v31 = vsel %vm11297_vm5, %v12739_v6, %v12685_v32 }
 0x140   : >> { %10467 = vmatmul.mubr.msk.bf16.gmra.mxu1 %vm1027_vm4, %v10940_v18  ;;  %v12957_v7 = vpop.f32.mrf.mxu0  ;;  %v12969_v36 = vcombine.low %v16416_v50, %v16415_v55  ;;  %v12981_v8 = vcombine.low %v16418_v31, %v16417_v44  ;;  %v16419_v42 = vsel %vm11297_vm5, %v12821_v62, %v12806_v15  ;;  %v16420_v41 = vsel %vm11297_vm5, %v12816_v56, %v12720_v30  ;;  %v13007_v62 = vld [vmem:[%s11284_s25 + $0x110] sm:$0xf]  ;;  %v13010_v30 = vld [vmem:[%s11284_s25 + $0x114] sm:$0xf]  ;;  %v13023_v18 = vld [vmem:[%s11284_s25 + $0x118] sm:$0xf] }
 0x141   : >> { %10470 = vmatprep.mubr.msk.bf16.mxu1 %vm1027_vm4, %v10941_v34  ;;  %v12993_v33 = vcombine.low %v16420_v41, %v16419_v42  ;;  %v12995_v63 = vcombine.low %v3908_v22, %v3918_v26  ;;  %v12999_v32 = vcombine.low %v3932_v20, %v3942_v9  ;;  %v13001_v6 = vcombine.low %v3952_v0, %v3962_v2  ;;  %v9313_v26 = vld [vmem:[%s11284_s25 + $0x120] sm:$0xf]  ;;  %v13031_v9 = vld [vmem:[%s11284_s25 + $0x124] sm:$0xf] }
 0x142   : >> { %v12997_v19 = vpop.f32.mrf.mxu1  ;;  %v13003_v27 = vcombine.low %v3972_v13, %v3982_v29  ;;  %v4043_v15 = vshll.u32 %v12949_v21, 16  ;;  %v3992_v56 = vsel %vm11297_vm5, %v12940_v53, %v12885_v37  ;;  %v4002_v22 = vsel %vm11297_vm5, %v12944_v4, %v12942_v46  ;;  %16422 = vst [vmem:[#allocation47_spill] sm:$0xff] %v13023_v18  ;;  %16423 = vst [vmem:[#allocation48_spill] sm:$0xff] %v13031_v9  ;;  %v10943_v0 = vld [vmem:[%s11284_s25 + $0x7c] sm:$0xff]   ;;  %v13038_v13 = vpop.f32.mrf.mxu0 }
 0x143   : >> { %16421 = vst [vmem:[#allocation46_spill] sm:$0xff] %v12997_v19  ;;  %v4011_v1 = vrot.slane %v4010_v10, 4  ;;  %v13020_v52 = vrot.slane %v4033_v49, 5  ;;  %v4021_v45 = vrot.slane %v4020_v24, 4  ;;  %v4030_v34 = vor.u32 %v4029_v16, %v12946_v61 }
 0x144   : >> { %10537 = vmatmul.mubr.msk.bf16.gmra.mxu0 %vm1027_vm4, %v12572_v54  ;;  %v4039_v20 = vrot.slane %v4037_v12, 4  ;;  %v4049_v37 = vrot.slane %v4047_v17, 4  ;;  %v13036_v2 = vpop.f32.mrf.mxu1  ;;  %v4053_v29 = vshll.u32 %v13007_v62, 16  ;;  %v4057_v53 = vshrl.u32 %v13007_v62, 16  ;;  %v13067_v41 = vpop.f32.mrf.mxu0 }
 0x145   : >> { %10540 = vmatprep.mubr.msk.bf16.mxu0 %vm1027_vm4, %v12754_v60  ;;  %16424 = vst [vmem:[#allocation49_spill] sm:$0xff] %v13036_v2  ;;  %v4063_v54 = vshll.u32 %v13010_v30, 16  ;;  %v4067_v46 = vshrl.u32 %v13010_v30, 16  ;;  %v13044_v4 = vrot.slane %v4043_v15, 5  ;;  %v4073_v10 = vshll.u32 %v13023_v18, 16  ;;  %16427 = vst [vmem:[#allocation52_spill] sm:$0xff] %v13067_v41 }
 0x146   : >> { %v4077_v49 = vshrl.u32 %v13023_v18, 16  ;;  %v4088_v60 = vshrl.u32 %v9313_v26, 16  ;;  %v4016_v24 = vsel %vm11297_vm5, %v4011_v1, %v12909_v38  ;;  %v4091_v16 = vshll.u32 %v9313_v26, 16  ;;  %v13062_v38 = vld [vmem:[%s11284_s25 + $0x128] sm:$0xf]  ;;  %v13065_v42 = vpop.f32.mrf.mxu1 }
 0x147   : >> { %v4097_v12 = vshll.u32 %v13031_v9, 16  ;;  %v4101_v17 = vshrl.u32 %v13031_v9, 16  ;;  %v4026_v55 = vsel %vm11297_vm5, %v4021_v45, %v12946_v61  ;;  %v13057_v50 = vrot.slane %v4030_v34, 4  ;;  %16425 = vst [vmem:[#allocation50_spill] sm:$0xff] %v13062_v38  ;;  %16426 = vst [vmem:[#allocation51_spill] sm:$0xff] %v13065_v42 }
 0x148   : >> { %10471 = vmatmul.mubr.msk.bf16.gmra.mxu1 %vm1027_vm4, %v10942_v14  ;;  %v4040_v44 = vor.u32 %v4039_v20, %v13020_v52  ;;  %v4050_v31 = vor.u32 %v4049_v37, %v13044_v4  ;;  %v13069_v15 = vrot.slane %v4053_v29, 5  ;;  %v4059_v1 = vrot.slane %v4057_v53, 4  ;;  %v13074_v14 = vld [vmem:[%s11284_s25 + $0x12c] sm:$0xf]  ;;  %v13077_v45 = vld [vmem:[%s11284_s25 + $0x11c] sm:$0x1] }
 0x149   : >> { %10474 = vmatprep.mubr.msk.bf16.mxu1 %vm1027_vm4, %v10943_v0  ;;  %v13071_v26 = vrot.slane %v4063_v54, 5  ;;  %v4069_v61 = vrot.slane %v4067_v46, 4  ;;  %16428 = vst [vmem:[#allocation53_spill] sm:$0xff] %v13074_v14  ;;  %16429 = vst [vmem:[#allocation54_spill] sm:$0xff] %v13077_v45  ;;  %v13079_v34 = vrot.slane %v4073_v10, 5  ;;  %v4079_v20 = vrot.slane %v4077_v49, 4 }
 0x14a   : >> { %v4090_v37 = vrot.slane %v4088_v60, 4  ;;  %v4093_v0 = vrot.slane %v4091_v16, 5  ;;  %v13081_v42 = vrot.slane %v4097_v12, 5  ;;  %v4103_v2 = vrot.slane %v4101_v17, 4  ;;  %v10944_v54 = vld [vmem:[%s11284_s25 + $0x84] sm:$0xff]   ;;  %v13094_v60 = vpop.f32.mrf.mxu1  ;;  %v10945_v16 = vld [vmem:[%s11284_s25 + $0x90] sm:$0xff]  }
 0x14b   : >> { %v4107_v29 = vshll.u32 %v13062_v38, 16  ;;  %v4111_v53 = vshrl.u32 %v13062_v38, 16  ;;  %v13088_v46 = vcombine.low %v3992_v56, %v4002_v22  ;;  %v13090_v19 = vcombine.low %v4016_v24, %v4026_v55  ;;  %16430 = vst [vmem:[#allocation55_spill] sm:$0xff] %v13094_v60  ;;  %v13109_v17 = vld [vmem:[%s11284_s25 + $0x134] sm:$0xf] }
 0x14c   : >> { %10541 = vmatmul.mubr.msk.bf16.gmra.mxu0 %vm1027_vm4, %v12766_v35  ;;  %v4117_v10 = vshll.u32 %v13074_v14, 16  ;;  %v4121_v49 = vshrl.u32 %v13074_v14, 16  ;;  %v4060_v56 = vor.u32 %v4059_v1, %v13069_v15  ;;  %v4070_v22 = vor.u32 %v4069_v61, %v13071_v26  ;;  %16432 = vst [vmem:[#allocation57_spill] sm:$0xff] %v13109_v17  ;;  %v13120_v14 = vld [vmem:[%s11284_s25 + $0x138] sm:$0xf] }
 0x14d   : >> { %10544 = vmatprep.mubr.msk.bf16.mxu0 %vm1027_vm4, %v12777_v47  ;;  %v13099_v12 = vpop.f32.mrf.mxu0  ;;  %v4083_v24 = vshll.u32 %v13077_v45, 16  ;;  %v13111_v55 = vrot.slane %v4040_v44, 4  ;;  %v13113_v60 = vrot.slane %v4050_v31, 4  ;;  %v4080_v47 = vor.u32 %v4079_v20, %v13079_v34  ;;  %16433 = vst [vmem:[#allocation58_spill] sm:$0xff] %v13120_v14 }
 0x14e   : >> { %16431 = vst [vmem:[#allocation56_spill] sm:$0xff] %v13099_v12  ;;  %v4094_v28 = vor.u32 %v4093_v0, %v4090_v37  ;;  %v4104_v1 = vor.u32 %v4103_v2, %v13081_v42  ;;  %v13123_v35 = vrot.slane %v4107_v29, 5  ;;  %v4113_v61 = vrot.slane %v4111_v53, 4  ;;  %v13134_v0 = vld [vmem:[%s11284_s25 + $0x13c] sm:$0xf] }
 0x14f   : >> { %v4131_v12 = vshrl.u32 %v13117_v51, 16  ;;  %v13127_v44 = vpop.f32.mrf.mxu0  ;;  %v13129_v31 = vrot.slane %v4117_v10, 5  ;;  %v4123_v38 = vrot.slane %v4121_v49, 4  ;;  %v4137_v20 = vshll.u32 %v13109_v17, 16  ;;  %16435 = vst [vmem:[#allocation60_spill] sm:$0xff] %v13134_v0 }
 0x150   : >> { %10475 = vmatmul.mubr.msk.bf16.gmra.mxu1 %vm1027_vm4, %v10944_v54  ;;  %16434 = vst [vmem:[#allocation59_spill] sm:$0xff] %v13127_v44  ;;  %v4141_v37 = vshrl.u32 %v13109_v17, 16  ;;  %v4061_v29 = vrot.slane %v4060_v56, 4  ;;  %v4071_v53 = vrot.slane %v4070_v22, 4  ;;  %v4085_v45 = vrot.slane %v4083_v24, 5  ;;  %v10946_v56 = vld [vmem:[%s11284_s25 + $0x98] sm:$0xff]  }
 0x151   : >> { %10478 = vmatprep.mubr.msk.bf16.mxu1 %vm1027_vm4, %v10945_v16  ;;  %v13137_v2 = vpop.f32.mrf.mxu1  ;;  %v4147_v54 = vshll.u32 %v13120_v14, 16  ;;  %v4081_v44 = vrot.slane %v4080_v47, 4  ;;  %v4095_v10 = vrot.slane %v4094_v28, 4  ;;  %v4127_v49 = vshll.u32 %v13117_v51, 16  ;;  %v13150_v24 = vpop.f32.mrf.mxu0 }
 0x152   : >> { %16436 = vst [vmem:[#allocation61_spill] sm:$0xff] %v13137_v2  ;;  %v4151_v41 = vshrl.u32 %v13120_v14, 16  ;;  %v4105_v17 = vrot.slane %v4104_v1, 4  ;;  %v4114_v9 = vor.u32 %v4113_v61, %v13123_v35  ;;  %v4157_v18 = vshll.u32 %v13134_v0, 16  ;;  %v10947_v61 = vld [vmem:[%s11284_s25 + $0xa0] sm:$0xff]  }
 0x153   : >> { %v4161_v16 = vshrl.u32 %v13134_v0, 16  ;;  %v13148_v22 = vpop.f32.mrf.mxu1  ;;  %v4124_v28 = vor.u32 %v4123_v38, %v13129_v31  ;;  %v4133_v47 = vrot.slane %v4131_v12, 4  ;;  %v13153_v2 = vrot.slane %v4137_v20, 5  ;;  %v13169_v12 = vld [vmem:[%s11284_s25 + $0x140] sm:$0x1] }
 0x154   : >> { %10545 = vmatmul.mubr.msk.bf16.gmra.mxu0 %vm1027_vm4, %v12779_v58  ;;  %16437 = vst [vmem:[#allocation62_spill] sm:$0xff] %v13148_v22  ;;  %v4143_v1 = vrot.slane %v4141_v37, 4  ;;  %v4046_v0 = vsel %vm11297_vm5, %v13111_v55, %v13044_v4  ;;  %v4056_v58 = vsel %vm11297_vm5, %v13113_v60, %v13069_v15  ;;  %v13166_v22 = vrot.slane %v4147_v54, 5  ;;  %16438 = vst [vmem:[#allocation63_spill] sm:$0xff] %v13169_v12  ;;  %v9671_v4 = vld [vmem:[%s16142_s1 + $0xe] sm:$0x3] }
 0x155   : >> { %10548 = vmatprep.mubr.msk.bf16.mxu0 %vm1027_vm4, %v12781_v5  ;;  %v4153_v38 = vrot.slane %v4151_v41, 4  ;;  %v4066_v20 = vsel %vm11297_vm5, %v4061_v29, %v13071_v26  ;;  %v4129_v5 = vrot.slane %v4127_v49, 5  ;;  %v13174_v37 = vrot.slane %v4157_v18, 5  ;;  %v9752_v60 = vld [vmem:[%s16142_s1 + $0x10] sm:$0x3] }
 0x156   : >> { %v4163_v14 = vrot.slane %v4161_v16, 4  ;;  %v4076_v15 = vsel %vm11297_vm5, %v4071_v53, %v13079_v34  ;;  %v4086_v41 = vsel %vm11297_vm5, %v4081_v44, %v4085_v45  ;;  %v4100_v26 = vsel %vm11297_vm5, %v4095_v10, %v13081_v42  ;;  %v13194_v34 = vpop.f32.mrf.mxu1  ;;  %v13196_v45 = vpop.f32.mrf.mxu0  ;;  %v11052_v53 = vld [vmem:[%s11284_s25 + $0x28] sm:$0xf] }
 0x157   : >> { %v4110_v18 = vsel %vm11297_vm5, %v4105_v17, %v13123_v35  ;;  %16439 = vst [vmem:[#allocation64_spill] sm:$0xff] %v13194_v34  ;;  %v4115_v55 = vrot.slane %v4114_v9, 4  ;;  %v4125_v44 = vrot.slane %v4124_v28, 4  ;;  %v4134_v42 = vor.u32 %v4133_v47, %v4129_v5  ;;  %v16440_v10 = vld [vmem:[#allocation6_spill] sm:$0xff]  ;;  %v11054_v47 = vld [vmem:[%s11284_s25 + $0x30] sm:$0xf] }
 0x158   : >> { %10479 = vmatmul.mubr.msk.bf16.gmra.mxu1 %vm1027_vm4, %v10946_v56  ;;  %v4144_v29 = vor.u32 %v4143_v1, %v13153_v2  ;;  %v4154_v35 = vor.u32 %v4153_v38, %v13166_v22  ;;  %v4167_v17 = vshll.u32 %v13169_v12, 16  ;;  %v4803_v54 = vrot.slane %v11052_v53, 5  ;;  %v9387_v56 = vld [vmem:[%s11284_s25 + $0x24] sm:$0xe]  ;;  %v11053_v9 = vld [vmem:[%s11284_s25 + $0x2c] sm:$0xf] }
 0x159   : >> { %10482 = vmatprep.mubr.msk.bf16.mxu1 %vm1027_vm4, %v10947_v61  ;;  %v13204_v49 = vand.u32 %v9671_v4, %v16440_v10  ;;  %v4164_v16 = vor.u32 %v4163_v14, %v13174_v37  ;;  %v4806_v28 = vrot.slane %v11053_v9, 5  ;;  %v4809_v34 = vrot.slane %v11054_v47, 5  ;;  %v13227_v9 = vpop.f32.mrf.mxu1 }
 0x15a   : >> { %v13211_v1 = vand.u32 %v9752_v60, %v16440_v10  ;;  %v16443_v61 = vsel %vm11297_vm5, %v13057_v50, %v13020_v52  ;;  %v13220_v4 = vcombine.low %v4056_v58, %v4066_v20  ;;  %v13222_v53 = vcombine.low %v4076_v15, %v4086_v41  ;;  %16444 = vst [vmem:[#allocation66_spill] sm:$0xff] %v13227_v9  ;;  %v10948_v60 = vld [vmem:[%s11284_s25 + $0xa8] sm:$0xff]   ;;  %v10949_v20 = vld [vmem:[%s11284_s25 + $0xb4] sm:$0xff]  }
 0x15b   : >> { %16441 = vst [vmem:[#allocation6_spill] sm:$0xff] %v13204_v49  ;;  %v13218_v38 = vcombine.low %v16443_v61, %v4046_v0  ;;  %v13224_v14 = vcombine.low %v4100_v26, %v4110_v18  ;;  %10716 = vmatprep.subr.bf16.mxu1 %v13204_v49  ;;  %v4120_v52 = vsel %vm11297_vm5, %v4115_v55, %v13129_v31  ;;  %v4135_v0 = vrot.slane %v4134_v42, 4  ;;  %v11060_v49 = vld [vmem:[%s11284_s25 + $0x50] sm:$0xf] }
 0x15c   : >> { %16442 = vst [vmem:[#allocation65_spill] sm:$0xff] %v13211_v1  ;;  %v13229_v47 = vpop.f32.mrf.mxu0  ;;  %10549 = vmatmul.mubr.msk.bf16.gmra.mxu0 %vm1027_vm4, %v12787_v43  ;;  %v4130_v50 = vsel %vm11297_vm5, %v4125_v44, %v4129_v5  ;;  %v4145_v58 = vrot.slane %v4144_v29, 4  ;;  %10782 = vmatprep.subr.bf16.mxu0 %v13211_v1  ;;  %v13243_v43 = vrot.slane %v4154_v35, 4  ;;  %v13245_v15 = vrot.slane %v4167_v17, 5  ;;  %v11055_v44 = vld [vmem:[%s11284_s25 + $0x34] sm:$0xf] }
 0x15d   : >> { %16445 = vst [vmem:[#allocation67_spill] sm:$0xff] %v13229_v47  ;;  %10552 = vmatprep.mubr.msk.bf16.mxu0 %vm1027_vm4, %v12969_v36  ;;  %v9395_v41 = vrot.slane %v9387_v56, 9  ;;  %v4805_v31 = vrot.slane %v4803_v54, 4  ;;  %v4165_v5 = vrot.slane %v4164_v16, 4  ;;  %v4808_v18 = vrot.slane %v4806_v28, 4 }
 0x15e   : >> { %v13247_v26 = vpop.f32.mrf.mxu0  ;;  %v4811_v55 = vrot.slane %v4809_v34, 4  ;;  %v4812_v42 = vrot.slane %v11055_v44, 5  ;;  %v13250_v29 = vcombine.low %v4120_v52, %v4130_v50  ;;  %v11056_v36 = vld [vmem:[%s11284_s25 + $0x38] sm:$0xf]  ;;  %v11057_v35 = vld [vmem:[%s11284_s25 + $0x3c] sm:$0xf]  ;;  %v4140_v44 = vsel %vm11297_vm5, %v4135_v0, %v13153_v2 }
 0x15f   : >> { %16446 = vst [vmem:[#allocation68_spill] sm:$0xff] %v13247_v26  ;;  %v4815_v10 = vrot.slane %v11056_v36, 5  ;;  %v4818_v61 = vrot.slane %v11057_v35, 5  ;;  %v11058_v17 = vld [vmem:[%s11284_s25 + $0x40] sm:$0xf]  ;;  %v4150_v52 = vsel %vm11297_vm5, %v4145_v58, %v13166_v22  ;;  %v4831_v12 = vrot.slane %v11060_v49, 5 }
 0x160   : >> { %v4821_v56 = vrot.slane %v11058_v17, 5  ;;  %v13255_v9 = vpop.f32.mrf.mxu1  ;;  %10483 = vmatmul.mubr.msk.bf16.gmra.mxu1 %vm1027_vm4, %v10948_v60  ;;  %v13258_v16 = vpop.f32.mrf.mxu0  ;;  %v9388_v50 = vld [vmem:[%s11284_s25 + $0x48] sm:$0xe]  ;;  %v11059_v36 = vld [vmem:[%s11284_s25 + $0x4c] sm:$0xf]  ;;  %v4160_v60 = vsel %vm11297_vm5, %v13243_v43, %v13174_v37  ;;  %v13276_v17 = vsel %vm11630_vm8, %v9395_v41, %v4803_v54  ;;  %v13280_v2 = vsel %vm11630_vm8, %v4805_v31, %v4806_v28 }
 0x161   : >> { %16447 = vst [vmem:[#allocation69_spill] sm:$0xff] %v13255_v9  ;;  %16448 = vst [vmem:[#allocation70_spill] sm:$0xff] %v13258_v16  ;;  %v4828_v35 = vrot.slane %v11059_v36, 5  ;;  %10486 = vmatprep.mubr.msk.bf16.mxu1 %vm1027_vm4, %v10949_v20  ;;  %v11061_v22 = vld [vmem:[%s11284_s25 + $0x54] sm:$0xf]  ;;  %v4170_v37 = vsel %vm11297_vm5, %v4165_v5, %v13245_v15  ;;  %v13292_v54 = vsel %vm11630_vm8, %v4808_v18, %v4809_v34  ;;  %v4814_v20 = vrot.slane %v4812_v42, 4 }
 0x162   : >> { %16449 = vst [vmem:[#allocation71_spill] sm:$0xff] %v13280_v2  ;;  %v4834_v0 = vrot.slane %v11061_v22, 5  ;;  %v13283_v58 = vpop.f32.mrf.mxu1  ;;  %v13285_v49 = vpop.f32.mrf.mxu0  ;;  %16452 = vst [vmem:[#allocation74_spill] sm:$0xff] %v13292_v54  ;;  %v13296_v28 = vsel %vm11630_vm8, %v4811_v55, %v4812_v42  ;;  %v4817_v43 = vrot.slane %v4815_v10, 4  ;;  %v4820_v41 = vrot.slane %v4818_v61, 4  ;;  %v10950_v5 = vld [vmem:[%s11284_s25 + $0xbc] sm:$0xff]  }
 0x163   : >> { %16450 = vst [vmem:[#allocation72_spill] sm:$0xff] %v13283_v58  ;;  %16451 = vst [vmem:[#allocation73_spill] sm:$0xff] %v13285_v49  ;;  %v4823_v31 = vrot.slane %v4821_v56, 4  ;;  %v9396_v36 = vrot.slane %v9388_v50, 9  ;;  %v13303_v34 = vcombine.low %v4140_v44, %v4150_v52  ;;  %v4830_v18 = vrot.slane %v4828_v35, 4  ;;  %v10951_v9 = vld [vmem:[%s11284_s25 + $0xc4] sm:$0xff]  }
 0x164   : >> { %16453 = vst [vmem:[#allocation75_spill] sm:$0xff] %v13296_v28  ;;  %v13298_v22 = vpop.f32.mrf.mxu1  ;;  %v10390_v15 = vpop.f32.mrf.mxu0  ;;  %10553 = vmatmul.mubr.msk.bf16.gmra.mxu0 %vm1027_vm4, %v12981_v8  ;;  %v4833_v55 = vrot.slane %v4831_v12, 4  ;;  %v11062_v58 = vld [vmem:[%s11284_s25 + $0x5c] sm:$0xf]  ;;  %v4836_v23 = vrot.slane %v4834_v0, 4  ;;  %v13314_v44 = vcombine.low %v4160_v60, %v4170_v37  ;;  %v16456_v60 = vrot.slane %v12279_v11, 5 }
 0x165   : >> { %16454 = vst [vmem:[#allocation76_spill] sm:$0xff] %v13298_v22  ;;  %v4840_v42 = vrot.slane %v11062_v58, 5  ;;  %10556 = vmatprep.mubr.msk.bf16.mxu0 %vm1027_vm4, %v12993_v33  ;;  %v11063_v50 = vld [vmem:[%s11284_s25 + $0x58] sm:$0xf]  ;;  %v11064_v22 = vld [vmem:[%s11284_s25 + $0x60] sm:$0xf]  ;;  %v13322_v33 = vsel %vm11630_vm8, %v4814_v20, %v4815_v10 }
 0x166   : >> { %v4837_v49 = vrot.slane %v11063_v50, 5  ;;  %v4843_v1 = vrot.slane %v11064_v22, 5  ;;  %v11065_v16 = vld [vmem:[%s11284_s25 + $0x64] sm:$0xf]  ;;  %v13312_v47 = vpop.f32.mrf.mxu1  ;;  %v2426_v8 = vpop.f32.mrf.mxu0  ;;  %v13326_v22 = vsel %vm11630_vm8, %v4817_v43, %v4818_v61  ;;  %v13336_v37 = vsel %vm11630_vm8, %v4823_v31, %v16456_v60  ;;  %v11067_v58 = vld [vmem:[%s11284_s25 + $0x74] sm:$0xf] }
 0x167   : >> { %v4846_v26 = vrot.slane %v11065_v16, 5  ;;  %16455 = vst [vmem:[#allocation77_spill] sm:$0xff] %v13312_v47  ;;  %v13330_v16 = vsel %vm11630_vm8, %v4820_v41, %v4821_v56  ;;  %16457 = vst [vmem:[#allocation78_spill] sm:$0xff] %v13336_v37  ;;  %v13340_v50 = vsel %vm11630_vm8, %v9396_v36, %v4828_v35  ;;  %v13345_v56 = vsel %vm11630_vm8, %v4830_v18, %v4831_v12  ;;  %v9389_v41 = vld [vmem:[%s11284_s25 + $0x6c] sm:$0xe] }
 0x168   : >> { %16458 = vst [vmem:[#allocation79_spill] sm:$0xff] %v13340_v50  ;;  %v10324_v10 = vpop.f32.mrf.mxu1  ;;  %10487 = vmatmul.mubr.msk.bf16.gmra.mxu1 %vm1027_vm4, %v10950_v5  ;;  %v10391_v61 = vpop.f32.mrf.mxu0  ;;  %16459 = vst [vmem:[#allocation80_spill] sm:$0xff] %v13345_v56  ;;  %v13349_v11 = vsel %vm11630_vm8, %v4833_v55, %v4834_v0  ;;  %v4839_v20 = vrot.slane %v4837_v49, 4  ;;  %v4842_v43 = vrot.slane %v4840_v42, 4  ;;  %v13356_v31 = vsel %vm11630_vm8, %v4836_v23, %v4837_v49  ;;  %v11066_v55 = vld [vmem:[%s11284_s25 + $0x70] sm:$0xf] }
 0x169   : >> { %16460 = vst [vmem:[#allocation81_spill] sm:$0xff] %v13349_v11  ;;  %v1722_v35 = vadd.f32 %v10324_v10, %v12339_v3  ;;  %10490 = vmatprep.mubr.msk.bf16.mxu1 %vm1027_vm4, %v10951_v9  ;;  %16461 = vst [vmem:[#allocation82_spill] sm:$0xff] %v13356_v31  ;;  %v4845_v36 = vrot.slane %v4843_v1, 4  ;;  %v4848_v5 = vrot.slane %v4846_v26, 4  ;;  %v4853_v60 = vrot.slane %v11066_v55, 5  ;;  %v10952_v2 = vld [vmem:[%s11284_s25 + $0xcc] sm:$0xff]  }
 0x16a   : >> { %v1713_v12 = vpop.f32.mrf.mxu1  ;;  %v2429_v18 = vpop.f32.mrf.mxu0  ;;  %v4856_v52 = vrot.slane %v11067_v58, 5  ;;  %v11068_v47 = vld [vmem:[%s11284_s25 + $0x78] sm:$0xf]  ;;  %v9397_v10 = vrot.slane %v9389_v41, 9  ;;  %v11072_v0 = vld [vmem:[%s11284_s25 + $0x88] sm:$0xf] }
 0x16b   : >> { %v4859_v3 = vrot.slane %v11068_v47, 5  ;;  %v13363_v9 = vadd.f32 %v10390_v15, %v1722_v35  ;;  %v1714_v23 = vadd.f32 %v1713_v12, %v12361_v57  ;;  %v13377_v57 = vsel %vm11630_vm8, %v4839_v20, %v4840_v42  ;;  %v16466_v35 = vld [vmem:[#allocation17_spill] sm:$0xff]  ;;  %v16468_v47 = vld [vmem:[#allocation15_spill] sm:$0xff] }
 0x16c   : >> { %v10325_v28 = vpop.f32.mrf.mxu1  ;;  %v10394_v54 = vpop.f32.mrf.mxu0  ;;  %10557 = vmatmul.mubr.msk.bf16.gmra.mxu0 %vm1027_vm4, %v12995_v63  ;;  %16463 = vst [vmem:[#allocation84_spill] sm:$0xff] %v13377_v57  ;;  %v13381_v15 = vsel %vm11630_vm8, %v4842_v43, %v4843_v1  ;;  %v10953_v63 = vld [vmem:[%s11284_s25 + $0xd8] sm:$0xff]   ;;  %v13391_v55 = vsel %vm11630_vm8, %v4845_v36, %v4846_v26  ;;  %v16469_v58 = vrot.slane %v16468_v47, 5  ;;  %v4855_v20 = vrot.slane %v4853_v60, 4  ;;  %v16472_v26 = vld [vmem:[#allocation26_spill] sm:$0xff]  ;;  %v10954_v57 = vld [vmem:[%s11284_s25 + $0xe0] sm:$0xff]  }
 0x16d   : >> { %16462 = vst [vmem:[#allocation83_spill] sm:$0xff] %v13363_v9  ;;  %16464 = vst [vmem:[#allocation85_spill] sm:$0xff] %v13381_v15  ;;  %v13383_v41 = vadd.f32 %v2426_v8, %v1714_v23  ;;  %v1725_v12 = vadd.f32 %v10325_v28, %v16466_v35  ;;  %10560 = vmatprep.mubr.msk.bf16.mxu0 %vm1027_vm4, %v12999_v32  ;;  %v4858_v28 = vrot.slane %v4856_v52, 4  ;;  %v4861_v43 = vrot.slane %v4859_v3, 4  ;;  %v11069_v23 = vld [vmem:[%s11284_s25 + $0x7c] sm:$0xf] }
 0x16e   : >> { %16467 = vst [vmem:[#allocation17_spill] sm:$0xff] %v13391_v55  ;;  %v13397_v42 = vsel %vm11630_vm8, %v4848_v5, %v16469_v58  ;;  %v1716_v1 = vpop.f32.mrf.mxu1  ;;  %v2442_v8 = vpop.f32.mrf.mxu0  ;;  %v4862_v32 = vrot.slane %v11069_v23, 5  ;;  %v13407_v5 = vsel %vm11630_vm8, %v9397_v10, %v4853_v60  ;;  %v4871_v47 = vrot.slane %v11072_v0, 5  ;;  %v9390_v10 = vld [vmem:[%s11284_s25 + $0x90] sm:$0xe] }
 0x16f   : >> { %16465 = vst [vmem:[#allocation86_spill] sm:$0xff] %v13383_v41  ;;  %16470 = vst [vmem:[#allocation15_spill] sm:$0xff] %v13397_v42  ;;  %v13400_v35 = vadd.f32 %v10391_v61, %v1725_v12  ;;  %v1717_v36 = vadd.f32 %v1716_v1, %v16472_v26  ;;  %v11070_v12 = vld [vmem:[%s11284_s25 + $0x80] sm:$0xf]  ;;  %v11071_v1 = vld [vmem:[%s11284_s25 + $0x84] sm:$0xf] }
 0x170   : >> { %v10328_v58 = vpop.f32.mrf.mxu1  ;;  %10491 = vmatmul.mubr.msk.bf16.gmra.mxu1 %vm1027_vm4, %v10952_v2  ;;  %v10395_v49 = vpop.f32.mrf.mxu0  ;;  %v4865_v23 = vrot.slane %v11070_v12, 5  ;;  %v4868_v26 = vrot.slane %v11071_v1, 5  ;;  %v16474_v41 = vld [vmem:[#allocation24_spill] sm:$0xff]  ;;  %v11073_v2 = vld [vmem:[%s11284_s25 + $0x94] sm:$0xf]  ;;  %v13424_v1 = vsel %vm11630_vm8, %v4855_v20, %v4856_v52  ;;  %v13432_v0 = vsel %vm11630_vm8, %v4861_v43, %v4862_v32 }
 0x171   : >> { %16471 = vst [vmem:[#allocation87_spill] sm:$0xff] %v13400_v35  ;;  %v13415_v35 = vadd.f32 %v2429_v18, %v1717_v36  ;;  %v1738_v60 = vadd.f32 %v10328_v58, %v16474_v41  ;;  %10494 = vmatprep.mubr.msk.bf16.mxu1 %vm1027_vm4, %v10953_v63  ;;  %v4878_v9 = vrot.slane %v11073_v2, 5  ;;  %v11074_v15 = vld [vmem:[%s11284_s25 + $0x98] sm:$0xf]  ;;  %v13428_v18 = vsel %vm11630_vm8, %v4858_v28, %v4859_v3  ;;  %v11075_v41 = vld [vmem:[%s11284_s25 + $0x9c] sm:$0xf] }
 0x172   : >> { %v4881_v61 = vrot.slane %v11074_v15, 5  ;;  %v1729_v42 = vpop.f32.mrf.mxu1  ;;  %v2445_v12 = vpop.f32.mrf.mxu0  ;;  %v4884_v63 = vrot.slane %v11075_v41, 5  ;;  %v16476_v15 = vld [vmem:[#allocation27_spill] sm:$0xff]  ;;  %v4864_v2 = vrot.slane %v4862_v32, 4  ;;  %v4867_v3 = vrot.slane %v4865_v23, 4 }
 0x173   : >> { %16473 = vst [vmem:[#allocation26_spill] sm:$0xff] %v13415_v35  ;;  %v13435_v36 = vadd.f32 %v10394_v54, %v1738_v60  ;;  %v1730_v58 = vadd.f32 %v1729_v42, %v16476_v15  ;;  %v11076_v35 = vld [vmem:[%s11284_s25 + $0x8c] sm:$0x1]  ;;  %v4870_v28 = vrot.slane %v4868_v26, 4  ;;  %v4873_v43 = vrot.slane %v4871_v47, 4  ;;  %v16478_v54 = vld [vmem:[#allocation29_spill] sm:$0xff] }
 0x174   : >> { %v4874_v55 = vrot.slane %v11076_v35, 5  ;;  %v10329_v52 = vpop.f32.mrf.mxu1  ;;  %v10398_v20 = vpop.f32.mrf.mxu0  ;;  %10561 = vmatmul.mubr.msk.bf16.gmra.mxu0 %vm1027_vm4, %v13001_v6  ;;  %v9398_v31 = vrot.slane %v9390_v10, 9  ;;  %v10955_v42 = vld [vmem:[%s11284_s25 + $0xe8] sm:$0xff]   ;;  %v4880_v32 = vrot.slane %v4878_v9, 4  ;;  %v4883_v35 = vrot.slane %v4881_v61, 4 }
 0x175   : >> { %16475 = vst [vmem:[#allocation24_spill] sm:$0xff] %v13435_v36  ;;  %v13442_v41 = vadd.f32 %v2442_v8, %v1730_v58  ;;  %v1741_v60 = vadd.f32 %v10329_v52, %v16478_v54  ;;  %10564 = vmatprep.mubr.msk.bf16.mxu0 %vm1027_vm4, %v13003_v27  ;;  %v4886_v10 = vrot.slane %v4884_v63, 4  ;;  %v11077_v8 = vld [vmem:[%s11284_s25 + $0xa0] sm:$0xf]  ;;  %v16480_v52 = vld [vmem:[#allocation19_spill] sm:$0xff]  ;;  %v13458_v27 = vsel %vm11630_vm8, %v4864_v2, %v4865_v23 }
 0x176   : >> { %v1732_v15 = vpop.f32.mrf.mxu1  ;;  %v2458_v36 = vpop.f32.mrf.mxu0  ;;  %v4887_v58 = vrot.slane %v11077_v8, 5  ;;  %v11078_v56 = vld [vmem:[%s11284_s25 + $0xa4] sm:$0xf]  ;;  %v13464_v11 = vsel %vm11630_vm8, %v4867_v3, %v4868_v26  ;;  %v13472_v23 = vsel %vm11630_vm8, %v4873_v43, %v4874_v55  ;;  %v13484_v26 = vsel %vm11630_vm8, %v4880_v32, %v4881_v61  ;;  %v10956_v8 = vld [vmem:[%s11284_s25 + $0xf0] sm:$0xff]  }
 0x177   : >> { %16477 = vst [vmem:[#allocation27_spill] sm:$0xff] %v13442_v41  ;;  %v13453_v41 = vadd.f32 %v10395_v49, %v1741_v60  ;;  %v1733_v54 = vadd.f32 %v1732_v15, %v16480_v52  ;;  %v4890_v50 = vrot.slane %v11078_v56, 5  ;;  %16481 = vst [vmem:[#allocation19_spill] sm:$0xff] %v13464_v11  ;;  %v13468_v49 = vsel %vm11630_vm8, %v4870_v28, %v4871_v47  ;;  %v11080_v28 = vld [vmem:[%s11284_s25 + $0xac] sm:$0xf] }
 0x178   : >> { %v10332_v37 = vpop.f32.mrf.mxu1  ;;  %10495 = vmatmul.mubr.msk.bf16.gmra.mxu1 %vm1027_vm4, %v10954_v57  ;;  %v10399_v6 = vpop.f32.mrf.mxu0  ;;  %16482 = vst [vmem:[#allocation88_spill] sm:$0xff] %v13468_v49  ;;  %16483 = vst [vmem:[#allocation89_spill] sm:$0xff] %v13472_v23  ;;  %v13476_v56 = vsel %vm11630_vm8, %v9398_v31, %v4878_v9  ;;  %v16486_v57 = vld [vmem:[#allocation22_spill] sm:$0xff]  ;;  %v13488_v47 = vsel %vm11630_vm8, %v4883_v35, %v4884_v63  ;;  %v13492_v31 = vsel %vm11630_vm8, %v4886_v10, %v4887_v58  ;;  %v9391_v52 = vld [vmem:[%s11284_s25 + $0xb4] sm:$0xe] }
 0x179   : >> { %16479 = vst [vmem:[#allocation29_spill] sm:$0xff] %v13453_v41  ;;  %16484 = vst [vmem:[#allocation90_spill] sm:$0xff] %v13476_v56  ;;  %v13478_v2 = vadd.f32 %v2445_v12, %v1733_v54  ;;  %v1754_v60 = vadd.f32 %v10332_v37, %v16486_v57  ;;  %10498 = vmatprep.mubr.msk.bf16.mxu1 %vm1027_vm4, %v10955_v42  ;;  %v4889_v9 = vrot.slane %v4887_v58, 4  ;;  %v11079_v37 = vld [vmem:[%s11284_s25 + $0xa8] sm:$0xf]  ;;  %v4896_v61 = vrot.slane %v11080_v28, 5 }
 0x17a   : >> { %16487 = vst [vmem:[#allocation22_spill] sm:$0xff] %v13484_v26  ;;  %16488 = vst [vmem:[#allocation92_spill] sm:$0xff] %v13488_v47  ;;  %v1745_v55 = vpop.f32.mrf.mxu1  ;;  %v2461_v3 = vpop.f32.mrf.mxu0  ;;  %v4893_v12 = vrot.slane %v11079_v37, 5  ;;  %v16491_v42 = vld [vmem:[#allocation21_spill] sm:$0xff]  ;;  %v4892_v35 = vrot.slane %v4890_v50, 4 }
 0x17b   : >> { %16485 = vst [vmem:[#allocation91_spill] sm:$0xff] %v13478_v2  ;;  %16489 = vst [vmem:[#allocation93_spill] sm:$0xff] %v13492_v31  ;;  %v13496_v43 = vadd.f32 %v10398_v20, %v1754_v60  ;;  %v1746_v32 = vadd.f32 %v1745_v55, %v16491_v42  ;;  %v11081_v54 = vld [vmem:[%s11284_s25 + $0xb8] sm:$0xf]  ;;  %v11082_v60 = vld [vmem:[%s11284_s25 + $0xbc] sm:$0xf] }
 0x17c   : >> { %v10333_v15 = vpop.f32.mrf.mxu1  ;;  %v10402_v10 = vpop.f32.mrf.mxu0  ;;  %10565 = vmatmul.mubr.msk.bf16.gmra.mxu0 %vm1027_vm4, %v13088_v46  ;;  %v4903_v57 = vrot.slane %v11081_v54, 5  ;;  %v4906_v55 = vrot.slane %v11082_v60, 5  ;;  %v16493_v28 = vld [vmem:[#allocation25_spill] sm:$0xff]  ;;  %v13522_v54 = vsel %vm11630_vm8, %v4889_v9, %v4890_v50  ;;  %v9399_v46 = vrot.slane %v9391_v52, 9  ;;  %v9392_v56 = vld [vmem:[%s11284_s25 + $0xd8] sm:$0xe] }
 0x17d   : >> { %16490 = vst [vmem:[#allocation94_spill] sm:$0xff] %v13496_v43  ;;  %v13511_v37 = vadd.f32 %v2458_v36, %v1746_v32  ;;  %v1757_v42 = vadd.f32 %v10333_v15, %v16493_v28  ;;  %v10957_v63 = vld [vmem:[%s11284_s25 + $0xfc] sm:$0xff]   ;;  %10568 = vmatprep.mubr.msk.bf16.mxu0 %vm1027_vm4, %v13090_v19  ;;  %16494 = vst [vmem:[#allocation25_spill] sm:$0xff] %v13522_v54  ;;  %v4895_v36 = vrot.slane %v4893_v12, 4  ;;  %v4898_v32 = vrot.slane %v4896_v61, 4  ;;  %v16496_v19 = vld [vmem:[#allocation30_spill] sm:$0xff] }
 0x17e   : >> { %v11083_v58 = vld [vmem:[%s11284_s25 + $0xc0] sm:$0xf]  ;;  %v1748_v20 = vpop.f32.mrf.mxu1  ;;  %v2474_v2 = vpop.f32.mrf.mxu0  ;;  %v11084_v15 = vld [vmem:[%s11284_s25 + $0xb0] sm:$0x1]  ;;  %v4905_v9 = vrot.slane %v4903_v57, 4  ;;  %v4908_v31 = vrot.slane %v4906_v55, 4 }
 0x17f   : >> { %16492 = vst [vmem:[#allocation21_spill] sm:$0xff] %v13511_v37  ;;  %v4909_v43 = vrot.slane %v11083_v58, 5  ;;  %v4899_v60 = vrot.slane %v11084_v15, 5  ;;  %v13525_v28 = vadd.f32 %v10399_v6, %v1757_v42  ;;  %v1749_v37 = vadd.f32 %v1748_v20, %v16496_v19  ;;  %v11085_v47 = vld [vmem:[%s11284_s25 + $0xc4] sm:$0xf]  ;;  %v16499_v20 = vld [vmem:[#allocation32_spill] sm:$0xff] }
 0x180   : >> { %v13530_v58 = vsel %vm11630_vm8, %v4892_v35, %v4893_v12  ;;  %v10336_v41 = vpop.f32.mrf.mxu1  ;;  %10499 = vmatmul.mubr.msk.bf16.gmra.mxu1 %vm1027_vm4, %v10956_v8  ;;  %v10403_v50 = vpop.f32.mrf.mxu0  ;;  %v4912_v26 = vrot.slane %v11085_v47, 5  ;;  %v11086_v15 = vld [vmem:[%s11284_s25 + $0xc8] sm:$0xf]  ;;  %v11087_v35 = vld [vmem:[%s11284_s25 + $0xcc] sm:$0xf]  ;;  %v13544_v47 = vsel %vm11630_vm8, %v4895_v36, %v4896_v61 }
 0x181   : >> { %16495 = vst [vmem:[#allocation95_spill] sm:$0xff] %v13525_v28  ;;  %16497 = vst [vmem:[#allocation30_spill] sm:$0xff] %v13530_v58  ;;  %v4915_v6 = vrot.slane %v11086_v15, 5  ;;  %v13535_v42 = vadd.f32 %v2461_v3, %v1749_v37  ;;  %v1770_v19 = vadd.f32 %v10336_v41, %v16499_v20  ;;  %10502 = vmatprep.mubr.msk.bf16.mxu1 %vm1027_vm4, %v10957_v63  ;;  %v4911_v12 = vrot.slane %v4909_v43, 4  ;;  %v11088_v41 = vld [vmem:[%s11284_s25 + $0xd0] sm:$0xf] }
 0x182   : >> { %v4918_v52 = vrot.slane %v11087_v35, 5  ;;  %v1761_v8 = vpop.f32.mrf.mxu1  ;;  %v2477_v28 = vpop.f32.mrf.mxu0  ;;  %v13548_v3 = vsel %vm11630_vm8, %v4898_v32, %v4899_v60  ;;  %v4921_v37 = vrot.slane %v11088_v41, 5  ;;  %v16501_v15 = vld [vmem:[#allocation36_spill] sm:$0xff]  ;;  %v13556_v35 = vsel %vm11630_vm8, %v9399_v46, %v4903_v57  ;;  %v10958_v54 = vld [vmem:[%s11284_s25 + $0x104] sm:$0xff]  }
 0x183   : >> { %16498 = vst [vmem:[#allocation96_spill] sm:$0xff] %v13535_v42  ;;  %v13551_v63 = vadd.f32 %v10402_v10, %v1770_v19  ;;  %v1762_v20 = vadd.f32 %v1761_v8, %v16501_v15  ;;  %v11089_v42 = vld [vmem:[%s11284_s25 + $0xdc] sm:$0xf]  ;;  %v13565_v10 = vsel %vm11630_vm8, %v4905_v9, %v4906_v55  ;;  %v13569_v32 = vsel %vm11630_vm8, %v4908_v31, %v4909_v43  ;;  %v10959_v8 = vld [vmem:[%s11284_s25 + $0x10c] sm:$0xff]   ;;  %v11090_v43 = vld [vmem:[%s11284_s25 + $0xd4] sm:$0x1] }
 0x184   : >> { %v4928_v58 = vrot.slane %v11089_v42, 5  ;;  %v10337_v61 = vpop.f32.mrf.mxu1  ;;  %v10406_v36 = vpop.f32.mrf.mxu0  ;;  %10569 = vmatmul.mubr.msk.bf16.gmra.mxu0 %vm1027_vm4, %v13218_v38  ;;  %v4914_v57 = vrot.slane %v4912_v26, 4  ;;  %v4917_v46 = vrot.slane %v4915_v6, 4  ;;  %v16503_v42 = vld [vmem:[#allocation40_spill] sm:$0xff]  ;;  %v13579_v38 = vsel %vm11630_vm8, %v4911_v12, %v4912_v26  ;;  %v11092_v49 = vld [vmem:[%s11284_s25 + $0xe4] sm:$0xf] }
 0x185   : >> { %16500 = vst [vmem:[#allocation32_spill] sm:$0xff] %v13551_v63  ;;  %v13571_v60 = vadd.f32 %v2474_v2, %v1762_v20  ;;  %v1773_v19 = vadd.f32 %v10337_v61, %v16503_v42  ;;  %10572 = vmatprep.mubr.msk.bf16.mxu0 %vm1027_vm4, %v13220_v4  ;;  %v4920_v55 = vrot.slane %v4918_v52, 4  ;;  %v4923_v31 = vrot.slane %v4921_v37, 4  ;;  %v11091_v2 = vld [vmem:[%s11284_s25 + $0xe0] sm:$0xf]  ;;  %v16505_v61 = vld [vmem:[#allocation38_spill] sm:$0xff] }
 0x186   : >> { %v1764_v9 = vpop.f32.mrf.mxu1  ;;  %v2490_v41 = vpop.f32.mrf.mxu0  ;;  %v4924_v15 = vrot.slane %v11090_v43, 5  ;;  %v9400_v63 = vrot.slane %v9392_v56, 9  ;;  %v4931_v20 = vrot.slane %v11091_v2, 5  ;;  %v4930_v23 = vrot.slane %v4928_v58, 4  ;;  %v10961_v12 = vld [vmem:[%s11284_s25 + $0x120] sm:$0xff]  }
 0x187   : >> { %16502 = vst [vmem:[#allocation36_spill] sm:$0xff] %v13571_v60  ;;  %v13583_v60 = vadd.f32 %v10403_v50, %v1773_v19  ;;  %v1765_v42 = vadd.f32 %v1764_v9, %v16505_v61  ;;  %v4934_v4 = vrot.slane %v11092_v49, 5  ;;  %v13596_v19 = vsel %vm11630_vm8, %v4914_v57, %v4915_v6  ;;  %v16507_v49 = vld [vmem:[#allocation9_spill] sm:$0xff] }
 0x188   : >> { %v10340_v11 = vpop.f32.mrf.mxu1  ;;  %10503 = vmatmul.mubr.msk.bf16.gmra.mxu1 %vm1027_vm4, %v10958_v54  ;;  %v10407_v26 = vpop.f32.mrf.mxu0  ;;  %v13604_v54 = vsel %vm11630_vm8, %v4917_v46, %v4918_v52  ;;  %v13608_v2 = vsel %vm11630_vm8, %v4920_v55, %v4921_v37  ;;  %v4933_v6 = vrot.slane %v4931_v20, 4  ;;  %v11093_v52 = vld [vmem:[%s11284_s25 + $0xe8] sm:$0xf]  ;;  %v16509_v37 = vld [vmem:[#allocation11_spill] sm:$0xff]  ;;  %v13624_v55 = vsel %vm11630_vm8, %v4930_v23, %v4931_v20 }
 0x189   : >> { %16504 = vst [vmem:[#allocation40_spill] sm:$0xff] %v13583_v60  ;;  %v13598_v9 = vadd.f32 %v2477_v28, %v1765_v42  ;;  %v1786_v43 = vadd.f32 %v10340_v11, %v16507_v49  ;;  %10506 = vmatprep.mubr.msk.bf16.mxu1 %vm1027_vm4, %v10959_v8  ;;  %v13612_v28 = vsel %vm11630_vm8, %v4923_v31, %v4924_v15  ;;  %v4937_v57 = vrot.slane %v11093_v52, 5  ;;  %v10960_v49 = vld [vmem:[%s11284_s25 + $0x114] sm:$0xff]  }
 0x18a   : >> { %v1777_v61 = vpop.f32.mrf.mxu1  ;;  %v2493_v50 = vpop.f32.mrf.mxu0  ;;  %v13616_v11 = vsel %vm11630_vm8, %v9400_v63, %v4928_v58  ;;  %16510 = vst [vmem:[#allocation11_spill] sm:$0xff] %v13624_v55  ;;  %v4936_v31 = vrot.slane %v4934_v4, 4  ;;  %v11094_v63 = vld [vmem:[%s11284_s25 + $0xec] sm:$0xf]  ;;  %v11096_v52 = vld [vmem:[%s11284_s25 + $0xf4] sm:$0xf] }
 0x18b   : >> { %16506 = vst [vmem:[#allocation38_spill] sm:$0xff] %v13598_v9  ;;  %v13619_v46 = vadd.f32 %v10406_v36, %v1786_v43  ;;  %v1778_v8 = vadd.f32 %v1777_v61, %v16509_v37  ;;  %v4940_v36 = vrot.slane %v11094_v63, 5  ;;  %v11095_v43 = vld [vmem:[%s11284_s25 + $0xf0] sm:$0xf]  ;;  %v4946_v37 = vrot.slane %v11096_v52, 5 }
 0x18c   : >> { %v10341_v15 = vpop.f32.mrf.mxu1  ;;  %v10410_v42 = vpop.f32.mrf.mxu0  ;;  %10573 = vmatmul.mubr.msk.bf16.gmra.mxu0 %vm1027_vm4, %v13222_v53  ;;  %v4943_v61 = vrot.slane %v11095_v43, 5  ;;  %v16512_v23 = vld [vmem:[#allocation43_spill] sm:$0xff]  ;;  %v4939_v58 = vrot.slane %v4937_v57, 4  ;;  %v4956_v43 = vrot.slane %v12893_v39, 5  ;;  %v9393_v53 = vld [vmem:[%s11284_s25 + $0xfc] sm:$0xe] }
 0x18d   : >> { %16508 = vst [vmem:[#allocation9_spill] sm:$0xff] %v13619_v46  ;;  %v13634_v56 = vadd.f32 %v2490_v41, %v1778_v8  ;;  %v1789_v20 = vadd.f32 %v10341_v15, %v16512_v23  ;;  %10576 = vmatprep.mubr.msk.bf16.mxu0 %vm1027_vm4, %v13224_v14  ;;  %v13646_v41 = vsel %vm11630_vm8, %v4933_v6, %v4934_v4  ;;  %v11097_v8 = vld [vmem:[%s11284_s25 + $0x100] sm:$0xf]  ;;  %v4959_v63 = vrot.slane %v12913_v59, 5  ;;  %v11098_v55 = vld [vmem:[%s11284_s25 + $0xf8] sm:$0x1] }
 0x18e   : >> { %v1780_v46 = vpop.f32.mrf.mxu1  ;;  %v2506_v9 = vpop.f32.mrf.mxu0  ;;  %v4953_v15 = vrot.slane %v11097_v8, 5  ;;  %v13655_v23 = vsel %vm11630_vm8, %v4936_v31, %v4937_v57  ;;  %v4942_v6 = vrot.slane %v4940_v36, 4  ;;  %v4945_v60 = vrot.slane %v4943_v61, 4 }
 0x18f   : >> { %16511 = vst [vmem:[#allocation97_spill] sm:$0xff] %v13634_v56  ;;  %v13650_v52 = vadd.f32 %v10407_v26, %v1789_v20  ;;  %v1781_v14 = vadd.f32 %v1780_v46, %v12898_v40  ;;  %v4948_v8 = vrot.slane %v4946_v37, 4  ;;  %v4949_v39 = vrot.slane %v11098_v55, 5 }
 0x190   : >> { %v10344_v56 = vpop.f32.mrf.mxu1  ;;  %10507 = vmatmul.mubr.msk.bf16.gmra.mxu1 %vm1027_vm4, %v10960_v49  ;;  %v10411_v4 = vpop.f32.mrf.mxu0  ;;  %v4962_v57 = vrot.slane %v12949_v21, 5  ;;  %v4965_v59 = vrot.slane %v13007_v62, 5  ;;  %v13669_v49 = vsel %vm11630_vm8, %v4939_v58, %v4940_v36  ;;  %v9401_v20 = vrot.slane %v9393_v53, 9  ;;  %v10962_v62 = vld [vmem:[%s11284_s25 + $0x128] sm:$0xff]  }
 0x191   : >> { %16513 = vst [vmem:[#allocation43_spill] sm:$0xff] %v13650_v52  ;;  %v13661_v26 = vadd.f32 %v2493_v50, %v1781_v14  ;;  %v1802_v40 = vadd.f32 %v10344_v56, %v12932_v25  ;;  %10510 = vmatprep.mubr.msk.bf16.mxu1 %vm1027_vm4, %v10961_v12  ;;  %v4955_v52 = vrot.slane %v4953_v15, 4  ;;  %v4958_v50 = vrot.slane %v4956_v43, 4 }
 0x192   : >> { %v1793_v46 = vpop.f32.mrf.mxu1  ;;  %v2509_v31 = vpop.f32.mrf.mxu0  ;;  %v4961_v56 = vrot.slane %v4959_v63, 4  ;;  %v4964_v12 = vrot.slane %v4962_v57, 4  ;;  %v13679_v58 = vsel %vm11630_vm8, %v4942_v6, %v4943_v61  ;;  %v13683_v36 = vsel %vm11630_vm8, %v4945_v60, %v4946_v37  ;;  %v16519_v61 = vld [vmem:[#allocation47_spill] sm:$0xff] }
 0x193   : >> { %16514 = vst [vmem:[#allocation98_spill] sm:$0xff] %v13661_v26  ;;  %v13671_v55 = vadd.f32 %v10410_v42, %v1802_v40  ;;  %v1794_v25 = vadd.f32 %v1793_v46, %v12957_v7  ;;  %16516 = vst [vmem:[#allocation100_spill] sm:$0xff] %v13683_v36  ;;  %v13687_v7 = vsel %vm11630_vm8, %v4948_v8, %v4949_v39  ;;  %v4968_v42 = vrot.slane %v13010_v30, 5  ;;  %v10963_v46 = vld [vmem:[%s11284_s25 + $0x130] sm:$0xff]  }
 0x194   : >> { %v10345_v21 = vpop.f32.mrf.mxu1  ;;  %v10414_v14 = vpop.f32.mrf.mxu0  ;;  %10577 = vmatmul.mubr.msk.bf16.gmra.mxu0 %vm1027_vm4, %v13250_v29  ;;  %16517 = vst [vmem:[#allocation101_spill] sm:$0xff] %v13687_v7  ;;  %v4967_v29 = vrot.slane %v4965_v59, 4  ;;  %v4971_v6 = vrot.slane %v16519_v61, 5  ;;  %v13700_v8 = vsel %vm11630_vm8, %v9401_v20, %v4953_v15  ;;  %v13704_v30 = vsel %vm11630_vm8, %v4955_v52, %v4956_v43  ;;  %v16528_v20 = vld [vmem:[#allocation54_spill] sm:$0xff] }
 0x195   : >> { %16515 = vst [vmem:[#allocation99_spill] sm:$0xff] %v13671_v55  ;;  %v13690_v53 = vadd.f32 %v2506_v9, %v1794_v25  ;;  %v1805_v40 = vadd.f32 %v10345_v21, %v13038_v13  ;;  %10580 = vmatprep.mubr.msk.bf16.mxu0 %vm1027_vm4, %v13303_v34  ;;  %v9394_v55 = vld [vmem:[%s11284_s25 + $0x120] sm:$0xe]  ;;  %16520 = vst [vmem:[#allocation47_spill] sm:$0xff] %v13700_v8  ;;  %v13708_v13 = vsel %vm11630_vm8, %v4958_v50, %v4959_v63  ;;  %v16523_v9 = vld [vmem:[#allocation48_spill] sm:$0xff] }
 0x196   : >> { %v1796_v60 = vpop.f32.mrf.mxu1  ;;  %v2522_v37 = vpop.f32.mrf.mxu0  ;;  %16521 = vst [vmem:[#allocation103_spill] sm:$0xff] %v13704_v30  ;;  %16522 = vst [vmem:[#allocation104_spill] sm:$0xff] %v13708_v13  ;;  %v4978_v34 = vrot.slane %v16523_v9, 5  ;;  %v16525_v25 = vld [vmem:[#allocation52_spill] sm:$0xff]  ;;  %v13716_v61 = vsel %vm11630_vm8, %v4961_v56, %v4962_v57  ;;  %v13720_v15 = vsel %vm11630_vm8, %v4964_v12, %v4965_v59  ;;  %v4970_v52 = vrot.slane %v4968_v42, 4  ;;  %v10965_v59 = vld [vmem:[%s11284_s25 + $0x48] sm:$0xff]  }
 0x197   : >> { %16518 = vst [vmem:[#allocation102_spill] sm:$0xff] %v13690_v53  ;;  %v13711_v39 = vadd.f32 %v10411_v4, %v1805_v40  ;;  %v1797_v21 = vadd.f32 %v1796_v60, %v16525_v25  ;;  %16526 = vst [vmem:[#allocation52_spill] sm:$0xff] %v13716_v61  ;;  %v4974_v50 = vrot.slane %v16528_v20, 5  ;;  %v9402_v9 = vrot.slane %v9394_v55, 9  ;;  %v16529_v4 = vld [vmem:[#allocation50_spill] sm:$0xff]  ;;  %v16531_v60 = vld [vmem:[#allocation56_spill] sm:$0xff] }
 0x198   : >> { %16527 = vst [vmem:[#allocation105_spill] sm:$0xff] %v13720_v15  ;;  %v10348_v43 = vpop.f32.mrf.mxu1  ;;  %10511 = vmatmul.mubr.msk.bf16.gmra.mxu1 %vm1027_vm4, %v10962_v62  ;;  %v10415_v63 = vpop.f32.mrf.mxu0  ;;  %v4981_v40 = vrot.slane %v16529_v4, 5  ;;  %v13732_v56 = vsel %vm11630_vm8, %v4967_v29, %v4968_v42  ;;  %v4973_v12 = vrot.slane %v4971_v6, 4  ;;  %v16534_v20 = vld [vmem:[#allocation59_spill] sm:$0xff]  ;;  %v16563_v7 = vld [vmem:[#allocation6_spill] sm:$0xff]  ;;  %v16564_v36 = vcombine.low %v13322_v33, %v13326_v22 }
 0x199   : >> { %16524 = vst [vmem:[#allocation48_spill] sm:$0xff] %v13711_v39  ;;  %v13725_v39 = vadd.f32 %v2509_v31, %v1797_v21  ;;  %v1818_v57 = vadd.f32 %v10348_v43, %v16531_v60  ;;  %10514 = vmatprep.mubr.msk.bf16.mxu1 %vm1027_vm4, %v10963_v46  ;;  %16532 = vst [vmem:[#allocation50_spill] sm:$0xff] %v13732_v56  ;;  %v4980_v43 = vrot.slane %v4978_v34, 4  ;;  %v9599_v60 = vld [vmem:[%s11284_s25 + $0x48] sm:$0xf]  ;;  %v10964_v31 = vld [vmem:[%s11284_s25 + $0x138] sm:$0xff]  }
 0x19a   : >> { %v1809_v62 = vpop.f32.mrf.mxu1  ;;  %v2525_v25 = vpop.f32.mrf.mxu0  ;;  %v10967_v56 = vld [vmem:[%s11284_s25 + $0x58] sm:$0xff]   ;;  %v16560_v8 = vld [vmem:[#allocation63_spill] sm:$0xff] }
 0x19b   : >> { %16530 = vst [vmem:[#allocation54_spill] sm:$0xff] %v13725_v39  ;;  %v13740_v46 = vadd.f32 %v10414_v14, %v1818_v57  ;;  %v1810_v4 = vadd.f32 %v1809_v62, %v16534_v20  ;;  %v13749_v39 = vld [vmem:[%s11284_s25 + $0x4c] sm:$0xf]  ;;  %v13758_v57 = vsel %vm11630_vm8, %v4970_v52, %v4971_v6  ;;  %v13762_v62 = vsel %vm11630_vm8, %v9402_v9, %v4978_v34  ;;  %v16539_v14 = vld [vmem:[#allocation53_spill] sm:$0xff] }
 0x19c   : >> { %v10349_v55 = vpop.f32.mrf.mxu1  ;;  %v10418_v53 = vpop.f32.mrf.mxu0  ;;  %10581 = vmatmul.mubr.msk.bf16.gmra.mxu0 %vm1027_vm4, %v13314_v44  ;;  %16535 = vst [vmem:[#allocation59_spill] sm:$0xff] %v13758_v57  ;;  %16536 = vst [vmem:[#allocation106_spill] sm:$0xff] %v13762_v62  ;;  %v4983_v20 = vrot.slane %v4981_v40, 4  ;;  %v13770_v44 = vsel %vm11630_vm8, %v4973_v12, %v4974_v50  ;;  %v4984_v6 = vrot.slane %v16539_v14, 5  ;;  %v13775_v34 = vsel %vm11630_vm8, %v4980_v43, %v4981_v40  ;;  %v13783_v12 = vld [vmem:[%s11284_s25 + $0x50] sm:$0xf] }
 0x19d   : >> { %16533 = vst [vmem:[#allocation56_spill] sm:$0xff] %v13740_v46  ;;  %v13764_v29 = vadd.f32 %v2522_v37, %v1810_v4  ;;  %v1821_v42 = vadd.f32 %v10349_v55, %v13150_v24  ;;  %10652 = vmatprep.mubr.msk.bf16.mxu0 %vm1027_vm4, %v10965_v59  ;;  %16538 = vst [vmem:[#allocation108_spill] sm:$0xff] %v13770_v44  ;;  %v6306_v9 = vshrl.u32 %v9599_v60, 16  ;;  %v6309_v37 = vshll.u32 %v9599_v60, 16  ;;  %v13786_v55 = vld [vmem:[%s11284_s25 + $0x54] sm:$0xf] }
 0x19e   : >> { %v1812_v52 = vpop.f32.mrf.mxu1  ;;  %v2538_v21 = vpop.f32.mrf.mxu0  ;;  %16540 = vst [vmem:[#allocation53_spill] sm:$0xff] %v13775_v34  ;;  %v6315_v4 = vshll.u32 %v13749_v39, 16  ;;  %v6319_v14 = vshrl.u32 %v13749_v39, 16  ;;  %v10966_v43 = vld [vmem:[%s11284_s25 + $0x50] sm:$0xff]   ;;  %v13817_v34 = vsel %vm11630_vm8, %v4983_v20, %v4984_v6  ;;  %v16550_v62 = vld [vmem:[#allocation60_spill] sm:$0xff] }
 0x19f   : >> { %16537 = vst [vmem:[#allocation107_spill] sm:$0xff] %v13764_v29  ;;  %v13778_v24 = vadd.f32 %v10415_v63, %v1821_v42  ;;  %v1813_v59 = vadd.f32 %v1812_v52, %v13196_v45  ;;  %v6308_v42 = vrot.slane %v6306_v9, 4  ;;  %v6311_v60 = vrot.slane %v6309_v37, 5  ;;  %v16543_v50 = vld [vmem:[#allocation67_spill] sm:$0xff] }
 0x1a0   : >> { %v10352_v29 = vpop.f32.mrf.mxu1  ;;  %10515 = vmatmul.mubr.msk.bf16.gmra.mxu1 %vm1027_vm4, %v10964_v31  ;;  %v10419_v40 = vpop.f32.mrf.mxu0  ;;  %v13793_v45 = vrot.slane %v6315_v4, 5  ;;  %v16544_v46 = vld [vmem:[#allocation71_spill] sm:$0xff]  ;;  %v6321_v15 = vrot.slane %v6319_v14, 4  ;;  %v6325_v9 = vshll.u32 %v13783_v12, 16  ;;  %v6329_v37 = vshrl.u32 %v13783_v12, 16 }
 0x1a1   : >> { %16541 = vst [vmem:[#allocation109_spill] sm:$0xff] %v13778_v24  ;;  %v13795_v52 = vadd.f32 %v2525_v25, %v1813_v59  ;;  %v1834_v24 = vadd.f32 %v10352_v29, %v16543_v50  ;;  %v16545_v26 = vcombine.low %v13276_v17, %v16544_v46  ;;  %v6335_v25 = vshll.u32 %v13786_v55, 16  ;;  %v16547_v17 = vld [vmem:[#allocation68_spill] sm:$0xff]  ;;  %v16549_v50 = vld [vmem:[#allocation58_spill] sm:$0xff] }
 0x1a2   : >> { %v1825_v61 = vpop.f32.mrf.mxu1  ;;  %v2541_v63 = vpop.f32.mrf.mxu0  ;;  %v6339_v29 = vshrl.u32 %v13786_v55, 16  ;;  %v4996_v44 = vrot.slane %v16550_v62, 5  ;;  %v6312_v57 = vor.u32 %v6311_v60, %v6308_v42  ;;  %v13828_v62 = vrot.slane %v6325_v9, 5 }
 0x1a3   : >> { %16542 = vst [vmem:[#allocation110_spill] sm:$0xff] %v13795_v52  ;;  %10586 = vmatprep.mubr.msk.bf16.mxu1 %vm1027_vm4, %v16545_v26  ;;  %v13809_v4 = vadd.f32 %v10418_v53, %v1834_v24  ;;  %v1826_v46 = vadd.f32 %v1825_v61, %v16547_v17  ;;  %v16548_v26 = vld [vmem:[#allocation57_spill] sm:$0xff]  ;;  %v4993_v52 = vrot.slane %v16549_v50, 5  ;;  %v6322_v53 = vor.u32 %v6321_v15, %v13793_v45  ;;  %v16552_v61 = vld [vmem:[#allocation70_spill] sm:$0xff] }
 0x1a4   : >> { %v4990_v59 = vrot.slane %v16548_v26, 5  ;;  %v10353_v31 = vpop.f32.mrf.mxu1  ;;  %v10422_v14 = vpop.f32.mrf.mxu0  ;;  %10653 = vmatmul.mubr.msk.bf16.vlgmr.msra.gmra.mxu0 %vm1027_vm4, %v10966_v43  ;;  %v16553_v26 = vld [vmem:[#allocation65_spill] sm:$0xff]  ;;  %v4986_v50 = vrot.slane %v4984_v6, 4  ;;  %v16554_v43 = vrot.slane %v13117_v51, 5  ;;  %v6331_v42 = vrot.slane %v6329_v37, 4 }
 0x1a5   : >> { %16546 = vst [vmem:[#allocation67_spill] sm:$0xff] %v13809_v4  ;;  %v13821_v24 = vadd.f32 %v2538_v21, %v1826_v46  ;;  %v1837_v17 = vadd.f32 %v10353_v31, %v16552_v61  ;;  %10783 = vmatpush3.bf16.msra.mxu0 %v16553_v26  ;;  %10656 = vmatprep.mubr.msk.bf16.mxu0 %vm1027_vm4, %v10967_v56  ;;  %v13830_v15 = vrot.slane %v6335_v25, 5  ;;  %v6341_v21 = vrot.slane %v6339_v29, 4  ;;  %v16556_v31 = vld [vmem:[#allocation73_spill] sm:$0xff]  ;;  %v13836_v6 = vld [vmem:[%s11284_s25 + $0x58] sm:$0xf] }
 0x1a6   : >> { %v4989_v20 = vrot.slane %v16554_v43, 4  ;;  %v1828_v4 = vpop.f32.mrf.mxu1  ;;  %v2554_v13 = vpop.f32.mrf.mxu0  ;;  %v4992_v61 = vrot.slane %v4990_v59, 4  ;;  %v4995_v56 = vrot.slane %v4993_v52, 4  ;;  %v16558_v43 = vld [vmem:[#allocation75_spill] sm:$0xff]  ;;  %v10968_v37 = vld [vmem:[%s11284_s25 + $0x60] sm:$0xff]   ;;  %v4998_v25 = vrot.slane %v4996_v44, 4 }
 0x1a7   : >> { %16551 = vst [vmem:[#allocation71_spill] sm:$0xff] %v13821_v24  ;;  %v13832_v60 = vadd.f32 %v10419_v40, %v1837_v17  ;;  %v1829_v46 = vadd.f32 %v1828_v4, %v16556_v31  ;;  %v16557_v24 = vld [vmem:[#allocation74_spill] sm:$0xff]  ;;  %v4999_v29 = vrot.slane %v16560_v8, 5  ;;  %v6313_v40 = vrot.slane %v6312_v57, 4  ;;  %v16562_v4 = vld [vmem:[#allocation12_spill] sm:$0xff] }
 0x1a8   : >> { %v10356_v26 = vpop.f32.mrf.mxu1  ;;  %v16559_v30 = vcombine.low %v16557_v24, %v16558_v43  ;;  %v10423_v9 = vpop.f32.mrf.mxu0  ;;  %v6323_v17 = vrot.slane %v6322_v53, 4  ;;  %v10969_v24 = vld [vmem:[%s11284_s25 + $0x6c] sm:$0xff]   ;;  %v6342_v53 = vor.u32 %v6341_v21, %v13830_v15  ;;  %v6345_v33 = vshll.u32 %v13836_v6, 16 }
 0x1a9   : >> { %16555 = vst [vmem:[#allocation68_spill] sm:$0xff] %v13832_v60  ;;  %v13844_v60 = vadd.f32 %v2541_v63, %v1829_v46  ;;  %v1850_v31 = vadd.f32 %v10356_v26, %v16562_v4  ;;  %v13861_v63 = vsel %vm11630_vm8, %v4989_v20, %v4990_v59  ;;  %v13875_v46 = vsel %vm11630_vm8, %v4995_v56, %v4996_v44  ;;  %v16574_v56 = vld [vmem:[#allocation14_spill] sm:$0xff] }
 0x1aa   : >> { %10587 = vmatmul.mubr.msk.bf16.vlgmr.msra.gmra.mxu1 %vm1027_vm4, %v16559_v30  ;;  %v16565_v30 = vrot.slane %v13117_v51, 5  ;;  %v1841_v8 = vpop.f32.mrf.mxu1  ;;  %v2557_v57 = vpop.f32.mrf.mxu0  ;;  %16566 = vst [vmem:[#allocation58_spill] sm:$0xff] %v13861_v63  ;;  %v16568_v51 = vld [vmem:[#allocation13_spill] sm:$0xff]  ;;  %16570 = vst [vmem:[#allocation65_spill] sm:$0xff] %v13875_v46  ;;  %v6318_v21 = vsel %vm11297_vm5, %v6313_v40, %v13793_v45  ;;  %v10974_v46 = vld [vmem:[%s11284_s25 + $0x98] sm:$0xff]  }
 0x1ab   : >> { %16561 = vst [vmem:[#allocation57_spill] sm:$0xff] %v13844_v60  ;;  %10717 = vmatpush3.bf16.msra.mxu1 %v16563_v7  ;;  %10590 = vmatprep.mubr.msk.bf16.mxu1 %vm1027_vm4, %v16564_v36  ;;  %v6332_v7 = vor.u32 %v6331_v42, %v13828_v62  ;;  %v13866_v22 = vadd.f32 %v10422_v14, %v1850_v31  ;;  %v16576_v31 = vld [vmem:[#allocation16_spill] sm:$0xff] }
 0x1ac   : >> { %v13857_v43 = vsel %vm11630_vm8, %v4986_v50, %v16565_v30  ;;  %v1842_v36 = vadd.f32 %v1841_v8, %v16568_v51  ;;  %v13871_v50 = vsel %vm11630_vm8, %v4992_v61, %v4993_v52  ;;  %v10357_v59 = vpop.f32.mrf.mxu1  ;;  %v10426_v20 = vpop.f32.mrf.mxu0  ;;  %10657 = vmatmul.mubr.msk.bf16.gmra.mxu0 %vm1027_vm4, %v10968_v37  ;;  %v13880_v42 = vsel %vm11630_vm8, %v4998_v25, %v4999_v29  ;;  %v9736_v37 = vld [vmem:[%s11284_s25 + $0x48] sm:$0xe]  ;;  %v13907_v8 = vld [vmem:[%s11284_s25 + $0x5c] sm:$0xf] }
 0x1ad   : >> { %16567 = vst [vmem:[#allocation60_spill] sm:$0xff] %v13866_v22  ;;  %16569 = vst [vmem:[#allocation70_spill] sm:$0xff] %v13871_v50  ;;  %v6328_v52 = vsel %vm11297_vm5, %v6323_v17, %v13828_v62  ;;  %v7609_v61 = vrot.slane %v13749_v39, 5  ;;  %v1853_v26 = vadd.f32 %v10357_v59, %v16574_v56  ;;  %10660 = vmatprep.mubr.msk.bf16.mxu0 %vm1027_vm4, %v10969_v24  ;;  %v7612_v25 = vrot.slane %v13783_v12, 5  ;;  %v16582_v12 = vld [vmem:[#allocation79_spill] sm:$0xff]  ;;  %v16583_v62 = vld [vmem:[#allocation80_spill] sm:$0xff] }
 0x1ae   : >> { %16571 = vst [vmem:[#allocation73_spill] sm:$0xff] %v13880_v42  ;;  %v13889_v44 = vadd.f32 %v2554_v13, %v1842_v36  ;;  %v6349_v29 = vshrl.u32 %v13836_v6, 16  ;;  %v1844_v45 = vpop.f32.mrf.mxu1  ;;  %v2570_v40 = vpop.f32.mrf.mxu0  ;;  %v6333_v17 = vrot.slane %v6332_v7, 4  ;;  %v6343_v39 = vrot.slane %v6342_v53, 4  ;;  %v16577_v36 = vld [vmem:[#allocation78_spill] sm:$0xff] }
 0x1af   : >> { %v13898_v13 = vrot.slane %v6345_v33, 5  ;;  %v13900_v4 = vadd.f32 %v10423_v9, %v1853_v26  ;;  %v1845_v24 = vadd.f32 %v1844_v45, %v16576_v31  ;;  %v7615_v30 = vrot.slane %v13786_v55, 5  ;;  %v10970_v9 = vld [vmem:[%s11284_s25 + $0x74] sm:$0xff]   ;;  %v16581_v55 = vld [vmem:[#allocation18_spill] sm:$0xff] }
 0x1b0   : >> { %16573 = vst [vmem:[#allocation74_spill] sm:$0xff] %v13889_v44  ;;  %v10360_v51 = vpop.f32.mrf.mxu1  ;;  %v16578_v7 = vcombine.low %v13330_v16, %v16577_v36  ;;  %v10427_v53 = vpop.f32.mrf.mxu0  ;;  %v13916_v59 = vcombine.low %v6318_v21, %v6328_v52  ;;  %v9744_v56 = vrot.slane %v9736_v37, 9  ;;  %v7611_v26 = vrot.slane %v7609_v61, 4  ;;  %v10971_v16 = vld [vmem:[%s11284_s25 + $0x7c] sm:$0xff]  }
 0x1b1   : >> { %16575 = vst [vmem:[#allocation75_spill] sm:$0xff] %v13900_v4  ;;  %v13918_v45 = vadd.f32 %v2557_v57, %v1845_v24  ;;  %v1866_v31 = vadd.f32 %v10360_v51, %v16581_v55  ;;  %v16584_v4 = vcombine.low %v16582_v12, %v16583_v62  ;;  %v7614_v36 = vrot.slane %v7612_v25, 4  ;;  %v16586_v24 = vld [vmem:[#allocation28_spill] sm:$0xff]  ;;  %v13942_v55 = vld [vmem:[%s11284_s25 + $0x64] sm:$0xf] }
 0x1b2   : >> { %10591 = vmatmul.mubr.msk.bf16.gmra.mxu1 %vm1027_vm4, %v16578_v7  ;;  %16579 = vst [vmem:[#allocation63_spill] sm:$0xff] %v13916_v59  ;;  %v13927_v7 = vld [vmem:[%s11284_s25 + $0x60] sm:$0xf]  ;;  %v6351_v44 = vrot.slane %v6349_v29, 4  ;;  %v1857_v33 = vpop.f32.mrf.mxu1  ;;  %v2573_v21 = vpop.f32.mrf.mxu0  ;;  %v6338_v57 = vsel %vm11297_vm5, %v6333_v17, %v13830_v15  ;;  %v6348_v52 = vsel %vm11297_vm5, %v6343_v39, %v13898_v13  ;;  %v6355_v37 = vshll.u32 %v13907_v8, 16 }
 0x1b3   : >> { %16580 = vst [vmem:[#allocation12_spill] sm:$0xff] %v13918_v45  ;;  %10594 = vmatprep.mubr.msk.bf16.mxu1 %vm1027_vm4, %v16584_v4  ;;  %v6359_v62 = vshrl.u32 %v13907_v8, 16  ;;  %v13937_v4 = vadd.f32 %v10426_v20, %v1866_v31  ;;  %v1858_v12 = vadd.f32 %v1857_v33, %v16586_v24  ;;  %v7617_v51 = vrot.slane %v7615_v30, 4  ;;  %v16602_v59 = vld [vmem:[#allocation85_spill] sm:$0xff] }
 0x1b4   : >> { %v7618_v29 = vrot.slane %v13836_v6, 5  ;;  %v10361_v45 = vpop.f32.mrf.mxu1  ;;  %v10430_v22 = vpop.f32.mrf.mxu0  ;;  %10661 = vmatmul.mubr.msk.bf16.gmra.mxu0 %vm1027_vm4, %v10970_v9  ;;  %v13947_v15 = vsel %vm11630_vm8, %v9744_v56, %v7609_v61  ;;  %v13951_v17 = vsel %vm11630_vm8, %v7611_v26, %v7612_v25  ;;  %v6365_v20 = vshll.u32 %v13927_v7, 16  ;;  %v16590_v6 = vld [vmem:[#allocation31_spill] sm:$0xff] }
 0x1b5   : >> { %16585 = vst [vmem:[#allocation6_spill] sm:$0xff] %v13937_v4  ;;  %16587 = vst [vmem:[#allocation13_spill] sm:$0xff] %v13947_v15  ;;  %v6369_v39 = vshrl.u32 %v13927_v7, 16  ;;  %v13955_v33 = vadd.f32 %v2570_v40, %v1858_v12  ;;  %v1869_v31 = vadd.f32 %v10361_v45, %v16590_v6  ;;  %10664 = vmatprep.mubr.msk.bf16.mxu0 %vm1027_vm4, %v10971_v16  ;;  %v13964_v26 = vrot.slane %v6355_v37, 5  ;;  %v16593_v16 = vld [vmem:[#allocation20_spill] sm:$0xff]  ;;  %v16596_v37 = vld [vmem:[#allocation82_spill] sm:$0xff] }
 0x1b6   : >> { %16588 = vst [vmem:[#allocation7_spill] sm:$0xff] %v13951_v17  ;;  %v13961_v9 = vsel %vm11630_vm8, %v7614_v36, %v7615_v30  ;;  %v6352_v61 = vor.u32 %v6351_v44, %v13898_v13  ;;  %v1860_v56 = vpop.f32.mrf.mxu1  ;;  %v2586_v25 = vpop.f32.mrf.mxu0  ;;  %v6361_v24 = vrot.slane %v6359_v62, 4  ;;  %v6375_v4 = vshll.u32 %v13942_v55, 16  ;;  %v16595_v36 = vld [vmem:[#allocation81_spill] sm:$0xff] }
 0x1b7   : >> { %16589 = vst [vmem:[#allocation14_spill] sm:$0xff] %v13955_v33  ;;  %16591 = vst [vmem:[#allocation16_spill] sm:$0xff] %v13961_v9  ;;  %v6379_v40 = vshrl.u32 %v13942_v55, 16  ;;  %v13968_v45 = vadd.f32 %v10427_v53, %v1869_v31  ;;  %v1861_v12 = vadd.f32 %v1860_v56, %v16593_v16  ;;  %v13973_v30 = vsel %vm11630_vm8, %v7617_v51, %v7618_v29  ;;  %v10972_v33 = vld [vmem:[%s11284_s25 + $0x84] sm:$0xff]   ;;  %v16600_v16 = vld [vmem:[#allocation23_spill] sm:$0xff] }
 0x1b8   : >> { %16594 = vst [vmem:[#allocation18_spill] sm:$0xff] %v13973_v30  ;;  %v7620_v44 = vrot.slane %v7618_v29, 4  ;;  %v10364_v13 = vpop.f32.mrf.mxu1  ;;  %v16597_v6 = vcombine.low %v16595_v36, %v16596_v37  ;;  %v10431_v62 = vpop.f32.mrf.mxu0  ;;  %v13980_v60 = vcombine.low %v6338_v57, %v6348_v52  ;;  %v13982_v53 = vrot.slane %v6365_v20, 5  ;;  %v10973_v36 = vld [vmem:[%s11284_s25 + $0x90] sm:$0xff]   ;;  %v9608_v20 = vld [vmem:[%s11284_s25 + $0x6c] sm:$0xf] }
 0x1b9   : >> { %16592 = vst [vmem:[#allocation78_spill] sm:$0xff] %v13968_v45  ;;  %v6371_v31 = vrot.slane %v6369_v39, 4  ;;  %v7621_v56 = vrot.slane %v13907_v8, 5  ;;  %v13985_v51 = vadd.f32 %v2573_v21, %v1861_v12  ;;  %v1882_v29 = vadd.f32 %v10364_v13, %v16600_v16  ;;  %v16601_v45 = vld [vmem:[#allocation84_spill] sm:$0xff]  ;;  %v14002_v12 = vld [vmem:[%s11284_s25 + $0x68] sm:$0x1] }
 0x1ba   : >> { %10595 = vmatmul.mubr.msk.bf16.gmra.mxu1 %vm1027_vm4, %v16597_v6  ;;  %16598 = vst [vmem:[#allocation79_spill] sm:$0xff] %v13980_v60  ;;  %v16603_v42 = vcombine.low %v16601_v45, %v16602_v59  ;;  %v13995_v52 = vrot.slane %v6352_v61, 4  ;;  %v1873_v39 = vpop.f32.mrf.mxu1  ;;  %v2589_v37 = vpop.f32.mrf.mxu0  ;;  %v6362_v21 = vor.u32 %v6361_v24, %v13964_v26  ;;  %v14004_v59 = vrot.slane %v6375_v4, 5  ;;  %v16605_v13 = vld [vmem:[#allocation33_spill] sm:$0xff]  ;;  %v14015_v57 = vld [vmem:[%s11284_s25 + $0x70] sm:$0xf] }
 0x1bb   : >> { %16599 = vst [vmem:[#allocation80_spill] sm:$0xff] %v13985_v51  ;;  %v14006_v45 = vadd.f32 %v10430_v22, %v1882_v29  ;;  %v1874_v6 = vadd.f32 %v1873_v39, %v16605_v13  ;;  %v14011_v61 = vsel %vm11630_vm8, %v7620_v44, %v7621_v56  ;;  %v7624_v16 = vrot.slane %v13927_v7, 5  ;;  %v16607_v39 = vld [vmem:[#allocation35_spill] sm:$0xff]  ;;  %v16610_v60 = vld [vmem:[#allocation17_spill] sm:$0xff] }
 0x1bc   : >> { %10598 = vmatprep.mubr.msk.bf16.mxu1 %vm1027_vm4, %v16603_v42  ;;  %v6381_v42 = vrot.slane %v6379_v40, 4  ;;  %v10365_v8 = vpop.f32.mrf.mxu1  ;;  %v10434_v51 = vpop.f32.mrf.mxu0  ;;  %10665 = vmatmul.mubr.msk.bf16.gmra.mxu0 %vm1027_vm4, %v10972_v33  ;;  %v6372_v4 = vor.u32 %v6371_v31, %v13982_v53  ;;  %v7623_v24 = vrot.slane %v7621_v56, 4  ;;  %v6390_v40 = vshrl.u32 %v9608_v20, 16  ;;  %v16611_v30 = vld [vmem:[#allocation15_spill] sm:$0xff] }
 0x1bd   : >> { %16604 = vst [vmem:[#allocation28_spill] sm:$0xff] %v14006_v45  ;;  %v6393_v22 = vshll.u32 %v9608_v20, 16  ;;  %v14019_v29 = vadd.f32 %v2586_v25, %v1874_v6  ;;  %v1885_v13 = vadd.f32 %v10365_v8, %v16607_v39  ;;  %10668 = vmatprep.mubr.msk.bf16.mxu0 %vm1027_vm4, %v10973_v36  ;;  %v6385_v44 = vshll.u32 %v14002_v12, 16  ;;  %v16609_v6 = vld [vmem:[#allocation34_spill] sm:$0xff] }
 0x1be   : >> { %v1876_v33 = vpop.f32.mrf.mxu1  ;;  %v2602_v31 = vpop.f32.mrf.mxu0  ;;  %v6382_v56 = vor.u32 %v6381_v42, %v14004_v59  ;;  %v7627_v25 = vrot.slane %v13942_v55, 5  ;;  %v6399_v20 = vshll.u32 %v14015_v57, 16  ;;  %v6403_v8 = vshrl.u32 %v14015_v57, 16 }
 0x1bf   : >> { %16606 = vst [vmem:[#allocation31_spill] sm:$0xff] %v14019_v29  ;;  %v14032_v36 = vadd.f32 %v10431_v62, %v1885_v13  ;;  %v1877_v39 = vadd.f32 %v1876_v33, %v16609_v6  ;;  %v6363_v29 = vrot.slane %v6362_v21, 4  ;;  %v7626_v7 = vrot.slane %v7624_v16, 4  ;;  %v14047_v62 = vld [vmem:[%s11284_s25 + $0x74] sm:$0xf]  ;;  %v16614_v6 = vld [vmem:[#allocation37_spill] sm:$0xff] }
 0x1c0   : >> { %v10368_v45 = vpop.f32.mrf.mxu1  ;;  %v16612_v9 = vcombine.low %v16610_v60, %v16611_v30  ;;  %v10435_v42 = vpop.f32.mrf.mxu0  ;;  %v14040_v55 = vrot.slane %v6372_v4, 4  ;;  %v14044_v17 = vsel %vm11630_vm8, %v7623_v24, %v7624_v16  ;;  %v6392_v13 = vrot.slane %v6390_v40, 4 }
 0x1c1   : >> { %16608 = vst [vmem:[#allocation20_spill] sm:$0xff] %v14032_v36  ;;  %v6395_v21 = vrot.slane %v6393_v22, 5  ;;  %v14049_v33 = vadd.f32 %v2589_v37, %v1877_v39  ;;  %v1898_v36 = vadd.f32 %v10368_v45, %v16614_v6  ;;  %v16615_v60 = vcombine.low %v13407_v5, %v13424_v1  ;;  %v14061_v37 = vld [vmem:[%s11284_s25 + $0x78] sm:$0xf]  ;;  %v16617_v22 = vld [vmem:[#allocation41_spill] sm:$0xff] }
 0x1c2   : >> { %10599 = vmatmul.mubr.msk.bf16.gmra.mxu1 %vm1027_vm4, %v16612_v9  ;;  %v10975_v9 = vld [vmem:[%s11284_s25 + $0xa0] sm:$0xff]   ;;  %v6387_v30 = vrot.slane %v6385_v44, 5  ;;  %v7630_v4 = vrot.slane %v14002_v12, 5  ;;  %v1889_v16 = vpop.f32.mrf.mxu1  ;;  %v2605_v24 = vpop.f32.mrf.mxu0  ;;  %v6383_v15 = vrot.slane %v6382_v56, 4  ;;  %v7629_v50 = vrot.slane %v7627_v25, 4  ;;  %v16619_v6 = vld [vmem:[#allocation8_spill] sm:$0xff] }
 0x1c3   : >> { %16613 = vst [vmem:[#allocation81_spill] sm:$0xff] %v14049_v33  ;;  %10602 = vmatprep.mubr.msk.bf16.mxu1 %vm1027_vm4, %v16615_v60  ;;  %v14058_v63 = vrot.slane %v6399_v20, 5  ;;  %v6405_v40 = vrot.slane %v6403_v8, 4  ;;  %v14063_v45 = vadd.f32 %v10434_v51, %v1898_v36  ;;  %v1890_v5 = vadd.f32 %v1889_v16, %v16617_v22  ;;  %v16634_v20 = vld [vmem:[#allocation88_spill] sm:$0xff] }
 0x1c4   : >> { %v6409_v1 = vshll.u32 %v14047_v62, 16  ;;  %v6413_v44 = vshrl.u32 %v14047_v62, 16  ;;  %v10369_v39 = vpop.f32.mrf.mxu1  ;;  %v10438_v12 = vpop.f32.mrf.mxu0  ;;  %10669 = vmatmul.mubr.msk.bf16.gmra.mxu0 %vm1027_vm4, %v10974_v46  ;;  %v6368_v56 = vsel %vm11297_vm5, %v6363_v29, %v13982_v53  ;;  %v6378_v51 = vsel %vm11297_vm5, %v14040_v55, %v14004_v59  ;;  %v9737_v53 = vld [vmem:[%s11284_s25 + $0x6c] sm:$0xe] }
 0x1c5   : >> { %16616 = vst [vmem:[#allocation82_spill] sm:$0xff] %v14063_v45  ;;  %v6396_v8 = vor.u32 %v6395_v21, %v6392_v13  ;;  %v14078_v36 = vadd.f32 %v2602_v31, %v1890_v5  ;;  %v1901_v60 = vadd.f32 %v10369_v39, %v16619_v6  ;;  %10672 = vmatprep.mubr.msk.bf16.mxu0 %vm1027_vm4, %v10975_v9  ;;  %v6419_v29 = vshll.u32 %v14061_v37, 16  ;;  %v14191_v45 = vld [vmem:[%s11284_s25 + $0x88] sm:$0xf] }
 0x1c6   : >> { %v14084_v46 = vsel %vm11630_vm8, %v7626_v7, %v7627_v25  ;;  %v1892_v16 = vpop.f32.mrf.mxu1  ;;  %v2618_v22 = vpop.f32.mrf.mxu0  ;;  %v6388_v59 = vsel %vm11297_vm5, %v6383_v15, %v6387_v30  ;;  %v14092_v31 = vsel %vm11630_vm8, %v7629_v50, %v7630_v4  ;;  %v6406_v55 = vor.u32 %v6405_v40, %v14058_v63  ;;  %v16621_v25 = vld [vmem:[#allocation10_spill] sm:$0xff] }
 0x1c7   : >> { %16618 = vst [vmem:[#allocation23_spill] sm:$0xff] %v14078_v36  ;;  %v6423_v13 = vshrl.u32 %v14061_v37, 16  ;;  %v14096_v7 = vadd.f32 %v10435_v42, %v1901_v60  ;;  %v1893_v21 = vadd.f32 %v1892_v16, %v16621_v25  ;;  %v14099_v9 = vrot.slane %v6409_v1, 5  ;;  %v10976_v30 = vld [vmem:[%s11284_s25 + $0xa8] sm:$0xff]   ;;  %v10977_v25 = vld [vmem:[%s11284_s25 + $0xb4] sm:$0xff]  }
 0x1c8   : >> { %v6415_v5 = vrot.slane %v6413_v44, 4  ;;  %v10372_v39 = vpop.f32.mrf.mxu1  ;;  %v16622_v15 = vcombine.low %v13428_v18, %v13432_v0  ;;  %v10439_v50 = vpop.f32.mrf.mxu0  ;;  %v16623_v42 = vsel %vm11297_vm5, %v13995_v52, %v13964_v26  ;;  %v14113_v40 = vrot.slane %v6396_v8, 4  ;;  %v16625_v60 = vld [vmem:[#allocation42_spill] sm:$0xff]  ;;  %v16626_v0 = vld [vmem:[#allocation19_spill] sm:$0xff] }
 0x1c9   : >> { %16620 = vst [vmem:[#allocation84_spill] sm:$0xff] %v14096_v7  ;;  %v14111_v4 = vcombine.low %v16623_v42, %v6368_v56  ;;  %v9745_v1 = vrot.slane %v9737_v53, 9  ;;  %v7634_v44 = vrot.slane %v14015_v57, 5  ;;  %v14116_v6 = vadd.f32 %v2605_v24, %v1893_v21  ;;  %v16640_v7 = vld [vmem:[#allocation22_spill] sm:$0xff] }
 0x1ca   : >> { %10603 = vmatmul.mubr.msk.bf16.gmra.mxu1 %vm1027_vm4, %v16622_v15  ;;  %v1914_v18 = vadd.f32 %v10372_v39, %v16625_v60  ;;  %v16627_v16 = vcombine.low %v13458_v27, %v16626_v0  ;;  %v14125_v15 = vld [vmem:[%s11284_s25 + $0x7c] sm:$0xf]  ;;  %v14127_v26 = vrot.slane %v6419_v29, 5  ;;  %v6425_v52 = vrot.slane %v6423_v13, 4  ;;  %v1905_v56 = vpop.f32.mrf.mxu1  ;;  %v2621_v8 = vpop.f32.mrf.mxu0  ;;  %v16629_v39 = vld [vmem:[#allocation39_spill] sm:$0xff] }
 0x1cb   : >> { %16624 = vst [vmem:[#allocation85_spill] sm:$0xff] %v14116_v6  ;;  %v14129_v53 = vcombine.low %v6378_v51, %v6388_v59  ;;  %v6407_v24 = vrot.slane %v6406_v55, 4  ;;  %v6433_v21 = vshrl.u32 %v14125_v15, 16  ;;  %v1906_v42 = vadd.f32 %v1905_v56, %v16629_v39  ;;  %v14140_v0 = vld [vmem:[%s11284_s25 + $0x80] sm:$0xf]  ;;  %v16639_v6 = vld [vmem:[#allocation90_spill] sm:$0xff] }
 0x1cc   : >> { %10606 = vmatprep.mubr.msk.bf16.mxu1 %vm1027_vm4, %v16627_v16  ;;  %v14134_v27 = vadd.f32 %v10438_v12, %v1914_v18  ;;  %v6416_v60 = vor.u32 %v6415_v5, %v14099_v9  ;;  %v7637_v29 = vrot.slane %v14047_v62, 5  ;;  %v10373_v13 = vpop.f32.mrf.mxu1  ;;  %v10442_v51 = vpop.f32.mrf.mxu0  ;;  %10673 = vmatmul.mubr.msk.bf16.gmra.mxu0 %vm1027_vm4, %v10976_v30  ;;  %v6402_v59 = vsel %vm11297_vm5, %v14113_v40, %v14058_v63  ;;  %v16631_v62 = vld [vmem:[#allocation44_spill] sm:$0xff] }
 0x1cd   : >> { %v7636_v12 = vrot.slane %v7634_v44, 4  ;;  %v6429_v55 = vshll.u32 %v14125_v15, 16  ;;  %v7640_v18 = vrot.slane %v14061_v37, 5  ;;  %v14149_v5 = vadd.f32 %v2618_v22, %v1906_v42  ;;  %10676 = vmatprep.mubr.msk.bf16.mxu0 %vm1027_vm4, %v10977_v25  ;;  %v14162_v37 = vld [vmem:[%s11284_s25 + $0x84] sm:$0xf] }
 0x1ce   : >> { %16628 = vst [vmem:[#allocation33_spill] sm:$0xff] %v14134_v27  ;;  %v1917_v16 = vadd.f32 %v10373_v13, %v16631_v62  ;;  %v14155_v56 = vsel %vm11630_vm8, %v9745_v1, %v7634_v44  ;;  %v6426_v30 = vor.u32 %v6425_v52, %v14127_v26  ;;  %v1908_v39 = vpop.f32.mrf.mxu1  ;;  %v2634_v63 = vpop.f32.mrf.mxu0  ;;  %v6412_v40 = vsel %vm11297_vm5, %v6407_v24, %v14099_v9  ;;  %v16633_v1 = vld [vmem:[#allocation45_spill] sm:$0xff] }
 0x1cf   : >> { %16630 = vst [vmem:[#allocation35_spill] sm:$0xff] %v14149_v5  ;;  %v6435_v22 = vrot.slane %v6433_v21, 4  ;;  %v6439_v42 = vshll.u32 %v14140_v0, 16  ;;  %v6443_v25 = vshrl.u32 %v14140_v0, 16  ;;  %v1909_v44 = vadd.f32 %v1908_v39, %v16633_v1  ;;  %v16635_v5 = vld [vmem:[#allocation89_spill] sm:$0xff]  ;;  %v16638_v1 = vld [vmem:[#allocation46_spill] sm:$0xff] }
 0x1d0   : >> { %v14166_v13 = vadd.f32 %v10439_v50, %v1917_v16  ;;  %v14169_v62 = vrot.slane %v6416_v60, 4  ;;  %v7639_v52 = vrot.slane %v7637_v29, 4  ;;  %v10376_v57 = vpop.f32.mrf.mxu1  ;;  %v16636_v9 = vcombine.low %v16634_v20, %v16635_v5  ;;  %v10443_v24 = vpop.f32.mrf.mxu0  ;;  %v10978_v21 = vld [vmem:[%s11284_s25 + $0xbc] sm:$0xff]   ;;  %v10979_v20 = vld [vmem:[%s11284_s25 + $0xc4] sm:$0xff]  }
 0x1d1   : >> { %v14178_v27 = vsel %vm11630_vm8, %v7636_v12, %v7637_v29  ;;  %v6431_v50 = vrot.slane %v6429_v55, 5  ;;  %v7642_v16 = vrot.slane %v7640_v18, 4  ;;  %v7643_v39 = vrot.slane %v14125_v15, 5 }
 0x1d2   : >> { %16632 = vst [vmem:[#allocation34_spill] sm:$0xff] %v14166_v13  ;;  %10607 = vmatmul.mubr.msk.bf16.gmra.mxu1 %vm1027_vm4, %v16636_v9  ;;  %v14181_v60 = vadd.f32 %v2621_v8, %v1909_v44  ;;  %v1930_v13 = vadd.f32 %v10376_v57, %v16638_v1  ;;  %v16641_v36 = vcombine.low %v16639_v6, %v16640_v7  ;;  %v6427_v5 = vrot.slane %v6426_v30, 4  ;;  %v1921_v29 = vpop.f32.mrf.mxu1  ;;  %v2637_v12 = vpop.f32.mrf.mxu0  ;;  %v16643_v44 = vld [vmem:[#allocation49_spill] sm:$0xff] }
 0x1d3   : >> { %v6449_v9 = vshll.u32 %v14162_v37, 16  ;;  %v6436_v55 = vor.u32 %v6435_v22, %v6431_v50  ;;  %v14193_v33 = vrot.slane %v6439_v42, 5  ;;  %v6445_v15 = vrot.slane %v6443_v25, 4  ;;  %v16648_v25 = vld [vmem:[#allocation51_spill] sm:$0xff] }
 0x1d4   : >> { %16637 = vst [vmem:[#allocation17_spill] sm:$0xff] %v14181_v60  ;;  %10610 = vmatprep.mubr.msk.bf16.mxu1 %vm1027_vm4, %v16641_v36  ;;  %v6453_v8 = vshrl.u32 %v14162_v37, 16  ;;  %v14196_v57 = vadd.f32 %v10442_v51, %v1930_v13  ;;  %v1922_v7 = vadd.f32 %v1921_v29, %v16643_v44  ;;  %v14199_v36 = vcombine.low %v6402_v59, %v6412_v40  ;;  %v10377_v30 = vpop.f32.mrf.mxu1  ;;  %v10446_v1 = vpop.f32.mrf.mxu0  ;;  %v16652_v60 = vld [vmem:[#allocation93_spill] sm:$0xff] }
 0x1d5   : >> { %10677 = vmatmul.mubr.msk.bf16.gmra.mxu0 %vm1027_vm4, %v10978_v21  ;;  %v6422_v22 = vsel %vm11297_vm5, %v14169_v62, %v14127_v26  ;;  %v14210_v51 = vsel %vm11630_vm8, %v7639_v52, %v7640_v18  ;;  %v14214_v59 = vsel %vm11630_vm8, %v7642_v16, %v7643_v39  ;;  %v6459_v40 = vshll.u32 %v14191_v45, 16  ;;  %v9617_v18 = vld [vmem:[%s11284_s25 + $0x90] sm:$0xf] }
 0x1d6   : >> { %16642 = vst [vmem:[#allocation15_spill] sm:$0xff] %v14196_v57  ;;  %16644 = vst [vmem:[#allocation37_spill] sm:$0xff] %v14199_v36  ;;  %v14217_v42 = vadd.f32 %v2634_v63, %v1922_v7  ;;  %v1933_v13 = vadd.f32 %v10377_v30, %v16648_v25  ;;  %10680 = vmatprep.mubr.msk.bf16.mxu0 %vm1027_vm4, %v10979_v20  ;;  %v14221_v21 = vrot.slane %v6449_v9, 5  ;;  %v6463_v26 = vshrl.u32 %v14191_v45, 16  ;;  %v1924_v62 = vpop.f32.mrf.mxu1  ;;  %v2650_v52 = vpop.f32.mrf.mxu0  ;;  %v16650_v30 = vld [vmem:[#allocation55_spill] sm:$0xff]  ;;  %v16651_v57 = vld [vmem:[#allocation92_spill] sm:$0xff] }
 0x1d7   : >> { %16645 = vst [vmem:[#allocation41_spill] sm:$0xff] %v14210_v51  ;;  %16646 = vst [vmem:[#allocation8_spill] sm:$0xff] %v14214_v59  ;;  %v6432_v16 = vsel %vm11297_vm5, %v6427_v5, %v6431_v50  ;;  %v14227_v29 = vrot.slane %v6436_v55, 4  ;;  %v6446_v63 = vor.u32 %v6445_v15, %v14193_v33  ;;  %v6455_v44 = vrot.slane %v6453_v8, 4  ;;  %v10980_v9 = vld [vmem:[%s11284_s25 + $0xcc] sm:$0xff]  }
 0x1d8   : >> { %16647 = vst [vmem:[#allocation10_spill] sm:$0xff] %v14217_v42  ;;  %v14230_v7 = vadd.f32 %v10443_v24, %v1933_v13  ;;  %v1925_v20 = vadd.f32 %v1924_v62, %v16650_v30  ;;  %v7646_v6 = vrot.slane %v14140_v0, 5  ;;  %v10380_v42 = vpop.f32.mrf.mxu1  ;;  %v16653_v50 = vcombine.low %v16651_v57, %v16652_v60  ;;  %v10447_v5 = vpop.f32.mrf.mxu0  ;;  %v14242_v55 = vld [vmem:[%s11284_s25 + $0x8c] sm:$0x1]  ;;  %v16655_v30 = vld [vmem:[#allocation61_spill] sm:$0xff]  ;;  %v10981_v60 = vld [vmem:[%s11284_s25 + $0xd8] sm:$0xff]  }
 0x1d9   : >> { %v14244_v24 = vrot.slane %v6459_v40, 5  ;;  %v6465_v15 = vrot.slane %v6463_v26, 4  ;;  %v6474_v8 = vshrl.u32 %v9617_v18, 16  ;;  %v6477_v13 = vshll.u32 %v9617_v18, 16  ;;  %v16656_v0 = vld [vmem:[#allocation25_spill] sm:$0xff] }
 0x1da   : >> { %16649 = vst [vmem:[#allocation42_spill] sm:$0xff] %v14230_v7  ;;  %10611 = vmatmul.mubr.msk.bf16.gmra.mxu1 %vm1027_vm4, %v16653_v50  ;;  %v14246_v62 = vadd.f32 %v2637_v12, %v1925_v20  ;;  %v1946_v25 = vadd.f32 %v10380_v42, %v16655_v30  ;;  %v16657_v7 = vld [vmem:[#allocation30_spill] sm:$0xff]  ;;  %v14254_v57 = vcombine.low %v6422_v22, %v6432_v16  ;;  %v7645_v50 = vrot.slane %v7643_v39, 4  ;;  %v1937_v51 = vpop.f32.mrf.mxu1  ;;  %v2653_v40 = vpop.f32.mrf.mxu0  ;;  %v14263_v20 = vld [vmem:[%s11284_s25 + $0x94] sm:$0xf] }
 0x1db   : >> { %v16658_v59 = vcombine.low %v16656_v0, %v16657_v7  ;;  %v6442_v26 = vsel %vm11297_vm5, %v14227_v29, %v14193_v33  ;;  %v6447_v12 = vrot.slane %v6446_v63, 4  ;;  %v6456_v18 = vor.u32 %v6455_v44, %v14221_v21 }
 0x1dc   : >> { %16654 = vst [vmem:[#allocation19_spill] sm:$0xff] %v14246_v62  ;;  %16659 = vst [vmem:[#allocation39_spill] sm:$0xff] %v14254_v57  ;;  %v7649_v42 = vrot.slane %v14162_v37, 5  ;;  %v14265_v7 = vadd.f32 %v10446_v1, %v1946_v25  ;;  %v7648_v16 = vrot.slane %v7646_v6, 4  ;;  %v6469_v39 = vshll.u32 %v14242_v55, 16  ;;  %v10381_v30 = vpop.f32.mrf.mxu1  ;;  %v10450_v0 = vpop.f32.mrf.mxu0  ;;  %v16663_v1 = vld [vmem:[#allocation64_spill] sm:$0xff] }
 0x1dd   : >> { %10614 = vmatprep.mubr.msk.bf16.mxu1 %vm1027_vm4, %v16658_v59  ;;  %v16661_v59 = vld [vmem:[#allocation62_spill] sm:$0xff]  ;;  %10681 = vmatmul.mubr.msk.bf16.gmra.mxu0 %vm1027_vm4, %v10980_v9  ;;  %v6466_v33 = vor.u32 %v6465_v15, %v14244_v24  ;;  %v7652_v29 = vrot.slane %v14191_v45, 5  ;;  %v6476_v63 = vrot.slane %v6474_v8, 4  ;;  %v6479_v44 = vrot.slane %v6477_v13, 5 }
 0x1de   : >> { %16660 = vst [vmem:[#allocation44_spill] sm:$0xff] %v14265_v7  ;;  %v1938_v22 = vadd.f32 %v1937_v51, %v16661_v59  ;;  %v1949_v25 = vadd.f32 %v10381_v30, %v16663_v1  ;;  %10684 = vmatprep.mubr.msk.bf16.mxu0 %vm1027_vm4, %v10981_v60  ;;  %v6483_v51 = vshll.u32 %v14263_v20, 16  ;;  %v6487_v59 = vshrl.u32 %v14263_v20, 16  ;;  %v1940_v9 = vpop.f32.mrf.mxu1  ;;  %v2666_v7 = vpop.f32.mrf.mxu0  ;;  %v16665_v60 = vld [vmem:[#allocation66_spill] sm:$0xff] }
 0x1df   : >> { %v6452_v45 = vsel %vm11297_vm5, %v6447_v12, %v14221_v21  ;;  %v6457_v15 = vrot.slane %v6456_v18, 4  ;;  %v7651_v8 = vrot.slane %v7649_v42, 4  ;;  %v14290_v30 = vsel %vm11630_vm8, %v7648_v16, %v7649_v42  ;;  %v14297_v21 = vld [vmem:[%s11284_s25 + $0x9c] sm:$0xf]  ;;  %v16668_v16 = vld [vmem:[#allocation69_spill] sm:$0xff]  ;;  %v10983_v62 = vld [vmem:[%s11284_s25 + $0xe8] sm:$0xff]  }
 0x1e0   : >> { %v14272_v37 = vadd.f32 %v2650_v52, %v1938_v22  ;;  %v14283_v52 = vsel %vm11630_vm8, %v7645_v50, %v7646_v6  ;;  %v14285_v13 = vadd.f32 %v10447_v5, %v1949_v25  ;;  %v1941_v22 = vadd.f32 %v1940_v9, %v16665_v60  ;;  %v10384_v12 = vpop.f32.mrf.mxu1  ;;  %v10451_v5 = vpop.f32.mrf.mxu0  ;;  %v10982_v50 = vld [vmem:[%s11284_s25 + $0xe0] sm:$0xff]  }
 0x1e1   : >> { %v7655_v1 = vrot.slane %v14242_v55, 5  ;;  %v16666_v6 = vcombine.low %v13544_v47, %v13548_v3  ;;  %v6467_v18 = vrot.slane %v6466_v33, 4  ;;  %v6471_v25 = vrot.slane %v6469_v39, 5 }
 0x1e2   : >> { %16662 = vst [vmem:[#allocation45_spill] sm:$0xff] %v14272_v37  ;;  %16664 = vst [vmem:[#allocation88_spill] sm:$0xff] %v14285_v13  ;;  %v14294_v37 = vld [vmem:[%s11284_s25 + $0x98] sm:$0xf]  ;;  %v7654_v9 = vrot.slane %v7652_v29, 4  ;;  %v6480_v60 = vor.u32 %v6479_v44, %v6476_v63  ;;  %v14304_v42 = vadd.f32 %v2653_v40, %v1941_v22  ;;  %v1962_v55 = vadd.f32 %v10384_v12, %v16668_v16  ;;  %v1953_v3 = vpop.f32.mrf.mxu1 }
 0x1e3   : >> { %10615 = vmatmul.mubr.msk.bf16.gmra.mxu1 %vm1027_vm4, %v16666_v6  ;;  %v16669_v13 = vcombine.low %v13556_v35, %v13565_v10  ;;  %v14312_v57 = vrot.slane %v6483_v51, 5  ;;  %v6489_v47 = vrot.slane %v6487_v59, 4  ;;  %v2669_v6 = vpop.f32.mrf.mxu0  ;;  %v14314_v36 = vcombine.low %v6442_v26, %v6452_v45  ;;  %v16671_v44 = vld [vmem:[#allocation72_spill] sm:$0xff] }
 0x1e4   : >> { %16667 = vst [vmem:[#allocation89_spill] sm:$0xff] %v14304_v42  ;;  %v6493_v39 = vshll.u32 %v14294_v37, 16  ;;  %v6497_v40 = vshrl.u32 %v14294_v37, 16  ;;  %v6503_v33 = vshll.u32 %v14297_v21, 16  ;;  %v14319_v63 = vadd.f32 %v10450_v0, %v1962_v55  ;;  %v10385_v26 = vpop.f32.mrf.mxu1  ;;  %v16712_v42 = vld [vmem:[#allocation47_spill] sm:$0xff] }
 0x1e5   : >> { %10618 = vmatprep.mubr.msk.bf16.mxu1 %vm1027_vm4, %v16669_v13  ;;  %v1954_v35 = vadd.f32 %v1953_v3, %v16671_v44  ;;  %v6462_v51 = vsel %vm11297_vm5, %v6457_v15, %v14244_v24  ;;  %v10522_v59 = vpop.f32.mrf.mxu0  ;;  %10685 = vmatmul.mubr.msk.bf16.gmra.mxu0 %vm1027_vm4, %v10982_v50  ;;  %v6472_v45 = vsel %vm11297_vm5, %v6467_v18, %v6471_v25  ;;  %v6507_v22 = vshrl.u32 %v14297_v21, 16  ;;  %v16673_v24 = vld [vmem:[#allocation76_spill] sm:$0xff]  ;;  %v16675_v3 = vld [vmem:[#allocation77_spill] sm:$0xff] }
 0x1e6   : >> { %16670 = vst [vmem:[#allocation46_spill] sm:$0xff] %v14319_v63  ;;  %v14332_v0 = vsel %vm11630_vm8, %v7651_v8, %v7652_v29  ;;  %v14336_v13 = vsel %vm11630_vm8, %v7654_v9, %v7655_v1  ;;  %v1965_v15 = vadd.f32 %v10385_v26, %v16673_v24  ;;  %10688 = vmatprep.mubr.msk.bf16.mxu0 %vm1027_vm4, %v10983_v62  ;;  %v14343_v50 = vrot.slane %v6480_v60, 4  ;;  %v9738_v29 = vld [vmem:[%s11284_s25 + $0x90] sm:$0xe]  ;;  %v1956_v8 = vpop.f32.mrf.mxu1 }
 0x1e7   : >> { %v14339_v12 = vadd.f32 %v2666_v7, %v1954_v35  ;;  %v6490_v18 = vor.u32 %v6489_v47, %v14312_v57  ;;  %v4402_v25 = vpop.f32.mrf.mxu0  ;;  %v14347_v16 = vrot.slane %v6493_v39, 5  ;;  %v6499_v1 = vrot.slane %v6497_v40, 4  ;;  %v10984_v62 = vld [vmem:[%s11284_s25 + $0xf0] sm:$0xff]   ;;  %v14360_v35 = vld [vmem:[%s11284_s25 + $0xa0] sm:$0xf] }
 0x1e8   : >> { %v14349_v9 = vrot.slane %v6503_v33, 5  ;;  %v6509_v7 = vrot.slane %v6507_v22, 4  ;;  %v14351_v55 = vadd.f32 %v10451_v5, %v1965_v15  ;;  %v1957_v44 = vadd.f32 %v1956_v8, %v16675_v3  ;;  %v10456_v39 = vpop.f32.mrf.mxu1  ;;  %v16678_v15 = vld [vmem:[#allocation83_spill] sm:$0xff] }
 0x1e9   : >> { %16672 = vst [vmem:[#allocation90_spill] sm:$0xff] %v14339_v12  ;;  %v14355_v60 = vcombine.low %v6462_v51, %v6472_v45  ;;  %v16676_v40 = vcombine.low %v13569_v32, %v13579_v38  ;;  %v10523_v33 = vpop.f32.mrf.mxu0  ;;  %v9746_v5 = vrot.slane %v9738_v29, 9  ;;  %v7659_v26 = vrot.slane %v14263_v20, 5  ;;  %v14370_v45 = vld [vmem:[%s11284_s25 + $0xa4] sm:$0xf]  ;;  %v10985_v32 = vld [vmem:[%s11284_s25 + $0xfc] sm:$0xff]  }
 0x1ea   : >> { %16674 = vst [vmem:[#allocation22_spill] sm:$0xff] %v14351_v55  ;;  %v7662_v22 = vrot.slane %v14294_v37, 5  ;;  %v7665_v51 = vrot.slane %v14297_v21, 5  ;;  %v14372_v24 = vadd.f32 %v2669_v6, %v1957_v44  ;;  %v3365_v8 = vadd.f32 %v10456_v39, %v16678_v15  ;;  %v3108_v20 = vpop.f32.mrf.mxu1 }
 0x1eb   : >> { %10619 = vmatmul.mubr.msk.bf16.gmra.mxu1 %vm1027_vm4, %v16676_v40  ;;  %v16679_v3 = vcombine.low %v13596_v19, %v13604_v54  ;;  %v6491_v38 = vrot.slane %v6490_v18, 4  ;;  %v6517_v29 = vshrl.u32 %v14360_v35, 16  ;;  %v4405_v40 = vpop.f32.mrf.mxu0  ;;  %v6486_v37 = vsel %vm11297_vm5, %v14343_v50, %v14312_v57  ;;  %v16681_v54 = vld [vmem:[#allocation86_spill] sm:$0xff] }
 0x1ec   : >> { %16677 = vst [vmem:[#allocation49_spill] sm:$0xff] %v14372_v24  ;;  %v6500_v21 = vor.u32 %v6499_v1, %v14347_v16  ;;  %v6510_v6 = vor.u32 %v6509_v7, %v14349_v9  ;;  %v6513_v44 = vshll.u32 %v14360_v35, 16  ;;  %v14388_v19 = vadd.f32 %v10522_v59, %v3365_v8  ;;  %v16683_v24 = vld [vmem:[#allocation87_spill] sm:$0xff] }
 0x1ed   : >> { %10622 = vmatprep.mubr.msk.bf16.mxu1 %vm1027_vm4, %v16679_v3  ;;  %v3363_v18 = vadd.f32 %v3108_v20, %v16681_v54  ;;  %v6523_v39 = vshll.u32 %v14370_v45, 16  ;;  %v6527_v15 = vshrl.u32 %v14370_v45, 16  ;;  %v10457_v3 = vpop.f32.mrf.mxu1  ;;  %v10526_v47 = vpop.f32.mrf.mxu0  ;;  %10689 = vmatmul.mubr.msk.bf16.gmra.mxu0 %vm1027_vm4, %v10984_v62  ;;  %v7661_v57 = vrot.slane %v7659_v26, 4  ;;  %v14403_v20 = vld [vmem:[%s11284_s25 + $0xa8] sm:$0xf] }
 0x1ee   : >> { %16680 = vst [vmem:[#allocation51_spill] sm:$0xff] %v14388_v19  ;;  %v7664_v50 = vrot.slane %v7662_v22, 4  ;;  %v7667_v1 = vrot.slane %v7665_v51, 4  ;;  %v7668_v7 = vrot.slane %v14360_v35, 5  ;;  %v3366_v59 = vadd.f32 %v10457_v3, %v16683_v24  ;;  %10692 = vmatprep.mubr.msk.bf16.mxu0 %vm1027_vm4, %v10985_v32  ;;  %v16685_v32 = vld [vmem:[#allocation26_spill] sm:$0xff] }
 0x1ef   : >> { %v14395_v10 = vadd.f32 %v4402_v25, %v3363_v18  ;;  %v6496_v8 = vsel %vm11297_vm5, %v6491_v38, %v14347_v16  ;;  %v6519_v62 = vrot.slane %v6517_v29, 4  ;;  %v3111_v54 = vpop.f32.mrf.mxu1  ;;  %v4418_v19 = vpop.f32.mrf.mxu0  ;;  %v6501_v55 = vrot.slane %v6500_v21, 4  ;;  %v14415_v38 = vld [vmem:[%s11284_s25 + $0xac] sm:$0xf] }
 0x1f0   : >> { %v14407_v25 = vsel %vm11630_vm8, %v9746_v5, %v7659_v26  ;;  %v6511_v35 = vrot.slane %v6510_v6, 4  ;;  %v6515_v18 = vrot.slane %v6513_v44, 5  ;;  %v14409_v24 = vadd.f32 %v10523_v33, %v3366_v59  ;;  %v10986_v26 = vld [vmem:[%s11284_s25 + $0x104] sm:$0xff]   ;;  %v16689_v59 = vld [vmem:[#allocation11_spill] sm:$0xff] }
 0x1f1   : >> { %16682 = vst [vmem:[#allocation55_spill] sm:$0xff] %v14395_v10  ;;  %v3364_v3 = vadd.f32 %v3111_v54, %v16685_v32  ;;  %v14412_v10 = vrot.slane %v6523_v39, 5  ;;  %v6529_v16 = vrot.slane %v6527_v15, 4  ;;  %v10460_v29 = vpop.f32.mrf.mxu1  ;;  %v16686_v21 = vcombine.low %v13608_v2, %v13612_v28  ;;  %v10527_v5 = vpop.f32.mrf.mxu0  ;;  %v16688_v2 = vld [vmem:[#allocation24_spill] sm:$0xff] }
 0x1f2   : >> { %16684 = vst [vmem:[#allocation92_spill] sm:$0xff] %v14409_v24  ;;  %v14424_v33 = vsel %vm11630_vm8, %v7661_v57, %v7662_v22  ;;  %v14428_v6 = vsel %vm11630_vm8, %v7664_v50, %v7665_v51  ;;  %v14432_v44 = vsel %vm11630_vm8, %v7667_v1, %v7668_v7  ;;  %v6533_v39 = vshll.u32 %v14403_v20, 16  ;;  %v10987_v22 = vld [vmem:[%s11284_s25 + $0x10c] sm:$0xff]  }
 0x1f3   : >> { %10623 = vmatmul.mubr.msk.bf16.gmra.mxu1 %vm1027_vm4, %v16686_v21  ;;  %v14435_v15 = vadd.f32 %v4405_v40, %v3364_v3  ;;  %v3369_v28 = vadd.f32 %v10460_v29, %v16688_v2  ;;  %v16690_v54 = vcombine.low %v13616_v11, %v16689_v59  ;;  %v6520_v57 = vor.u32 %v6519_v62, %v6515_v18  ;;  %v3124_v50 = vpop.f32.mrf.mxu1  ;;  %v4421_v32 = vpop.f32.mrf.mxu0  ;;  %v16692_v29 = vld [vmem:[#allocation27_spill] sm:$0xff] }
 0x1f4   : >> { %v6537_v51 = vshrl.u32 %v14403_v20, 16  ;;  %v14444_v21 = vcombine.low %v6486_v37, %v6496_v8  ;;  %v6506_v40 = vsel %vm11297_vm5, %v6501_v55, %v14349_v9  ;;  %v6516_v1 = vsel %vm11297_vm5, %v6511_v35, %v6515_v18 }
 0x1f5   : >> { %16687 = vst [vmem:[#allocation93_spill] sm:$0xff] %v14435_v15  ;;  %10626 = vmatprep.mubr.msk.bf16.mxu1 %vm1027_vm4, %v16690_v54  ;;  %v6543_v3 = vshll.u32 %v14415_v38, 16  ;;  %v14452_v11 = vadd.f32 %v10526_v47, %v3369_v28  ;;  %v3367_v62 = vadd.f32 %v3124_v50, %v16692_v29  ;;  %v6530_v2 = vor.u32 %v6529_v16, %v14412_v10  ;;  %v10461_v8 = vpop.f32.mrf.mxu1  ;;  %v10530_v59 = vpop.f32.mrf.mxu0  ;;  %v16694_v28 = vld [vmem:[#allocation29_spill] sm:$0xff]  ;;  %v14472_v29 = vld [vmem:[%s11284_s25 + $0xb8] sm:$0xf] }
 0x1f6   : >> { %v6547_v37 = vshrl.u32 %v14415_v38, 16  ;;  %10693 = vmatmul.mubr.msk.bf16.gmra.mxu0 %vm1027_vm4, %v10986_v26  ;;  %v14462_v47 = vrot.slane %v6533_v39, 5  ;;  %v7670_v35 = vrot.slane %v7668_v7, 4  ;;  %v3370_v54 = vadd.f32 %v10461_v8, %v16694_v28  ;;  %v9626_v26 = vld [vmem:[%s11284_s25 + $0xb4] sm:$0xf] }
 0x1f7   : >> { %16691 = vst [vmem:[#allocation61_spill] sm:$0xff] %v14452_v11  ;;  %v14464_v18 = vadd.f32 %v4418_v19, %v3367_v62  ;;  %10696 = vmatprep.mubr.msk.bf16.mxu0 %vm1027_vm4, %v10987_v22  ;;  %v14468_v16 = vrot.slane %v6520_v57, 4  ;;  %v6539_v50 = vrot.slane %v6537_v51, 4  ;;  %v3127_v9 = vpop.f32.mrf.mxu1  ;;  %v4434_v11 = vpop.f32.mrf.mxu0  ;;  %v14474_v55 = vcombine.low %v6506_v40, %v6516_v1  ;;  %v16696_v8 = vld [vmem:[#allocation91_spill] sm:$0xff] }
 0x1f8   : >> { %v7671_v7 = vrot.slane %v14370_v45, 5  ;;  %v14477_v19 = vrot.slane %v6543_v3, 5  ;;  %v6549_v39 = vrot.slane %v6547_v37, 4  ;;  %v14479_v62 = vadd.f32 %v10527_v5, %v3370_v54  ;;  %v14484_v28 = vld [vmem:[%s11284_s25 + $0xb0] sm:$0x1]  ;;  %v10988_v1 = vld [vmem:[%s11284_s25 + $0x114] sm:$0xff]  }
 0x1f9   : >> { %16693 = vst [vmem:[#allocation25_spill] sm:$0xff] %v14464_v18  ;;  %v3368_v22 = vadd.f32 %v3127_v9, %v16696_v8  ;;  %v6531_v57 = vrot.slane %v6530_v2, 4  ;;  %v7674_v51 = vrot.slane %v14403_v20, 5  ;;  %v10464_v18 = vpop.f32.mrf.mxu1  ;;  %v16697_v40 = vcombine.low %v13646_v41, %v13655_v23  ;;  %v10531_v45 = vpop.f32.mrf.mxu0  ;;  %v16699_v2 = vld [vmem:[#allocation94_spill] sm:$0xff]  ;;  %v10989_v41 = vld [vmem:[%s11284_s25 + $0x120] sm:$0xff]  }
 0x1fa   : >> { %16695 = vst [vmem:[#allocation30_spill] sm:$0xff] %v14479_v62  ;;  %v6558_v3 = vshrl.u32 %v9626_v26, 16  ;;  %v6561_v37 = vshll.u32 %v9626_v26, 16  ;;  %v6567_v5 = vshll.u32 %v14472_v29, 16  ;;  %v6571_v54 = vshrl.u32 %v14472_v29, 16 }
 0x1fb   : >> { %10627 = vmatmul.mubr.msk.bf16.gmra.mxu1 %vm1027_vm4, %v16697_v40  ;;  %v14493_v9 = vadd.f32 %v4421_v32, %v3368_v22  ;;  %v3373_v20 = vadd.f32 %v10464_v18, %v16699_v2  ;;  %v16700_v8 = vcombine.low %v13669_v49, %v13679_v58  ;;  %v6526_v23 = vsel %vm11297_vm5, %v14468_v16, %v14412_v10  ;;  %v3140_v40 = vpop.f32.mrf.mxu1  ;;  %v4437_v62 = vpop.f32.mrf.mxu0  ;;  %v16702_v2 = vld [vmem:[#allocation21_spill] sm:$0xff] }
 0x1fc   : >> { %v6540_v26 = vor.u32 %v6539_v50, %v14462_v47  ;;  %v14508_v32 = vsel %vm11630_vm8, %v7670_v35, %v7671_v7  ;;  %v6550_v18 = vor.u32 %v6549_v39, %v14477_v19  ;;  %v6553_v49 = vshll.u32 %v14484_v28, 16  ;;  %v14521_v35 = vld [vmem:[%s11284_s25 + $0xbc] sm:$0xf] }
 0x1fd   : >> { %16698 = vst [vmem:[#allocation62_spill] sm:$0xff] %v14493_v9  ;;  %10630 = vmatprep.mubr.msk.bf16.mxu1 %vm1027_vm4, %v16700_v8  ;;  %v7677_v58 = vrot.slane %v14415_v38, 5  ;;  %v14513_v22 = vadd.f32 %v10530_v59, %v3373_v20  ;;  %v3371_v8 = vadd.f32 %v3140_v40, %v16702_v2  ;;  %v6536_v10 = vsel %vm11297_vm5, %v6531_v57, %v14462_v47  ;;  %v10465_v50 = vpop.f32.mrf.mxu1  ;;  %v10534_v9 = vpop.f32.mrf.mxu0  ;;  %v16704_v20 = vld [vmem:[#allocation95_spill] sm:$0xff] }
 0x1fe   : >> { %v7673_v16 = vrot.slane %v7671_v7, 4  ;;  %10697 = vmatmul.mubr.msk.bf16.gmra.mxu0 %vm1027_vm4, %v10988_v1  ;;  %v6560_v39 = vrot.slane %v6558_v3, 4  ;;  %v6563_v15 = vrot.slane %v6561_v37, 5  ;;  %v14523_v24 = vrot.slane %v6567_v5, 5  ;;  %v14531_v37 = vld [vmem:[%s11284_s25 + $0xc0] sm:$0xf] }
 0x1ff   : >> { %16701 = vst [vmem:[#allocation64_spill] sm:$0xff] %v14513_v22  ;;  %v6573_v38 = vrot.slane %v6571_v54, 4  ;;  %v14525_v59 = vadd.f32 %v4434_v11, %v3371_v8  ;;  %v3374_v40 = vadd.f32 %v10465_v50, %v16704_v20  ;;  %10700 = vmatprep.mubr.msk.bf16.mxu0 %vm1027_vm4, %v10989_v41  ;;  %v6541_v47 = vrot.slane %v6540_v26, 4  ;;  %v3143_v57 = vpop.f32.mrf.mxu1  ;;  %v4450_v2 = vpop.f32.mrf.mxu0  ;;  %v16706_v11 = vld [vmem:[#allocation96_spill] sm:$0xff]  ;;  %v16708_v20 = vld [vmem:[#allocation101_spill] sm:$0xff] }
 0x200   : >> { %v7676_v7 = vrot.slane %v7674_v51, 4  ;;  %v6551_v1 = vrot.slane %v6550_v18, 4  ;;  %v6555_v22 = vrot.slane %v6553_v49, 5  ;;  %v7679_v12 = vrot.slane %v7677_v58, 4  ;;  %v16707_v50 = vld [vmem:[#allocation100_spill] sm:$0xff]  ;;  %v10990_v49 = vld [vmem:[%s11284_s25 + $0x128] sm:$0xff]  }
 0x201   : >> { %16703 = vst [vmem:[#allocation66_spill] sm:$0xff] %v14525_v59  ;;  %v7680_v3 = vrot.slane %v14484_v28, 5  ;;  %v14533_v5 = vadd.f32 %v10531_v45, %v3374_v40  ;;  %v3372_v54 = vadd.f32 %v3143_v57, %v16706_v11  ;;  %v6577_v8 = vshll.u32 %v14521_v35, 16  ;;  %v10468_v26 = vpop.f32.mrf.mxu1  ;;  %v10535_v18 = vpop.f32.mrf.mxu0 }
 0x202   : >> { %v6581_v41 = vshrl.u32 %v14521_v35, 16  ;;  %v16709_v59 = vcombine.low %v16707_v50, %v16708_v20  ;;  %v14543_v28 = vcombine.low %v6526_v23, %v6536_v10  ;;  %v14547_v45 = vsel %vm11630_vm8, %v7673_v16, %v7674_v51  ;;  %v16713_v50 = vld [vmem:[#allocation103_spill] sm:$0xff] }
 0x203   : >> { %16705 = vst [vmem:[#allocation69_spill] sm:$0xff] %v14533_v5  ;;  %v6564_v40 = vor.u32 %v6563_v15, %v6560_v39  ;;  %v6574_v57 = vor.u32 %v6573_v38, %v14523_v24  ;;  %v14550_v11 = vadd.f32 %v4437_v62, %v3372_v54  ;;  %v16711_v5 = vld [vmem:[#allocation32_spill] sm:$0xff]  ;;  %v16714_v20 = vcombine.low %v16712_v42, %v16713_v50  ;;  %v3156_v15 = vpop.f32.mrf.mxu1  ;;  %v4453_v10 = vpop.f32.mrf.mxu0 }
 0x204   : >> { %10631 = vmatmul.mubr.msk.bf16.gmra.mxu1 %vm1027_vm4, %v16709_v59  ;;  %v3377_v63 = vadd.f32 %v10468_v26, %v16711_v5  ;;  %v10991_v59 = vld [vmem:[%s11284_s25 + $0x130] sm:$0xff]   ;;  %v6546_v23 = vsel %vm11297_vm5, %v6541_v47, %v14477_v19  ;;  %v6587_v51 = vshll.u32 %v14531_v37, 16  ;;  %v6556_v62 = vsel %vm11297_vm5, %v6551_v1, %v6555_v22  ;;  %v16718_v19 = vld [vmem:[#allocation36_spill] sm:$0xff] }
 0x205   : >> { %16710 = vst [vmem:[#allocation72_spill] sm:$0xff] %v14550_v11  ;;  %10634 = vmatprep.mubr.msk.bf16.mxu1 %vm1027_vm4, %v16714_v20  ;;  %v14566_v16 = vsel %vm11630_vm8, %v7676_v7, %v7677_v58  ;;  %v14570_v42 = vsel %vm11630_vm8, %v7679_v12, %v7680_v3  ;;  %v6591_v39 = vshrl.u32 %v14531_v37, 16  ;;  %v3375_v47 = vadd.f32 %v3156_v15, %v16718_v19  ;;  %v9739_v26 = vld [vmem:[%s11284_s25 + $0xb4] sm:$0xe]  ;;  %v10469_v22 = vpop.f32.mrf.mxu1  ;;  %v10538_v1 = vpop.f32.mrf.mxu0  ;;  %v16720_v3 = vld [vmem:[#allocation40_spill] sm:$0xff] }
 0x206   : >> { %16715 = vst [vmem:[#allocation76_spill] sm:$0xff] %v14566_v16  ;;  %16716 = vst [vmem:[#allocation77_spill] sm:$0xff] %v14570_v42  ;;  %v14573_v38 = vadd.f32 %v10534_v9, %v3377_v63  ;;  %v14576_v5 = vrot.slane %v6577_v8, 5  ;;  %v6583_v54 = vrot.slane %v6581_v41, 4  ;;  %10701 = vmatmul.mubr.msk.bf16.gmra.mxu0 %vm1027_vm4, %v10990_v49  ;;  %v14582_v12 = vrot.slane %v6564_v40, 4  ;;  %v16742_v16 = vld [vmem:[#allocation108_spill] sm:$0xff] }
 0x207   : >> { %v14584_v7 = vrot.slane %v6574_v57, 4  ;;  %v7684_v63 = vrot.slane %v14472_v29, 5  ;;  %v14587_v9 = vadd.f32 %v4450_v2, %v3375_v47  ;;  %v3378_v8 = vadd.f32 %v10469_v22, %v16720_v3  ;;  %10704 = vmatprep.mubr.msk.bf16.mxu0 %vm1027_vm4, %v10991_v59  ;;  %v14592_v41 = vld [vmem:[%s11284_s25 + $0xc4] sm:$0xf]  ;;  %v3159_v20 = vpop.f32.mrf.mxu1  ;;  %v4466_v40 = vpop.f32.mrf.mxu0  ;;  %v16723_v47 = vld [vmem:[#allocation38_spill] sm:$0xff]  ;;  %v10992_v29 = vld [vmem:[%s11284_s25 + $0x138] sm:$0xff]  }
 0x208   : >> { %16717 = vst [vmem:[#allocation83_spill] sm:$0xff] %v14573_v38  ;;  %v14594_v50 = vrot.slane %v6587_v51, 5  ;;  %v6593_v49 = vrot.slane %v6591_v39, 4  ;;  %v14596_v15 = vcombine.low %v6546_v23, %v6556_v62  ;;  %v9747_v2 = vrot.slane %v9739_v26, 9  ;;  %v14607_v39 = vld [vmem:[%s11284_s25 + $0xc8] sm:$0xf] }
 0x209   : >> { %16719 = vst [vmem:[#allocation86_spill] sm:$0xff] %v14587_v9  ;;  %v6601_v57 = vshrl.u32 %v14592_v41, 16  ;;  %v14601_v19 = vadd.f32 %v10535_v18, %v3378_v8  ;;  %v3376_v59 = vadd.f32 %v3159_v20, %v16723_v47  ;;  %v6584_v51 = vor.u32 %v6583_v54, %v14576_v5  ;;  %v10472_v3 = vpop.f32.mrf.mxu1  ;;  %v16724_v23 = vld [vmem:[#allocation104_spill] sm:$0xff]  ;;  %v10539_v26 = vpop.f32.mrf.mxu0  ;;  %v16728_v47 = vld [vmem:[#allocation9_spill] sm:$0xff] }
 0x20a   : >> { %16721 = vst [vmem:[#allocation87_spill] sm:$0xff] %v14596_v15  ;;  %v7687_v22 = vrot.slane %v14521_v35, 5  ;;  %v16725_v62 = vld [vmem:[#allocation52_spill] sm:$0xff]  ;;  %v6570_v18 = vsel %vm11297_vm5, %v14582_v12, %v14523_v24  ;;  %v7686_v8 = vrot.slane %v7684_v63, 4  ;;  %v6597_v54 = vshll.u32 %v14592_v41, 16  ;;  %v10993_v9 = vld [vmem:[%s11284_s25 + $0x144] sm:$0xff]  }
 0x20b   : >> { %16722 = vst [vmem:[#allocation26_spill] sm:$0xff] %v14601_v19  ;;  %v16726_v58 = vcombine.low %v16724_v23, %v16725_v62  ;;  %v7690_v35 = vrot.slane %v14531_v37, 5  ;;  %v14620_v20 = vadd.f32 %v4453_v10, %v3376_v59  ;;  %v3381_v19 = vadd.f32 %v10472_v3, %v16728_v47  ;;  %v16729_v23 = vld [vmem:[#allocation105_spill] sm:$0xff]  ;;  %v16730_v62 = vld [vmem:[#allocation50_spill] sm:$0xff]  ;;  %v3172_v38 = vpop.f32.mrf.mxu1  ;;  %v4469_v11 = vpop.f32.mrf.mxu0 }
 0x20c   : >> { %v6580_v24 = vsel %vm11297_vm5, %v14584_v7, %v14576_v5  ;;  %v6594_v12 = vor.u32 %v6593_v49, %v14594_v50  ;;  %v14635_v37 = vsel %vm11630_vm8, %v9747_v2, %v7684_v63  ;;  %v14638_v10 = vld [vmem:[%s11284_s25 + $0xcc] sm:$0xf]  ;;  %v6603_v59 = vrot.slane %v6601_v57, 4 }
 0x20d   : >> { %10635 = vmatmul.mubr.msk.bf16.gmra.mxu1 %vm1027_vm4, %v16726_v58  ;;  %16727 = vst [vmem:[#allocation24_spill] sm:$0xff] %v14620_v20  ;;  %v16731_v58 = vcombine.low %v16729_v23, %v16730_v62  ;;  %16732 = vst [vmem:[#allocation11_spill] sm:$0xff] %v14635_v37  ;;  %v6607_v3 = vshll.u32 %v14607_v39, 16  ;;  %v6611_v47 = vshrl.u32 %v14607_v39, 16  ;;  %v14642_v23 = vadd.f32 %v10538_v1, %v3381_v19  ;;  %v16734_v62 = vld [vmem:[#allocation97_spill] sm:$0xff]  ;;  %v10542_v20 = vpop.f32.mrf.mxu0  ;;  %v16737_v1 = vld [vmem:[#allocation43_spill] sm:$0xff] }
 0x20e   : >> { %v3379_v5 = vadd.f32 %v3172_v38, %v16734_v62  ;;  %v6585_v7 = vrot.slane %v6584_v51, 4  ;;  %v7689_v49 = vrot.slane %v7687_v22, 4  ;;  %10705 = vmatmul.mubr.msk.bf16.gmra.mxu0 %vm1027_vm4, %v10992_v29  ;;  %v14648_v63 = vsel %vm11630_vm8, %v7686_v8, %v7687_v22  ;;  %v14657_v62 = vld [vmem:[%s11284_s25 + $0xd0] sm:$0xf]  ;;  %v14711_v37 = vld [vmem:[%s11284_s25 + $0xd4] sm:$0x1] }
 0x20f   : >> { %10638 = vmatprep.mubr.msk.bf16.mxu1 %vm1027_vm4, %v16731_v58  ;;  %16733 = vst [vmem:[#allocation27_spill] sm:$0xff] %v14642_v23  ;;  %v10473_v58 = vpop.f32.mrf.mxu1  ;;  %16735 = vst [vmem:[#allocation29_spill] sm:$0xff] %v14648_v63  ;;  %v6599_v2 = vrot.slane %v6597_v54, 5  ;;  %v7692_v57 = vrot.slane %v7690_v35, 4  ;;  %v7693_v15 = vrot.slane %v14592_v41, 5  ;;  %10708 = vmatprep.mubr.msk.bf16.mxu0 %vm1027_vm4, %v10993_v9  ;;  %v6595_v38 = vrot.slane %v6594_v12, 4  ;;  %v4482_v23 = vpop.f32.mrf.mxu0 }
 0x210   : >> { %v14651_v42 = vadd.f32 %v4466_v40, %v3379_v5  ;;  %v3382_v19 = vadd.f32 %v10473_v58, %v16737_v1  ;;  %v6617_v51 = vshll.u32 %v14638_v10, 16  ;;  %v14659_v8 = vrot.slane %v6607_v3, 5  ;;  %v16739_v5 = vld [vmem:[#allocation98_spill] sm:$0xff] }
 0x211   : >> { %v3175_v29 = vpop.f32.mrf.mxu1  ;;  %v6604_v22 = vor.u32 %v6603_v59, %v6599_v2  ;;  %v6613_v54 = vrot.slane %v6611_v47, 4  ;;  %v6621_v41 = vshrl.u32 %v14638_v10, 16  ;;  %v14665_v9 = vcombine.low %v6570_v18, %v6580_v24  ;;  %v10543_v3 = vpop.f32.mrf.mxu0  ;;  %v10994_v47 = vld [vmem:[%s11284_s25 + $0x14c] sm:$0xff]  }
 0x212   : >> { %16736 = vst [vmem:[#allocation91_spill] sm:$0xff] %v14651_v42  ;;  %v14662_v40 = vadd.f32 %v10539_v26, %v3382_v19  ;;  %v3380_v58 = vadd.f32 %v3175_v29, %v16739_v5  ;;  %v16741_v42 = vld [vmem:[#allocation59_spill] sm:$0xff]  ;;  %v6590_v26 = vsel %vm11297_vm5, %v6585_v7, %v14594_v50  ;;  %v14679_v18 = vsel %vm11630_vm8, %v7689_v49, %v7690_v35  ;;  %v16747_v5 = vld [vmem:[#allocation106_spill] sm:$0xff]  ;;  %v9635_v49 = vld [vmem:[%s11284_s25 + $0xd8] sm:$0xf] }
 0x213   : >> { %16740 = vst [vmem:[#allocation21_spill] sm:$0xff] %v14665_v9  ;;  %v10476_v1 = vpop.f32.mrf.mxu1  ;;  %v16743_v59 = vcombine.low %v16741_v42, %v16742_v16  ;;  %v14683_v24 = vsel %vm11630_vm8, %v7692_v57, %v7693_v15  ;;  %v6627_v19 = vshll.u32 %v14657_v62, 16  ;;  %v16746_v16 = vld [vmem:[#allocation99_spill] sm:$0xff]  ;;  %v14694_v7 = vrot.slane %v6617_v51, 5 }
 0x214   : >> { %16738 = vst [vmem:[#allocation94_spill] sm:$0xff] %v14662_v40  ;;  %16744 = vst [vmem:[#allocation95_spill] sm:$0xff] %v14683_v24  ;;  %v14686_v29 = vadd.f32 %v4469_v11, %v3380_v58  ;;  %v3385_v42 = vadd.f32 %v10476_v1, %v16746_v16  ;;  %v10995_v50 = vld [vmem:[%s11284_s25 + $0x154] sm:$0xff]   ;;  %v6631_v35 = vshrl.u32 %v14657_v62, 16  ;;  %v4485_v40 = vpop.f32.mrf.mxu0  ;;  %v6600_v11 = vsel %vm11297_vm5, %v6595_v38, %v6599_v2 }
 0x215   : >> { %10639 = vmatmul.mubr.msk.bf16.gmra.mxu1 %vm1027_vm4, %v16743_v59  ;;  %v16748_v59 = vld [vmem:[#allocation53_spill] sm:$0xff]  ;;  %v3188_v57 = vpop.f32.mrf.mxu1  ;;  %v14700_v58 = vrot.slane %v6604_v22, 4  ;;  %v6614_v1 = vor.u32 %v6613_v54, %v14659_v8  ;;  %v6623_v16 = vrot.slane %v6621_v41, 4  ;;  %v14713_v2 = vrot.slane %v6627_v19, 5  ;;  %v16753_v41 = vld [vmem:[#allocation48_spill] sm:$0xff] }
 0x216   : >> { %16745 = vst [vmem:[#allocation96_spill] sm:$0xff] %v14686_v29  ;;  %v16749_v12 = vcombine.low %v16747_v5, %v16748_v59  ;;  %v14703_v5 = vadd.f32 %v10542_v20, %v3385_v42  ;;  %v7696_v29 = vrot.slane %v14607_v39, 5  ;;  %v10546_v63 = vpop.f32.mrf.mxu0  ;;  %10709 = vmatmul.mubr.msk.bf16.gmra.mxu0 %vm1027_vm4, %v10994_v47  ;;  %v6633_v38 = vrot.slane %v6631_v35, 4 }
 0x217   : >> { %v10477_v9 = vpop.f32.mrf.mxu1  ;;  %v6642_v22 = vshrl.u32 %v9635_v49, 16  ;;  %v6645_v20 = vshll.u32 %v9635_v49, 16  ;;  %10712 = vmatprep.mubr.msk.bf16.mxu0 %vm1027_vm4, %v10995_v50  ;;  %v7695_v39 = vrot.slane %v7693_v15, 4  ;;  %v6610_v19 = vsel %vm11297_vm5, %v14700_v58, %v14659_v8  ;;  %v10996_v58 = vld [vmem:[%s11284_s25 + $0x15c] sm:$0xff]  }
 0x218   : >> { %10642 = vmatprep.mubr.msk.bf16.mxu1 %vm1027_vm4, %v16749_v12  ;;  %16750 = vst [vmem:[#allocation100_spill] sm:$0xff] %v14703_v5  ;;  %v16751_v12 = vld [vmem:[#allocation102_spill] sm:$0xff]  ;;  %v3386_v42 = vadd.f32 %v10477_v9, %v16753_v41  ;;  %v4498_v47 = vpop.f32.mrf.mxu0  ;;  %v6615_v35 = vrot.slane %v6614_v1, 4  ;;  %v6624_v49 = vor.u32 %v6623_v16, %v14694_v7  ;;  %v6637_v15 = vshll.u32 %v14711_v37, 16 }
 0x219   : >> { %v3383_v59 = vadd.f32 %v3188_v57, %v16751_v12  ;;  %v14719_v57 = vcombine.low %v6590_v26, %v6600_v11  ;;  %v3191_v12 = vpop.f32.mrf.mxu1  ;;  %v16756_v26 = vld [vmem:[#allocation54_spill] sm:$0xff]  ;;  %v7698_v11 = vrot.slane %v7696_v29, 4  ;;  %v16757_v51 = vcombine.low %v13817_v34, %v13857_v43 }
 0x21a   : >> { %v14730_v9 = vadd.f32 %v10543_v3, %v3386_v42  ;;  %v3384_v50 = vadd.f32 %v3191_v12, %v16756_v26  ;;  %v10547_v8 = vpop.f32.mrf.mxu0  ;;  %v6634_v1 = vor.u32 %v6633_v38, %v14713_v2  ;;  %v6644_v16 = vrot.slane %v6642_v22, 4  ;;  %v16759_v12 = vld [vmem:[#allocation56_spill] sm:$0xff] }
 0x21b   : >> { %v14715_v54 = vadd.f32 %v4482_v23, %v3383_v59  ;;  %16754 = vst [vmem:[#allocation32_spill] sm:$0xff] %v14719_v57  ;;  %v7699_v23 = vrot.slane %v14638_v10, 5  ;;  %v14728_v59 = vld [vmem:[%s11284_s25 + $0xdc] sm:$0xf]  ;;  %v10480_v41 = vpop.f32.mrf.mxu1  ;;  %v7702_v10 = vrot.slane %v14657_v62, 5  ;;  %v6647_v3 = vrot.slane %v6645_v20, 5 }
 0x21c   : >> { %16755 = vst [vmem:[#allocation47_spill] sm:$0xff] %v14730_v9  ;;  %v14741_v42 = vadd.f32 %v4485_v40, %v3384_v50  ;;  %v3389_v26 = vadd.f32 %v10480_v41, %v16759_v12  ;;  %v16760_v9 = vld [vmem:[#allocation58_spill] sm:$0xff]  ;;  %v6651_v34 = vshll.u32 %v14728_v59, 16  ;;  %v6655_v43 = vshrl.u32 %v14728_v59, 16  ;;  %v4501_v38 = vpop.f32.mrf.mxu0  ;;  %v14766_v12 = vld [vmem:[%s11284_s25 + $0xe0] sm:$0xf] }
 0x21d   : >> { %16752 = vst [vmem:[#allocation101_spill] sm:$0xff] %v14715_v54  ;;  %10643 = vmatmul.mubr.msk.bf16.gmra.mxu1 %vm1027_vm4, %v16757_v51  ;;  %v16761_v54 = vld [vmem:[#allocation70_spill] sm:$0xff]  ;;  %v3204_v51 = vpop.f32.mrf.mxu1  ;;  %v6620_v62 = vsel %vm11297_vm5, %v6615_v35, %v14694_v7  ;;  %v6625_v40 = vrot.slane %v6624_v49, 4  ;;  %v14755_v22 = vsel %vm11630_vm8, %v7695_v39, %v7696_v29  ;;  %v7701_v20 = vrot.slane %v7699_v23, 4 }
 0x21e   : >> { %16758 = vst [vmem:[#allocation103_spill] sm:$0xff] %v14741_v42  ;;  %v16762_v5 = vcombine.low %v16760_v9, %v16761_v54  ;;  %v14757_v54 = vadd.f32 %v10546_v63, %v3389_v26  ;;  %v14762_v50 = vsel %vm11630_vm8, %v7698_v11, %v7699_v23  ;;  %v7705_v41 = vrot.slane %v14711_v37, 5  ;;  %v10550_v35 = vpop.f32.mrf.mxu0  ;;  %10713 = vmatmul.mubr.msk.bf16.gmra.mxu0 %vm1027_vm4, %v10996_v58  ;;  %v14770_v63 = vld [vmem:[%s11284_s25 + $0xe4] sm:$0xf]  ;;  %v16768_v11 = vld [vmem:[#allocation7_spill] sm:$0xff] }
 0x21f   : >> { %v10481_v7 = vpop.f32.mrf.mxu1  ;;  %v6635_v49 = vrot.slane %v6634_v1, 4  ;;  %v6639_v29 = vrot.slane %v6637_v15, 5  ;;  %v7704_v39 = vrot.slane %v7702_v10, 4  ;;  %v6648_v42 = vor.u32 %v6647_v3, %v6644_v16  ;;  %v16767_v23 = vld [vmem:[#allocation13_spill] sm:$0xff] }
 0x220   : >> { %10646 = vmatprep.mubr.msk.bf16.mxu1 %vm1027_vm4, %v16762_v5  ;;  %16763 = vst [vmem:[#allocation36_spill] sm:$0xff] %v14757_v54  ;;  %v16764_v5 = vld [vmem:[#allocation107_spill] sm:$0xff]  ;;  %v16769_v54 = vcombine.low %v16767_v23, %v16768_v11  ;;  %v14779_v37 = vrot.slane %v6651_v34, 5  ;;  %v6657_v57 = vrot.slane %v6655_v43, 4  ;;  %v4514_v58 = vpop.f32.mrf.mxu0  ;;  %v14781_v1 = vcombine.low %v6610_v19, %v6620_v62  ;;  %v16772_v62 = vld [vmem:[#allocation65_spill] sm:$0xff] }
 0x221   : >> { %v3387_v9 = vadd.f32 %v3204_v51, %v16764_v5  ;;  %v16766_v51 = vld [vmem:[#allocation109_spill] sm:$0xff]  ;;  %v3207_v24 = vpop.f32.mrf.mxu1  ;;  %v6665_v16 = vshrl.u32 %v14766_v12, 16  ;;  %v6630_v34 = vsel %vm11297_vm5, %v6625_v40, %v14713_v2  ;;  %v6671_v43 = vshll.u32 %v14770_v63, 16  ;;  %v16776_v11 = vld [vmem:[#allocation67_spill] sm:$0xff] }
 0x222   : >> { %v3390_v5 = vadd.f32 %v10481_v7, %v16766_v51  ;;  %10784 = vmatprep.mubr.msk.bf16.mxu0 %vm1027_vm4, %v16769_v54  ;;  %v16773_v54 = vld [vmem:[#allocation73_spill] sm:$0xff]  ;;  %v10551_v23 = vpop.f32.mrf.mxu0  ;;  %v6675_v2 = vshrl.u32 %v14770_v63, 16 }
 0x223   : >> { %v14772_v26 = vadd.f32 %v4498_v47, %v3387_v9  ;;  %v6661_v47 = vshll.u32 %v14766_v12, 16  ;;  %v16771_v9 = vld [vmem:[#allocation110_spill] sm:$0xff]  ;;  %v10484_v19 = vpop.f32.mrf.mxu1  ;;  %v16774_v51 = vcombine.low %v16772_v62, %v16773_v54  ;;  %v16777_v62 = vld [vmem:[#allocation63_spill] sm:$0xff]  ;;  %v14814_v54 = vrot.slane %v6648_v42, 4 }
 0x224   : >> { %v14787_v3 = vadd.f32 %v10547_v8, %v3390_v5  ;;  %v3388_v7 = vadd.f32 %v3207_v24, %v16771_v9  ;;  %v6640_v8 = vsel %vm11297_vm5, %v6635_v49, %v6639_v29  ;;  %v14802_v5 = vsel %vm11630_vm8, %v7701_v20, %v7702_v10  ;;  %v9740_v10 = vld [vmem:[%s11284_s25 + $0xd8] sm:$0xe]  ;;  %v4517_v29 = vpop.f32.mrf.mxu0 }
 0x225   : >> { %16765 = vst [vmem:[#allocation40_spill] sm:$0xff] %v14772_v26  ;;  %10647 = vmatmul.mubr.msk.bf16.gmra.mxu1 %vm1027_vm4, %v16774_v51  ;;  %v14806_v24 = vsel %vm11630_vm8, %v7704_v39, %v7705_v41  ;;  %v3393_v9 = vadd.f32 %v10484_v19, %v16776_v11  ;;  %v6658_v49 = vor.u32 %v6657_v57, %v14779_v37  ;;  %v3220_v20 = vpop.f32.mrf.mxu1  ;;  %v14818_v51 = vrot.slane %v6661_v47, 5  ;;  %v16779_v19 = vld [vmem:[#allocation71_spill] sm:$0xff]  ;;  %v16781_v47 = vld [vmem:[#allocation18_spill] sm:$0xff] }
 0x226   : >> { %16770 = vst [vmem:[#allocation38_spill] sm:$0xff] %v14787_v3  ;;  %v14809_v40 = vadd.f32 %v4501_v38, %v3388_v7  ;;  %10718 = vmatprep.mubr.msk.bf16.mxu1 %vm1027_vm4, %v16777_v62  ;;  %v6667_v41 = vrot.slane %v6665_v16, 4  ;;  %v7709_v39 = vrot.slane %v14728_v59, 5  ;;  %v7712_v38 = vrot.slane %v14766_v12, 5  ;;  %v14826_v62 = vld [vmem:[%s11284_s25 + $0xe8] sm:$0xf] }
 0x227   : >> { %v14822_v7 = vadd.f32 %v10550_v35, %v3393_v9  ;;  %v3391_v11 = vadd.f32 %v3220_v20, %v16779_v19  ;;  %v14828_v42 = vrot.slane %v6671_v43, 5  ;;  %v6677_v57 = vrot.slane %v6675_v2, 4  ;;  %v10485_v15 = vpop.f32.mrf.mxu1  ;;  %v16780_v3 = vld [vmem:[#allocation16_spill] sm:$0xff]  ;;  %v14847_v19 = vld [vmem:[%s11284_s25 + $0xec] sm:$0xf] }
 0x228   : >> { %16775 = vst [vmem:[#allocation104_spill] sm:$0xff] %v14809_v40  ;;  %v10554_v40 = vpop.f32.mrf.mxu0  ;;  %v16782_v26 = vcombine.low %v16780_v3, %v16781_v47  ;;  %v14834_v59 = vcombine.low %v6630_v34, %v6640_v8  ;;  %v9748_v35 = vrot.slane %v9740_v10, 9  ;;  %v7715_v16 = vrot.slane %v14770_v63, 5  ;;  %v16785_v43 = vld [vmem:[#allocation68_spill] sm:$0xff] }
 0x229   : >> { %16778 = vst [vmem:[#allocation52_spill] sm:$0xff] %v14822_v7  ;;  %v14839_v9 = vadd.f32 %v4514_v58, %v3391_v11  ;;  %v3394_v20 = vadd.f32 %v10485_v15, %v16785_v43  ;;  %v16786_v2 = vcombine.low %v14011_v61, %v14044_v17  ;;  %v6659_v3 = vrot.slane %v6658_v49, 4  ;;  %v3223_v34 = vpop.f32.mrf.mxu1  ;;  %v16788_v61 = vld [vmem:[#allocation57_spill] sm:$0xff] }
 0x22a   : >> { %10785 = vmatmul.mubr.msk.bf16.vlgmr.msra.gmra.mxu0 %vm1027_vm4, %v16782_v26  ;;  %16783 = vst [vmem:[#allocation9_spill] sm:$0xff] %v14834_v59  ;;  %v6685_v26 = vshrl.u32 %v14826_v62, 16  ;;  %v4530_v8 = vpop.f32.mrf.mxu0  ;;  %v6654_v63 = vsel %vm11297_vm5, %v14814_v54, %v14779_v37  ;;  %v6668_v58 = vor.u32 %v6667_v41, %v14818_v51  ;;  %v7711_v15 = vrot.slane %v7709_v39, 4 }
 0x22b   : >> { %16784 = vst [vmem:[#allocation105_spill] sm:$0xff] %v14839_v9  ;;  %10788 = vmatprep.mubr.msk.bf16.mxu0 %vm1027_vm4, %v16786_v2  ;;  %v6681_v10 = vshll.u32 %v14826_v62, 16  ;;  %v14856_v17 = vadd.f32 %v10551_v23, %v3394_v20  ;;  %v3392_v49 = vadd.f32 %v3223_v34, %v16788_v61  ;;  %v7714_v11 = vrot.slane %v7712_v38, 4  ;;  %v10488_v43 = vpop.f32.mrf.mxu1  ;;  %v16789_v2 = vld [vmem:[#allocation79_spill] sm:$0xff]  ;;  %v16791_v23 = vld [vmem:[#allocation60_spill] sm:$0xff] }
 0x22c   : >> { %v6678_v47 = vor.u32 %v6677_v57, %v14828_v42  ;;  %v10555_v12 = vpop.f32.mrf.mxu0  ;;  %v7717_v9 = vrot.slane %v7715_v16, 4  ;;  %v7718_v37 = vrot.slane %v14826_v62, 5  ;;  %v6691_v54 = vshll.u32 %v14847_v19, 16  ;;  %v14874_v34 = vld [vmem:[%s11284_s25 + $0xf0] sm:$0xf] }
 0x22d   : >> { %16787 = vst [vmem:[#allocation50_spill] sm:$0xff] %v14856_v17  ;;  %10719 = vmatmul.mubr.msk.bf16.vlgmr.msra.gmra.mxu1 %vm1027_vm4, %v16789_v2  ;;  %v6695_v41 = vshrl.u32 %v14847_v19, 16  ;;  %v14865_v7 = vadd.f32 %v4517_v29, %v3392_v49  ;;  %v3397_v20 = vadd.f32 %v10488_v43, %v16791_v23  ;;  %v6664_v57 = vsel %vm11297_vm5, %v6659_v3, %v14818_v51  ;;  %v3236_v62 = vpop.f32.mrf.mxu1  ;;  %v16793_v23 = vld [vmem:[#allocation74_spill] sm:$0xff] }
 0x22e   : >> { %10722 = vmatprep.mubr.msk.bf16.mxu1 %vm1027_vm4, %v14111_v4  ;;  %v6687_v61 = vrot.slane %v6685_v26, 4  ;;  %v4533_v2 = vpop.f32.mrf.mxu0  ;;  %v6669_v17 = vrot.slane %v6668_v58, 4  ;;  %v14878_v29 = vsel %vm11630_vm8, %v9748_v35, %v7709_v39  ;;  %v14882_v49 = vsel %vm11630_vm8, %v7711_v15, %v7712_v38  ;;  %v14892_v26 = vld [vmem:[%s11284_s25 + $0xf4] sm:$0xf] }
 0x22f   : >> { %16790 = vst [vmem:[#allocation97_spill] sm:$0xff] %v14865_v7  ;;  %v6683_v43 = vrot.slane %v6681_v10, 5  ;;  %v14884_v4 = vadd.f32 %v10554_v40, %v3397_v20  ;;  %v3395_v7 = vadd.f32 %v3236_v62, %v16793_v23  ;;  %v6679_v51 = vrot.slane %v6678_v47, 4  ;;  %v10489_v58 = vpop.f32.mrf.mxu1  ;;  %v16796_v10 = vld [vmem:[#allocation75_spill] sm:$0xff]  ;;  %v16922_v14 = vld [vmem:[#allocation104_spill] sm:$0xff] }
 0x230   : >> { %v14889_v3 = vsel %vm11630_vm8, %v7714_v11, %v7715_v16  ;;  %v10558_v59 = vpop.f32.mrf.mxu0  ;;  %v16794_v39 = vcombine.low %v14084_v46, %v14092_v31  ;;  %v14900_v40 = vsel %vm11630_vm8, %v7717_v9, %v7718_v37  ;;  %v14902_v38 = vrot.slane %v6691_v54, 5 }
 0x231   : >> { %16792 = vst [vmem:[#allocation43_spill] sm:$0xff] %v14884_v4  ;;  %v6697_v35 = vrot.slane %v6695_v41, 4  ;;  %v6701_v15 = vshll.u32 %v14874_v34, 16  ;;  %v14905_v16 = vadd.f32 %v4530_v8, %v3395_v7  ;;  %v3398_v11 = vadd.f32 %v10489_v58, %v16796_v10  ;;  %v3239_v20 = vpop.f32.mrf.mxu1  ;;  %v14954_v41 = vld [vmem:[%s11284_s25 + $0xf8] sm:$0x1] }
 0x232   : >> { %10789 = vmatmul.mubr.msk.bf16.gmra.mxu0 %vm1027_vm4, %v16794_v39  ;;  %v16797_v47 = vcombine.low %v14155_v56, %v14178_v27  ;;  %v6688_v46 = vor.u32 %v6687_v61, %v6683_v43  ;;  %v6705_v31 = vshrl.u32 %v14874_v34, 16  ;;  %v4546_v9 = vpop.f32.mrf.mxu0  ;;  %v14913_v54 = vcombine.low %v6654_v63, %v6664_v57  ;;  %v16799_v56 = vld [vmem:[#allocation12_spill] sm:$0xff] }
 0x233   : >> { %16795 = vst [vmem:[#allocation98_spill] sm:$0xff] %v14905_v16  ;;  %v6674_v7 = vsel %vm11297_vm5, %v6669_v17, %v14828_v42  ;;  %v6711_v8 = vshll.u32 %v14892_v26, 16  ;;  %v14921_v27 = vadd.f32 %v10555_v12, %v3398_v11  ;;  %v3396_v61 = vadd.f32 %v3239_v20, %v16799_v56  ;;  %v10492_v57 = vpop.f32.mrf.mxu1  ;;  %v9644_v39 = vld [vmem:[%s11284_s25 + $0xfc] sm:$0xf]  ;;  %v16802_v11 = vld [vmem:[#allocation37_spill] sm:$0xff] }
 0x234   : >> { %10792 = vmatprep.mubr.msk.bf16.mxu0 %vm1027_vm4, %v16797_v47  ;;  %v6684_v62 = vsel %vm11297_vm5, %v6679_v51, %v6683_v43  ;;  %v6715_v63 = vshrl.u32 %v14892_v26, 16  ;;  %v10559_v23 = vpop.f32.mrf.mxu0  ;;  %v6698_v17 = vor.u32 %v6697_v35, %v14902_v38  ;;  %v14932_v12 = vrot.slane %v6701_v15, 5  ;;  %v16801_v43 = vld [vmem:[#allocation6_spill] sm:$0xff]  ;;  %v14943_v20 = vld [vmem:[%s11284_s25 + $0x100] sm:$0xf]  ;;  %v16806_v16 = vld [vmem:[#allocation8_spill] sm:$0xff] }
 0x235   : >> { %16798 = vst [vmem:[#allocation59_spill] sm:$0xff] %v14921_v27  ;;  %10723 = vmatmul.mubr.msk.bf16.gmra.mxu1 %vm1027_vm4, %v14129_v53  ;;  %v7720_v58 = vrot.slane %v7718_v37, 4  ;;  %v14935_v10 = vadd.f32 %v4533_v2, %v3396_v61  ;;  %v3401_v51 = vadd.f32 %v10492_v57, %v16801_v43  ;;  %v14940_v47 = vrot.slane %v6688_v46, 4  ;;  %v3252_v56 = vpop.f32.mrf.mxu1  ;;  %v16804_v57 = vld [vmem:[#allocation14_spill] sm:$0xff]  ;;  %v16805_v27 = vld [vmem:[#allocation41_spill] sm:$0xff] }
 0x236   : >> { %10726 = vmatprep.mubr.msk.bf16.mxu1 %vm1027_vm4, %v16802_v11  ;;  %v6707_v53 = vrot.slane %v6705_v31, 4  ;;  %v4549_v42 = vpop.f32.mrf.mxu0  ;;  %v14945_v35 = vcombine.low %v6674_v7, %v6684_v62  ;;  %v7721_v37 = vrot.slane %v14847_v19, 5  ;;  %v14948_v15 = vrot.slane %v6711_v8, 5 }
 0x237   : >> { %16800 = vst [vmem:[#allocation108_spill] sm:$0xff] %v14935_v10  ;;  %v6717_v2 = vrot.slane %v6715_v63, 4  ;;  %v14950_v61 = vadd.f32 %v10558_v59, %v3401_v51  ;;  %v3399_v43 = vadd.f32 %v3252_v56, %v16804_v57  ;;  %v6726_v46 = vshrl.u32 %v9644_v39, 16  ;;  %v10493_v31 = vpop.f32.mrf.mxu1  ;;  %v16809_v63 = vld [vmem:[#allocation78_spill] sm:$0xff]  ;;  %v16812_v57 = vld [vmem:[#allocation80_spill] sm:$0xff] }
 0x238   : >> { %v6729_v11 = vshll.u32 %v9644_v39, 16  ;;  %v10562_v10 = vpop.f32.mrf.mxu0  ;;  %v16807_v4 = vcombine.low %v16805_v27, %v16806_v16  ;;  %v6699_v7 = vrot.slane %v6698_v17, 4  ;;  %v7724_v19 = vrot.slane %v14874_v34, 5 }
 0x239   : >> { %16803 = vst [vmem:[#allocation99_spill] sm:$0xff] %v14950_v61  ;;  %v6735_v8 = vshll.u32 %v14943_v20, 16  ;;  %v6739_v59 = vshrl.u32 %v14943_v20, 16  ;;  %v14963_v62 = vadd.f32 %v4546_v9, %v3399_v43  ;;  %v3402_v51 = vadd.f32 %v10493_v31, %v16809_v63  ;;  %v3255_v16 = vpop.f32.mrf.mxu1  ;;  %v16813_v31 = vld [vmem:[#allocation39_spill] sm:$0xff] }
 0x23a   : >> { %10793 = vmatmul.mubr.msk.bf16.gmra.mxu0 %vm1027_vm4, %v16807_v4  ;;  %v16810_v39 = vcombine.low %v14283_v52, %v14290_v30  ;;  %v6694_v4 = vsel %vm11297_vm5, %v14940_v47, %v14902_v38  ;;  %v6708_v34 = vor.u32 %v6707_v53, %v14932_v12  ;;  %v4562_v27 = vpop.f32.mrf.mxu0  ;;  %v14977_v9 = vsel %vm11630_vm8, %v7720_v58, %v7721_v37 }
 0x23b   : >> { %16808 = vst [vmem:[#allocation106_spill] sm:$0xff] %v14963_v62  ;;  %v6718_v17 = vor.u32 %v6717_v2, %v14948_v15  ;;  %v6721_v52 = vshll.u32 %v14954_v41, 16  ;;  %v7727_v30 = vrot.slane %v14892_v26, 5  ;;  %v14982_v56 = vadd.f32 %v10559_v23, %v3402_v51  ;;  %v10496_v53 = vpop.f32.mrf.mxu1 }
 0x23c   : >> { %10796 = vmatprep.mubr.msk.bf16.mxu0 %vm1027_vm4, %v16810_v39  ;;  %v3400_v43 = vadd.f32 %v3255_v16, %v16812_v57  ;;  %v6728_v38 = vrot.slane %v6726_v46, 4  ;;  %v6731_v47 = vrot.slane %v6729_v11, 5  ;;  %v10563_v63 = vpop.f32.mrf.mxu0  ;;  %v6704_v58 = vsel %vm11297_vm5, %v6699_v7, %v14932_v12  ;;  %v14991_v39 = vld [vmem:[%s11284_s25 + $0x104] sm:$0xf]  ;;  %v16815_v16 = vld [vmem:[#allocation28_spill] sm:$0xff] }
 0x23d   : >> { %16811 = vst [vmem:[#allocation53_spill] sm:$0xff] %v14982_v56  ;;  %10727 = vmatmul.mubr.msk.bf16.gmra.mxu1 %vm1027_vm4, %v16813_v31  ;;  %v7723_v2 = vrot.slane %v7721_v37, 4  ;;  %v14993_v26 = vrot.slane %v6735_v8, 5  ;;  %v6741_v23 = vrot.slane %v6739_v59, 4  ;;  %v3405_v46 = vadd.f32 %v10496_v53, %v16815_v16  ;;  %v15001_v31 = vld [vmem:[%s11284_s25 + $0x108] sm:$0xf]  ;;  %v3268_v56 = vpop.f32.mrf.mxu1 }
 0x23e   : >> { %v14995_v51 = vadd.f32 %v4549_v42, %v3400_v43  ;;  %10730 = vmatprep.mubr.msk.bf16.mxu1 %vm1027_vm4, %v14314_v36  ;;  %v6709_v11 = vrot.slane %v6708_v34, 4  ;;  %v7726_v57 = vrot.slane %v7724_v19, 4  ;;  %v4565_v62 = vpop.f32.mrf.mxu0  ;;  %v6719_v12 = vrot.slane %v6718_v17, 4  ;;  %v16816_v42 = vld [vmem:[#allocation31_spill] sm:$0xff] }
 0x23f   : >> { %v6723_v37 = vrot.slane %v6721_v52, 5  ;;  %v7729_v7 = vrot.slane %v7727_v30, 4  ;;  %v7730_v8 = vrot.slane %v14954_v41, 5  ;;  %v15004_v61 = vadd.f32 %v10562_v10, %v3405_v46  ;;  %v10497_v16 = vpop.f32.mrf.mxu1 }
 0x240   : >> { %16814 = vst [vmem:[#allocation102_spill] sm:$0xff] %v14995_v51  ;;  %v3403_v59 = vadd.f32 %v3268_v56, %v16816_v42  ;;  %v6732_v43 = vor.u32 %v6731_v47, %v6728_v38  ;;  %v6745_v53 = vshll.u32 %v14991_v39, 16  ;;  %v10566_v36 = vpop.f32.mrf.mxu0  ;;  %v16817_v34 = vcombine.low %v14332_v0, %v14336_v13  ;;  %v16818_v56 = vld [vmem:[#allocation20_spill] sm:$0xff] }
 0x241   : >> { %v15012_v51 = vcombine.low %v6694_v4, %v6704_v58  ;;  %v6742_v17 = vor.u32 %v6741_v23, %v14993_v26  ;;  %v6749_v41 = vshrl.u32 %v14991_v39, 16  ;;  %v6755_v10 = vshll.u32 %v15001_v31, 16  ;;  %v3271_v4 = vpop.f32.mrf.mxu1  ;;  %v9741_v42 = vld [vmem:[%s11284_s25 + $0xfc] sm:$0xe] }
 0x242   : >> { %10797 = vmatmul.mubr.msk.bf16.gmra.mxu0 %vm1027_vm4, %v16817_v34  ;;  %v15017_v52 = vadd.f32 %v4562_v27, %v3403_v59  ;;  %v3406_v38 = vadd.f32 %v10497_v16, %v16818_v56  ;;  %v16819_v47 = vcombine.low %v14407_v25, %v14424_v33  ;;  %v15026_v0 = vsel %vm11630_vm8, %v7723_v2, %v7724_v19  ;;  %v4578_v58 = vpop.f32.mrf.mxu0  ;;  %v16821_v2 = vld [vmem:[#allocation81_spill] sm:$0xff]  ;;  %v15059_v34 = vld [vmem:[%s11284_s25 + $0x10c] sm:$0xf] }
 0x243   : >> { %v6714_v13 = vsel %vm11297_vm5, %v6709_v11, %v14948_v15  ;;  %v6724_v27 = vsel %vm11297_vm5, %v6719_v12, %v6723_v37  ;;  %v15035_v23 = vsel %vm11630_vm8, %v7726_v57, %v7727_v30  ;;  %v15039_v25 = vsel %vm11630_vm8, %v7729_v7, %v7730_v8  ;;  %v10500_v59 = vpop.f32.mrf.mxu1 }
 0x244   : >> { %10800 = vmatprep.mubr.msk.bf16.mxu0 %vm1027_vm4, %v16819_v47  ;;  %v6759_v33 = vshrl.u32 %v15001_v31, 16  ;;  %v15042_v19 = vadd.f32 %v10563_v63, %v3406_v38  ;;  %v3404_v46 = vadd.f32 %v3271_v4, %v16821_v2  ;;  %v6733_v15 = vrot.slane %v6732_v43, 4  ;;  %v10567_v30 = vpop.f32.mrf.mxu0  ;;  %v16823_v63 = vld [vmem:[#allocation82_spill] sm:$0xff] }
 0x245   : >> { %v6747_v11 = vrot.slane %v6745_v53, 5  ;;  %10731 = vmatmul.mubr.msk.bf16.gmra.mxu1 %vm1027_vm4, %v14355_v60  ;;  %v6743_v57 = vrot.slane %v6742_v17, 4  ;;  %v6751_v12 = vrot.slane %v6749_v41, 4  ;;  %v15048_v37 = vrot.slane %v6755_v10, 5  ;;  %v3284_v60 = vpop.f32.mrf.mxu1  ;;  %v15119_v41 = vld [vmem:[%s11284_s25 + $0x118] sm:$0xf] }
 0x246   : >> { %16820 = vst [vmem:[#allocation48_spill] sm:$0xff] %v15042_v19  ;;  %v6761_v7 = vrot.slane %v6759_v33, 4  ;;  %v15050_v8 = vadd.f32 %v4565_v62, %v3404_v46  ;;  %v3409_v16 = vadd.f32 %v10500_v59, %v16823_v63  ;;  %10734 = vmatprep.mubr.msk.bf16.mxu1 %vm1027_vm4, %v14444_v21  ;;  %v7734_v53 = vrot.slane %v14943_v20, 5  ;;  %v4581_v17 = vpop.f32.mrf.mxu0  ;;  %v16825_v21 = vld [vmem:[#allocation23_spill] sm:$0xff] }
 0x247   : >> { %v9749_v62 = vrot.slane %v9741_v42, 9  ;;  %v7737_v10 = vrot.slane %v14991_v39, 5  ;;  %v7740_v56 = vrot.slane %v15001_v31, 5  ;;  %v3407_v47 = vadd.f32 %v3284_v60, %v16825_v21  ;;  %v10501_v33 = vpop.f32.mrf.mxu1  ;;  %v16831_v60 = vld [vmem:[#allocation85_spill] sm:$0xff] }
 0x248   : >> { %16822 = vst [vmem:[#allocation54_spill] sm:$0xff] %v15050_v8  ;;  %v15065_v38 = vadd.f32 %v10566_v36, %v3409_v16  ;;  %v15068_v4 = vcombine.low %v6714_v13, %v6724_v27  ;;  %v6738_v20 = vsel %vm11297_vm5, %v6733_v15, %v14993_v26  ;;  %v10570_v2 = vpop.f32.mrf.mxu0  ;;  %v16826_v46 = vcombine.low %v14428_v6, %v14432_v44  ;;  %v15082_v27 = vld [vmem:[%s11284_s25 + $0x110] sm:$0xf]  ;;  %v16828_v26 = vld [vmem:[#allocation84_spill] sm:$0xff] }
 0x249   : >> { %v6748_v39 = vsel %vm11297_vm5, %v6743_v57, %v6747_v11  ;;  %v6752_v31 = vor.u32 %v6751_v12, %v6747_v11  ;;  %v6762_v36 = vor.u32 %v6761_v7, %v15048_v37  ;;  %v6765_v13 = vshll.u32 %v15059_v34, 16  ;;  %v3287_v11 = vpop.f32.mrf.mxu1 }
 0x24a   : >> { %16824 = vst [vmem:[#allocation56_spill] sm:$0xff] %v15065_v38  ;;  %10801 = vmatmul.mubr.msk.bf16.gmra.mxu0 %vm1027_vm4, %v16826_v46  ;;  %v15084_v42 = vadd.f32 %v4578_v58, %v3407_v47  ;;  %v3410_v15 = vadd.f32 %v10501_v33, %v16828_v26  ;;  %v16829_v6 = vcombine.low %v14508_v32, %v14547_v45  ;;  %v7736_v44 = vrot.slane %v7734_v53, 4  ;;  %v4594_v57 = vpop.f32.mrf.mxu0  ;;  %v15101_v32 = vld [vmem:[%s11284_s25 + $0x114] sm:$0xf] }
 0x24b   : >> { %v6769_v59 = vshrl.u32 %v15059_v34, 16  ;;  %v15094_v12 = vsel %vm11630_vm8, %v9749_v62, %v7734_v53  ;;  %v7739_v7 = vrot.slane %v7737_v10, 4  ;;  %v7742_v63 = vrot.slane %v7740_v56, 4  ;;  %v10504_v33 = vpop.f32.mrf.mxu1 }
 0x24c   : >> { %16827 = vst [vmem:[#allocation58_spill] sm:$0xff] %v15084_v42  ;;  %10804 = vmatprep.mubr.msk.bf16.mxu0 %vm1027_vm4, %v16829_v6  ;;  %v7743_v58 = vrot.slane %v15059_v34, 5  ;;  %v15097_v16 = vadd.f32 %v10567_v30, %v3410_v15  ;;  %v3408_v21 = vadd.f32 %v3287_v11, %v16831_v60  ;;  %v6775_v45 = vshll.u32 %v15082_v27, 16  ;;  %v10571_v53 = vpop.f32.mrf.mxu0  ;;  %v16833_v15 = vld [vmem:[#allocation33_spill] sm:$0xff]  ;;  %v16852_v42 = vld [vmem:[#allocation95_spill] sm:$0xff] }
 0x24d   : >> { %v6779_v47 = vshrl.u32 %v15082_v27, 16  ;;  %10735 = vmatmul.mubr.msk.bf16.gmra.mxu1 %vm1027_vm4, %v14474_v55  ;;  %v6753_v62 = vrot.slane %v6752_v31, 4  ;;  %v15107_v46 = vcombine.low %v6738_v20, %v6748_v39  ;;  %v6763_v34 = vrot.slane %v6762_v36, 4  ;;  %v3300_v55 = vpop.f32.mrf.mxu1 }
 0x24e   : >> { %16830 = vst [vmem:[#allocation70_spill] sm:$0xff] %v15097_v16  ;;  %v6767_v30 = vrot.slane %v6765_v13, 5  ;;  %v15109_v26 = vadd.f32 %v4581_v17, %v3408_v21  ;;  %v3413_v6 = vadd.f32 %v10504_v33, %v16833_v15  ;;  %10738 = vmatprep.mubr.msk.bf16.mxu1 %vm1027_vm4, %v14543_v28  ;;  %v15116_v11 = vsel %vm11630_vm8, %v7736_v44, %v7737_v10  ;;  %v4597_v31 = vpop.f32.mrf.mxu0  ;;  %v16835_v10 = vld [vmem:[#allocation35_spill] sm:$0xff] }
 0x24f   : >> { %v6771_v60 = vrot.slane %v6769_v59, 4  ;;  %v15123_v20 = vsel %vm11630_vm8, %v7739_v7, %v7740_v56  ;;  %v15127_v17 = vsel %vm11630_vm8, %v7742_v63, %v7743_v58  ;;  %v6785_v39 = vshll.u32 %v15101_v32, 16  ;;  %v10505_v21 = vpop.f32.mrf.mxu1  ;;  %v16836_v56 = vld [vmem:[#allocation76_spill] sm:$0xff]  ;;  %v16837_v7 = vld [vmem:[#allocation77_spill] sm:$0xff] }
 0x250   : >> { %16832 = vst [vmem:[#allocation107_spill] sm:$0xff] %v15109_v26  ;;  %v6789_v28 = vshrl.u32 %v15101_v32, 16  ;;  %v15131_v36 = vadd.f32 %v10570_v2, %v3413_v6  ;;  %v3411_v13 = vadd.f32 %v3300_v55, %v16835_v10  ;;  %v15134_v44 = vrot.slane %v6775_v45, 5  ;;  %v10574_v33 = vpop.f32.mrf.mxu0  ;;  %v16840_v55 = vld [vmem:[#allocation34_spill] sm:$0xff] }
 0x251   : >> { %v6781_v59 = vrot.slane %v6779_v47, 4  ;;  %v16838_v15 = vcombine.low %v16836_v56, %v16837_v7  ;;  %v6758_v2 = vsel %vm11297_vm5, %v6753_v62, %v15048_v37  ;;  %v6768_v6 = vsel %vm11297_vm5, %v6763_v34, %v6767_v30  ;;  %v16841_v56 = vld [vmem:[#allocation11_spill] sm:$0xff]  ;;  %v16842_v7 = vld [vmem:[#allocation29_spill] sm:$0xff]  ;;  %v3303_v37 = vpop.f32.mrf.mxu1 }
 0x252   : >> { %16834 = vst [vmem:[#allocation109_spill] sm:$0xff] %v15131_v36  ;;  %v6795_v45 = vshll.u32 %v15119_v41, 16  ;;  %v15148_v47 = vadd.f32 %v4594_v57, %v3411_v13  ;;  %v3414_v10 = vadd.f32 %v10505_v21, %v16840_v55  ;;  %v6772_v63 = vor.u32 %v6771_v60, %v6767_v30  ;;  %v9653_v36 = vld [vmem:[%s11284_s25 + $0x120] sm:$0xf]  ;;  %v4610_v62 = vpop.f32.mrf.mxu0  ;;  %v15168_v60 = vld [vmem:[%s11284_s25 + $0x124] sm:$0xf] }
 0x253   : >> { %10805 = vmatmul.mubr.msk.bf16.gmra.mxu0 %vm1027_vm4, %v16838_v15  ;;  %v16843_v15 = vcombine.low %v16841_v56, %v16842_v7  ;;  %v6799_v43 = vshrl.u32 %v15119_v41, 16  ;;  %v15159_v26 = vrot.slane %v6785_v39, 5  ;;  %v6791_v57 = vrot.slane %v6789_v28, 4  ;;  %v16845_v21 = vld [vmem:[#allocation17_spill] sm:$0xff]  ;;  %v10508_v7 = vpop.f32.mrf.mxu1 }
 0x254   : >> { %16839 = vst [vmem:[#allocation13_spill] sm:$0xff] %v15148_v47  ;;  %v7745_v13 = vrot.slane %v7743_v58, 4  ;;  %v15161_v47 = vadd.f32 %v10571_v53, %v3414_v10  ;;  %v3412_v55 = vadd.f32 %v3303_v37, %v16845_v21  ;;  %v15164_v56 = vcombine.low %v6758_v2, %v6768_v6  ;;  %v10575_v34 = vpop.f32.mrf.mxu0  ;;  %v16848_v37 = vld [vmem:[#allocation15_spill] sm:$0xff]  ;;  %v16849_v2 = vld [vmem:[#allocation21_spill] sm:$0xff] }
 0x255   : >> { %10808 = vmatprep.mubr.msk.bf16.mxu0 %vm1027_vm4, %v16843_v15  ;;  %v6782_v30 = vor.u32 %v6781_v59, %v15134_v44  ;;  %v16846_v15 = vld [vmem:[#allocation87_spill] sm:$0xff]  ;;  %v15172_v39 = vrot.slane %v6795_v45, 5  ;;  %v6801_v28 = vrot.slane %v6799_v43, 4  ;;  %v6810_v58 = vshrl.u32 %v9653_v36, 16  ;;  %v3316_v16 = vpop.f32.mrf.mxu1 }
 0x256   : >> { %16844 = vst [vmem:[#allocation7_spill] sm:$0xff] %v15161_v47  ;;  %10739 = vmatmul.mubr.msk.bf16.gmra.mxu1 %vm1027_vm4, %v16846_v15  ;;  %v6813_v53 = vshll.u32 %v9653_v36, 16  ;;  %v15174_v10 = vadd.f32 %v4597_v31, %v3412_v55  ;;  %v3417_v21 = vadd.f32 %v10508_v7, %v16848_v37  ;;  %v15179_v59 = vrot.slane %v6772_v63, 4  ;;  %v9652_v47 = vld [vmem:[%s11284_s25 + $0x11c] sm:$0x1]  ;;  %v4613_v15 = vpop.f32.mrf.mxu0  ;;  %v16851_v7 = vld [vmem:[#allocation10_spill] sm:$0xff] }
 0x257   : >> { %10742 = vmatprep.mubr.msk.bf16.mxu1 %vm1027_vm4, %v16849_v2  ;;  %v7746_v6 = vrot.slane %v15082_v27, 5  ;;  %v6792_v45 = vor.u32 %v6791_v57, %v15159_v26  ;;  %v7749_v43 = vrot.slane %v15101_v32, 5  ;;  %v6819_v36 = vshll.u32 %v15168_v60, 16  ;;  %v10509_v27 = vpop.f32.mrf.mxu1 }
 0x258   : >> { %16847 = vst [vmem:[#allocation110_spill] sm:$0xff] %v15174_v10  ;;  %v6823_v31 = vshrl.u32 %v15168_v60, 16  ;;  %v15187_v55 = vadd.f32 %v10574_v33, %v3417_v21  ;;  %v3415_v37 = vadd.f32 %v3316_v16, %v16851_v7  ;;  %v15190_v2 = vrot.slane %v6782_v30, 4  ;;  %v10578_v10 = vpop.f32.mrf.mxu0  ;;  %v16855_v16 = vld [vmem:[#allocation42_spill] sm:$0xff] }
 0x259   : >> { %v7752_v63 = vrot.slane %v15119_v41, 5  ;;  %v16853_v57 = vcombine.low %v14679_v18, %v16852_v42  ;;  %v6802_v32 = vor.u32 %v6801_v28, %v15172_v39  ;;  %v6805_v38 = vshll.u32 %v9652_v47, 16  ;;  %v3319_v7 = vpop.f32.mrf.mxu1 }
 0x25a   : >> { %16850 = vst [vmem:[#allocation65_spill] sm:$0xff] %v15187_v55  ;;  %v6812_v8 = vrot.slane %v6810_v58, 4  ;;  %v6815_v33 = vrot.slane %v6813_v53, 5  ;;  %v15198_v21 = vadd.f32 %v4610_v62, %v3415_v37  ;;  %v3418_v30 = vadd.f32 %v10509_v27, %v16855_v16  ;;  %v4626_v28 = vpop.f32.mrf.mxu0  ;;  %v15210_v53 = vld [vmem:[%s11284_s25 + $0x128] sm:$0xf]  ;;  %v16858_v55 = vld [vmem:[#allocation32_spill] sm:$0xff] }
 0x25b   : >> { %10809 = vmatmul.mubr.msk.bf16.gmra.mxu0 %vm1027_vm4, %v16853_v57  ;;  %v16856_v41 = vcombine.low %v14755_v22, %v14762_v50  ;;  %v6778_v18 = vsel %vm11297_vm5, %v15179_v59, %v15134_v44  ;;  %v7748_v42 = vrot.slane %v7746_v6, 4  ;;  %v6793_v57 = vrot.slane %v6792_v45, 4  ;;  %v16857_v22 = vld [vmem:[#allocation19_spill] sm:$0xff] }
 0x25c   : >> { %16854 = vst [vmem:[#allocation73_spill] sm:$0xff] %v15198_v21  ;;  %v7751_v58 = vrot.slane %v7749_v43, 4  ;;  %v15212_v62 = vrot.slane %v6819_v36, 5  ;;  %v6825_v37 = vrot.slane %v6823_v31, 4  ;;  %v15214_v27 = vadd.f32 %v10575_v34, %v3418_v30  ;;  %v10512_v21 = vpop.f32.mrf.mxu1  ;;  %v10579_v44 = vpop.f32.mrf.mxu0  ;;  %v16859_v34 = vld [vmem:[#allocation44_spill] sm:$0xff] }
 0x25d   : >> { %10812 = vmatprep.mubr.msk.bf16.mxu0 %vm1027_vm4, %v16856_v41  ;;  %v3416_v50 = vadd.f32 %v3319_v7, %v16857_v22  ;;  %v7754_v16 = vrot.slane %v7752_v63, 4  ;;  %v7755_v41 = vrot.slane %v9652_v47, 5  ;;  %v15221_v59 = vsel %vm11630_vm8, %v7745_v13, %v7746_v6 }
 0x25e   : >> { %10743 = vmatmul.mubr.msk.bf16.gmra.mxu1 %vm1027_vm4, %v16858_v55  ;;  %v6803_v45 = vrot.slane %v6802_v32, 4  ;;  %v6807_v36 = vrot.slane %v6805_v38, 5  ;;  %v6816_v19 = vor.u32 %v6815_v33, %v6812_v8  ;;  %v3421_v30 = vadd.f32 %v10512_v21, %v16859_v34  ;;  %v15231_v55 = vld [vmem:[%s11284_s25 + $0x12c] sm:$0xf]  ;;  %v3332_v22 = vpop.f32.mrf.mxu1  ;;  %v4629_v13 = vpop.f32.mrf.mxu0  ;;  %v16860_v32 = vld [vmem:[#allocation45_spill] sm:$0xff] }
 0x25f   : >> { %v15223_v31 = vadd.f32 %v4613_v15, %v3416_v50  ;;  %10746 = vmatprep.mubr.msk.bf16.mxu1 %vm1027_vm4, %v14781_v1  ;;  %v6829_v47 = vshll.u32 %v15210_v53, 16  ;;  %v6833_v7 = vshrl.u32 %v15210_v53, 16  ;;  %v6788_v8 = vsel %vm11297_vm5, %v15190_v2, %v15159_v26  ;;  %v16862_v50 = vld [vmem:[#allocation88_spill] sm:$0xff] }
 0x260   : >> { %v15239_v38 = vsel %vm11630_vm8, %v7748_v42, %v7749_v43  ;;  %v6798_v1 = vsel %vm11297_vm5, %v6793_v57, %v15172_v39  ;;  %v6826_v6 = vor.u32 %v6825_v37, %v15212_v62  ;;  %v15245_v15 = vadd.f32 %v10578_v10, %v3421_v30  ;;  %v10513_v43 = vpop.f32.mrf.mxu1  ;;  %v10582_v2 = vpop.f32.mrf.mxu0  ;;  %v9742_v57 = vld [vmem:[%s11284_s25 + $0x120] sm:$0xe] }
 0x261   : >> { %v3419_v33 = vadd.f32 %v3332_v22, %v16860_v32  ;;  %v15250_v21 = vsel %vm11630_vm8, %v7751_v58, %v7752_v63  ;;  %v15254_v26 = vsel %vm11630_vm8, %v7754_v16, %v7755_v41  ;;  %v16861_v42 = vcombine.low %v14802_v5, %v14806_v24  ;;  %v16864_v32 = vld [vmem:[#allocation89_spill] sm:$0xff] }
 0x262   : >> { %v6808_v39 = vsel %vm11297_vm5, %v6803_v45, %v6807_v36  ;;  %v6817_v10 = vrot.slane %v6816_v19, 4  ;;  %v6839_v37 = vshll.u32 %v15231_v55, 16  ;;  %v6843_v63 = vshrl.u32 %v15231_v55, 16  ;;  %v3335_v34 = vpop.f32.mrf.mxu1  ;;  %v4642_v45 = vpop.f32.mrf.mxu0 }
 0x263   : >> { %10813 = vmatmul.mubr.msk.bf16.gmra.mxu0 %vm1027_vm4, %v16861_v42  ;;  %v15265_v58 = vadd.f32 %v4626_v28, %v3419_v33  ;;  %v3422_v16 = vadd.f32 %v10513_v43, %v16862_v50  ;;  %v16863_v41 = vcombine.low %v14878_v29, %v14882_v49  ;;  %v6831_v5 = vrot.slane %v6829_v47, 5  ;;  %v15288_v43 = vld [vmem:[%s11284_s25 + $0x130] sm:$0xf]  ;;  %v16867_v50 = vld [vmem:[#allocation46_spill] sm:$0xff] }
 0x264   : >> { %v6835_v24 = vrot.slane %v6833_v7, 4  ;;  %v15272_v19 = vcombine.low %v6778_v18, %v6788_v8  ;;  %v6827_v30 = vrot.slane %v6826_v6, 4  ;;  %v7759_v28 = vrot.slane %v15168_v60, 5  ;;  %v10516_v47 = vpop.f32.mrf.mxu1  ;;  %v16865_v7 = vld [vmem:[#allocation9_spill] sm:$0xff]  ;;  %v10583_v18 = vpop.f32.mrf.mxu0 }
 0x265   : >> { %10816 = vmatprep.mubr.msk.bf16.mxu0 %vm1027_vm4, %v16863_v41  ;;  %v15277_v22 = vadd.f32 %v10579_v44, %v3422_v16  ;;  %v3420_v33 = vadd.f32 %v3335_v34, %v16864_v32  ;;  %v9750_v49 = vrot.slane %v9742_v57, 9  ;;  %v15284_v8 = vcombine.low %v6798_v1, %v6808_v39  ;;  %v15301_v39 = vld [vmem:[%s11284_s25 + $0x134] sm:$0xf] }
 0x266   : >> { %10747 = vmatmul.mubr.msk.bf16.gmra.mxu1 %vm1027_vm4, %v16865_v7  ;;  %v7762_v6 = vrot.slane %v15210_v53, 5  ;;  %v15290_v60 = vrot.slane %v6839_v37, 5  ;;  %v6845_v44 = vrot.slane %v6843_v63, 4  ;;  %v3425_v16 = vadd.f32 %v10516_v47, %v16867_v50  ;;  %v3348_v53 = vpop.f32.mrf.mxu1  ;;  %v4645_v41 = vpop.f32.mrf.mxu0 }
 0x267   : >> { %v15292_v42 = vadd.f32 %v4629_v13, %v3420_v33  ;;  %10750 = vmatprep.mubr.msk.bf16.mxu1 %vm1027_vm4, %v14913_v54  ;;  %v6822_v57 = vsel %vm11297_vm5, %v6817_v10, %v15212_v62  ;;  %v6836_v1 = vor.u32 %v6835_v24, %v6831_v5  ;;  %v6832_v37 = vsel %vm11297_vm5, %v6827_v30, %v6831_v5  ;;  %v16869_v54 = vld [vmem:[#allocation90_spill] sm:$0xff] }
 0x268   : >> { %v7761_v13 = vrot.slane %v7759_v28, 4  ;;  %v7765_v63 = vrot.slane %v15231_v55, 5  ;;  %v6853_v34 = vshrl.u32 %v15288_v43, 16  ;;  %v15307_v32 = vadd.f32 %v10582_v2, %v3425_v16  ;;  %v10517_v24 = vpop.f32.mrf.mxu1  ;;  %v10654_v47 = vpop.f32.mrf.mxu0  ;;  %v15321_v2 = vld [vmem:[%s11284_s25 + $0x138] sm:$0xf] }
 0x269   : >> { %16866 = vst [vmem:[#allocation67_spill] sm:$0xff] %v15292_v42  ;;  %v3423_v33 = vadd.f32 %v3348_v53, %v16869_v54  ;;  %v15312_v62 = vsel %vm11630_vm8, %v9750_v49, %v7759_v28  ;;  %v6849_v10 = vshll.u32 %v15288_v43, 16  ;;  %v16870_v5 = vcombine.low %v14889_v3, %v14900_v40  ;;  %v16872_v49 = vld [vmem:[#allocation22_spill] sm:$0xff]  ;;  %v16888_v42 = vld [vmem:[#allocation25_spill] sm:$0xff] }
 0x26a   : >> { %16868 = vst [vmem:[#allocation63_spill] sm:$0xff] %v15307_v32  ;;  %v7764_v55 = vrot.slane %v7762_v6, 4  ;;  %v6846_v30 = vor.u32 %v6845_v44, %v15290_v60  ;;  %v6859_v7 = vshll.u32 %v15301_v39, 16  ;;  %v6863_v50 = vshrl.u32 %v15301_v39, 16  ;;  %v3351_v44 = vpop.f32.mrf.mxu1  ;;  %v5914_v54 = vpop.f32.mrf.mxu0 }
 0x26b   : >> { %10817 = vmatmul.mubr.msk.bf16.gmra.mxu0 %vm1027_vm4, %v16870_v5  ;;  %v15325_v28 = vadd.f32 %v4642_v45, %v3423_v33  ;;  %v3426_v16 = vadd.f32 %v10517_v24, %v16872_v49  ;;  %v16873_v53 = vcombine.low %v14977_v9, %v15026_v0  ;;  %v15332_v3 = vrot.slane %v6836_v1, 4  ;;  %v16875_v49 = vld [vmem:[#allocation49_spill] sm:$0xff] }
 0x26c   : >> { %v15334_v40 = vcombine.low %v6822_v57, %v6832_v37  ;;  %v15338_v5 = vsel %vm11630_vm8, %v7761_v13, %v7762_v6  ;;  %v7767_v29 = vrot.slane %v7765_v63, 4  ;;  %v7768_v45 = vrot.slane %v15288_v43, 5  ;;  %v15348_v57 = vld [vmem:[%s11284_s25 + $0x13c] sm:$0xf]  ;;  %v10588_v37 = vpop.f32.mrf.mxu1  ;;  %v10655_v6 = vpop.f32.mrf.mxu0 }
 0x26d   : >> { %16871 = vst [vmem:[#allocation71_spill] sm:$0xff] %v15325_v28  ;;  %10820 = vmatprep.mubr.msk.bf16.mxu0 %vm1027_vm4, %v16873_v53  ;;  %v6855_v33 = vrot.slane %v6853_v34, 4  ;;  %v15341_v24 = vadd.f32 %v10583_v18, %v3426_v16  ;;  %v3424_v9 = vadd.f32 %v3351_v44, %v16875_v49  ;;  %v15344_v0 = vrot.slane %v6849_v10, 5  ;;  %v16877_v10 = vld [vmem:[#allocation51_spill] sm:$0xff] }
 0x26e   : >> { %v6869_v1 = vshll.u32 %v15321_v2, 16  ;;  %10751 = vmatmul.mubr.msk.bf16.gmra.mxu1 %vm1027_vm4, %v14945_v35  ;;  %v15352_v13 = vrot.slane %v6846_v30, 4  ;;  %v15354_v53 = vrot.slane %v6859_v7, 5  ;;  %v6865_v43 = vrot.slane %v6863_v50, 4  ;;  %v5232_v30 = vpop.f32.mrf.mxu1  ;;  %v5917_v7 = vpop.f32.mrf.mxu0 }
 0x26f   : >> { %16874 = vst [vmem:[#allocation16_spill] sm:$0xff] %v15341_v24  ;;  %v6873_v18 = vshrl.u32 %v15321_v2, 16  ;;  %v15357_v34 = vadd.f32 %v4645_v41, %v3424_v9  ;;  %v5489_v16 = vadd.f32 %v10588_v37, %v16877_v10  ;;  %10754 = vmatprep.mubr.msk.bf16.mxu1 %vm1027_vm4, %v15012_v51  ;;  %v15370_v41 = vsel %vm11630_vm8, %v7764_v55, %v7765_v63  ;;  %v16879_v37 = vld [vmem:[#allocation55_spill] sm:$0xff] }
 0x270   : >> { %v15374_v50 = vsel %vm11630_vm8, %v7767_v29, %v7768_v45  ;;  %v6856_v51 = vor.u32 %v6855_v33, %v15344_v0  ;;  %v6879_v49 = vshll.u32 %v15348_v57, 16  ;;  %v5487_v10 = vadd.f32 %v5232_v30, %v16879_v37  ;;  %v10589_v36 = vpop.f32.mrf.mxu1  ;;  %v10658_v63 = vpop.f32.mrf.mxu0  ;;  %v16882_v37 = vld [vmem:[#allocation92_spill] sm:$0xff]  ;;  %v15404_v29 = vld [vmem:[%s11284_s25 + $0x148] sm:$0xf] }
 0x271   : >> { %16876 = vst [vmem:[#allocation18_spill] sm:$0xff] %v15357_v34  ;;  %v15378_v9 = vadd.f32 %v10654_v47, %v5489_v16  ;;  %v15381_v44 = vrot.slane %v6869_v1, 5  ;;  %v6883_v35 = vshrl.u32 %v15348_v57, 16  ;;  %v16880_v55 = vcombine.low %v15035_v23, %v15039_v25  ;;  %v9662_v1 = vld [vmem:[%s11284_s25 + $0x144] sm:$0xf] }
 0x272   : >> { %v6866_v47 = vor.u32 %v6865_v43, %v15354_v53  ;;  %v6875_v33 = vrot.slane %v6873_v18, 4  ;;  %v7770_v16 = vrot.slane %v7768_v45, 4  ;;  %v15394_v30 = vadd.f32 %v5914_v54, %v5487_v10  ;;  %v5235_v43 = vpop.f32.mrf.mxu1  ;;  %v5930_v18 = vpop.f32.mrf.mxu0 }
 0x273   : >> { %16878 = vst [vmem:[#allocation68_spill] sm:$0xff] %v15378_v9  ;;  %10821 = vmatmul.mubr.msk.bf16.gmra.mxu0 %vm1027_vm4, %v16880_v55  ;;  %v5490_v9 = vadd.f32 %v10589_v36, %v16882_v37  ;;  %v16883_v23 = vcombine.low %v15094_v12, %v15116_v11  ;;  %v7771_v25 = vrot.slane %v15301_v39, 5  ;;  %v7774_v55 = vrot.slane %v15321_v2, 5  ;;  %v16885_v12 = vld [vmem:[#allocation93_spill] sm:$0xff] }
 0x274   : >> { %16881 = vst [vmem:[#allocation57_spill] sm:$0xff] %v15394_v30  ;;  %v15406_v45 = vrot.slane %v6856_v51, 4  ;;  %v15408_v34 = vrot.slane %v6879_v49, 5  ;;  %v6885_v54 = vrot.slane %v6883_v35, 4  ;;  %v7777_v36 = vrot.slane %v15348_v57, 5  ;;  %v10592_v30 = vpop.f32.mrf.mxu1  ;;  %v10659_v2 = vpop.f32.mrf.mxu0 }
 0x275   : >> { %10824 = vmatprep.mubr.msk.bf16.mxu0 %vm1027_vm4, %v16883_v23  ;;  %v15411_v10 = vadd.f32 %v10655_v6, %v5490_v9  ;;  %v5488_v11 = vadd.f32 %v5235_v43, %v16885_v12  ;;  %v9661_v37 = vld [vmem:[%s11284_s25 + $0x140] sm:$0x1]  ;;  %v6894_v23 = vshrl.u32 %v9662_v1, 16  ;;  %v6897_v39 = vshll.u32 %v9662_v1, 16 }
 0x276   : >> { %10755 = vmatmul.mubr.msk.bf16.gmra.mxu1 %vm1027_vm4, %v15068_v4  ;;  %v6867_v24 = vrot.slane %v6866_v47, 4  ;;  %v6876_v51 = vor.u32 %v6875_v33, %v15381_v44  ;;  %v6903_v49 = vshll.u32 %v15404_v29, 16  ;;  %v6907_v35 = vshrl.u32 %v15404_v29, 16  ;;  %v16887_v6 = vld [vmem:[#allocation61_spill] sm:$0xff]  ;;  %v5248_v12 = vpop.f32.mrf.mxu1 }
 0x277   : >> { %16884 = vst [vmem:[#allocation79_spill] sm:$0xff] %v15411_v10  ;;  %v15420_v57 = vadd.f32 %v5917_v7, %v5488_v11  ;;  %v5493_v9 = vadd.f32 %v10592_v30, %v16887_v6  ;;  %10758 = vmatprep.mubr.msk.bf16.mxu1 %vm1027_vm4, %v15107_v46  ;;  %v7773_v1 = vrot.slane %v7771_v25, 4  ;;  %v7776_v43 = vrot.slane %v7774_v55, 4  ;;  %v5933_v10 = vpop.f32.mrf.mxu0 }
 0x278   : >> { %v6886_v4 = vor.u32 %v6885_v54, %v15408_v34  ;;  %v6889_v47 = vshll.u32 %v9661_v37, 16  ;;  %v7779_v28 = vrot.slane %v7777_v36, 4  ;;  %v7780_v33 = vrot.slane %v9661_v37, 5  ;;  %v10593_v30 = vpop.f32.mrf.mxu1 }
 0x279   : >> { %16886 = vst [vmem:[#allocation60_spill] sm:$0xff] %v15420_v57  ;;  %v15426_v32 = vadd.f32 %v10658_v63, %v5493_v9  ;;  %v5491_v7 = vadd.f32 %v5248_v12, %v16888_v42  ;;  %v6896_v11 = vrot.slane %v6894_v23, 4  ;;  %v6899_v57 = vrot.slane %v6897_v39, 5  ;;  %v10662_v6 = vpop.f32.mrf.mxu0  ;;  %v16890_v39 = vld [vmem:[#allocation30_spill] sm:$0xff] }
 0x27a   : >> { %v16889_v46 = vcombine.low %v15123_v20, %v15127_v17  ;;  %v6862_v54 = vsel %vm11297_vm5, %v15406_v45, %v15354_v53  ;;  %v15439_v63 = vsel %vm11630_vm8, %v7770_v16, %v7771_v25  ;;  %v15441_v37 = vrot.slane %v6903_v49, 5  ;;  %v15454_v45 = vld [vmem:[%s11284_s25 + $0x14c] sm:$0xf]  ;;  %v5251_v16 = vpop.f32.mrf.mxu1 }
 0x27b   : >> { %v6909_v42 = vrot.slane %v6907_v35, 4  ;;  %v15443_v23 = vadd.f32 %v5930_v18, %v5491_v7  ;;  %v5494_v9 = vadd.f32 %v10593_v30, %v16890_v39  ;;  %v16891_v20 = vcombine.low %v15221_v59, %v15239_v38  ;;  %v5946_v25 = vpop.f32.mrf.mxu0 }
 0x27c   : >> { %10825 = vmatmul.mubr.msk.bf16.gmra.mxu0 %vm1027_vm4, %v16889_v46  ;;  %v6872_v17 = vsel %vm11297_vm5, %v6867_v24, %v15381_v44  ;;  %v6877_v53 = vrot.slane %v6876_v51, 4  ;;  %v15458_v18 = vsel %vm11630_vm8, %v7773_v1, %v7774_v55  ;;  %v6891_v49 = vrot.slane %v6889_v47, 5  ;;  %v16892_v24 = vld [vmem:[#allocation62_spill] sm:$0xff]  ;;  %v10596_v7 = vpop.f32.mrf.mxu1  ;;  %v16893_v47 = vld [vmem:[#allocation64_spill] sm:$0xff] }
 0x27d   : >> { %10828 = vmatprep.mubr.msk.bf16.mxu0 %vm1027_vm4, %v16891_v20  ;;  %v15462_v35 = vsel %vm11630_vm8, %v7776_v43, %v7777_v36  ;;  %v15466_v59 = vsel %vm11630_vm8, %v7779_v28, %v7780_v33  ;;  %v15468_v38 = vadd.f32 %v10659_v2, %v5494_v9  ;;  %v5492_v44 = vadd.f32 %v5251_v16, %v16892_v24  ;;  %v10663_v55 = vpop.f32.mrf.mxu0  ;;  %v15514_v9 = vld [vmem:[%s11284_s25 + $0x150] sm:$0xf] }
 0x27e   : >> { %v6887_v51 = vrot.slane %v6886_v4, 4  ;;  %v6900_v12 = vor.u32 %v6899_v57, %v6896_v11  ;;  %10759 = vmatmul.mubr.msk.bf16.gmra.mxu1 %vm1027_vm4, %v15164_v56  ;;  %v9778_v36 = vcombine.low %v15370_v41, %v15374_v50  ;;  %v6910_v1 = vor.u32 %v6909_v42, %v15441_v37  ;;  %v5264_v30 = vpop.f32.mrf.mxu1 }
 0x27f   : >> { %v6913_v28 = vshll.u32 %v15454_v45, 16  ;;  %v6917_v43 = vshrl.u32 %v15454_v45, 16  ;;  %v15478_v2 = vadd.f32 %v5933_v10, %v5492_v44  ;;  %v5497_v4 = vadd.f32 %v10596_v7, %v16893_v47  ;;  %10762 = vmatprep.mubr.msk.bf16.mxu1 %vm1027_vm4, %v15272_v19  ;;  %v9743_v10 = vld [vmem:[%s11284_s25 + $0x144] sm:$0xe]  ;;  %v5949_v46 = vpop.f32.mrf.mxu0  ;;  %v15525_v44 = vld [vmem:[%s11284_s25 + $0x158] sm:$0xf] }
 0x280   : >> { %v16894_v56 = vsel %vm11297_vm5, %v15352_v13, %v15344_v0  ;;  %v16895_v57 = vsel %vm11297_vm5, %v15332_v3, %v15290_v60  ;;  %v7784_v11 = vrot.slane %v15404_v29, 5  ;;  %v15497_v42 = vcombine.low %v6862_v54, %v6872_v17  ;;  %v16896_v13 = vld [vmem:[#allocation66_spill] sm:$0xff]  ;;  %v10597_v20 = vpop.f32.mrf.mxu1 }
 0x281   : >> { %v15493_v33 = vcombine.low %v16895_v57, %v16894_v56  ;;  %v9779_v19 = vcombine.low %v15439_v63, %v15458_v18  ;;  %v6882_v0 = vsel %vm11297_vm5, %v6877_v53, %v15408_v34  ;;  %v15506_v3 = vadd.f32 %v10662_v6, %v5497_v4  ;;  %v10666_v17 = vpop.f32.mrf.mxu0  ;;  %v16906_v63 = vld [vmem:[#allocation24_spill] sm:$0xff] }
 0x282   : >> { %v5495_v39 = vadd.f32 %v5264_v30, %v16896_v13  ;;  %v6892_v29 = vsel %vm11297_vm5, %v6887_v51, %v6891_v49  ;;  %v15511_v54 = vrot.slane %v6900_v12, 4  ;;  %v16897_v34 = vcombine.low %v15250_v21, %v15254_v26  ;;  %v16898_v51 = vld [vmem:[#allocation69_spill] sm:$0xff]  ;;  %v15580_v13 = vld [vmem:[%s11284_s25 + $0x15c] sm:$0xf] }
 0x283   : >> { %v15520_v53 = vrot.slane %v6910_v1, 4  ;;  %v15522_v6 = vrot.slane %v6913_v28, 5  ;;  %v6919_v16 = vrot.slane %v6917_v43, 4  ;;  %v9751_v24 = vrot.slane %v9743_v10, 9  ;;  %v15536_v1 = vld [vmem:[%s11284_s25 + $0x154] sm:$0xf]  ;;  %v5267_v28 = vpop.f32.mrf.mxu1  ;;  %v5962_v47 = vpop.f32.mrf.mxu0 }
 0x284   : >> { %10829 = vmatmul.mubr.msk.bf16.gmra.mxu0 %vm1027_vm4, %v16897_v34  ;;  %v15527_v49 = vadd.f32 %v5946_v25, %v5495_v39  ;;  %v5498_v12 = vadd.f32 %v10597_v20, %v16898_v51  ;;  %v16899_v7 = vcombine.low %v15312_v62, %v15338_v5  ;;  %v7786_v21 = vrot.slane %v7784_v11, 4  ;;  %v16900_v62 = vld [vmem:[#allocation72_spill] sm:$0xff]  ;;  %v16901_v34 = vld [vmem:[#allocation83_spill] sm:$0xff] }
 0x285   : >> { %v7787_v26 = vrot.slane %v15454_v45, 5  ;;  %v15538_v43 = vcombine.low %v6882_v0, %v6892_v29  ;;  %v6923_v4 = vshll.u32 %v15514_v9, 16  ;;  %v6927_v25 = vshrl.u32 %v15514_v9, 16  ;;  %v10600_v30 = vpop.f32.mrf.mxu1  ;;  %v10667_v0 = vpop.f32.mrf.mxu0 }
 0x286   : >> { %10832 = vmatprep.mubr.msk.bf16.mxu0 %vm1027_vm4, %v16899_v7  ;;  %v6937_v56 = vshrl.u32 %v15536_v1, 16  ;;  %v15543_v57 = vadd.f32 %v10663_v55, %v5498_v12  ;;  %v5496_v5 = vadd.f32 %v5267_v28, %v16900_v62  ;;  %v6943_v10 = vshll.u32 %v15525_v44, 16  ;;  %10763 = vmatmul.mubr.msk.bf16.gmra.mxu1 %vm1027_vm4, %v15284_v8 }
 0x287   : >> { %v6947_v45 = vshrl.u32 %v15525_v44, 16  ;;  %v6920_v39 = vor.u32 %v6919_v16, %v15522_v6  ;;  %v6933_v29 = vshll.u32 %v15536_v1, 16  ;;  %v5501_v8 = vadd.f32 %v10600_v30, %v16901_v34  ;;  %10766 = vmatprep.mubr.msk.bf16.mxu1 %vm1027_vm4, %v15334_v40  ;;  %v5280_v7 = vpop.f32.mrf.mxu1  ;;  %v5965_v28 = vpop.f32.mrf.mxu0  ;;  %v16902_v34 = vld [vmem:[#allocation86_spill] sm:$0xff] }
 0x288   : >> { %v15560_v20 = vadd.f32 %v5949_v46, %v5496_v5  ;;  %v15567_v51 = vsel %vm11630_vm8, %v9751_v24, %v7784_v11  ;;  %v15571_v12 = vsel %vm11630_vm8, %v7786_v21, %v7787_v26  ;;  %v15573_v16 = vrot.slane %v6923_v4, 5 }
 0x289   : >> { %v6929_v62 = vrot.slane %v6927_v25, 4  ;;  %v7790_v46 = vrot.slane %v15514_v9, 5  ;;  %v6939_v5 = vrot.slane %v6937_v56, 4  ;;  %v15576_v30 = vadd.f32 %v10666_v17, %v5501_v8  ;;  %v10601_v21 = vpop.f32.mrf.mxu1  ;;  %v10670_v55 = vpop.f32.mrf.mxu0  ;;  %v16904_v8 = vld [vmem:[#allocation26_spill] sm:$0xff] }
 0x28a   : >> { %v5499_v40 = vadd.f32 %v5280_v7, %v16902_v34  ;;  %v15582_v11 = vrot.slane %v6943_v10, 5  ;;  %v6949_v24 = vrot.slane %v6947_v45, 4  ;;  %v15588_v4 = vrot.slane %v6920_v39, 4 }
 0x28b   : >> { %v7789_v9 = vrot.slane %v7787_v26, 4  ;;  %v15590_v17 = vrot.slane %v6933_v29, 5  ;;  %v7796_v25 = vrot.slane %v15525_v44, 5  ;;  %v5502_v10 = vadd.f32 %v10601_v21, %v16904_v8  ;;  %v5283_v26 = vpop.f32.mrf.mxu1  ;;  %v5978_v45 = vpop.f32.mrf.mxu0 }
 0x28c   : >> { %10833 = vmatmul.mubr.msk.bf16.gmra.mxu0 %vm1027_vm4, %v9778_v36  ;;  %v15593_v56 = vadd.f32 %v5962_v47, %v5499_v40  ;;  %v9781_v41 = vcombine.low %v15567_v51, %v15571_v12  ;;  %v7793_v50 = vrot.slane %v15536_v1, 5  ;;  %v15604_v36 = vld [vmem:[%s11284_s25 + $0x160] sm:$0xf]  ;;  %v6930_v44 = vor.u32 %v6929_v62, %v15573_v16 }
 0x28d   : >> { %10836 = vmatprep.mubr.msk.bf16.mxu0 %vm1027_vm4, %v9779_v19  ;;  %v7792_v47 = vrot.slane %v7790_v46, 4  ;;  %v6940_v39 = vor.u32 %v6939_v5, %v15590_v17  ;;  %v6953_v29 = vshll.u32 %v15580_v13, 16  ;;  %v15609_v7 = vadd.f32 %v10667_v0, %v5502_v10  ;;  %v10604_v1 = vpop.f32.mrf.mxu1  ;;  %v10671_v12 = vpop.f32.mrf.mxu0  ;;  %v16908_v0 = vld [vmem:[#allocation27_spill] sm:$0xff] }
 0x28e   : >> { %16903 = vst [vmem:[#allocation74_spill] sm:$0xff] %v15593_v56  ;;  %v5500_v18 = vadd.f32 %v5283_v26, %v16906_v63  ;;  %v6950_v19 = vor.u32 %v6949_v24, %v15582_v11  ;;  %v6957_v51 = vshrl.u32 %v15580_v13, 16  ;;  %10767 = vmatmul.mubr.msk.bf16.gmra.mxu1 %vm1027_vm4, %v15493_v33  ;;  %v7795_v34 = vrot.slane %v7793_v50, 4 }
 0x28f   : >> { %16905 = vst [vmem:[#allocation75_spill] sm:$0xff] %v15609_v7  ;;  %v7798_v62 = vrot.slane %v7796_v25, 4  ;;  %v7799_v40 = vrot.slane %v15580_v13, 5  ;;  %v6963_v5 = vshll.u32 %v15604_v36, 16  ;;  %v5505_v8 = vadd.f32 %v10604_v1, %v16908_v0  ;;  %10770 = vmatprep.mubr.msk.bf16.mxu1 %vm1027_vm4, %v15497_v42  ;;  %v5296_v33 = vpop.f32.mrf.mxu1  ;;  %v5981_v26 = vpop.f32.mrf.mxu0  ;;  %v16909_v1 = vld [vmem:[#allocation91_spill] sm:$0xff] }
 0x290   : >> { %v15618_v21 = vadd.f32 %v5965_v28, %v5500_v18  ;;  %v7791_v24 = vsel %vm11630_vm8, %v7789_v9, %v7790_v46  ;;  %v6967_v10 = vshrl.u32 %v15604_v36, 16  ;;  %v6931_v63 = vrot.slane %v6930_v44, 4 }
 0x291   : >> { %v7794_v13 = vsel %vm11630_vm8, %v7792_v47, %v7793_v50  ;;  %v6941_v60 = vrot.slane %v6940_v39, 4  ;;  %v6955_v28 = vrot.slane %v6953_v29, 5  ;;  %v15628_v18 = vadd.f32 %v10670_v55, %v5505_v8  ;;  %v10605_v7 = vpop.f32.mrf.mxu1  ;;  %v10674_v56 = vpop.f32.mrf.mxu0  ;;  %v16913_v39 = vld [vmem:[#allocation94_spill] sm:$0xff] }
 0x292   : >> { %16907 = vst [vmem:[#allocation12_spill] sm:$0xff] %v15618_v21  ;;  %v5503_v0 = vadd.f32 %v5296_v33, %v16909_v1  ;;  %v6951_v21 = vrot.slane %v6950_v19, 4  ;;  %v6959_v42 = vrot.slane %v6957_v51, 4  ;;  %v16910_v46 = vcombine.low %v15462_v35, %v15466_v59  ;;  %v16916_v1 = vld [vmem:[#allocation101_spill] sm:$0xff] }
 0x293   : >> { %v16911_v9 = vsel %vm11297_vm5, %v15520_v53, %v15522_v6  ;;  %v16912_v55 = vsel %vm11297_vm5, %v15511_v54, %v15441_v37  ;;  %v7797_v44 = vsel %vm11630_vm8, %v7795_v34, %v7796_v25  ;;  %v7800_v47 = vsel %vm11630_vm8, %v7798_v62, %v7799_v40  ;;  %v9670_v53 = vld [vmem:[%s11284_s25 + $0x164] sm:$0x1]  ;;  %v5299_v37 = vpop.f32.mrf.mxu1  ;;  %v5994_v54 = vpop.f32.mrf.mxu0  ;;  %v16914_v34 = vld [vmem:[#allocation96_spill] sm:$0xff]  ;;  %s9955_s25 = sshll.u32 %s11167_s7, 8  ;;  %s176_s7 = sadd.s32 1, %s11167_s7  }
 0x294   : >> { %10837 = vmatmul.mubr.msk.bf16.gmra.mxu0 %vm1027_vm4, %v16910_v46  ;;  %v9700_v50 = vcombine.low %v16912_v55, %v16911_v9  ;;  %v15649_v35 = vrot.slane %v6963_v5, 5  ;;  %v15651_v59 = vadd.f32 %v5978_v45, %v5503_v0  ;;  %v5506_v29 = vadd.f32 %v10605_v7, %v16913_v39  ;;  %s15834_s26 = scalar_lea.vmem %s163_s6, %s9955_s25 [#allocation2]  ;;  %p173_p11 = scmp.ge.s32.totalorder %s176_s7, 8  }
 0x295   : >> { %10840 = vmatprep.mubr.msk.bf16.mxu0 %vm1027_vm4, %v9781_v41  ;;  %v6969_v6 = vrot.slane %v6967_v10, 4  ;;  %v7802_v19 = vrot.slane %v15604_v36, 5  ;;  %v6926_v25 = vsel %vm11297_vm5, %v15588_v4, %v15573_v16  ;;  %v6936_v45 = vsel %vm11297_vm5, %v6931_v63, %v15590_v17  ;;  %v10608_v8 = vpop.f32.mrf.mxu1  ;;  %v10675_v16 = vpop.f32.mrf.mxu0  ;;  %s9956_s28 = sshll.u32 (%p173_p11), %s11214_s16, 15  ;;  %s8829_s8 = sshll.u32 (%p173_p11), %s163_s6, 4  ;;  %s16097_s8 = int_to_ptr.vmem [resolvable:$true] %s8829_s8 }
 0x296   : >> { %v9782_v51 = vcombine.low %v7791_v24, %v7794_v13  ;;  %v6946_v41 = vsel %vm11297_vm5, %v6941_v60, %v15582_v11  ;;  %v15667_v7 = vadd.f32 %v10671_v12, %v5506_v29  ;;  %v5504_v36 = vadd.f32 %v5299_v37, %v16914_v34  ;;  %10771 = vmatmul.mubr.msk.bf16.gmra.mxu1 %vm1027_vm4, %v15538_v43  ;;  %v16915_v60 = vld [vmem:[#allocation100_spill] sm:$0xff]  ;;  %v16918_v37 = vld [vmem:[#allocation103_spill] sm:$0xff]  ;;  %s16093_s4 = scalar_lea.hbm (%p173_p11), %s16144_s3, %s9956_s28  ;;  %s16101_s7 = scalar_lea.sflag (%p173_p11), [#allocation3], %s161_s24 }
 0x297   : >> { %v6956_v62 = vsel %vm11297_vm5, %v6951_v21, %v6955_v28  ;;  %v6960_v5 = vor.u32 %v6959_v42, %v6955_v28  ;;  %v7801_v4 = vrot.slane %v7799_v40, 4  ;;  %v9783_v17 = vcombine.low %v7797_v44, %v7800_v47  ;;  %10774 = vmatprep.mubr.msk.bf16.mxu1 %vm1027_vm4, %v9700_v50  ;;  %v5312_v21 = vpop.f32.mrf.mxu1  ;;  %v5997_v13 = vpop.f32.mrf.mxu0  ;;  %v16917_v44 = vld [vmem:[#allocation47_spill] sm:$0xff]  ;;  %s11099_s5 = scalar_lea.vmem (%p173_p11), %s16097_s8, 32768  ;;  %s11170_s16 = smov (%p173_p11), [#allocation2]  }
 0x298   : >> { %v6973_v24 = vshll.u32 %v9670_v53, 16  ;;  %v7805_v10 = vrot.slane %v9670_v53, 5  ;;  %v15674_v33 = vadd.f32 %v5981_v26, %v5504_v36  ;;  %v5509_v11 = vadd.f32 %v10608_v8, %v16915_v60  ;;  %p11100_p12 = scmp.ne.s32.totalorder (%p173_p11), %s16097_s8, %s11099_s5  ;;  %s11103_s9 = sshll.u32 (%p173_p11), %s11170_s16, 4  ;;  %s11104_s9 = int_to_ptr.vmem [resolvable:$false] %s11103_s9 }
 0x299   : >> { %v6970_v12 = vor.u32 %v6969_v6, %v15649_v35  ;;  %v7804_v63 = vrot.slane %v7802_v19, 4  ;;  %v5507_v43 = vadd.f32 %v5312_v21, %v16916_v1  ;;  %v9701_v0 = vcombine.low %v6926_v25, %v6936_v45  ;;  %v10609_v40 = vpop.f32.mrf.mxu1  ;;  %v10678_v42 = vpop.f32.mrf.mxu0  ;;  %s11105_s10 = scalar_lea.vmem (%p173_p11), %s11104_s9, 65536  ;;  %p11106_p1 = scmp.lt.s32.totalorder (%p173_p11), %s16097_s8, %s11104_s9 }
 0x29a   : >> { %v15679_v28 = vadd.f32 %v10674_v56, %v5509_v11  ;;  %v6961_v26 = vrot.slane %v6960_v5, 4  ;;  %v9702_v46 = vcombine.low %v6946_v41, %v6956_v62  ;;  %v6975_v9 = vrot.slane %v6973_v24, 5  ;;  %v16919_v41 = vld [vmem:[#allocation36_spill] sm:$0xff]  ;;  %v16921_v11 = vld [vmem:[#allocation38_spill] sm:$0xff]  ;;  %p11101_p13 = pnand (%p173_p11), %p11100_p12, %p11231_p5  ;;  %p11107_p2 = scmp.lt.s32.totalorder (%p173_p11), %s11105_s10, %s11099_s5 }
 0x29b   : >> { %v7803_v55 = vsel %vm11630_vm8, %v7801_v4, %v7802_v19  ;;  %v15685_v50 = vadd.f32 %v5994_v54, %v5507_v43  ;;  %v5510_v47 = vadd.f32 %v10609_v40, %v16917_v44  ;;  %v6971_v56 = vrot.slane %v6970_v12, 4  ;;  %v5315_v29 = vpop.f32.mrf.mxu1  ;;  %v6010_v53 = vpop.f32.mrf.mxu0  ;;  %v16923_v40 = vld [vmem:[#allocation52_spill] sm:$0xff] }
 0x29c   : >> { %10841 = vmatmul.mubr.msk.bf16.gmra.mxu0 %vm1027_vm4, %v9782_v51  ;;  %v7806_v39 = vsel %vm11630_vm8, %v7804_v63, %v7805_v10  ;;  %v5508_v25 = vadd.f32 %v5315_v29, %v16918_v37  ;;  %v6966_v48 = vsel %vm11297_vm5, %v6961_v26, %v15649_v35  ;;  %v16925_v29 = vld [vmem:[#allocation50_spill] sm:$0xff]  ;;  %p11102_p0 = pneg (%p173_p11), %p11101_p13  ;;  %p11108_p3 = por (%p173_p11), %p11107_p2, %p11106_p1 }
 0x29d   : >> { %10844 = vmatprep.mubr.msk.bf16.mxu0 %vm1027_vm4, %v9783_v17  ;;  %v15691_v6 = vadd.f32 %v10675_v16, %v5510_v47  ;;  %v10612_v45 = vpop.f32.mrf.mxu1  ;;  %v10679_v19 = vpop.f32.mrf.mxu0  ;;  %v9784_v54 = vcombine.low %v7803_v55, %v7806_v39  ;;  %v6976_v36 = vsel %vm11297_vm5, %v6971_v56, %v6975_v9  ;;  %v16920_v16 = vld [vmem:[#allocation40_spill] sm:$0xff]  ;;  %v16924_v55 = vld [vmem:[#allocation105_spill] sm:$0xff] }
 0x29e   : >> { %10775 = vmatmul.mubr.msk.bf16.gmra.mxu1 %vm1027_vm4, %v9701_v0  ;;  %v15695_v51 = vadd.f32 %v5997_v13, %v5508_v25  ;;  %v5513_v34 = vadd.f32 %v10612_v45, %v16919_v41  ;;  %v9703_v10 = vcombine.low %v6966_v48, %v6976_v36  ;;  %v16927_v36 = vld [vmem:[#allocation43_spill] sm:$0xff]  ;;  %p11109_p4 = pnand (%p173_p11), %p11108_p3, %p11102_p0 }
 0x29f   : >> { %10778 = vmatprep.mubr.msk.bf16.mxu1 %vm1027_vm4, %v9702_v46  ;;  %v5328_v62 = vpop.f32.mrf.mxu1  ;;  %v6013_v5 = vpop.f32.mrf.mxu0 }
 0x2a0   : >> { %v15704_v8 = vadd.f32 %v10678_v42, %v5513_v34  ;;  %v5511_v4 = vadd.f32 %v5328_v62, %v16920_v16 }
 0x2a1   : >> { %v10613_v17 = vpop.f32.mrf.mxu1  ;;  %v10682_v24 = vpop.f32.mrf.mxu0 }
 0x2a2   : >> { %v15708_v60 = vadd.f32 %v6010_v53, %v5511_v4  ;;  %v5514_v12 = vadd.f32 %v10613_v17, %v16921_v11  ;;  %v16928_v17 = vld [vmem:[#allocation98_spill] sm:$0xff] }
 0x2a3   : >> { %v5331_v63 = vpop.f32.mrf.mxu1  ;;  %v6026_v35 = vpop.f32.mrf.mxu0 }
 0x2a4   : >> { %10845 = vmatmul.mubr.msk.bf16.gmra.mxu0 %vm1027_vm4, %v9784_v54  ;;  %v15711_v21 = vadd.f32 %v10679_v19, %v5514_v12  ;;  %v5512_v13 = vadd.f32 %v5331_v63, %v16922_v14  ;;  %v16926_v19 = vld [vmem:[#allocation97_spill] sm:$0xff]  ;;  %v16929_v63 = vld [vmem:[#allocation59_spill] sm:$0xff] }
 0x2a5   : >> { %v10616_v1 = vpop.f32.mrf.mxu1  ;;  %v10683_v43 = vpop.f32.mrf.mxu0 }
 0x2a6   : >> { %10779 = vmatmul.mubr.msk.bf16.gmra.mxu1 %vm1027_vm4, %v9703_v10  ;;  %v15715_v0 = vadd.f32 %v6013_v5, %v5512_v13  ;;  %v5517_v42 = vadd.f32 %v10616_v1, %v16923_v40 }
 0x2a7   : >> { %v5344_v26 = vpop.f32.mrf.mxu1  ;;  %v6029_v46 = vpop.f32.mrf.mxu0 }
 0x2a8   : >> { %v15718_v9 = vadd.f32 %v10682_v24, %v5517_v42  ;;  %v5515_v44 = vadd.f32 %v5344_v26, %v16924_v55  ;;  %v16931_v55 = vld [vmem:[#allocation99_spill] sm:$0xff] }
 0x2a9   : >> { %v10617_v47 = vpop.f32.mrf.mxu1  ;;  %v10686_v56 = vpop.f32.mrf.mxu0 }
 0x2aa   : >> { %v15721_v39 = vadd.f32 %v6026_v35, %v5515_v44  ;;  %v5518_v53 = vadd.f32 %v10617_v47, %v16925_v29 }
 0x2ab   : >> { %v5347_v37 = vpop.f32.mrf.mxu1  ;;  %v6042_v25 = vpop.f32.mrf.mxu0 }
 0x2ac   : >> { %v15724_v45 = vadd.f32 %v10683_v43, %v5518_v53  ;;  %v5516_v54 = vadd.f32 %v5347_v37, %v16926_v19  ;;  %v16930_v43 = vld [vmem:[#allocation108_spill] sm:$0xff]  ;;  %v16932_v53 = vld [vmem:[#allocation106_spill] sm:$0xff] }
 0x2ad   : >> { %v10620_v41 = vpop.f32.mrf.mxu1  ;;  %v10687_v34 = vpop.f32.mrf.mxu0 }
 0x2ae   : >> { %v15727_v48 = vadd.f32 %v6029_v46, %v5516_v54  ;;  %v5521_v62 = vadd.f32 %v10620_v41, %v16927_v36  ;;  %v16933_v41 = vld [vmem:[#allocation53_spill] sm:$0xff] }
 0x2af   : >> { %v5360_v5 = vpop.f32.mrf.mxu1  ;;  %v6045_v16 = vpop.f32.mrf.mxu0 }
 0x2b0   : >> { %v15730_v4 = vadd.f32 %v10686_v56, %v5521_v62  ;;  %v5519_v24 = vadd.f32 %v5360_v5, %v16928_v17 }
 0x2b1   : >> { %v10621_v10 = vpop.f32.mrf.mxu1  ;;  %v10690_v11 = vpop.f32.mrf.mxu0 }
 0x2b2   : >> { %v15733_v12 = vadd.f32 %v6042_v25, %v5519_v24  ;;  %v5522_v35 = vadd.f32 %v10621_v10, %v16929_v63 }
 0x2b3   : >> { %v5363_v14 = vpop.f32.mrf.mxu1  ;;  %v6058_v13 = vpop.f32.mrf.mxu0 }
 0x2b4   : >> { %v15736_v1 = vadd.f32 %v10687_v34, %v5522_v35  ;;  %v5520_v40 = vadd.f32 %v5363_v14, %v16930_v43 }
 0x2b5   : >> { %v10624_v42 = vpop.f32.mrf.mxu1  ;;  %v10691_v26 = vpop.f32.mrf.mxu0 }
 0x2b6   : >> { %v15739_v46 = vadd.f32 %v6045_v16, %v5520_v40  ;;  %v5525_v44 = vadd.f32 %v10624_v42, %v16931_v55  ;;  %v16934_v16 = vld [vmem:[#allocation102_spill] sm:$0xff] }
 0x2b7   : >> { %v5376_v47 = vpop.f32.mrf.mxu1  ;;  %v6061_v56 = vpop.f32.mrf.mxu0 }
 0x2b8   : >> { %v15742_v29 = vadd.f32 %v10690_v11, %v5525_v44  ;;  %v5523_v37 = vadd.f32 %v5376_v47, %v16932_v53 }
 0x2b9   : >> { %v10625_v25 = vpop.f32.mrf.mxu1  ;;  %v10694_v19 = vpop.f32.mrf.mxu0 }
 0x2ba   : >> { %v15745_v54 = vadd.f32 %v6058_v13, %v5523_v37  ;;  %v5526_v34 = vadd.f32 %v10625_v25, %v16933_v41 }
 0x2bb   : >> { %v5379_v36 = vpop.f32.mrf.mxu1  ;;  %v6074_v62 = vpop.f32.mrf.mxu0 }
 0x2bc   : >> { %v15748_v5 = vadd.f32 %v10691_v26, %v5526_v34  ;;  %v5524_v17 = vadd.f32 %v5379_v36, %v16934_v16  ;;  %v16935_v26 = vld [vmem:[#allocation48_spill] sm:$0xff] }
 0x2bd   : >> { %v10628_v24 = vpop.f32.mrf.mxu1  ;;  %v10695_v10 = vpop.f32.mrf.mxu0 }
 0x2be   : >> { %v15751_v63 = vadd.f32 %v6061_v56, %v5524_v17  ;;  %v5529_v11 = vadd.f32 %v10628_v24, %v15004_v61  ;;  %v16936_v56 = vld [vmem:[#allocation54_spill] sm:$0xff] }
 0x2bf   : >> { %v5392_v35 = vpop.f32.mrf.mxu1  ;;  %v6077_v14 = vpop.f32.mrf.mxu0 }
 0x2c0   : >> { %v15754_v43 = vadd.f32 %v10694_v19, %v5529_v11  ;;  %v5527_v13 = vadd.f32 %v5392_v35, %v15017_v52  ;;  %v16937_v19 = vld [vmem:[#allocation56_spill] sm:$0xff] }
 0x2c1   : >> { %v10629_v40 = vpop.f32.mrf.mxu1  ;;  %v10698_v42 = vpop.f32.mrf.mxu0 }
 0x2c2   : >> { %v15757_v55 = vadd.f32 %v6074_v62, %v5527_v13  ;;  %v5530_v44 = vadd.f32 %v10629_v40, %v16935_v26  ;;  %v16939_v62 = vld [vmem:[#allocation58_spill] sm:$0xff] }
 0x2c3   : >> { %v5395_v47 = vpop.f32.mrf.mxu1  ;;  %v6090_v53 = vpop.f32.mrf.mxu0 }
 0x2c4   : >> { %v15760_v37 = vadd.f32 %v10695_v10, %v5530_v44  ;;  %v5528_v25 = vadd.f32 %v5395_v47, %v16936_v56  ;;  %v16941_v10 = vld [vmem:[#allocation70_spill] sm:$0xff] }
 0x2c5   : >> { %v10632_v41 = vpop.f32.mrf.mxu1  ;;  %v10699_v61 = vpop.f32.mrf.mxu0 }
 0x2c6   : >> { %v15763_v34 = vadd.f32 %v6077_v14, %v5528_v25  ;;  %v5533_v36 = vadd.f32 %v10632_v41, %v16937_v19  ;;  %v16943_v14 = vld [vmem:[#allocation107_spill] sm:$0xff] }
 0x2c7   : >> { %v5408_v16 = vpop.f32.mrf.mxu1  ;;  %v6093_v52 = vpop.f32.mrf.mxu0 }
 0x2c8   : >> { %v15766_v17 = vadd.f32 %v10698_v42, %v5533_v36  ;;  %v5531_v24 = vadd.f32 %v5408_v16, %v16939_v62  ;;  %v16945_v42 = vld [vmem:[#allocation109_spill] sm:$0xff] }
 0x2c9   : >> { %v10633_v11 = vpop.f32.mrf.mxu1  ;;  %v10702_v35 = vpop.f32.mrf.mxu0 }
 0x2ca   : >> { %16938 = vst [vmem:[#allocation6_spill] sm:$0xff] %v15766_v17  ;;  %v15769_v13 = vadd.f32 %v6090_v53, %v5531_v24  ;;  %v5534_v40 = vadd.f32 %v10633_v11, %v16941_v10  ;;  %v16947_v53 = vld [vmem:[#allocation13_spill] sm:$0xff] }
 0x2cb   : >> { %v5411_v26 = vpop.f32.mrf.mxu1  ;;  %v6106_v44 = vpop.f32.mrf.mxu0 }
 0x2cc   : >> { %16940 = vst [vmem:[#allocation37_spill] sm:$0xff] %v15769_v13  ;;  %v15772_v47 = vadd.f32 %v10699_v61, %v5534_v40  ;;  %v5532_v56 = vadd.f32 %v5411_v26, %v16943_v14  ;;  %v16949_v61 = vld [vmem:[#allocation7_spill] sm:$0xff] }
 0x2cd   : >> { %v10636_v25 = vpop.f32.mrf.mxu1  ;;  %v10703_v41 = vpop.f32.mrf.mxu0 }
 0x2ce   : >> { %16942 = vst [vmem:[#allocation14_spill] sm:$0xff] %v15772_v47  ;;  %v15775_v19 = vadd.f32 %v6093_v52, %v5532_v56  ;;  %v5537_v36 = vadd.f32 %v10636_v25, %v16945_v42  ;;  %v16950_v52 = vld [vmem:[#allocation110_spill] sm:$0xff] }
 0x2cf   : >> { %v5424_v17 = vpop.f32.mrf.mxu1  ;;  %v6109_v16 = vpop.f32.mrf.mxu0 }
 0x2d0   : >> { %16944 = vst [vmem:[#allocation41_spill] sm:$0xff] %v15775_v19  ;;  %v15778_v62 = vadd.f32 %v10702_v35, %v5537_v36  ;;  %v5535_v24 = vadd.f32 %v5424_v17, %v16947_v53  ;;  %v16951_v35 = vld [vmem:[#allocation65_spill] sm:$0xff] }
 0x2d1   : >> { %v10637_v13 = vpop.f32.mrf.mxu1  ;;  %v10706_v11 = vpop.f32.mrf.mxu0 }
 0x2d2   : >> { %16946 = vst [vmem:[#allocation8_spill] sm:$0xff] %v15778_v62  ;;  %v15781_v10 = vadd.f32 %v6106_v44, %v5535_v24  ;;  %v5538_v40 = vadd.f32 %v10637_v13, %v16949_v61  ;;  %v16952_v44 = vld [vmem:[#allocation73_spill] sm:$0xff] }
 0x2d3   : >> { %v5427_v47 = vpop.f32.mrf.mxu1  ;;  %v6122_v26 = vpop.f32.mrf.mxu0 }
 0x2d4   : >> { %16948 = vst [vmem:[#allocation78_spill] sm:$0xff] %v15781_v10  ;;  %v15784_v14 = vadd.f32 %v10703_v41, %v5538_v40  ;;  %v5536_v56 = vadd.f32 %v5427_v47, %v16950_v52 }
 0x2d5   : >> { %v10640_v19 = vpop.f32.mrf.mxu1  ;;  %v10707_v25 = vpop.f32.mrf.mxu0 }
 0x2d6   : >> { %v15787_v42 = vadd.f32 %v6109_v16, %v5536_v56  ;;  %v5541_v36 = vadd.f32 %v10640_v19, %v16951_v35 }
 0x2d7   : >> { %v5440_v62 = vpop.f32.mrf.mxu1  ;;  %v6125_v17 = vpop.f32.mrf.mxu0 }
 0x2d8   : >> { %v15790_v53 = vadd.f32 %v10706_v11, %v5541_v36  ;;  %v5539_v24 = vadd.f32 %v5440_v62, %v16952_v44 }
 0x2d9   : >> { %v10641_v10 = vpop.f32.mrf.mxu1  ;;  %v10710_v13 = vpop.f32.mrf.mxu0 }
 0x2da   : >> { %v15793_v61 = vadd.f32 %v6122_v26, %v5539_v24  ;;  %v5542_v41 = vadd.f32 %v10641_v10, %v15214_v27 }
 0x2db   : >> { %v5443_v40 = vpop.f32.mrf.mxu1  ;;  %v6138_v47 = vpop.f32.mrf.mxu0 }
 0x2dc   : >> { %v15796_v52 = vadd.f32 %v10707_v25, %v5542_v41  ;;  %v5540_v16 = vadd.f32 %v5443_v40, %v15223_v31 }
 0x2dd   : >> { %v10644_v56 = vpop.f32.mrf.mxu1  ;;  %v10711_v19 = vpop.f32.mrf.mxu0 }
 0x2de   : >> { %16953 = vst [vmem:[#allocation80_spill] sm:$0xff] %v15796_v52  ;;  %v15799_v35 = vadd.f32 %v6125_v17, %v5540_v16  ;;  %v5545_v11 = vadd.f32 %v10644_v56, %v15245_v15  ;;  %v16958_v17 = vld [vmem:[#allocation67_spill] sm:$0xff] }
 0x2df   : >> { %v5456_v36 = vpop.f32.mrf.mxu1  ;;  %v6141_v62 = vpop.f32.mrf.mxu0 }
 0x2e0   : >> { %16954 = vst [vmem:[#allocation39_spill] sm:$0xff] %v15799_v35  ;;  %v15802_v44 = vadd.f32 %v10710_v13, %v5545_v11  ;;  %v5543_v26 = vadd.f32 %v5456_v36, %v15265_v58  ;;  %v16960_v13 = vld [vmem:[#allocation63_spill] sm:$0xff] }
 0x2e1   : >> { %v10645_v24 = vpop.f32.mrf.mxu1  ;;  %v10714_v27 = vpop.f32.mrf.mxu0 }
 0x2e2   : >> { %16955 = vst [vmem:[#allocation28_spill] sm:$0xff] %v15802_v44  ;;  %v15805_v10 = vadd.f32 %v6138_v47, %v5543_v26  ;;  %v5546_v25 = vadd.f32 %v10645_v24, %v15277_v22  ;;  %v16962_v47 = vld [vmem:[#allocation71_spill] sm:$0xff] }
 0x2e3   : >> { %v5459_v41 = vpop.f32.mrf.mxu1  ;;  %v6154_v31 = vpop.f32.mrf.mxu0 }
 0x2e4   : >> { %16956 = vst [vmem:[#allocation31_spill] sm:$0xff] %v15805_v10  ;;  %v15808_v40 = vadd.f32 %v10711_v19, %v5546_v25  ;;  %v5544_v16 = vadd.f32 %v5459_v41, %v16958_v17  ;;  %v16964_v19 = vld [vmem:[#allocation16_spill] sm:$0xff] }
 0x2e5   : >> { %v10648_v35 = vpop.f32.mrf.mxu1  ;;  %v10715_v15 = vpop.f32.mrf.mxu0 }
 0x2e6   : >> { %16957 = vst [vmem:[#allocation20_spill] sm:$0xff] %v15808_v40  ;;  %v15811_v56 = vadd.f32 %v6141_v62, %v5544_v16  ;;  %v5549_v11 = vadd.f32 %v10648_v35, %v16960_v13  ;;  %v16966_v62 = vld [vmem:[#allocation18_spill] sm:$0xff] }
 0x2e7   : >> { %v5472_v44 = vpop.f32.mrf.mxu1  ;;  %v6157_v58 = vpop.f32.mrf.mxu0 }
 0x2e8   : >> { %16959 = vst [vmem:[#allocation81_spill] sm:$0xff] %v15811_v56  ;;  %v15814_v36 = vadd.f32 %v10714_v27, %v5549_v11  ;;  %v5547_v26 = vadd.f32 %v5472_v44, %v16962_v47  ;;  %v16968_v27 = vld [vmem:[#allocation68_spill] sm:$0xff] }
 0x2e9   : >> { %v10649_v10 = vpop.f32.mrf.mxu1 }
 0x2ea   : >> { %16961 = vst [vmem:[#allocation82_spill] sm:$0xff] %v15814_v36  ;;  %v10786_v22 = vpop.f32.mrf.mxu0  ;;  %v15817_v24 = vadd.f32 %v6154_v31, %v5547_v26  ;;  %v5550_v25 = vadd.f32 %v10649_v10, %v16964_v19  ;;  %v16969_v26 = vld [vmem:[#allocation57_spill] sm:$0xff] }
 0x2eb   : >> { %v5475_v41 = vpop.f32.mrf.mxu1  ;;  %v16970_v36 = vld [vmem:[#allocation5_spill] sm:$0xff] }
 0x2ec   : >> { %16963 = vst [vmem:[#allocation23_spill] sm:$0xff] %v15817_v24  ;;  %v8038_v17 = vpop.f32.mrf.mxu0  ;;  %v15820_v40 = vadd.f32 %v10715_v15, %v5550_v25  ;;  %v5548_v16 = vadd.f32 %v5475_v41, %v16966_v62  ;;  %v16971_v25 = vld [vmem:[#allocation79_spill] sm:$0xff] }
 0x2ed   : >> { %v10720_v35 = vpop.f32.mrf.mxu1 }
 0x2ee   : >> { %16965 = vst [vmem:[#allocation84_spill] sm:$0xff] %v15820_v40  ;;  %v10787_v13 = vpop.f32.mrf.mxu0  ;;  %v15823_v56 = vadd.f32 %v6157_v58, %v5548_v16  ;;  %v7465_v11 = vadd.f32 %v10720_v35, %v16968_v27  ;;  %v16972_v27 = vld [vmem:[#allocation60_spill] sm:$0xff] }
 0x2ef   : >> { %v7208_v44 = vpop.f32.mrf.mxu1 }
 0x2f0   : >> { %16967 = vst [vmem:[#allocation85_spill] sm:$0xff] %v15823_v56  ;;  %v8041_v47 = vpop.f32.mrf.mxu0  ;;  %v8295_v31 = vadd.f32 %v10786_v22, %v7465_v11  ;;  %v7463_v24 = vadd.f32 %v7208_v44, %v16969_v26 }
 0x2f1   : >> { %v10721_v10 = vpop.f32.mrf.mxu1 }
 0x2f2   : >> { %v10790_v19 = vpop.f32.mrf.mxu0  ;;  %v8365_v52 = vadd.f32 %v16970_v36, %v8295_v31  ;;  %v8293_v15 = vadd.f32 %v8038_v17, %v7463_v24  ;;  %v7466_v41 = vadd.f32 %v10721_v10, %v16971_v25 }
 0x2f3   : >> { %v7211_v62 = vpop.f32.mrf.mxu1 }
 0x2f4   : >> { %v8054_v40 = vpop.f32.mrf.mxu0  ;;  %v8429_v58 = vmax.f32 %v8365_v52, 0.0  ;;  %v8363_v16 = vadd.f32 %v16970_v36, %v8293_v15  ;;  %v8296_v35 = vadd.f32 %v10787_v13, %v7466_v41  ;;  %v7464_v56 = vadd.f32 %v7211_v62, %v16972_v27 }
 0x2f5   : >> { %v10724_v22 = vpop.f32.mrf.mxu1 }
 0x2f6   : >> { %v10791_v11 = vpop.f32.mrf.mxu0  ;;  %v9892_v44 = vpack.c.bf16 %v8429_v58, %v8429_v58  ;;  %v8427_v24 = vmax.f32 %v8363_v16, 0.0  ;;  %v8366_v17 = vadd.f32 %v16970_v36, %v8296_v35  ;;  %v8294_v31 = vadd.f32 %v8041_v47, %v7464_v56 }
 0x2f7   : >> { %v7469_v52 = vadd.f32 %v10724_v22, %v15426_v32  ;;  %v7224_v26 = vpop.f32.mrf.mxu1 }
 0x2f8   : >> { %v8057_v10 = vpop.f32.mrf.mxu0  ;;  %8753 = vst.msk [vmem:[%s15834_s26 + $0x8] sm:$0xf] %vm8750_vm9, %v9892_v44  ;;  %v9890_v13 = vpack.c.bf16 %v8427_v24, %v8427_v24  ;;  %v8430_v15 = vmax.f32 %v8366_v17, 0.0  ;;  %v8364_v25 = vadd.f32 %v16970_v36, %v8294_v31  ;;  %v7467_v41 = vadd.f32 %v7224_v26, %v15443_v23 }
 0x2f9   : >> { %v8299_v62 = vadd.f32 %v10790_v19, %v7469_v52  ;;  %v10725_v27 = vpop.f32.mrf.mxu1 }
 0x2fa   : >> { %v10794_v58 = vpop.f32.mrf.mxu0  ;;  %8751 = vst.msk [vmem:[%s15834_s26] sm:$0xf] %vm8750_vm9, %v9890_v13  ;;  %v9893_v56 = vpack.c.bf16 %v8430_v15, %v8430_v15  ;;  %v8428_v47 = vmax.f32 %v8364_v25, 0.0  ;;  %v8297_v32 = vadd.f32 %v8054_v40, %v7467_v41  ;;  %v7470_v16 = vadd.f32 %v10725_v27, %v15468_v38 }
 0x2fb   : >> { %v8369_v35 = vadd.f32 %v16970_v36, %v8299_v62  ;;  %v7227_v22 = vpop.f32.mrf.mxu1 }
 0x2fc   : >> { %v8070_v44 = vpop.f32.mrf.mxu0  ;;  %8754 = vst.msk [vmem:[%s15834_s26 + $0xc] sm:$0xf] %vm8750_vm9, %v9893_v56  ;;  %v9891_v24 = vpack.c.bf16 %v8428_v47, %v8428_v47  ;;  %v8367_v23 = vadd.f32 %v16970_v36, %v8297_v32  ;;  %v8300_v19 = vadd.f32 %v10791_v11, %v7470_v16  ;;  %v7468_v17 = vadd.f32 %v7227_v22, %v15478_v2 }
 0x2fd   : >> { %v8433_v31 = vmax.f32 %v8369_v35, 0.0  ;;  %v10728_v52 = vpop.f32.mrf.mxu1 }
 0x2fe   : >> { %v10795_v26 = vpop.f32.mrf.mxu0  ;;  %8752 = vst.msk [vmem:[%s15834_s26 + $0x4] sm:$0xf] %vm8750_vm9, %v9891_v24  ;;  %v8431_v38 = vmax.f32 %v8367_v23, 0.0  ;;  %v8370_v40 = vadd.f32 %v16970_v36, %v8300_v19  ;;  %v8298_v13 = vadd.f32 %v8057_v10, %v7468_v17  ;;  %v7473_v15 = vadd.f32 %v10728_v52, %v15506_v3 }
 0x2ff   : >> { %v9896_v25 = vpack.c.bf16 %v8433_v31, %v8433_v31  ;;  %v7240_v41 = vpop.f32.mrf.mxu1 }
 0x300   : >> { %v8073_v62 = vpop.f32.mrf.mxu0  ;;  %v9894_v27 = vpack.c.bf16 %v8431_v38, %v8431_v38  ;;  %v8434_v11 = vmax.f32 %v8370_v40, 0.0  ;;  %v8368_v2 = vadd.f32 %v16970_v36, %v8298_v13  ;;  %v8303_v56 = vadd.f32 %v10794_v58, %v7473_v15 }
 0x301   : >> { %8757 = vst.msk [vmem:[%s15834_s26 + $0x18] sm:$0xf] %vm8750_vm9, %v9896_v25  ;;  %v7471_v47 = vadd.f32 %v7240_v41, %v15527_v49  ;;  %v10729_v32 = vpop.f32.mrf.mxu1 }
 0x302   : >> { %v10798_v16 = vpop.f32.mrf.mxu0  ;;  %8755 = vst.msk [vmem:[%s15834_s26 + $0x10] sm:$0xf] %vm8750_vm9, %v9894_v27  ;;  %v9897_v10 = vpack.c.bf16 %v8434_v11, %v8434_v11  ;;  %v8432_v3 = vmax.f32 %v8368_v2, 0.0  ;;  %v8373_v35 = vadd.f32 %v16970_v36, %v8303_v56  ;;  %v7474_v22 = vadd.f32 %v10729_v32, %v15543_v57  ;;  %v16973_v2 = vld [vmem:[#allocation74_spill] sm:$0xff] }
 0x303   : >> { %v8301_v24 = vadd.f32 %v8070_v44, %v7471_v47  ;;  %v7243_v23 = vpop.f32.mrf.mxu1 }
 0x304   : >> { %v8086_v19 = vpop.f32.mrf.mxu0  ;;  %8758 = vst.msk [vmem:[%s15834_s26 + $0x1c] sm:$0xf] %vm8750_vm9, %v9897_v10  ;;  %v9895_v58 = vpack.c.bf16 %v8432_v3, %v8432_v3  ;;  %v8437_v17 = vmax.f32 %v8373_v35, 0.0  ;;  %v8304_v49 = vadd.f32 %v10795_v26, %v7474_v22  ;;  %v7472_v31 = vadd.f32 %v7243_v23, %v15560_v20  ;;  %v16974_v22 = vld [vmem:[#allocation75_spill] sm:$0xff] }
 0x305   : >> { %v8371_v52 = vadd.f32 %v16970_v36, %v8301_v24  ;;  %v10732_v38 = vpop.f32.mrf.mxu1 }
 0x306   : >> { %v10799_v40 = vpop.f32.mrf.mxu0  ;;  %8756 = vst.msk [vmem:[%s15834_s26 + $0x14] sm:$0xf] %vm8750_vm9, %v9895_v58  ;;  %v9900_v13 = vpack.c.bf16 %v8437_v17, %v8437_v17  ;;  %v8374_v57 = vadd.f32 %v16970_v36, %v8304_v49  ;;  %v8302_v44 = vadd.f32 %v8073_v62, %v7472_v31  ;;  %v7477_v15 = vadd.f32 %v10732_v38, %v15576_v30  ;;  %v16975_v31 = vld [vmem:[#allocation12_spill] sm:$0xff] }
 0x307   : >> { %v8435_v25 = vmax.f32 %v8371_v52, 0.0  ;;  %v7256_v41 = vpop.f32.mrf.mxu1 }
 0x308   : >> { %v8089_v27 = vpop.f32.mrf.mxu0  ;;  %8761 = vst.msk [vmem:[%s15834_s26 + $0x28] sm:$0xf] %vm8750_vm9, %v9900_v13  ;;  %v8438_v20 = vmax.f32 %v8374_v57, 0.0  ;;  %v8372_v26 = vadd.f32 %v16970_v36, %v8302_v44  ;;  %v8307_v11 = vadd.f32 %v10798_v16, %v7477_v15  ;;  %v7475_v56 = vadd.f32 %v7256_v41, %v16973_v2 }
 0x309   : >> { %v9898_v47 = vpack.c.bf16 %v8435_v25, %v8435_v25  ;;  %v10733_v32 = vpop.f32.mrf.mxu1 }
 0x30a   : >> { %v10802_v10 = vpop.f32.mrf.mxu0  ;;  %v9901_v3 = vpack.c.bf16 %v8438_v20, %v8438_v20  ;;  %v8436_v62 = vmax.f32 %v8372_v26, 0.0  ;;  %v8377_v30 = vadd.f32 %v16970_v36, %v8307_v11  ;;  %v8305_v35 = vadd.f32 %v8086_v19, %v7475_v56 }
 0x30b   : >> { %8759 = vst.msk [vmem:[%s15834_s26 + $0x20] sm:$0xf] %vm8750_vm9, %v9898_v47  ;;  %v7478_v24 = vadd.f32 %v10733_v32, %v16974_v22  ;;  %v7259_v23 = vpop.f32.mrf.mxu1 }
 0x30c   : >> { %v8102_v58 = vpop.f32.mrf.mxu0  ;;  %8762 = vst.msk [vmem:[%s15834_s26 + $0x2c] sm:$0xf] %vm8750_vm9, %v9901_v3  ;;  %v9899_v16 = vpack.c.bf16 %v8436_v62, %v8436_v62  ;;  %v8441_v17 = vmax.f32 %v8377_v30, 0.0  ;;  %v8375_v49 = vadd.f32 %v16970_v36, %v8305_v35  ;;  %v7476_v52 = vadd.f32 %v7259_v23, %v16975_v31 }
 0x30d   : >> { %v8308_v38 = vadd.f32 %v10799_v40, %v7478_v24  ;;  %v10736_v13 = vpop.f32.mrf.mxu1 }
 0x30e   : >> { %v10803_v57 = vpop.f32.mrf.mxu0  ;;  %8760 = vst.msk [vmem:[%s15834_s26 + $0x24] sm:$0xf] %vm8750_vm9, %v9899_v16  ;;  %v9904_v19 = vpack.c.bf16 %v8441_v17, %v8441_v17  ;;  %v8439_v44 = vmax.f32 %v8375_v49, 0.0  ;;  %v8306_v15 = vadd.f32 %v8089_v27, %v7476_v52  ;;  %v7481_v25 = vadd.f32 %v10736_v13, %v15628_v18 }
 0x30f   : >> { %v8378_v41 = vadd.f32 %v16970_v36, %v8308_v38  ;;  %v7272_v20 = vpop.f32.mrf.mxu1 }
 0x310   : >> { %v8105_v26 = vpop.f32.mrf.mxu0  ;;  %8765 = vst.msk [vmem:[%s15834_s26 + $0x38] sm:$0xf] %vm8750_vm9, %v9904_v19  ;;  %v9902_v11 = vpack.c.bf16 %v8439_v44, %v8439_v44  ;;  %v8376_v2 = vadd.f32 %v16970_v36, %v8306_v15  ;;  %v8311_v40 = vadd.f32 %v10802_v10, %v7481_v25  ;;  %v7479_v56 = vadd.f32 %v7272_v20, %v15651_v59 }
 0x311   : >> { %v8442_v47 = vmax.f32 %v8378_v41, 0.0  ;;  %v10737_v32 = vpop.f32.mrf.mxu1 }
 0x312   : >> { %8763 = vst.msk [vmem:[%s15834_s26 + $0x30] sm:$0xf] %vm8750_vm9, %v9902_v11  ;;  %v8440_v18 = vmax.f32 %v8376_v2, 0.0  ;;  %v8381_v27 = vadd.f32 %v16970_v36, %v8311_v40  ;;  %v8309_v62 = vadd.f32 %v8102_v58, %v7479_v56  ;;  %v7482_v30 = vadd.f32 %v10737_v32, %v15667_v7 }
 0x313   : >> { %v10806_v3 = vpop.f32.mrf.mxu0  ;;  %v9905_v35 = vpack.c.bf16 %v8442_v47, %v8442_v47  ;;  %v7275_v22 = vpop.f32.mrf.mxu1 }
 0x314   : >> { %v9903_v23 = vpack.c.bf16 %v8440_v18, %v8440_v18  ;;  %v8445_v10 = vmax.f32 %v8381_v27, 0.0  ;;  %v8379_v59 = vadd.f32 %v16970_v36, %v8309_v62  ;;  %v8312_v16 = vadd.f32 %v10803_v57, %v7482_v30 }
 0x315   : >> { %v8118_v24 = vpop.f32.mrf.mxu0  ;;  %8766 = vst.msk [vmem:[%s15834_s26 + $0x3c] sm:$0xf] %vm8750_vm9, %v9905_v35  ;;  %v7480_v17 = vadd.f32 %v7275_v22, %v15674_v33 }
 0x316   : >> { %v10740_v49 = vpop.f32.mrf.mxu1  ;;  %8764 = vst.msk [vmem:[%s15834_s26 + $0x34] sm:$0xf] %vm8750_vm9, %v9903_v23  ;;  %v9908_v58 = vpack.c.bf16 %v8445_v10, %v8445_v10  ;;  %v8443_v7 = vmax.f32 %v8379_v59, 0.0  ;;  %v8382_v52 = vadd.f32 %v16970_v36, %v8312_v16 }
 0x317   : >> { %v10807_v31 = vpop.f32.mrf.mxu0  ;;  %v7485_v38 = vadd.f32 %v10740_v49, %v15679_v28  ;;  %v8310_v13 = vadd.f32 %v8105_v26, %v7480_v17 }
 0x318   : >> { %v7288_v19 = vpop.f32.mrf.mxu1  ;;  %8769 = vst.msk [vmem:[%s15834_s26 + $0x48] sm:$0xf] %vm8750_vm9, %v9908_v58  ;;  %v9906_v57 = vpack.c.bf16 %v8443_v7, %v8443_v7  ;;  %v8446_v15 = vmax.f32 %v8382_v52, 0.0 }
 0x319   : >> { %v8121_v44 = vpop.f32.mrf.mxu0  ;;  %v8315_v33 = vadd.f32 %v10806_v3, %v7485_v38  ;;  %v7483_v25 = vadd.f32 %v7288_v19, %v15685_v50  ;;  %v8380_v41 = vadd.f32 %v16970_v36, %v8310_v13 }
 0x31a   : >> { %v10741_v20 = vpop.f32.mrf.mxu1  ;;  %8767 = vst.msk [vmem:[%s15834_s26 + $0x40] sm:$0xf] %vm8750_vm9, %v9906_v57  ;;  %v9909_v2 = vpack.c.bf16 %v8446_v15, %v8446_v15 }
 0x31b   : >> { %v10810_v11 = vpop.f32.mrf.mxu0  ;;  %v8385_v28 = vadd.f32 %v16970_v36, %v8315_v33  ;;  %v8313_v26 = vadd.f32 %v8118_v24, %v7483_v25  ;;  %v7486_v40 = vadd.f32 %v10741_v20, %v15691_v6  ;;  %v8444_v56 = vmax.f32 %v8380_v41, 0.0 }
 0x31c   : >> { %v7291_v47 = vpop.f32.mrf.mxu1  ;;  %8770 = vst.msk [vmem:[%s15834_s26 + $0x4c] sm:$0xf] %vm8750_vm9, %v9909_v2 }
 0x31d   : >> { %v8134_v32 = vpop.f32.mrf.mxu0  ;;  %v8449_v50 = vmax.f32 %v8385_v28, 0.0  ;;  %v8383_v3 = vadd.f32 %v16970_v36, %v8313_v26  ;;  %v8316_v18 = vadd.f32 %v10807_v31, %v7486_v40  ;;  %v7484_v27 = vadd.f32 %v7291_v47, %v15695_v51 }
 0x31e   : >> { %v9907_v62 = vpack.c.bf16 %v8444_v56, %v8444_v56  ;;  %v10744_v30 = vpop.f32.mrf.mxu1 }
 0x31f   : >> { %v10811_v35 = vpop.f32.mrf.mxu0  ;;  %v9912_v22 = vpack.c.bf16 %v8449_v50, %v8449_v50  ;;  %v8447_v24 = vmax.f32 %v8383_v3, 0.0  ;;  %v8386_v6 = vadd.f32 %v16970_v36, %v8316_v18  ;;  %v8314_v23 = vadd.f32 %v8121_v44, %v7484_v27 }
 0x320   : >> { %8768 = vst.msk [vmem:[%s15834_s26 + $0x44] sm:$0xf] %vm8750_vm9, %v9907_v62  ;;  %v7489_v10 = vadd.f32 %v10744_v30, %v15704_v8  ;;  %v7304_v59 = vpop.f32.mrf.mxu1 }
 0x321   : >> { %v8137_v16 = vpop.f32.mrf.mxu0  ;;  %8773 = vst.msk [vmem:[%s15834_s26 + $0x58] sm:$0xf] %vm8750_vm9, %v9912_v22  ;;  %v9910_v17 = vpack.c.bf16 %v8447_v24, %v8447_v24  ;;  %v8450_v51 = vmax.f32 %v8386_v6, 0.0  ;;  %v8384_v49 = vadd.f32 %v16970_v36, %v8314_v23  ;;  %v7487_v31 = vadd.f32 %v7304_v59, %v15708_v60 }
 0x322   : >> { %v8319_v58 = vadd.f32 %v10810_v11, %v7489_v10  ;;  %v10745_v7 = vpop.f32.mrf.mxu1 }
 0x323   : >> { %v10814_v52 = vpop.f32.mrf.mxu0  ;;  %8771 = vst.msk [vmem:[%s15834_s26 + $0x50] sm:$0xf] %vm8750_vm9, %v9910_v17  ;;  %v9913_v38 = vpack.c.bf16 %v8450_v51, %v8450_v51  ;;  %v8448_v13 = vmax.f32 %v8384_v49, 0.0  ;;  %v8317_v8 = vadd.f32 %v8134_v32, %v7487_v31  ;;  %v7490_v19 = vadd.f32 %v10745_v7, %v15711_v21 }
 0x324   : >> { %v8389_v44 = vadd.f32 %v16970_v36, %v8319_v58  ;;  %v7307_v57 = vpop.f32.mrf.mxu1 }
 0x325   : >> { %v8150_v15 = vpop.f32.mrf.mxu0  ;;  %8774 = vst.msk [vmem:[%s15834_s26 + $0x5c] sm:$0xf] %vm8750_vm9, %v9913_v38  ;;  %v9911_v33 = vpack.c.bf16 %v8448_v13, %v8448_v13  ;;  %v8387_v60 = vadd.f32 %v16970_v36, %v8317_v8  ;;  %v8320_v25 = vadd.f32 %v10811_v35, %v7490_v19  ;;  %v7488_v41 = vadd.f32 %v7307_v57, %v15715_v0 }
 0x326   : >> { %v8453_v20 = vmax.f32 %v8389_v44, 0.0  ;;  %v10748_v11 = vpop.f32.mrf.mxu1 }
 0x327   : >> { %v10815_v2 = vpop.f32.mrf.mxu0  ;;  %8772 = vst.msk [vmem:[%s15834_s26 + $0x54] sm:$0xf] %vm8750_vm9, %v9911_v33  ;;  %v8451_v21 = vmax.f32 %v8387_v60, 0.0  ;;  %v8390_v28 = vadd.f32 %v16970_v36, %v8320_v25  ;;  %v8318_v26 = vadd.f32 %v8137_v16, %v7488_v41  ;;  %v7493_v40 = vadd.f32 %v10748_v11, %v15718_v9 }
 0x328   : >> { %v9916_v56 = vpack.c.bf16 %v8453_v20, %v8453_v20  ;;  %v7320_v47 = vpop.f32.mrf.mxu1 }
 0x329   : >> { %v8153_v32 = vpop.f32.mrf.mxu0  ;;  %v9914_v50 = vpack.c.bf16 %v8451_v21, %v8451_v21  ;;  %v8454_v3 = vmax.f32 %v8390_v28, 0.0  ;;  %v8388_v0 = vadd.f32 %v16970_v36, %v8318_v26  ;;  %v8323_v18 = vadd.f32 %v10814_v52, %v7493_v40 }
 0x32a   : >> { %8777 = vst.msk [vmem:[%s15834_s26 + $0x68] sm:$0xf] %vm8750_vm9, %v9916_v56  ;;  %v7491_v27 = vadd.f32 %v7320_v47, %v15721_v39  ;;  %v10749_v62 = vpop.f32.mrf.mxu1 }
 0x32b   : >> { %v10818_v30 = vpop.f32.mrf.mxu0  ;;  %8775 = vst.msk [vmem:[%s15834_s26 + $0x60] sm:$0xf] %vm8750_vm9, %v9914_v50  ;;  %v9917_v35 = vpack.c.bf16 %v8454_v3, %v8454_v3  ;;  %v8452_v9 = vmax.f32 %v8388_v0, 0.0  ;;  %v8393_v22 = vadd.f32 %v16970_v36, %v8323_v18  ;;  %v7494_v24 = vadd.f32 %v10749_v62, %v15724_v45 }
 0x32c   : >> { %v8321_v6 = vadd.f32 %v8150_v15, %v7491_v27  ;;  %v7323_v23 = vpop.f32.mrf.mxu1 }
 0x32d   : >> { %v8166_v10 = vpop.f32.mrf.mxu0  ;;  %8778 = vst.msk [vmem:[%s15834_s26 + $0x6c] sm:$0xf] %vm8750_vm9, %v9917_v35  ;;  %v9915_v59 = vpack.c.bf16 %v8452_v9, %v8452_v9  ;;  %v8457_v16 = vmax.f32 %v8393_v22, 0.0  ;;  %v8324_v39 = vadd.f32 %v10815_v2, %v7494_v24  ;;  %v7492_v17 = vadd.f32 %v7323_v23, %v15727_v48 }
 0x32e   : >> { %v8391_v51 = vadd.f32 %v16970_v36, %v8321_v6  ;;  %v10752_v49 = vpop.f32.mrf.mxu1 }
 0x32f   : >> { %v10819_v31 = vpop.f32.mrf.mxu0  ;;  %8776 = vst.msk [vmem:[%s15834_s26 + $0x64] sm:$0xf] %vm8750_vm9, %v9915_v59  ;;  %v9920_v58 = vpack.c.bf16 %v8457_v16, %v8457_v16  ;;  %v8394_v45 = vadd.f32 %v16970_v36, %v8324_v39  ;;  %v8322_v7 = vadd.f32 %v8153_v32, %v7492_v17  ;;  %v7497_v52 = vadd.f32 %v10752_v49, %v15730_v4 }
 0x330   : >> { %v8455_v38 = vmax.f32 %v8391_v51, 0.0  ;;  %v7336_v13 = vpop.f32.mrf.mxu1 }
 0x331   : >> { %v8169_v8 = vpop.f32.mrf.mxu0  ;;  %8781 = vst.msk [vmem:[%s15834_s26 + $0x78] sm:$0xf] %vm8750_vm9, %v9920_v58  ;;  %v8458_v48 = vmax.f32 %v8394_v45, 0.0  ;;  %v8392_v19 = vadd.f32 %v16970_v36, %v8322_v7  ;;  %v8327_v44 = vadd.f32 %v10818_v30, %v7497_v52  ;;  %v7495_v57 = vadd.f32 %v7336_v13, %v15733_v12 }
 0x332   : >> { %v9918_v15 = vpack.c.bf16 %v8455_v38, %v8455_v38  ;;  %v10753_v33 = vpop.f32.mrf.mxu1 }
 0x333   : >> { %v10822_v60 = vpop.f32.mrf.mxu0  ;;  %v9921_v25 = vpack.c.bf16 %v8458_v48, %v8458_v48  ;;  %v8456_v41 = vmax.f32 %v8392_v19, 0.0  ;;  %v8397_v4 = vadd.f32 %v16970_v36, %v8327_v44  ;;  %v8325_v20 = vadd.f32 %v8166_v10, %v7495_v57 }
 0x334   : >> { %8779 = vst.msk [vmem:[%s15834_s26 + $0x70] sm:$0xf] %vm8750_vm9, %v9918_v15  ;;  %v7498_v11 = vadd.f32 %v10753_v33, %v15736_v1  ;;  %v7339_v2 = vpop.f32.mrf.mxu1 }
 0x335   : >> { %v8182_v21 = vpop.f32.mrf.mxu0  ;;  %8782 = vst.msk [vmem:[%s15834_s26 + $0x7c] sm:$0xf] %vm8750_vm9, %v9921_v25  ;;  %v9919_v28 = vpack.c.bf16 %v8456_v41, %v8456_v41  ;;  %v8461_v12 = vmax.f32 %v8397_v4, 0.0  ;;  %v8395_v26 = vadd.f32 %v16970_v36, %v8325_v20  ;;  %v7496_v40 = vadd.f32 %v7339_v2, %v15739_v46 }
 0x336   : >> { %v8328_v56 = vadd.f32 %v10819_v31, %v7498_v11  ;;  %v10756_v47 = vpop.f32.mrf.mxu1 }
 0x337   : >> { %v10823_v32 = vpop.f32.mrf.mxu0  ;;  %8780 = vst.msk [vmem:[%s15834_s26 + $0x74] sm:$0xf] %vm8750_vm9, %v9919_v28  ;;  %v9924_v50 = vpack.c.bf16 %v8461_v12, %v8461_v12  ;;  %v8459_v3 = vmax.f32 %v8395_v26, 0.0  ;;  %v8326_v1 = vadd.f32 %v8169_v8, %v7496_v40  ;;  %v7501_v0 = vadd.f32 %v10756_v47, %v15742_v29 }
 0x338   : >> { %v8398_v18 = vadd.f32 %v16970_v36, %v8328_v56  ;;  %v7352_v27 = vpop.f32.mrf.mxu1 }
 0x339   : >> { %v8185_v62 = vpop.f32.mrf.mxu0  ;;  %8785 = vst.msk [vmem:[%s15834_s26 + $0x88] sm:$0xf] %vm8750_vm9, %v9924_v50  ;;  %v9922_v30 = vpack.c.bf16 %v8459_v3, %v8459_v3  ;;  %v8396_v46 = vadd.f32 %v16970_v36, %v8326_v1  ;;  %v8331_v35 = vadd.f32 %v10822_v60, %v7501_v0  ;;  %v7499_v9 = vadd.f32 %v7352_v27, %v15745_v54  ;;  %v16976_v1 = vld [vmem:[#allocation6_spill] sm:$0xff] }
 0x33a   : >> { %v8462_v22 = vmax.f32 %v8398_v18, 0.0  ;;  %v10757_v24 = vpop.f32.mrf.mxu1 }
 0x33b   : >> { %8783 = vst.msk [vmem:[%s15834_s26 + $0x80] sm:$0xf] %vm8750_vm9, %v9922_v30  ;;  %v8460_v29 = vmax.f32 %v8396_v46, 0.0  ;;  %v8401_v23 = vadd.f32 %v16970_v36, %v8331_v35  ;;  %v8329_v10 = vadd.f32 %v8182_v21, %v7499_v9  ;;  %v7502_v59 = vadd.f32 %v10757_v24, %v15748_v5  ;;  %v16977_v46 = vld [vmem:[#allocation37_spill] sm:$0xff] }
 0x33c   : >> { %v10826_v6 = vpop.f32.mrf.mxu0  ;;  %v9925_v16 = vpack.c.bf16 %v8462_v22, %v8462_v22  ;;  %v7355_v39 = vpop.f32.mrf.mxu1 }
 0x33d   : >> { %v9923_v51 = vpack.c.bf16 %v8460_v29, %v8460_v29  ;;  %v8465_v49 = vmax.f32 %v8401_v23, 0.0  ;;  %v8399_v54 = vadd.f32 %v16970_v36, %v8329_v10  ;;  %v8332_v31 = vadd.f32 %v10823_v32, %v7502_v59  ;;  %v16978_v10 = vld [vmem:[#allocation14_spill] sm:$0xff] }
 0x33e   : >> { %v8198_v17 = vpop.f32.mrf.mxu0  ;;  %8786 = vst.msk [vmem:[%s15834_s26 + $0x8c] sm:$0xf] %vm8750_vm9, %v9925_v16  ;;  %v7500_v58 = vadd.f32 %v7355_v39, %v15751_v63  ;;  %v10760_v45 = vpop.f32.mrf.mxu1 }
 0x33f   : >> { %8784 = vst.msk [vmem:[%s15834_s26 + $0x84] sm:$0xf] %vm8750_vm9, %v9923_v51  ;;  %v9928_v52 = vpack.c.bf16 %v8465_v49, %v8465_v49  ;;  %v8463_v5 = vmax.f32 %v8399_v54, 0.0  ;;  %v8402_v38 = vadd.f32 %v16970_v36, %v8332_v31  ;;  %v7505_v13 = vadd.f32 %v10760_v45, %v15754_v43  ;;  %v16979_v31 = vld [vmem:[#allocation41_spill] sm:$0xff] }
 0x340   : >> { %v10827_v7 = vpop.f32.mrf.mxu0  ;;  %v8330_v8 = vadd.f32 %v8185_v62, %v7500_v58  ;;  %v7368_v48 = vpop.f32.mrf.mxu1 }
 0x341   : >> { %8789 = vst.msk [vmem:[%s15834_s26 + $0x98] sm:$0xf] %vm8750_vm9, %v9928_v52  ;;  %v9926_v44 = vpack.c.bf16 %v8463_v5, %v8463_v5  ;;  %v8466_v57 = vmax.f32 %v8402_v38, 0.0  ;;  %v8335_v63 = vadd.f32 %v10826_v6, %v7505_v13  ;;  %v7503_v15 = vadd.f32 %v7368_v48, %v15757_v55 }
 0x342   : >> { %v8201_v19 = vpop.f32.mrf.mxu0  ;;  %v8400_v33 = vadd.f32 %v16970_v36, %v8330_v8  ;;  %v10761_v60 = vpop.f32.mrf.mxu1  ;;  %v16980_v8 = vld [vmem:[#allocation8_spill] sm:$0xff] }
 0x343   : >> { %8787 = vst.msk [vmem:[%s15834_s26 + $0x90] sm:$0xf] %vm8750_vm9, %v9926_v44  ;;  %v9929_v41 = vpack.c.bf16 %v8466_v57, %v8466_v57  ;;  %v8405_v43 = vadd.f32 %v16970_v36, %v8335_v63  ;;  %v8333_v4 = vadd.f32 %v8198_v17, %v7503_v15  ;;  %v7506_v20 = vadd.f32 %v10761_v60, %v15760_v37 }
 0x344   : >> { %v10830_v25 = vpop.f32.mrf.mxu0  ;;  %v8464_v11 = vmax.f32 %v8400_v33, 0.0  ;;  %v7371_v2 = vpop.f32.mrf.mxu1 }
 0x345   : >> { %8790 = vst.msk [vmem:[%s15834_s26 + $0x9c] sm:$0xf] %vm8750_vm9, %v9929_v41  ;;  %v8469_v55 = vmax.f32 %v8405_v43, 0.0  ;;  %v8403_v28 = vadd.f32 %v16970_v36, %v8333_v4  ;;  %v8336_v12 = vadd.f32 %v10827_v7, %v7506_v20  ;;  %v7504_v26 = vadd.f32 %v7371_v2, %v15763_v34 }
 0x346   : >> { %v8214_v21 = vpop.f32.mrf.mxu0  ;;  %v9927_v40 = vpack.c.bf16 %v8464_v11, %v8464_v11  ;;  %v10764_v56 = vpop.f32.mrf.mxu1 }
 0x347   : >> { %v9932_v32 = vpack.c.bf16 %v8469_v55, %v8469_v55  ;;  %v8467_v50 = vmax.f32 %v8403_v28, 0.0  ;;  %v8406_v37 = vadd.f32 %v16970_v36, %v8336_v12  ;;  %v8334_v3 = vadd.f32 %v8201_v19, %v7504_v26 }
 0x348   : >> { %v10831_v47 = vpop.f32.mrf.mxu0  ;;  %8788 = vst.msk [vmem:[%s15834_s26 + $0x94] sm:$0xf] %vm8750_vm9, %v9927_v40  ;;  %v7509_v0 = vadd.f32 %v10764_v56, %v16976_v1  ;;  %v7384_v18 = vpop.f32.mrf.mxu1 }
 0x349   : >> { %8793 = vst.msk [vmem:[%s15834_s26 + $0xa8] sm:$0xf] %vm8750_vm9, %v9932_v32  ;;  %v9930_v62 = vpack.c.bf16 %v8467_v50, %v8467_v50  ;;  %v8470_v34 = vmax.f32 %v8406_v37, 0.0  ;;  %v8404_v30 = vadd.f32 %v16970_v36, %v8334_v3  ;;  %v7507_v35 = vadd.f32 %v7384_v18, %v16977_v46 }
 0x34a   : >> { %v8217_v27 = vpop.f32.mrf.mxu0  ;;  %v8339_v9 = vadd.f32 %v10830_v25, %v7509_v0  ;;  %v10765_v22 = vpop.f32.mrf.mxu1  ;;  %v16981_v25 = vld [vmem:[#allocation78_spill] sm:$0xff] }
 0x34b   : >> { %8791 = vst.msk [vmem:[%s15834_s26 + $0xa0] sm:$0xf] %vm8750_vm9, %v9930_v62  ;;  %v9933_v6 = vpack.c.bf16 %v8470_v34, %v8470_v34  ;;  %v8468_v29 = vmax.f32 %v8404_v30, 0.0  ;;  %v8337_v23 = vadd.f32 %v8214_v21, %v7507_v35  ;;  %v7510_v59 = vadd.f32 %v10765_v22, %v16978_v10 }
 0x34c   : >> { %v10834_v24 = vpop.f32.mrf.mxu0  ;;  %v8409_v16 = vadd.f32 %v16970_v36, %v8339_v9  ;;  %v7387_v39 = vpop.f32.mrf.mxu1 }
 0x34d   : >> { %8794 = vst.msk [vmem:[%s15834_s26 + $0xac] sm:$0xf] %vm8750_vm9, %v9933_v6  ;;  %v9931_v51 = vpack.c.bf16 %v8468_v29, %v8468_v29  ;;  %v8407_v49 = vadd.f32 %v16970_v36, %v8337_v23  ;;  %v8340_v54 = vadd.f32 %v10831_v47, %v7510_v59  ;;  %v7508_v58 = vadd.f32 %v7387_v39, %v16979_v31  ;;  %v16982_v23 = vld [vmem:[#allocation80_spill] sm:$0xff] }
 0x34e   : >> { %v8230_v17 = vpop.f32.mrf.mxu0  ;;  %v8473_v45 = vmax.f32 %v8409_v16, 0.0  ;;  %v10768_v7 = vpop.f32.mrf.mxu1 }
 0x34f   : >> { %8792 = vst.msk [vmem:[%s15834_s26 + $0xa4] sm:$0xf] %vm8750_vm9, %v9931_v51  ;;  %v8471_v5 = vmax.f32 %v8407_v49, 0.0  ;;  %v8410_v38 = vadd.f32 %v16970_v36, %v8340_v54  ;;  %v8338_v13 = vadd.f32 %v8217_v27, %v7508_v58  ;;  %v7513_v48 = vadd.f32 %v10768_v7, %v16980_v8  ;;  %v16983_v51 = vld [vmem:[#allocation39_spill] sm:$0xff] }
 0x350   : >> { %v10835_v52 = vpop.f32.mrf.mxu0  ;;  %v9936_v19 = vpack.c.bf16 %v8473_v45, %v8473_v45  ;;  %v7400_v44 = vpop.f32.mrf.mxu1 }
 0x351   : >> { %v9934_v63 = vpack.c.bf16 %v8471_v5, %v8471_v5  ;;  %v8474_v15 = vmax.f32 %v8410_v38, 0.0  ;;  %v8408_v33 = vadd.f32 %v16970_v36, %v8338_v13  ;;  %v8343_v60 = vadd.f32 %v10834_v24, %v7513_v48  ;;  %v16984_v5 = vld [vmem:[#allocation28_spill] sm:$0xff] }
 0x352   : >> { %v8233_v57 = vpop.f32.mrf.mxu0  ;;  %8797 = vst.msk [vmem:[%s15834_s26 + $0xb8] sm:$0xf] %vm8750_vm9, %v9936_v19  ;;  %v7511_v41 = vadd.f32 %v7400_v44, %v16981_v25  ;;  %v10769_v43 = vpop.f32.mrf.mxu1 }
 0x353   : >> { %8795 = vst.msk [vmem:[%s15834_s26 + $0xb0] sm:$0xf] %vm8750_vm9, %v9934_v63  ;;  %v9937_v20 = vpack.c.bf16 %v8474_v15, %v8474_v15  ;;  %v8472_v11 = vmax.f32 %v8408_v33, 0.0  ;;  %v8413_v2 = vadd.f32 %v16970_v36, %v8343_v60  ;;  %v7514_v21 = vadd.f32 %v10769_v43, %v15784_v14  ;;  %v16985_v63 = vld [vmem:[#allocation31_spill] sm:$0xff] }
 0x354   : >> { %v10838_v4 = vpop.f32.mrf.mxu0  ;;  %v8341_v55 = vadd.f32 %v8230_v17, %v7511_v41  ;;  %v7403_v28 = vpop.f32.mrf.mxu1 }
 0x355   : >> { %8798 = vst.msk [vmem:[%s15834_s26 + $0xbc] sm:$0xf] %vm8750_vm9, %v9937_v20  ;;  %v9935_v26 = vpack.c.bf16 %v8472_v11, %v8472_v11  ;;  %v8477_v40 = vmax.f32 %v8413_v2, 0.0  ;;  %v8344_v56 = vadd.f32 %v10835_v52, %v7514_v21  ;;  %v7512_v47 = vadd.f32 %v7403_v28, %v15787_v42  ;;  %v16986_v20 = vld [vmem:[#allocation20_spill] sm:$0xff] }
 0x356   : >> { %v8246_v12 = vpop.f32.mrf.mxu0  ;;  %v8411_v32 = vadd.f32 %v16970_v36, %v8341_v55  ;;  %v10772_v50 = vpop.f32.mrf.mxu1 }
 0x357   : >> { %8796 = vst.msk [vmem:[%s15834_s26 + $0xb4] sm:$0xf] %vm8750_vm9, %v9935_v26  ;;  %v9940_v3 = vpack.c.bf16 %v8477_v40, %v8477_v40  ;;  %v8414_v14 = vadd.f32 %v16970_v36, %v8344_v56  ;;  %v8342_v1 = vadd.f32 %v8233_v57, %v7512_v47  ;;  %v7517_v0 = vadd.f32 %v10772_v50, %v15790_v53  ;;  %v16987_v40 = vld [vmem:[#allocation81_spill] sm:$0xff] }
 0x358   : >> { %v10839_v37 = vpop.f32.mrf.mxu0  ;;  %v8475_v18 = vmax.f32 %v8411_v32, 0.0  ;;  %v7416_v27 = vpop.f32.mrf.mxu1 }
 0x359   : >> { %8801 = vst.msk [vmem:[%s15834_s26 + $0xc8] sm:$0xf] %vm8750_vm9, %v9940_v3  ;;  %v8478_v42 = vmax.f32 %v8414_v14, 0.0  ;;  %v8412_v34 = vadd.f32 %v16970_v36, %v8342_v1  ;;  %v8347_v30 = vadd.f32 %v10838_v4, %v7517_v0  ;;  %v7515_v46 = vadd.f32 %v7416_v27, %v15793_v61  ;;  %v16988_v14 = vld [vmem:[#allocation82_spill] sm:$0xff] }
 0x35a   : >> { %v8249_v62 = vpop.f32.mrf.mxu0  ;;  %v9938_v35 = vpack.c.bf16 %v8475_v18, %v8475_v18  ;;  %v10773_v9 = vpop.f32.mrf.mxu1 }
 0x35b   : >> { %v9941_v24 = vpack.c.bf16 %v8478_v42, %v8478_v42  ;;  %v8476_v6 = vmax.f32 %v8412_v34, 0.0  ;;  %v8417_v53 = vadd.f32 %v16970_v36, %v8347_v30  ;;  %v8345_v29 = vadd.f32 %v8246_v12, %v7515_v46  ;;  %v16989_v34 = vld [vmem:[#allocation23_spill] sm:$0xff] }
 0x35c   : >> { %v10842_v22 = vpop.f32.mrf.mxu0  ;;  %8799 = vst.msk [vmem:[%s15834_s26 + $0xc0] sm:$0xf] %vm8750_vm9, %v9938_v35  ;;  %v7518_v10 = vadd.f32 %v10773_v9, %v16982_v23  ;;  %v7419_v59 = vpop.f32.mrf.mxu1 }
 0x35d   : >> { %8802 = vst.msk [vmem:[%s15834_s26 + $0xcc] sm:$0xf] %vm8750_vm9, %v9941_v24  ;;  %v9939_v39 = vpack.c.bf16 %v8476_v6, %v8476_v6  ;;  %v8481_v61 = vmax.f32 %v8417_v53, 0.0  ;;  %v8415_v17 = vadd.f32 %v16970_v36, %v8345_v29  ;;  %v7516_v49 = vadd.f32 %v7419_v59, %v16983_v51  ;;  %v16990_v53 = vld [vmem:[#allocation84_spill] sm:$0xff] }
 0x35e   : >> { %v8262_v16 = vpop.f32.mrf.mxu0  ;;  %v8348_v54 = vadd.f32 %v10839_v37, %v7518_v10  ;;  %v10776_v31 = vpop.f32.mrf.mxu1 }
 0x35f   : >> { %8800 = vst.msk [vmem:[%s15834_s26 + $0xc4] sm:$0xf] %vm8750_vm9, %v9939_v39  ;;  %v9944_v45 = vpack.c.bf16 %v8481_v61, %v8481_v61  ;;  %v8479_v7 = vmax.f32 %v8415_v17, 0.0  ;;  %v8346_v52 = vadd.f32 %v8249_v62, %v7516_v49  ;;  %v7521_v38 = vadd.f32 %v10776_v31, %v16984_v5  ;;  %v16991_v61 = vld [vmem:[#allocation85_spill] sm:$0xff] }
 0x360   : >> { %v10843_v58 = vpop.f32.mrf.mxu0  ;;  %v8418_v13 = vadd.f32 %v16970_v36, %v8348_v54  ;;  %v7432_v8 = vpop.f32.mrf.mxu1 }
 0x361   : >> { %8805 = vst.msk [vmem:[%s15834_s26 + $0xd8] sm:$0xf] %vm8750_vm9, %v9944_v45  ;;  %v9942_v19 = vpack.c.bf16 %v8479_v7, %v8479_v7  ;;  %v8416_v44 = vadd.f32 %v16970_v36, %v8346_v52  ;;  %v8351_v57 = vadd.f32 %v10842_v22, %v7521_v38  ;;  %v7519_v15 = vadd.f32 %v7432_v8, %v16985_v63 }
 0x362   : >> { %v8265_v48 = vpop.f32.mrf.mxu0  ;;  %v8482_v33 = vmax.f32 %v8418_v13, 0.0  ;;  %v10777_v60 = vpop.f32.mrf.mxu1 }
 0x363   : >> { %8803 = vst.msk [vmem:[%s15834_s26 + $0xd0] sm:$0xf] %vm8750_vm9, %v9942_v19  ;;  %v8480_v41 = vmax.f32 %v8416_v44, 0.0  ;;  %v8421_v43 = vadd.f32 %v16970_v36, %v8351_v57  ;;  %v8349_v4 = vadd.f32 %v8262_v16, %v7519_v15  ;;  %v7522_v11 = vadd.f32 %v10777_v60, %v16986_v20 }
 0x364   : >> { %v10846_v25 = vpop.f32.mrf.mxu0  ;;  %v9945_v2 = vpack.c.bf16 %v8482_v33, %v8482_v33  ;;  %v7435_v21 = vpop.f32.mrf.mxu1 }
 0x365   : >> { %v9943_v55 = vpack.c.bf16 %v8480_v41, %v8480_v41  ;;  %v8485_v28 = vmax.f32 %v8421_v43, 0.0  ;;  %v8419_v12 = vadd.f32 %v16970_v36, %v8349_v4  ;;  %v8352_v26 = vadd.f32 %v10843_v58, %v7522_v11 }
 0x366   : >> { %8806 = vst.msk [vmem:[%s15834_s26 + $0xdc] sm:$0xf] %vm8750_vm9, %v9945_v2  ;;  %v7520_v56 = vadd.f32 %v7435_v21, %v16987_v40  ;;  %v10780_v47 = vpop.f32.mrf.mxu1  ;;  %v8278_v32 = vpop.f32.mrf.mxu0 }
 0x367   : >> { %8804 = vst.msk [vmem:[%s15834_s26 + $0xd4] sm:$0xf] %vm8750_vm9, %v9943_v55  ;;  %v9948_v50 = vpack.c.bf16 %v8485_v28, %v8485_v28  ;;  %v8483_v37 = vmax.f32 %v8419_v12, 0.0  ;;  %v8422_v3 = vadd.f32 %v16970_v36, %v8352_v26  ;;  %v7525_v1 = vadd.f32 %v10780_v47, %v16988_v14 }
 0x368   : >> { %v8350_v0 = vadd.f32 %v8265_v48, %v7520_v56  ;;  %v7448_v18 = vpop.f32.mrf.mxu1  ;;  %v10847_v9 = vpop.f32.mrf.mxu0 }
 0x369   : >> { %8809 = vst.msk [vmem:[%s15834_s26 + $0xe8] sm:$0xf] %vm8750_vm9, %v9948_v50  ;;  %v9946_v27 = vpack.c.bf16 %v8483_v37, %v8483_v37  ;;  %v8486_v62 = vmax.f32 %v8422_v3, 0.0  ;;  %v8355_v42 = vadd.f32 %v10846_v25, %v7525_v1  ;;  %v7523_v30 = vadd.f32 %v7448_v18, %v16989_v34 }
 0x36a   : >> { %v8420_v46 = vadd.f32 %v16970_v36, %v8350_v0  ;;  %v10781_v35 = vpop.f32.mrf.mxu1  ;;  %v8281_v49 = vpop.f32.mrf.mxu0 }
 0x36b   : >> { %8807 = vst.msk [vmem:[%s15834_s26 + $0xe0] sm:$0xf] %vm8750_vm9, %v9946_v27  ;;  %v9949_v22 = vpack.c.bf16 %v8486_v62, %v8486_v62  ;;  %v8425_v24 = vadd.f32 %v16970_v36, %v8355_v42  ;;  %v8353_v6 = vadd.f32 %v8278_v32, %v7523_v30  ;;  %v7526_v29 = vadd.f32 %v10781_v35, %v16990_v53 }
 0x36c   : >> { %v8484_v23 = vmax.f32 %v8420_v46, 0.0  ;;  %v7451_v10 = vpop.f32.mrf.mxu1 }
 0x36d   : >> { %8810 = vst.msk [vmem:[%s15834_s26 + $0xec] sm:$0xf] %vm8750_vm9, %v9949_v22  ;;  %v8489_v59 = vmax.f32 %v8425_v24, 0.0  ;;  %v8423_v16 = vadd.f32 %v16970_v36, %v8353_v6  ;;  %v8356_v39 = vadd.f32 %v10847_v9, %v7526_v29  ;;  %v7524_v17 = vadd.f32 %v7451_v10, %v16991_v61 }
 0x36e   : >> { %v9947_v51 = vpack.c.bf16 %v8484_v23, %v8484_v23 }
 0x36f   : >> { %v9952_v54 = vpack.c.bf16 %v8489_v59, %v8489_v59  ;;  %v8487_v31 = vmax.f32 %v8423_v16, 0.0  ;;  %v8426_v58 = vadd.f32 %v16970_v36, %v8356_v39  ;;  %v8354_v45 = vadd.f32 %v8281_v49, %v7524_v17 }
 0x370   : >> { %8808 = vst.msk [vmem:[%s15834_s26 + $0xe4] sm:$0xf] %vm8750_vm9, %v9947_v51 }
 0x371   : >> { %8813 = vst.msk [vmem:[%s15834_s26 + $0xf8] sm:$0xf] %vm8750_vm9, %v9952_v54  ;;  %v9950_v7 = vpack.c.bf16 %v8487_v31, %v8487_v31  ;;  %v8490_v52 = vmax.f32 %v8426_v58, 0.0  ;;  %v8424_v5 = vadd.f32 %v16970_v36, %v8354_v45 }
 0x373   : >> { %8811 = vst.msk [vmem:[%s15834_s26 + $0xf0] sm:$0xf] %vm8750_vm9, %v9950_v7  ;;  %v9953_v38 = vpack.c.bf16 %v8490_v52, %v8490_v52  ;;  %v8488_v13 = vmax.f32 %v8424_v5, 0.0  ;;  %175 = sbr.rel (!%p173_p11) target bundleno = 26 (0x1a), region = 86 }
 0x375   : >> { %8814 = vst.msk [vmem:[%s15834_s26 + $0xfc] sm:$0xf] %vm8750_vm9, %v9953_v38  ;;  %v9951_v8 = vpack.c.bf16 %v8488_v13, %v8488_v13 }
 0x377   : >> { %8812 = vst.msk [vmem:[%s15834_s26 + $0xf4] sm:$0xf] %vm8750_vm9, %v9951_v8 }
 0x378   : > { %11112 = shalt.err (!%p11109_p4)
}
 0x379   : > { %s11113_s24 = scalar_lea.hbm %s16093_s4, 32768  ;;  %s11117_s11 = scalar_lea.hbm %s16144_s3, 65536 }
 0x37a   : > { %p11114_p7 = scmp.ne.s32.totalorder %s16093_s4, %s11113_s24  ;;  %p11118_p10 = scmp.lt.s32.totalorder %s16093_s4, %s16144_s3 }
 0x37b   : > { %p11119_p11 = scmp.lt.s32.totalorder %s11117_s11, %s11113_s24 }
 0x37c   : > { %p11115_p8 = pnand %p11114_p7, %p11231_p5 }
 0x37d   : > { %p11120_p12 = por %p11119_p11, %p11118_p10 }
 0x37e   : > { %p11116_p9 = pneg %p11115_p8 }
 0x380   : > { %p11121_p13 = pnand %p11120_p12, %p11116_p9 }
 0x382   : > { %11124 = shalt.err (!%p11121_p13)
}
 0x383   : > { %s11171_s20 = smov 64   ;;  %s11172_s25 = smov 4  }
 0x384   : > { %10851 = dma.vmem_to_hbm [thread:$0]  (%p11231_p5), %s16097_s8, 32768, %s16093_s4, %s16101_s7, %s11171_s20, %s11171_s20, %s11172_s25  }
 0x385 PF: > { %p10857_p0 = scmp.ge.s32.totalorder %s11163_s15, 2  ;;  %s8844_s26 = sand.u32 1, %s11151_s12  }
 0x386   : > { %s8845_s28 = scalar_lea.sflag [#allocation3], %s8844_s26 }
 0x387   : > { %p10854_p1 = pnand %p10857_p0, %p11235_p6 }
 0x389   : > { %p10855_p2 = pneg %p10854_p1 }
 0x38b   : > { %11146 = dma.done.wait (%p10855_p2), %s8845_s28, 32768  }
 0x38c   : > { %11148 = vsyncadd (%p10855_p2), %s8845_s28, 4294934528  ;;  %p13_p3 = scmp.ge.s32.totalorder %s11218_s18, 4   ;;  %s16992_s12 = smov %s11155_s13 }
 0x38d   : > { %s16993_s13 = smov %s11159_s14  ;;  %s16994_s14 = smov %s11229_s21 }
 0x38e   : > { %s16995_s15 = smov %s11218_s18  ;;  %15 = sbr.rel (!%p13_p3) target bundleno = 3 (0x3), region = 97 }
 0x393   :  { %8850 = vsyncpa [#allocation3], 1 }
 0x394   :  { %8852 = vsyncpa [#allocation3 + $0x1], 1 }

</bundles_post_ra>
